<compile_context>
chip_gen: v7x
topology: tpu7x:2x2x1
jax: 0.10.0
libtpu: 0.0.40
codegen_flags: <defaults>
</compile_context>

<pallas_src>
import functools

import jax
import jax.numpy as jnp
from jax.experimental import pallas as pl
from jax.experimental.pallas import tpu as pltpu


def _round_up(x, m):
    return (x + m - 1) // m * m


def _dynconv_kernel(x_ref, xt2_ref, sq_ref, a_ref, b_ref, idx_ref, out_ref, sel_ref,
                    *, k, dilation, tile_m, unroll):
    """Fused dilated-kNN + EdgeConv(mean) for one tile of query rows.

    Resident (grid-constant) inputs:
      x_ref   (N, C)  f32  point features (query rows sliced per tile with pl.ds)
      xt2_ref (C, N)  f32  2 * x^T (pre-transposed Gram rhs: no in-kernel transpose)
      sq_ref  (1, N)  f32  ||x_j||^2
      a_ref   (N, Fp) f32  x @ (W1 - W2) + b   (lane-padded to Fp)
      b_ref   (N, Fp) cd   x @ W2              (lane-padded to Fp)
    Outputs (lane-dense, padded; sliced in the wrapper):
      idx_ref (TM, IDXP) int32  the k*dilation nearest-neighbor indices in lanes [0, k*dilation)
      out_ref (TM, Fp)   f32    EdgeConv output in lanes [0, F)
    Scratch:
      sel_ref (k*TM, N) cd      one-hot masks of the k dilated neighbors
    """
    n = x_ref.shape[0]
    f_pad = a_ref.shape[-1]
    idx_pad = idx_ref.shape[-1]
    cd = b_ref.dtype

    row0 = pl.multiple_of(pl.program_id(0) * tile_m, tile_m)
    xq = x_ref[pl.ds(row0, tile_m), :]                             # (TM, C) query rows
    a_tile = a_ref[pl.ds(row0, tile_m), :]                         # (TM, Fp) x_i@(W1-W2)+b

    # kNN scores on the MXU (f32). Per-row argmax of -||xi - xj||^2 is invariant to the
    # row-constant ||xi||^2, so score_ij = 2<xi, xj> - ||xj||^2 (self column is the row max).
    score = jnp.dot(xq, xt2_ref[...], preferred_element_type=jnp.float32) - sq_ref[...]

    lane_ids = jax.lax.broadcasted_iota(jnp.int32, (1, n), 1)      # (1, N) lane iota only
    idx_lanes = jax.lax.broadcasted_iota(jnp.int32, (1, idx_pad), 1)
    neg_inf = jnp.float32(-jnp.inf)

    def select_one(pos, score, idx_acc):
        # First-index tie-break (parity with top_k): row max, then min lane among the maxima.
        # NOTE: a fused jnp.argmax would save one XLU reduce per step; the max+min formulation
        #       is kept for guaranteed Mosaic lowering and exact tie behavior.
        best = jnp.max(score, axis=-1, keepdims=True)                          # (TM, 1)
        best_idx = jnp.min(jnp.where(score == best, lane_ids, n),
                           axis=-1, keepdims=True)                             # (TM, 1) int32
        sel = lane_ids == best_idx                                             # exact one-hot
        idx_acc = jnp.where(idx_lanes == pos, best_idx, idx_acc)               # record index
        score = jnp.where(sel, neg_inf, score)                                 # drop chosen col
        return score, idx_acc, sel

    def body(jj, carry):
        score, idx_acc = carry
        # Dilated neighbor jj (global position jj*dilation): feeds EdgeConv -> stash its mask.
        score, idx_acc, sel = select_one(jj * dilation, score, idx_acc)
        sel_ref[pl.ds(pl.multiple_of(jj * tile_m, tile_m), tile_m), :] = sel.astype(cd)
        # Skipped neighbors (positions jj*dilation+1 .. +dilation-1): index output only.
        for d in range(1, dilation):
            score, idx_acc, _ = select_one(jj * dilation + d, score, idx_acc)
        return score, idx_acc

    idx0 = jnp.zeros((tile_m, idx_pad), jnp.int32)
    _, idx_acc = jax.lax.fori_loop(0, k, body, (score, idx0), unroll=unroll)
    idx_ref[...] = idx_acc                                          # one lane-dense store

    # Hoisted neighbor gather: one (k*TM, N) @ (N, Fp) MXU matmul for all k dilated neighbors
    # (no per-neighbor matmuls, no dynamic gather, nn_idx / masks never leave VMEM).
    bj = jnp.dot(sel_ref[...], b_ref[...], preferred_element_type=jnp.float32)  # (k*TM, Fp)

    acc = jnp.zeros((tile_m, f_pad), jnp.float32)
    for jj in range(k):                                             # static sublane-aligned slices
        acc = acc + jnp.maximum(a_tile + bj[jj * tile_m:(jj + 1) * tile_m, :], 0.0)
    out_ref[...] = (acc * (1.0 / k)).astype(out_ref.dtype)          # mean over k neighbors


def _pick_tile(n, target=256):
    """Largest row tile <= target that divides n, is a multiple of 8 and - if possible - gives an
    even grid >= 2 (so the 'parallel' axis splits evenly over v7x's two TensorCores)."""
    if n <= 8:
        return n
    best_any = None
    for t in range(min(target, n), 7, -1):
        if t % 8 or n % t:
            continue
        if (n // t) >= 2 and (n // t) % 2 == 0:
            return t
        if best_any is None:
            best_any = t
    return best_any if best_any is not None else n


def dyn_conv(x, w, b, *, k=9, dilation=1, compute_dtype=jnp.float32, tile_m=None):
    """Eval-mode forward of DynConv for a single graph (batch=None).

    x: (N, C) f32 node features; w: (F, 2C) weight of nn.Linear(2C, F); b: (F,) bias.
    Returns (out (N, F) f32, edge_index (2, N*k) int32) like the PyTorch module.
    """
    n, c = x.shape
    f_out = w.shape[0]
    k_total = k * dilation
    assert k_total <= n, "k * dilation must not exceed the number of points"

    tile_m = _pick_tile(n) if tile_m is None else tile_m
    assert n % tile_m == 0
    grid = (n // tile_m,)

    f_pad = _round_up(f_out, 128)
    idx_pad = _round_up(k_total, 128)

    # Grid-invariant precompute, hoisted out of the kernel. EdgeConv refactor:
    # relu(x_i@W1 + (x_j-x_i)@W2 + b) == relu(x_i@(W1-W2) + x_j@W2 + b).
    hi = jax.lax.Precision.HIGHEST
    xf = x.astype(jnp.float32)
    w1 = w[:, :c].T.astype(jnp.float32)                            # (C, F)
    w2 = w[:, c:].T.astype(jnp.float32)                            # (C, F)
    a_full = jnp.matmul(xf, w1 - w2, precision=hi) + b.astype(jnp.float32)[None, :]
    a_pad = jnp.pad(a_full, ((0, 0), (0, f_pad - f_out)))                        # (N, Fp) f32
    b_pad = jnp.pad(jnp.matmul(xf, w2, precision=hi),
                    ((0, 0), (0, f_pad - f_out))).astype(compute_dtype)          # (N, Fp) cd
    xt2 = (2.0 * xf).T                                              # (C, N) Gram rhs, no k-transpose
    sq = jnp.sum(xf * xf, axis=-1)[None, :]                         # (1, N)

    cd_sz = jnp.dtype(compute_dtype).itemsize
    est = (2 * n * c * 4 + 2 * c * n * 4 + 2 * 8 * n * 4            # resident inputs (2x buffered)
           + 2 * n * f_pad * 4 + 2 * n * f_pad * cd_sz
           + 2 * tile_m * idx_pad * 4 + 2 * tile_m * f_pad * 4      # outputs (double-buffered)
           + 2 * k * tile_m * n * cd_sz                             # sel scratch + matmul operand
           + 2 * tile_m * n * 4                                     # score + select temps
           + 2 * k * tile_m * f_pad * 4)                            # gathered projections
    vmem_limit = int(min(max(2 * est, 16 * 2 ** 20), 40 * 2 ** 20))
    # TODO(synk): for very large point clouds add a second ("arbitrary") key-dimension grid axis
    #             with a streaming running-top-k so score is (TM, TILE_N) not (TM, N) (needed to
    #             stay inside v7x's 64 MiB VMEM).

    kernel = functools.partial(_dynconv_kernel, k=k, dilation=dilation,
                               tile_m=tile_m, unroll=(k_total <= 16))
    idx_out, out_pad = pl.pallas_call(
        kernel,
        grid=grid,
        out_shape=(jax.ShapeDtypeStruct((n, idx_pad), jnp.int32),
                   jax.ShapeDtypeStruct((n, f_pad), jnp.float32)),
        in_specs=[
            pl.BlockSpec((n, c), lambda i: (0, 0)),                 # x (resident, queries + keys)
            pl.BlockSpec((c, n), lambda i: (0, 0)),                 # 2*x^T (resident)
            pl.BlockSpec((1, n), lambda i: (0, 0)),                 # ||x_j||^2 (resident)
            pl.BlockSpec((n, f_pad), lambda i: (0, 0)),             # x@(W1-W2)+b (resident)
            pl.BlockSpec((n, f_pad), lambda i: (0, 0)),             # x@W2 (resident)
        ],
        out_specs=(
            pl.BlockSpec((tile_m, idx_pad), lambda i: (i, 0)),
            pl.BlockSpec((tile_m, f_pad), lambda i: (i, 0)),
        ),
        scratch_shapes=[pltpu.VMEM((k * tile_m, n), compute_dtype)],
        compiler_params=pltpu.CompilerParams(
            dimension_semantics=("parallel",),                      # row tiles are independent
            vmem_limit_bytes=vmem_limit),
    )(xf, xt2, sq, a_pad, b_pad)

    nn_idx = idx_out[:, :k_total]                                   # (N, k*dilation)
    out = out_pad[:, :f_out]                                        # (N, F)

    # edge_index (row 0 = neighbor j, row 1 = center i), then dilated slice -- matches
    # knn_matrix + Dilated (stochastic=False) of the reference module.
    center_idx = jnp.repeat(jnp.arange(n, dtype=jnp.int32), k_total)
    edge_index = jnp.stack([nn_idx.reshape(-1), center_idx], axis=0)[:, ::dilation]
    # TODO(synk): dropout_adj(p=0.2) and stochastic dilation are training-only random edge
    #             dropping; the eval-mode forward implemented here is the identity on edges.
    # TODO(synk): batched point clouds (batch vector) are not implemented -- batch=None path only.
    return out, edge_index


# ----------------------------- pure-JAX checks (tie-robust) -----------------------------------
def _pairwise_neg_dist(x):
    sq = jnp.sum(x * x, axis=-1, keepdims=True)
    inner = jnp.matmul(x, x.T, precision=jax.lax.Precision.HIGHEST)
    return -(sq - 2.0 * inner + sq.T)                               # (N, N), 0 on the diagonal


def _edgeconv_ref(x, w, b, edge_index, k):
    """EdgeConv(MLP([2C, F], relu), aggr='mean') on a given edge list (k edges per center)."""
    src, dst = edge_index[0], edge_index[1]
    xi, xj = x[dst], x[src]
    feat = jnp.concatenate([xi, xj - xi], axis=-1)
    msg = jax.nn.relu(jnp.matmul(feat, w.T, precision=jax.lax.Precision.HIGHEST) + b)
    return msg.reshape(x.shape[0], k, -1).mean(axis=1)


def _check(x, w, b, out, edge_index, k, dilation, tol):
    n = x.shape[0]
    assert edge_index.shape == (2, n * k)
    assert bool((edge_index[1] == jnp.repeat(jnp.arange(n, dtype=jnp.int32), k)).all())
    # kNN check on distance VALUES (robust to near-tie index permutations): the distances of the
    # selected neighbors must match the true dilated top-(k*dilation) distances.
    neg_d = _pairwise_neg_dist(x)
    top_vals = jax.lax.top_k(neg_d, k * dilation)[0][:, ::dilation]          # (N, k)
    sel_vals = jnp.take_along_axis(neg_d, edge_index[0].reshape(n, k), axis=1)
    assert jnp.allclose(sel_vals, top_vals, atol=1e-2, rtol=1e-3), "kNN selection mismatch"
    # EdgeConv check on the kernel's own graph (validates the refactored MLP + mean aggregation).
    ref_out = _edgeconv_ref(x, w, b, edge_index, k)
    assert jnp.allclose(out, ref_out, atol=tol, rtol=tol), "EdgeConv output mismatch"


if __name__ == "__main__":
    key = jax.random.PRNGKey(0)
    kx, kw, kb = jax.random.split(key, 3)

    N, C, F_OUT, K = 256, 16, 32, 9
    x = jax.random.normal(kx, (N, C), dtype=jnp.float32)
    # deterministic "parameters" for MLP([2*C, F_OUT]) = Linear(2C, F) + ReLU
    w = jax.random.normal(kw, (F_OUT, 2 * C), dtype=jnp.float32) * 0.1
    b = jax.random.normal(kb, (F_OUT,), dtype=jnp.float32) * 0.1

    # dilation = 1 (module default), f32 compute
    out1, ei1 = dyn_conv(x, w, b, k=K, dilation=1)
    jax.block_until_ready((out1, ei1))
    assert out1.shape == (N, F_OUT)
    _check(x, w, b, out1, ei1, K, 1, tol=1e-3)

    # dilation = 2 (exercises the dilated edge selection and the non-unrolled fori_loop path)
    out2, ei2 = dyn_conv(x, w, b, k=K, dilation=2)
    jax.block_until_ready((out2, ei2))
    assert out2.shape == (N, F_OUT)
    _check(x, w, b, out2, ei2, K, 2, tol=1e-3)

    # bf16 fast path for the batched neighbor-gather matmul (v6e/v7x MXU); kNN stays f32.
    out3, ei3 = dyn_conv(x, w, b, k=K, dilation=1, compute_dtype=jnp.bfloat16)
    jax.block_until_ready((out3, ei3))
    _check(x, w, b, out3, ei3, K, 1, tol=5e-2)

    print("KERNEL_OK")
</pallas_src>

<mosaic_0001>
module attributes {stable_mosaic.version = 11 : i64} {
  func.func @_dynconv_kernel(%arg0: i32, %arg1: memref<256x16xf32, #tpu.memory_space<vmem>>, %arg2: memref<16x256xf32, #tpu.memory_space<vmem>>, %arg3: memref<1x256xf32, #tpu.memory_space<vmem>>, %arg4: memref<256x128xf32, #tpu.memory_space<vmem>>, %arg5: memref<256x128xf32, #tpu.memory_space<vmem>>, %arg6: memref<128x128xi32, #tpu.memory_space<vmem>>, %arg7: memref<128x128xf32, #tpu.memory_space<vmem>>, %arg8: memref<1152x256xf32, #tpu.memory_space<vmem>>) attributes {dimension_semantics = [#tpu.dimension_semantics<parallel>], iteration_bounds = array<i64: 2>, scalar_prefetch = 0 : i64, scratch_operands = 1 : i64, tpu.core_type = #tpu.core_type<tc>, window_params = [{pipeline_mode = #tpu.pipeline_mode<synchronous>, transform_indices = @transform_0, window_bounds = array<i64: 256, 16>}, {pipeline_mode = #tpu.pipeline_mode<synchronous>, transform_indices = @transform_1, window_bounds = array<i64: 16, 256>}, {pipeline_mode = #tpu.pipeline_mode<synchronous>, transform_indices = @transform_2, window_bounds = array<i64: 1, 256>}, {pipeline_mode = #tpu.pipeline_mode<synchronous>, transform_indices = @transform_3, window_bounds = array<i64: 256, 128>}, {pipeline_mode = #tpu.pipeline_mode<synchronous>, transform_indices = @transform_4, window_bounds = array<i64: 256, 128>}, {transform_indices = @transform_5, window_bounds = array<i64: 128, 128>}, {transform_indices = @transform_6, window_bounds = array<i64: 128, 128>}]} {
    %c128_i32 = arith.constant 128 : i32
    %0 = arith.muli %arg0, %c128_i32 : i32
    %1 = tpu.assume_multiple %0, 128 : i32
    %2 = arith.index_cast %1 : i32 to index
    %c0 = arith.constant 0 : index
    %3 = vector.load %arg1[%2, %c0] : memref<256x16xf32, #tpu.memory_space<vmem>>, vector<128x16xf32>
    %4 = arith.index_cast %1 : i32 to index
    %c0_0 = arith.constant 0 : index
    %5 = vector.load %arg4[%4, %c0_0] : memref<256x128xf32, #tpu.memory_space<vmem>>, vector<128x128xf32>
    %c0_1 = arith.constant 0 : index
    %c0_2 = arith.constant 0 : index
    %6 = vector.load %arg2[%c0_1, %c0_2] : memref<16x256xf32, #tpu.memory_space<vmem>>, vector<16x256xf32>
    %cst = arith.constant dense<0.000000e+00> : vector<128x256xf32>
    %7 = tpu.matmul %3, %6, %cst {dimension_numbers = #tpu.dot_dimension_numbers<[1], [0], [0], [1], [0, 0, 1, 1], [], []>} : vector<128x16xf32>, vector<16x256xf32>, vector<128x256xf32> -> vector<128x256xf32>
    %c0_3 = arith.constant 0 : index
    %c0_4 = arith.constant 0 : index
    %8 = vector.load %arg3[%c0_3, %c0_4] : memref<1x256xf32, #tpu.memory_space<vmem>>, vector<1x256xf32>
    %9 = vector.broadcast %8 : vector<1x256xf32> to vector<128x256xf32>
    %10 = arith.subf %7, %9 : vector<128x256xf32>
    %11 = tpu.iota {dimensions = array<i32: 1>} : vector<1x256xi32>
    %12 = tpu.iota {dimensions = array<i32: 1>} : vector<1x128xi32>
    %c0_i32 = arith.constant 0 : i32
    %13 = vector.broadcast %c0_i32 : i32 to vector<128x128xi32>
    %cst_5 = arith.constant 0xFF800000 : f32
    %c0_i32_6 = arith.constant 0 : i32
    %c1_i32 = arith.constant 1 : i32
    %14 = arith.muli %c0_i32_6, %c1_i32 : i32
    %cst_7 = arith.constant dense<0xFF800000> : vector<128xf32>
    %15 = vector.multi_reduction <maximumf>, %10, %cst_7 [1] : vector<128x256xf32> to vector<128xf32>
    %16 = vector.shape_cast %15 : vector<128xf32> to vector<128x1xf32>
    %17 = vector.broadcast %16 : vector<128x1xf32> to vector<128x256xf32>
    %18 = arith.cmpf oeq, %10, %17 : vector<128x256xf32>
    %c256_i32 = arith.constant 256 : i32
    %19 = vector.shape_cast %11 : vector<1x256xi32> to vector<1x256xi32>
    %20 = vector.broadcast %19 : vector<1x256xi32> to vector<128x256xi32>
    %21 = vector.broadcast %c256_i32 : i32 to vector<128x256xi32>
    %22 = arith.select %18, %20, %21 : vector<128x256xi1>, vector<128x256xi32>
    %cst_8 = arith.constant dense<2147483647> : vector<128xi32>
    %23 = vector.multi_reduction <minsi>, %22, %cst_8 [1] : vector<128x256xi32> to vector<128xi32>
    %24 = vector.shape_cast %23 : vector<128xi32> to vector<128x1xi32>
    %25 = vector.broadcast %11 : vector<1x256xi32> to vector<128x256xi32>
    %26 = vector.broadcast %24 : vector<128x1xi32> to vector<128x256xi32>
    %27 = arith.cmpi eq, %25, %26 : vector<128x256xi32>
    %28 = vector.broadcast %14 : i32 to vector<1x128xi32>
    %29 = arith.cmpi eq, %12, %28 : vector<1x128xi32>
    %30 = vector.shape_cast %29 : vector<1x128xi1> to vector<1x128xi1>
    %31 = vector.broadcast %30 : vector<1x128xi1> to vector<128x128xi1>
    %32 = vector.shape_cast %24 : vector<128x1xi32> to vector<128x1xi32>
    %33 = vector.broadcast %32 : vector<128x1xi32> to vector<128x128xi32>
    %34 = arith.select %31, %33, %13 : vector<128x128xi1>, vector<128x128xi32>
    %35 = vector.broadcast %cst_5 : f32 to vector<128x256xf32>
    %36 = arith.select %27, %35, %10 : vector<128x256xi1>, vector<128x256xf32>
    %37 = arith.extui %27 : vector<128x256xi1> to vector<128x256xi32>
    %38 = arith.sitofp %37 : vector<128x256xi32> to vector<128x256xf32>
    %c128_i32_9 = arith.constant 128 : i32
    %39 = arith.muli %c0_i32_6, %c128_i32_9 : i32
    %40 = tpu.assume_multiple %39, 128 : i32
    %41 = arith.index_cast %40 : i32 to index
    %c0_10 = arith.constant 0 : index
    %42 = vector.load %arg8[%41, %c0_10] : memref<1152x256xf32, #tpu.memory_space<vmem>>, vector<128x256xf32>
    tpu.vector_store %arg8[%41, %c0_10], %38 {strides = array<i32>} : memref<1152x256xf32, #tpu.memory_space<vmem>>, vector<128x256xf32>,
    %c1_i32_11 = arith.constant 1 : i32
    %c1_i32_12 = arith.constant 1 : i32
    %43 = arith.muli %c1_i32_11, %c1_i32_12 : i32
    %cst_13 = arith.constant dense<0xFF800000> : vector<128xf32>
    %44 = vector.multi_reduction <maximumf>, %36, %cst_13 [1] : vector<128x256xf32> to vector<128xf32>
    %45 = vector.shape_cast %44 : vector<128xf32> to vector<128x1xf32>
    %46 = vector.broadcast %45 : vector<128x1xf32> to vector<128x256xf32>
    %47 = arith.cmpf oeq, %36, %46 : vector<128x256xf32>
    %c256_i32_14 = arith.constant 256 : i32
    %48 = vector.shape_cast %11 : vector<1x256xi32> to vector<1x256xi32>
    %49 = vector.broadcast %48 : vector<1x256xi32> to vector<128x256xi32>
    %50 = vector.broadcast %c256_i32_14 : i32 to vector<128x256xi32>
    %51 = arith.select %47, %49, %50 : vector<128x256xi1>, vector<128x256xi32>
    %cst_15 = arith.constant dense<2147483647> : vector<128xi32>
    %52 = vector.multi_reduction <minsi>, %51, %cst_15 [1] : vector<128x256xi32> to vector<128xi32>
    %53 = vector.shape_cast %52 : vector<128xi32> to vector<128x1xi32>
    %54 = vector.broadcast %11 : vector<1x256xi32> to vector<128x256xi32>
    %55 = vector.broadcast %53 : vector<128x1xi32> to vector<128x256xi32>
    %56 = arith.cmpi eq, %54, %55 : vector<128x256xi32>
    %57 = vector.broadcast %43 : i32 to vector<1x128xi32>
    %58 = arith.cmpi eq, %12, %57 : vector<1x128xi32>
    %59 = vector.shape_cast %58 : vector<1x128xi1> to vector<1x128xi1>
    %60 = vector.broadcast %59 : vector<1x128xi1> to vector<128x128xi1>
    %61 = vector.shape_cast %53 : vector<128x1xi32> to vector<128x1xi32>
    %62 = vector.broadcast %61 : vector<128x1xi32> to vector<128x128xi32>
    %63 = arith.select %60, %62, %34 : vector<128x128xi1>, vector<128x128xi32>
    %64 = vector.broadcast %cst_5 : f32 to vector<128x256xf32>
    %65 = arith.select %56, %64, %36 : vector<128x256xi1>, vector<128x256xf32>
    %66 = arith.extui %56 : vector<128x256xi1> to vector<128x256xi32>
    %67 = arith.sitofp %66 : vector<128x256xi32> to vector<128x256xf32>
    %c128_i32_16 = arith.constant 128 : i32
    %68 = arith.muli %c1_i32_11, %c128_i32_16 : i32
    %69 = tpu.assume_multiple %68, 128 : i32
    %70 = arith.index_cast %69 : i32 to index
    %c0_17 = arith.constant 0 : index
    %71 = vector.load %arg8[%70, %c0_17] : memref<1152x256xf32, #tpu.memory_space<vmem>>, vector<128x256xf32>
    tpu.vector_store %arg8[%70, %c0_17], %67 {strides = array<i32>} : memref<1152x256xf32, #tpu.memory_space<vmem>>, vector<128x256xf32>,
    %c2_i32 = arith.constant 2 : i32
    %c1_i32_18 = arith.constant 1 : i32
    %72 = arith.muli %c2_i32, %c1_i32_18 : i32
    %cst_19 = arith.constant dense<0xFF800000> : vector<128xf32>
    %73 = vector.multi_reduction <maximumf>, %65, %cst_19 [1] : vector<128x256xf32> to vector<128xf32>
    %74 = vector.shape_cast %73 : vector<128xf32> to vector<128x1xf32>
    %75 = vector.broadcast %74 : vector<128x1xf32> to vector<128x256xf32>
    %76 = arith.cmpf oeq, %65, %75 : vector<128x256xf32>
    %c256_i32_20 = arith.constant 256 : i32
    %77 = vector.shape_cast %11 : vector<1x256xi32> to vector<1x256xi32>
    %78 = vector.broadcast %77 : vector<1x256xi32> to vector<128x256xi32>
    %79 = vector.broadcast %c256_i32_20 : i32 to vector<128x256xi32>
    %80 = arith.select %76, %78, %79 : vector<128x256xi1>, vector<128x256xi32>
    %cst_21 = arith.constant dense<2147483647> : vector<128xi32>
    %81 = vector.multi_reduction <minsi>, %80, %cst_21 [1] : vector<128x256xi32> to vector<128xi32>
    %82 = vector.shape_cast %81 : vector<128xi32> to vector<128x1xi32>
    %83 = vector.broadcast %11 : vector<1x256xi32> to vector<128x256xi32>
    %84 = vector.broadcast %82 : vector<128x1xi32> to vector<128x256xi32>
    %85 = arith.cmpi eq, %83, %84 : vector<128x256xi32>
    %86 = vector.broadcast %72 : i32 to vector<1x128xi32>
    %87 = arith.cmpi eq, %12, %86 : vector<1x128xi32>
    %88 = vector.shape_cast %87 : vector<1x128xi1> to vector<1x128xi1>
    %89 = vector.broadcast %88 : vector<1x128xi1> to vector<128x128xi1>
    %90 = vector.shape_cast %82 : vector<128x1xi32> to vector<128x1xi32>
    %91 = vector.broadcast %90 : vector<128x1xi32> to vector<128x128xi32>
    %92 = arith.select %89, %91, %63 : vector<128x128xi1>, vector<128x128xi32>
    %93 = vector.broadcast %cst_5 : f32 to vector<128x256xf32>
    %94 = arith.select %85, %93, %65 : vector<128x256xi1>, vector<128x256xf32>
    %95 = arith.extui %85 : vector<128x256xi1> to vector<128x256xi32>
    %96 = arith.sitofp %95 : vector<128x256xi32> to vector<128x256xf32>
    %c128_i32_22 = arith.constant 128 : i32
    %97 = arith.muli %c2_i32, %c128_i32_22 : i32
    %98 = tpu.assume_multiple %97, 128 : i32
    %99 = arith.index_cast %98 : i32 to index
    %c0_23 = arith.constant 0 : index
    %100 = vector.load %arg8[%99, %c0_23] : memref<1152x256xf32, #tpu.memory_space<vmem>>, vector<128x256xf32>
    tpu.vector_store %arg8[%99, %c0_23], %96 {strides = array<i32>} : memref<1152x256xf32, #tpu.memory_space<vmem>>, vector<128x256xf32>,
    %c3_i32 = arith.constant 3 : i32
    %c1_i32_24 = arith.constant 1 : i32
    %101 = arith.muli %c3_i32, %c1_i32_24 : i32
    %cst_25 = arith.constant dense<0xFF800000> : vector<128xf32>
    %102 = vector.multi_reduction <maximumf>, %94, %cst_25 [1] : vector<128x256xf32> to vector<128xf32>
    %103 = vector.shape_cast %102 : vector<128xf32> to vector<128x1xf32>
    %104 = vector.broadcast %103 : vector<128x1xf32> to vector<128x256xf32>
    %105 = arith.cmpf oeq, %94, %104 : vector<128x256xf32>
    %c256_i32_26 = arith.constant 256 : i32
    %106 = vector.shape_cast %11 : vector<1x256xi32> to vector<1x256xi32>
    %107 = vector.broadcast %106 : vector<1x256xi32> to vector<128x256xi32>
    %108 = vector.broadcast %c256_i32_26 : i32 to vector<128x256xi32>
    %109 = arith.select %105, %107, %108 : vector<128x256xi1>, vector<128x256xi32>
    %cst_27 = arith.constant dense<2147483647> : vector<128xi32>
    %110 = vector.multi_reduction <minsi>, %109, %cst_27 [1] : vector<128x256xi32> to vector<128xi32>
    %111 = vector.shape_cast %110 : vector<128xi32> to vector<128x1xi32>
    %112 = vector.broadcast %11 : vector<1x256xi32> to vector<128x256xi32>
    %113 = vector.broadcast %111 : vector<128x1xi32> to vector<128x256xi32>
    %114 = arith.cmpi eq, %112, %113 : vector<128x256xi32>
    %115 = vector.broadcast %101 : i32 to vector<1x128xi32>
    %116 = arith.cmpi eq, %12, %115 : vector<1x128xi32>
    %117 = vector.shape_cast %116 : vector<1x128xi1> to vector<1x128xi1>
    %118 = vector.broadcast %117 : vector<1x128xi1> to vector<128x128xi1>
    %119 = vector.shape_cast %111 : vector<128x1xi32> to vector<128x1xi32>
    %120 = vector.broadcast %119 : vector<128x1xi32> to vector<128x128xi32>
    %121 = arith.select %118, %120, %92 : vector<128x128xi1>, vector<128x128xi32>
    %122 = vector.broadcast %cst_5 : f32 to vector<128x256xf32>
    %123 = arith.select %114, %122, %94 : vector<128x256xi1>, vector<128x256xf32>
    %124 = arith.extui %114 : vector<128x256xi1> to vector<128x256xi32>
    %125 = arith.sitofp %124 : vector<128x256xi32> to vector<128x256xf32>
    %c128_i32_28 = arith.constant 128 : i32
    %126 = arith.muli %c3_i32, %c128_i32_28 : i32
    %127 = tpu.assume_multiple %126, 128 : i32
    %128 = arith.index_cast %127 : i32 to index
    %c0_29 = arith.constant 0 : index
    %129 = vector.load %arg8[%128, %c0_29] : memref<1152x256xf32, #tpu.memory_space<vmem>>, vector<128x256xf32>
    tpu.vector_store %arg8[%128, %c0_29], %125 {strides = array<i32>} : memref<1152x256xf32, #tpu.memory_space<vmem>>, vector<128x256xf32>,
    %c4_i32 = arith.constant 4 : i32
    %c1_i32_30 = arith.constant 1 : i32
    %130 = arith.muli %c4_i32, %c1_i32_30 : i32
    %cst_31 = arith.constant dense<0xFF800000> : vector<128xf32>
    %131 = vector.multi_reduction <maximumf>, %123, %cst_31 [1] : vector<128x256xf32> to vector<128xf32>
    %132 = vector.shape_cast %131 : vector<128xf32> to vector<128x1xf32>
    %133 = vector.broadcast %132 : vector<128x1xf32> to vector<128x256xf32>
    %134 = arith.cmpf oeq, %123, %133 : vector<128x256xf32>
    %c256_i32_32 = arith.constant 256 : i32
    %135 = vector.shape_cast %11 : vector<1x256xi32> to vector<1x256xi32>
    %136 = vector.broadcast %135 : vector<1x256xi32> to vector<128x256xi32>
    %137 = vector.broadcast %c256_i32_32 : i32 to vector<128x256xi32>
    %138 = arith.select %134, %136, %137 : vector<128x256xi1>, vector<128x256xi32>
    %cst_33 = arith.constant dense<2147483647> : vector<128xi32>
    %139 = vector.multi_reduction <minsi>, %138, %cst_33 [1] : vector<128x256xi32> to vector<128xi32>
    %140 = vector.shape_cast %139 : vector<128xi32> to vector<128x1xi32>
    %141 = vector.broadcast %11 : vector<1x256xi32> to vector<128x256xi32>
    %142 = vector.broadcast %140 : vector<128x1xi32> to vector<128x256xi32>
    %143 = arith.cmpi eq, %141, %142 : vector<128x256xi32>
    %144 = vector.broadcast %130 : i32 to vector<1x128xi32>
    %145 = arith.cmpi eq, %12, %144 : vector<1x128xi32>
    %146 = vector.shape_cast %145 : vector<1x128xi1> to vector<1x128xi1>
    %147 = vector.broadcast %146 : vector<1x128xi1> to vector<128x128xi1>
    %148 = vector.shape_cast %140 : vector<128x1xi32> to vector<128x1xi32>
    %149 = vector.broadcast %148 : vector<128x1xi32> to vector<128x128xi32>
    %150 = arith.select %147, %149, %121 : vector<128x128xi1>, vector<128x128xi32>
    %151 = vector.broadcast %cst_5 : f32 to vector<128x256xf32>
    %152 = arith.select %143, %151, %123 : vector<128x256xi1>, vector<128x256xf32>
    %153 = arith.extui %143 : vector<128x256xi1> to vector<128x256xi32>
    %154 = arith.sitofp %153 : vector<128x256xi32> to vector<128x256xf32>
    %c128_i32_34 = arith.constant 128 : i32
    %155 = arith.muli %c4_i32, %c128_i32_34 : i32
    %156 = tpu.assume_multiple %155, 128 : i32
    %157 = arith.index_cast %156 : i32 to index
    %c0_35 = arith.constant 0 : index
    %158 = vector.load %arg8[%157, %c0_35] : memref<1152x256xf32, #tpu.memory_space<vmem>>, vector<128x256xf32>
    tpu.vector_store %arg8[%157, %c0_35], %154 {strides = array<i32>} : memref<1152x256xf32, #tpu.memory_space<vmem>>, vector<128x256xf32>,
    %c5_i32 = arith.constant 5 : i32
    %c1_i32_36 = arith.constant 1 : i32
    %159 = arith.muli %c5_i32, %c1_i32_36 : i32
    %cst_37 = arith.constant dense<0xFF800000> : vector<128xf32>
    %160 = vector.multi_reduction <maximumf>, %152, %cst_37 [1] : vector<128x256xf32> to vector<128xf32>
    %161 = vector.shape_cast %160 : vector<128xf32> to vector<128x1xf32>
    %162 = vector.broadcast %161 : vector<128x1xf32> to vector<128x256xf32>
    %163 = arith.cmpf oeq, %152, %162 : vector<128x256xf32>
    %c256_i32_38 = arith.constant 256 : i32
    %164 = vector.shape_cast %11 : vector<1x256xi32> to vector<1x256xi32>
    %165 = vector.broadcast %164 : vector<1x256xi32> to vector<128x256xi32>
    %166 = vector.broadcast %c256_i32_38 : i32 to vector<128x256xi32>
    %167 = arith.select %163, %165, %166 : vector<128x256xi1>, vector<128x256xi32>
    %cst_39 = arith.constant dense<2147483647> : vector<128xi32>
    %168 = vector.multi_reduction <minsi>, %167, %cst_39 [1] : vector<128x256xi32> to vector<128xi32>
    %169 = vector.shape_cast %168 : vector<128xi32> to vector<128x1xi32>
    %170 = vector.broadcast %11 : vector<1x256xi32> to vector<128x256xi32>
    %171 = vector.broadcast %169 : vector<128x1xi32> to vector<128x256xi32>
    %172 = arith.cmpi eq, %170, %171 : vector<128x256xi32>
    %173 = vector.broadcast %159 : i32 to vector<1x128xi32>
    %174 = arith.cmpi eq, %12, %173 : vector<1x128xi32>
    %175 = vector.shape_cast %174 : vector<1x128xi1> to vector<1x128xi1>
    %176 = vector.broadcast %175 : vector<1x128xi1> to vector<128x128xi1>
    %177 = vector.shape_cast %169 : vector<128x1xi32> to vector<128x1xi32>
    %178 = vector.broadcast %177 : vector<128x1xi32> to vector<128x128xi32>
    %179 = arith.select %176, %178, %150 : vector<128x128xi1>, vector<128x128xi32>
    %180 = vector.broadcast %cst_5 : f32 to vector<128x256xf32>
    %181 = arith.select %172, %180, %152 : vector<128x256xi1>, vector<128x256xf32>
    %182 = arith.extui %172 : vector<128x256xi1> to vector<128x256xi32>
    %183 = arith.sitofp %182 : vector<128x256xi32> to vector<128x256xf32>
    %c128_i32_40 = arith.constant 128 : i32
    %184 = arith.muli %c5_i32, %c128_i32_40 : i32
    %185 = tpu.assume_multiple %184, 128 : i32
    %186 = arith.index_cast %185 : i32 to index
    %c0_41 = arith.constant 0 : index
    %187 = vector.load %arg8[%186, %c0_41] : memref<1152x256xf32, #tpu.memory_space<vmem>>, vector<128x256xf32>
    tpu.vector_store %arg8[%186, %c0_41], %183 {strides = array<i32>} : memref<1152x256xf32, #tpu.memory_space<vmem>>, vector<128x256xf32>,
    %c6_i32 = arith.constant 6 : i32
    %c1_i32_42 = arith.constant 1 : i32
    %188 = arith.muli %c6_i32, %c1_i32_42 : i32
    %cst_43 = arith.constant dense<0xFF800000> : vector<128xf32>
    %189 = vector.multi_reduction <maximumf>, %181, %cst_43 [1] : vector<128x256xf32> to vector<128xf32>
    %190 = vector.shape_cast %189 : vector<128xf32> to vector<128x1xf32>
    %191 = vector.broadcast %190 : vector<128x1xf32> to vector<128x256xf32>
    %192 = arith.cmpf oeq, %181, %191 : vector<128x256xf32>
    %c256_i32_44 = arith.constant 256 : i32
    %193 = vector.shape_cast %11 : vector<1x256xi32> to vector<1x256xi32>
    %194 = vector.broadcast %193 : vector<1x256xi32> to vector<128x256xi32>
    %195 = vector.broadcast %c256_i32_44 : i32 to vector<128x256xi32>
    %196 = arith.select %192, %194, %195 : vector<128x256xi1>, vector<128x256xi32>
    %cst_45 = arith.constant dense<2147483647> : vector<128xi32>
    %197 = vector.multi_reduction <minsi>, %196, %cst_45 [1] : vector<128x256xi32> to vector<128xi32>
    %198 = vector.shape_cast %197 : vector<128xi32> to vector<128x1xi32>
    %199 = vector.broadcast %11 : vector<1x256xi32> to vector<128x256xi32>
    %200 = vector.broadcast %198 : vector<128x1xi32> to vector<128x256xi32>
    %201 = arith.cmpi eq, %199, %200 : vector<128x256xi32>
    %202 = vector.broadcast %188 : i32 to vector<1x128xi32>
    %203 = arith.cmpi eq, %12, %202 : vector<1x128xi32>
    %204 = vector.shape_cast %203 : vector<1x128xi1> to vector<1x128xi1>
    %205 = vector.broadcast %204 : vector<1x128xi1> to vector<128x128xi1>
    %206 = vector.shape_cast %198 : vector<128x1xi32> to vector<128x1xi32>
    %207 = vector.broadcast %206 : vector<128x1xi32> to vector<128x128xi32>
    %208 = arith.select %205, %207, %179 : vector<128x128xi1>, vector<128x128xi32>
    %209 = vector.broadcast %cst_5 : f32 to vector<128x256xf32>
    %210 = arith.select %201, %209, %181 : vector<128x256xi1>, vector<128x256xf32>
    %211 = arith.extui %201 : vector<128x256xi1> to vector<128x256xi32>
    %212 = arith.sitofp %211 : vector<128x256xi32> to vector<128x256xf32>
    %c128_i32_46 = arith.constant 128 : i32
    %213 = arith.muli %c6_i32, %c128_i32_46 : i32
    %214 = tpu.assume_multiple %213, 128 : i32
    %215 = arith.index_cast %214 : i32 to index
    %c0_47 = arith.constant 0 : index
    %216 = vector.load %arg8[%215, %c0_47] : memref<1152x256xf32, #tpu.memory_space<vmem>>, vector<128x256xf32>
    tpu.vector_store %arg8[%215, %c0_47], %212 {strides = array<i32>} : memref<1152x256xf32, #tpu.memory_space<vmem>>, vector<128x256xf32>,
    %c7_i32 = arith.constant 7 : i32
    %c1_i32_48 = arith.constant 1 : i32
    %217 = arith.muli %c7_i32, %c1_i32_48 : i32
    %cst_49 = arith.constant dense<0xFF800000> : vector<128xf32>
    %218 = vector.multi_reduction <maximumf>, %210, %cst_49 [1] : vector<128x256xf32> to vector<128xf32>
    %219 = vector.shape_cast %218 : vector<128xf32> to vector<128x1xf32>
    %220 = vector.broadcast %219 : vector<128x1xf32> to vector<128x256xf32>
    %221 = arith.cmpf oeq, %210, %220 : vector<128x256xf32>
    %c256_i32_50 = arith.constant 256 : i32
    %222 = vector.shape_cast %11 : vector<1x256xi32> to vector<1x256xi32>
    %223 = vector.broadcast %222 : vector<1x256xi32> to vector<128x256xi32>
    %224 = vector.broadcast %c256_i32_50 : i32 to vector<128x256xi32>
    %225 = arith.select %221, %223, %224 : vector<128x256xi1>, vector<128x256xi32>
    %cst_51 = arith.constant dense<2147483647> : vector<128xi32>
    %226 = vector.multi_reduction <minsi>, %225, %cst_51 [1] : vector<128x256xi32> to vector<128xi32>
    %227 = vector.shape_cast %226 : vector<128xi32> to vector<128x1xi32>
    %228 = vector.broadcast %11 : vector<1x256xi32> to vector<128x256xi32>
    %229 = vector.broadcast %227 : vector<128x1xi32> to vector<128x256xi32>
    %230 = arith.cmpi eq, %228, %229 : vector<128x256xi32>
    %231 = vector.broadcast %217 : i32 to vector<1x128xi32>
    %232 = arith.cmpi eq, %12, %231 : vector<1x128xi32>
    %233 = vector.shape_cast %232 : vector<1x128xi1> to vector<1x128xi1>
    %234 = vector.broadcast %233 : vector<1x128xi1> to vector<128x128xi1>
    %235 = vector.shape_cast %227 : vector<128x1xi32> to vector<128x1xi32>
    %236 = vector.broadcast %235 : vector<128x1xi32> to vector<128x128xi32>
    %237 = arith.select %234, %236, %208 : vector<128x128xi1>, vector<128x128xi32>
    %238 = vector.broadcast %cst_5 : f32 to vector<128x256xf32>
    %239 = arith.select %230, %238, %210 : vector<128x256xi1>, vector<128x256xf32>
    %240 = arith.extui %230 : vector<128x256xi1> to vector<128x256xi32>
    %241 = arith.sitofp %240 : vector<128x256xi32> to vector<128x256xf32>
    %c128_i32_52 = arith.constant 128 : i32
    %242 = arith.muli %c7_i32, %c128_i32_52 : i32
    %243 = tpu.assume_multiple %242, 128 : i32
    %244 = arith.index_cast %243 : i32 to index
    %c0_53 = arith.constant 0 : index
    %245 = vector.load %arg8[%244, %c0_53] : memref<1152x256xf32, #tpu.memory_space<vmem>>, vector<128x256xf32>
    tpu.vector_store %arg8[%244, %c0_53], %241 {strides = array<i32>} : memref<1152x256xf32, #tpu.memory_space<vmem>>, vector<128x256xf32>,
    %c8_i32 = arith.constant 8 : i32
    %c1_i32_54 = arith.constant 1 : i32
    %246 = arith.muli %c8_i32, %c1_i32_54 : i32
    %cst_55 = arith.constant dense<0xFF800000> : vector<128xf32>
    %247 = vector.multi_reduction <maximumf>, %239, %cst_55 [1] : vector<128x256xf32> to vector<128xf32>
    %248 = vector.shape_cast %247 : vector<128xf32> to vector<128x1xf32>
    %249 = vector.broadcast %248 : vector<128x1xf32> to vector<128x256xf32>
    %250 = arith.cmpf oeq, %239, %249 : vector<128x256xf32>
    %c256_i32_56 = arith.constant 256 : i32
    %251 = vector.shape_cast %11 : vector<1x256xi32> to vector<1x256xi32>
    %252 = vector.broadcast %251 : vector<1x256xi32> to vector<128x256xi32>
    %253 = vector.broadcast %c256_i32_56 : i32 to vector<128x256xi32>
    %254 = arith.select %250, %252, %253 : vector<128x256xi1>, vector<128x256xi32>
    %cst_57 = arith.constant dense<2147483647> : vector<128xi32>
    %255 = vector.multi_reduction <minsi>, %254, %cst_57 [1] : vector<128x256xi32> to vector<128xi32>
    %256 = vector.shape_cast %255 : vector<128xi32> to vector<128x1xi32>
    %257 = vector.broadcast %11 : vector<1x256xi32> to vector<128x256xi32>
    %258 = vector.broadcast %256 : vector<128x1xi32> to vector<128x256xi32>
    %259 = arith.cmpi eq, %257, %258 : vector<128x256xi32>
    %260 = vector.broadcast %246 : i32 to vector<1x128xi32>
    %261 = arith.cmpi eq, %12, %260 : vector<1x128xi32>
    %262 = vector.shape_cast %261 : vector<1x128xi1> to vector<1x128xi1>
    %263 = vector.broadcast %262 : vector<1x128xi1> to vector<128x128xi1>
    %264 = vector.shape_cast %256 : vector<128x1xi32> to vector<128x1xi32>
    %265 = vector.broadcast %264 : vector<128x1xi32> to vector<128x128xi32>
    %266 = arith.select %263, %265, %237 : vector<128x128xi1>, vector<128x128xi32>
    %267 = vector.broadcast %cst_5 : f32 to vector<128x256xf32>
    %268 = arith.select %259, %267, %239 : vector<128x256xi1>, vector<128x256xf32>
    %269 = arith.extui %259 : vector<128x256xi1> to vector<128x256xi32>
    %270 = arith.sitofp %269 : vector<128x256xi32> to vector<128x256xf32>
    %c128_i32_58 = arith.constant 128 : i32
    %271 = arith.muli %c8_i32, %c128_i32_58 : i32
    %272 = tpu.assume_multiple %271, 128 : i32
    %273 = arith.index_cast %272 : i32 to index
    %c0_59 = arith.constant 0 : index
    %274 = vector.load %arg8[%273, %c0_59] : memref<1152x256xf32, #tpu.memory_space<vmem>>, vector<128x256xf32>
    tpu.vector_store %arg8[%273, %c0_59], %270 {strides = array<i32>} : memref<1152x256xf32, #tpu.memory_space<vmem>>, vector<128x256xf32>,
    %c9_i32 = arith.constant 9 : i32
    %c0_60 = arith.constant 0 : index
    %c0_61 = arith.constant 0 : index
    %275 = vector.load %arg6[%c0_60, %c0_61] : memref<128x128xi32, #tpu.memory_space<vmem>>, vector<128x128xi32>
    tpu.vector_store %arg6[%c0_60, %c0_61], %266 {strides = array<i32>} : memref<128x128xi32, #tpu.memory_space<vmem>>, vector<128x128xi32>,
    %c0_62 = arith.constant 0 : index
    %c0_63 = arith.constant 0 : index
    %276 = vector.load %arg8[%c0_62, %c0_63] : memref<1152x256xf32, #tpu.memory_space<vmem>>, vector<1152x256xf32>
    %c0_64 = arith.constant 0 : index
    %c0_65 = arith.constant 0 : index
    %277 = vector.load %arg5[%c0_64, %c0_65] : memref<256x128xf32, #tpu.memory_space<vmem>>, vector<256x128xf32>
    %cst_66 = arith.constant dense<0.000000e+00> : vector<1152x128xf32>
    %278 = tpu.matmul %276, %277, %cst_66 {dimension_numbers = #tpu.dot_dimension_numbers<[1], [0], [0], [1], [0, 0, 1, 1], [], []>} : vector<1152x256xf32>, vector<256x128xf32>, vector<1152x128xf32> -> vector<1152x128xf32>
    %cst_67 = arith.constant 0.000000e+00 : f32
    %279 = vector.broadcast %cst_67 : f32 to vector<128x128xf32>
    %280 = vector.extract_strided_slice %278 {offsets = [0, 0], sizes = [128, 128], strides = [1, 1]} : vector<1152x128xf32> to vector<128x128xf32>
    %281 = arith.addf %5, %280 : vector<128x128xf32>
    %cst_68 = arith.constant 0.000000e+00 : f32
    %282 = vector.broadcast %cst_68 : f32 to vector<128x128xf32>
    %283 = arith.maximumf %281, %282 : vector<128x128xf32>
    %284 = arith.addf %279, %283 : vector<128x128xf32>
    %285 = vector.extract_strided_slice %278 {offsets = [128, 0], sizes = [128, 128], strides = [1, 1]} : vector<1152x128xf32> to vector<128x128xf32>
    %286 = arith.addf %5, %285 : vector<128x128xf32>
    %cst_69 = arith.constant 0.000000e+00 : f32
    %287 = vector.broadcast %cst_69 : f32 to vector<128x128xf32>
    %288 = arith.maximumf %286, %287 : vector<128x128xf32>
    %289 = arith.addf %284, %288 : vector<128x128xf32>
    %290 = vector.extract_strided_slice %278 {offsets = [256, 0], sizes = [128, 128], strides = [1, 1]} : vector<1152x128xf32> to vector<128x128xf32>
    %291 = arith.addf %5, %290 : vector<128x128xf32>
    %cst_70 = arith.constant 0.000000e+00 : f32
    %292 = vector.broadcast %cst_70 : f32 to vector<128x128xf32>
    %293 = arith.maximumf %291, %292 : vector<128x128xf32>
    %294 = arith.addf %289, %293 : vector<128x128xf32>
    %295 = vector.extract_strided_slice %278 {offsets = [384, 0], sizes = [128, 128], strides = [1, 1]} : vector<1152x128xf32> to vector<128x128xf32>
    %296 = arith.addf %5, %295 : vector<128x128xf32>
    %cst_71 = arith.constant 0.000000e+00 : f32
    %297 = vector.broadcast %cst_71 : f32 to vector<128x128xf32>
    %298 = arith.maximumf %296, %297 : vector<128x128xf32>
    %299 = arith.addf %294, %298 : vector<128x128xf32>
    %300 = vector.extract_strided_slice %278 {offsets = [512, 0], sizes = [128, 128], strides = [1, 1]} : vector<1152x128xf32> to vector<128x128xf32>
    %301 = arith.addf %5, %300 : vector<128x128xf32>
    %cst_72 = arith.constant 0.000000e+00 : f32
    %302 = vector.broadcast %cst_72 : f32 to vector<128x128xf32>
    %303 = arith.maximumf %301, %302 : vector<128x128xf32>
    %304 = arith.addf %299, %303 : vector<128x128xf32>
    %305 = vector.extract_strided_slice %278 {offsets = [640, 0], sizes = [128, 128], strides = [1, 1]} : vector<1152x128xf32> to vector<128x128xf32>
    %306 = arith.addf %5, %305 : vector<128x128xf32>
    %cst_73 = arith.constant 0.000000e+00 : f32
    %307 = vector.broadcast %cst_73 : f32 to vector<128x128xf32>
    %308 = arith.maximumf %306, %307 : vector<128x128xf32>
    %309 = arith.addf %304, %308 : vector<128x128xf32>
    %310 = vector.extract_strided_slice %278 {offsets = [768, 0], sizes = [128, 128], strides = [1, 1]} : vector<1152x128xf32> to vector<128x128xf32>
    %311 = arith.addf %5, %310 : vector<128x128xf32>
    %cst_74 = arith.constant 0.000000e+00 : f32
    %312 = vector.broadcast %cst_74 : f32 to vector<128x128xf32>
    %313 = arith.maximumf %311, %312 : vector<128x128xf32>
    %314 = arith.addf %309, %313 : vector<128x128xf32>
    %315 = vector.extract_strided_slice %278 {offsets = [896, 0], sizes = [128, 128], strides = [1, 1]} : vector<1152x128xf32> to vector<128x128xf32>
    %316 = arith.addf %5, %315 : vector<128x128xf32>
    %cst_75 = arith.constant 0.000000e+00 : f32
    %317 = vector.broadcast %cst_75 : f32 to vector<128x128xf32>
    %318 = arith.maximumf %316, %317 : vector<128x128xf32>
    %319 = arith.addf %314, %318 : vector<128x128xf32>
    %320 = vector.extract_strided_slice %278 {offsets = [1024, 0], sizes = [128, 128], strides = [1, 1]} : vector<1152x128xf32> to vector<128x128xf32>
    %321 = arith.addf %5, %320 : vector<128x128xf32>
    %cst_76 = arith.constant 0.000000e+00 : f32
    %322 = vector.broadcast %cst_76 : f32 to vector<128x128xf32>
    %323 = arith.maximumf %321, %322 : vector<128x128xf32>
    %324 = arith.addf %319, %323 : vector<128x128xf32>
    %cst_77 = arith.constant 0.111111112 : f32
    %325 = vector.broadcast %cst_77 : f32 to vector<128x128xf32>
    %326 = arith.mulf %324, %325 : vector<128x128xf32>
    %c0_78 = arith.constant 0 : index
    %c0_79 = arith.constant 0 : index
    %327 = vector.load %arg7[%c0_78, %c0_79] : memref<128x128xf32, #tpu.memory_space<vmem>>, vector<128x128xf32>
    tpu.vector_store %arg7[%c0_78, %c0_79], %326 {strides = array<i32>} : memref<128x128xf32, #tpu.memory_space<vmem>>, vector<128x128xf32>,
    return
  }
  func.func @transform_0(%arg0: i32) -> (i32, i32) {
    %c0_i32 = arith.constant 0 : i32
    %c0_i32_0 = arith.constant 0 : i32
    %c0_i32_1 = arith.constant 0 : i32
    return %c0_i32, %c0_i32_0 : i32, i32
  }
  func.func @transform_1(%arg0: i32) -> (i32, i32) {
    %c0_i32 = arith.constant 0 : i32
    %c0_i32_0 = arith.constant 0 : i32
    %c0_i32_1 = arith.constant 0 : i32
    return %c0_i32, %c0_i32_0 : i32, i32
  }
  func.func @transform_2(%arg0: i32) -> (i32, i32) {
    %c0_i32 = arith.constant 0 : i32
    %c0_i32_0 = arith.constant 0 : i32
    %c0_i32_1 = arith.constant 0 : i32
    return %c0_i32, %c0_i32_0 : i32, i32
  }
  func.func @transform_3(%arg0: i32) -> (i32, i32) {
    %c0_i32 = arith.constant 0 : i32
    %c0_i32_0 = arith.constant 0 : i32
    %c0_i32_1 = arith.constant 0 : i32
    return %c0_i32, %c0_i32_0 : i32, i32
  }
  func.func @transform_4(%arg0: i32) -> (i32, i32) {
    %c0_i32 = arith.constant 0 : i32
    %c0_i32_0 = arith.constant 0 : i32
    %c0_i32_1 = arith.constant 0 : i32
    return %c0_i32, %c0_i32_0 : i32, i32
  }
  func.func @transform_5(%arg0: i32) -> (i32, i32) {
    %c0_i32 = arith.constant 0 : i32
    %c0_i32_0 = arith.constant 0 : i32
    return %arg0, %c0_i32 : i32, i32
  }
  func.func @transform_6(%arg0: i32) -> (i32, i32) {
    %c0_i32 = arith.constant 0 : i32
    %c0_i32_0 = arith.constant 0 : i32
    return %arg0, %c0_i32 : i32, i32
  }
}

</mosaic_0001>

<bundles_post_ra>
// kernel: tpu_custom_call.1
= control target key start
LH: loop header
LB: loop body
LE: loop exit
PB: predicated region body
PF: predicated region fallthrough
CT: control target
= control target key end

     0   :  { %12 = vsyncpa [#allocation4], 0  ;;  %s13884_s0 = inlined_call_operand.vmem [shape: f32[256,16], index: 0, kind: input, shape index: {}]   ;;  %s13885_s1 = inlined_call_operand.vmem [shape: f32[16,256], index: 1, kind: input, shape index: {}]   ;;  %s13886_s2 = inlined_call_operand.vmem [shape: f32[1,256], index: 2, kind: input, shape index: {}]   ;;  %s13887_s3 = inlined_call_operand.vmem [shape: f32[256,128], index: 3, kind: input, shape index: {}]   ;;  %s13888_s4 = inlined_call_operand.hbm [shape: f32[256,128], index: 4, kind: input, shape index: {}]   ;;  %s13889_s5 = inlined_call_operand.hbm [shape: s32[256,128], index: 5, kind: output, shape index: {0}]   ;;  %s13890_s6 = inlined_call_operand.hbm [shape: f32[256,128], index: 6, kind: output, shape index: {1}]  }
   0x1   :  { %13 = vsyncpa [#allocation5], 0 }
   0x2   :  { %15 = vsyncpa [#allocation5 + $0x1], 0 }
   0x3   :  { %16 = vsyncpa [#allocation8], 0 }
   0x4   :  { %18 = vsyncpa [#allocation8 + $0x1], 0  ;;  %s8239_s21 = smov 0   ;;  %s8241_s22 = smov 0  }
   0x5   :  { %s8243_s23 = smov 0   ;;  %s8245_s24 = smov 0  }
   0x6 LB: > { %s8260_s25 = sadd.s32 4294967295, %s8192_s24   ;;  %s7198_s26 = sadd.s32 4294967294, %s8192_s24   ;;  %s8192_s24 = sphi %s8245_s24, %s14956_s24   ;;  %s8188_s23 = sphi %s8243_s23, %s14955_s23   ;;  %s8184_s22 = sphi %s8241_s22, %s14954_s22   ;;  %s8180_s21 = sphi %s8239_s21, %s14953_s21  }
   0x7   : > { %s8264_s27 = sadd.s32 1, %s8192_s24   ;;  %s136_s28 = sadd.s32 1, %s8188_s23 }
   0x8   : > { %s133_s29 = ssub.s32 %s8192_s24, %s8264_s27  ;;  %p146_p0 = scmp.ne.s32.totalorder %s8188_s23, %s8184_s22 }
   0x9   : > { %p134_p1 = scmp.eq.s32.totalorder %s133_s29, 0  ;;  %p147_p2 = scmp.eq.s32.totalorder %s8260_s25, 1 }
   0xa   : > { %p152_p3 = scmp.ne.s32.totalorder %s8184_s22, %s8180_s21  ;;  %p153_p4 = scmp.eq.s32.totalorder %s7198_s26, 1 }
   0xb   : > { %s8275_s30 = scalar_select %p134_p1, %s8188_s23, %s136_s28  }
   0xc   : > { %p8277_p5 = por %p147_p2, %p146_p0  ;;  %p8281_p6 = por %p153_p4, %p152_p3 }
   0xd   : > { %p7199_p7 = scmp.ge.s32.totalorder %s8192_s24, 1  ;;  %p186_p8 = scmp.lt.s32.totalorder %s8192_s24, 3 }
   0xe   : > { %s14133_s7 = scalar_select %p8277_p5, 1, 0 }
   0xf   : > { %s14134_s8 = scalar_select %p8281_p6, 1, 0 }
  0x10   : > { %p13891_p9 = scmp.eq.s32.totalorder %s8260_s25, 0  ;;  %p8288_p10 = pnand %p7199_p7, %p186_p8 }
  0x11   : > { %s8194_s10 = smov [#allocation3]   ;;  %s8066_s15 = scalar_lea.hbm %s13888_s4, 4096 }
  0x12   : > { %s14135_s9 = scalar_select %p8288_p10, 1, 0 }
  0x13   : > { %s210_s11 = sshll.u32 %s8194_s10, 4  ;;  %p7900_p11 = pneg %p8288_p10  ;;  %s211_s11 = int_to_ptr.vmem [resolvable:$true] %s210_s11 }
  0x14   : > { %p8067_p13 = scmp.ne.s32.totalorder %s13888_s4, %s8066_s15  ;;  %p8073_p3 = scmp.lt.u32.totalorder %s8066_s15, %s13888_s4 }
  0x15   : > { %p8296_p12 = pnand %p13891_p9, %p7900_p11 }
  0x17   : > { %p8068_p0 = pneg %p8296_p12 }
  0x19   : > { %p8069_p1 = pnand %p8068_p0, %p8067_p13 }
  0x1b   : > { %p8070_p2 = pneg %p8069_p1 }
  0x1d   : > { %p8075_p4 = pnand %p8073_p3, %p8070_p2 }
  0x1f   : > { %8078 = shalt.err (!%p8075_p4)
}
  0x20   : > { %s8079_s20 = scalar_lea.vmem %s211_s11, 4096  ;;  %p8087_p9 = scmp.lt.s32.totalorder %s211_s11, %s211_s11 }
  0x21   : > { %p8080_p7 = scmp.ne.s32.totalorder %s211_s11, %s8079_s20  ;;  %p8088_p6 = scmp.lt.s32.totalorder %s8079_s20, %s8079_s20 }
  0x23   : > { %p8082_p8 = pnand %p8080_p7, %p8068_p0  ;;  %p8089_p5 = por %p8088_p6, %p8087_p9 }
  0x25   : > { %p8083_p11 = pneg %p8082_p8 }
  0x27   : > { %p8090_p10 = pnand %p8089_p5, %p8083_p11 }
  0x29   : > { %8093 = shalt.err (!%p8090_p10)
}
  0x2a   : > { %s8195_s26 = smov 128   ;;  %s8196_s28 = smov 8  }
  0x2b   : > { %7903 = dma.hbm_to_vmem [thread:$0]  (!%p8296_p12), %s13888_s4, 4096, %s211_s11, [#allocation4], %s8195_s26, %s8195_s26, %s8196_s28  }
  0x2c   : > { %p14137_p13 = scmp.ne.s32.totalorder %s14135_s9, 0 }
  0x2e   : > { %226 = sbr.rel (%p14137_p13) target bundleno = 4568 (0x11d8), region = 40 }
  0x35   : > { %p14138_p1 = scmp.eq.s32.totalorder %s8260_s25, 0 }
  0x37   : > { %8167 = dma.done.wait (%p14138_p1), [#allocation4], 4096   ;;  %p14139_p0 = pmov %p14138_p1 }
  0x38   : > { %v8197_v0 = vmov 0.0   ;;  %s7205_s13 = sshll.u32 %s8260_s25, 7  ;;  %v294_v1 = vld [vmem:[%s13885_s1 + $0x8] sm:$0xff]  ;;  %v296_v2 = vld [vmem:[%s13885_s1 + $0x18] sm:$0xff]  ;;  %v293_v3 = vld [vmem:[%s13885_s1] sm:$0xff]  ;;  %vm297_vm0 = vcmask 130048   ;;  %v509_v23 = vlaneseq }
  0x39   : > { %8169 = vsyncadd (%p14139_p0), [#allocation4], 4294963200  ;;  %410 = vmatprep.mubr.f32.mxu0 %v8197_v0  ;;  %v7808_v4 = vpack.c.bf16 %v296_v2, %v294_v1  ;;  %v295_v5 = vld [vmem:[%s13885_s1 + $0x10] sm:$0xff]  ;;  %s8340_s26 = scalar_lea.vmem %s13884_s0, %s7205_s13  ;;  %v507_v26 = vld [vmem:[%s13886_s2] sm:$0x3]  ;;  %s9216_s12 = scalar_lea.vmem %s13887_s3, %s7205_s13 }
  0x3a   : > { %v7810_v6 = vpack.c.bf16 %v295_v5, %v293_v3  ;;  %v260_v7 = vld [vmem:[%s8340_s26] sm:$0xff]  ;;  %v261_v8 = vld [vmem:[%s8340_s26 + $0x8] sm:$0xff]  ;;  %v262_v9 = vld [vmem:[%s8340_s26 + $0x10] sm:$0xff]  ;;  %v510_v24 = vshrl.u32 %v509_v23, 7  ;;  %s13589_s13 = sand.u32 1, %s8184_s22   ;;  %s7518_s9 = sshll.u32 %s8260_s25, 11 }
  0x3b   : > { %7809 = vmatprep.subr.bf16.mxu0 %v7808_v4  ;;  %v263_v10 = vld [vmem:[%s8340_s26 + $0x18] sm:$0xff]  ;;  %v264_v11 = vld [vmem:[%s8340_s26 + $0x20] sm:$0xff]  ;;  %v265_v12 = vld [vmem:[%s8340_s26 + $0x28] sm:$0xff]  ;;  %s7203_s15 = sshll.u32 %s13589_s13, 7  ;;  %s13747_s19 = scalar_lea.hbm %s13889_s5, %s7518_s9 }
  0x3c   : > { %7811 = vmatpush1.bf16.msra.mxu0 %v7810_v6  ;;  %v266_v13 = vld [vmem:[%s8340_s26 + $0x30] sm:$0xff]  ;;  %v267_v14 = vld [vmem:[%s8340_s26 + $0x38] sm:$0xff]  ;;  %v268_v15 = vld [vmem:[%s8340_s26 + $0x40] sm:$0xff]  ;;  %v511_v25 = vsub.s32 0, %v510_v24  ;;  %v515_v27 = vsub.s32 1, %v510_v24  ;;  %s13602_s11 = scalar_lea.vmem [#allocation6], %s7203_s15 }
  0x3d   : > { %v269_v16 = vld [vmem:[%s8340_s26 + $0x48] sm:$0xff]  ;;  %v270_v17 = vld [vmem:[%s8340_s26 + $0x50] sm:$0xff]  ;;  %v271_v18 = vld [vmem:[%s8340_s26 + $0x58] sm:$0xff]  ;;  %s7076_s16 = sshll.u32 %s13602_s11, 4  ;;  %s7058_s20 = scalar_lea.sflag [#allocation5], %s13589_s13  ;;  %s13749_s16 = int_to_ptr.vmem [resolvable:$true] %s7076_s16 }
  0x3e   : > { %v272_v19 = vld [vmem:[%s8340_s26 + $0x60] sm:$0xff]  ;;  %v273_v20 = vld [vmem:[%s8340_s26 + $0x68] sm:$0xff]  ;;  %v274_v21 = vld [vmem:[%s8340_s26 + $0x70] sm:$0xff]  ;;  %v8378_v28 = vrot.slane %v507_v26, %v511_v25  ;;  %v8380_v29 = vrot.slane %v507_v26, %v515_v27  ;;  %p14931_p6 = scmp.ne.s32.totalorder %s14133_s7, 0  ;;  %s8200_s28 = smov [#allocation6]  }
  0x3f   : > { %7206 = vmatmul.mubr.msk.f32.vlgmr.msra.gmra.mrb[0].mxu0 %vm297_vm0, %v260_v7  ;;  %v275_v22 = vld [vmem:[%s8340_s26 + $0x78] sm:$0xff]  ;;  %s8094_s26 = scalar_lea.vmem %s13749_s16, 2048  ;;  %s8098_s29 = sshll.u32 %s8200_s28, 4  ;;  %s8099_s29 = int_to_ptr.vmem [resolvable:$false] %s8098_s29 }
  0x40   : > { %416 = vmatprep.mubr.f32.mxu0 %v8197_v0  ;;  %p8095_p5 = scmp.ne.s32.totalorder %s13749_s16, %s8094_s26  ;;  %s8100_s10 = scalar_lea.vmem %s8099_s29, 4096 }
  0x41   : > { %p8101_p12 = scmp.lt.s32.totalorder %s13749_s16, %s8099_s29  ;;  %p8102_p2 = scmp.lt.s32.totalorder %s8100_s10, %s8094_s26 }
  0x42   : > { %p8096_p9 = pnand %p8095_p5, %p14931_p6 }
  0x43   : > { %7207 = vmatmul.mubr.msk.f32.gmra.mrb[2].mxu0 %vm297_vm0, %v261_v8  ;;  %p8103_p3 = por %p8102_p2, %p8101_p12 }
  0x44   : > { %422 = vmatprep.mubr.f32.mxu0 %v8197_v0  ;;  %p8097_p10 = pneg %p8096_p9 }
  0x46   : > { %p8104_p4 = pnand %p8103_p3, %p8097_p10 }
  0x47   : > { %7208 = vmatmul.mubr.msk.f32.gmra.mrb[4].mxu0 %vm297_vm0, %v262_v9 }
  0x48   : > { %428 = vmatprep.mubr.f32.mxu0 %v8197_v0 }
  0x4b   : > { %7209 = vmatmul.mubr.msk.f32.gmra.mrb[6].mxu0 %vm297_vm0, %v263_v10 }
  0x4c   : > { %434 = vmatprep.mubr.f32.mxu0 %v8197_v0 }
  0x4f   : > { %7210 = vmatmul.mubr.msk.f32.gmra.mrb[8].mxu0 %vm297_vm0, %v264_v11 }
  0x50   : > { %440 = vmatprep.mubr.f32.mxu0 %v8197_v0 }
  0x53   : > { %7211 = vmatmul.mubr.msk.f32.gmra.mrb[10].mxu0 %vm297_vm0, %v265_v12 }
  0x54   : > { %446 = vmatprep.mubr.f32.mxu0 %v8197_v0 }
  0x57   : > { %7212 = vmatmul.mubr.msk.f32.gmra.mrb[12].mxu0 %vm297_vm0, %v266_v13 }
  0x58   : > { %452 = vmatprep.mubr.f32.mxu0 %v8197_v0 }
  0x5b   : > { %7213 = vmatmul.mubr.msk.f32.gmra.mrb[14].mxu0 %vm297_vm0, %v267_v14 }
  0x5c   : > { %458 = vmatprep.mubr.f32.mxu0 %v8197_v0 }
  0x5f   : > { %7214 = vmatmul.mubr.msk.f32.gmra.mrb[16].mxu0 %vm297_vm0, %v268_v15 }
  0x60   : > { %464 = vmatprep.mubr.f32.mxu0 %v8197_v0 }
  0x63   : > { %7215 = vmatmul.mubr.msk.f32.gmra.mrb[18].mxu0 %vm297_vm0, %v269_v16 }
  0x64   : > { %470 = vmatprep.mubr.f32.mxu0 %v8197_v0 }
  0x67   : > { %7216 = vmatmul.mubr.msk.f32.gmra.mrb[20].mxu0 %vm297_vm0, %v270_v17 }
  0x68   : > { %476 = vmatprep.mubr.f32.mxu0 %v8197_v0 }
  0x6b   : > { %7217 = vmatmul.mubr.msk.f32.gmra.mrb[22].mxu0 %vm297_vm0, %v271_v18 }
  0x6c   : > { %482 = vmatprep.mubr.f32.mxu0 %v8197_v0 }
  0x6f   : > { %7218 = vmatmul.mubr.msk.f32.gmra.mrb[24].mxu0 %vm297_vm0, %v272_v19 }
  0x70   : > { %488 = vmatprep.mubr.f32.mxu0 %v8197_v0 }
  0x73   : > { %7219 = vmatmul.mubr.msk.f32.gmra.mrb[26].mxu0 %vm297_vm0, %v273_v20 }
  0x74   : > { %494 = vmatprep.mubr.f32.mxu0 %v8197_v0 }
  0x77   : > { %7220 = vmatmul.mubr.msk.f32.gmra.mrb[28].mxu0 %vm297_vm0, %v274_v21 }
  0x78   : > { %500 = vmatprep.mubr.f32.mxu0 %v8197_v0 }
  0x7b   : > { %7221 = vmatmul.mubr.msk.f32.gmra.mrb[30].mxu0 %vm297_vm0, %v275_v22 }
 0x112   : > { %v412_v30 = vpop.f32.mrb[0].mxu0 }
 0x113   : > { %v8383_v31 = vsub.f32 %v412_v30, %v8378_v28  ;;  %v414_v32 = vpop.f32.mrb[1].mxu0 }
 0x114   : > { %v8386_v33 = vsub.f32 %v414_v32, %v8380_v29 }
 0x116   : > { %v418_v34 = vpop.f32.mrb[2].mxu0  ;;  %v554_v35 = vmax.f32 %v8383_v31, %v8386_v33 }
 0x117   : > { %v8391_v36 = vsub.f32 %v418_v34, %v8378_v28  ;;  %v420_v37 = vpop.f32.mrb[3].mxu0 }
 0x118   : > { %v8394_v38 = vsub.f32 %v420_v37, %v8380_v29  ;;  %555 = vmax.xlane.f32.xlu0 %v554_v35 }
 0x11a   : > { %v424_v39 = vpop.f32.mrb[4].mxu0  ;;  %v557_v40 = vmax.f32 %v8391_v36, %v8394_v38 }
 0x11b   : > { %v8399_v41 = vsub.f32 %v424_v39, %v8378_v28  ;;  %v426_v42 = vpop.f32.mrb[5].mxu0 }
 0x11c   : > { %v8402_v43 = vsub.f32 %v426_v42, %v8380_v29  ;;  %558 = vmax.xlane.f32.xlu0 %v557_v40 }
 0x11e   : > { %v430_v44 = vpop.f32.mrb[6].mxu0  ;;  %v560_v45 = vmax.f32 %v8399_v41, %v8402_v43 }
 0x11f   : > { %v8407_v46 = vsub.f32 %v430_v44, %v8378_v28  ;;  %v432_v47 = vpop.f32.mrb[7].mxu0 }
 0x120   : > { %v8410_v48 = vsub.f32 %v432_v47, %v8380_v29  ;;  %561 = vmax.xlane.f32.xlu1 %v560_v45 }
 0x122   : > { %v436_v49 = vpop.f32.mrb[8].mxu0  ;;  %v563_v50 = vmax.f32 %v8407_v46, %v8410_v48 }
 0x123   : > { %v8415_v51 = vsub.f32 %v436_v49, %v8378_v28  ;;  %v438_v52 = vpop.f32.mrb[9].mxu0 }
 0x124   : > { %v8418_v53 = vsub.f32 %v438_v52, %v8380_v29  ;;  %564 = vmax.xlane.f32.xlu1 %v563_v50 }
 0x126   : > { %v442_v54 = vpop.f32.mrb[10].mxu0  ;;  %v566_v55 = vmax.f32 %v8415_v51, %v8418_v53 }
 0x127   : > { %v8423_v56 = vsub.f32 %v442_v54, %v8378_v28  ;;  %v444_v57 = vpop.f32.mrb[11].mxu0 }
 0x128   : > { %v8426_v58 = vsub.f32 %v444_v57, %v8380_v29  ;;  %567 = vmax.xlane.f32.xlu0 %v566_v55 }
 0x12a   : > { %v448_v59 = vpop.f32.mrb[12].mxu0  ;;  %v569_v60 = vmax.f32 %v8423_v56, %v8426_v58 }
 0x12b   : > { %v8431_v61 = vsub.f32 %v448_v59, %v8378_v28  ;;  %v450_v62 = vpop.f32.mrb[13].mxu0 }
 0x12c   : > { %v8434_v63 = vsub.f32 %v450_v62, %v8380_v29  ;;  %570 = vmax.xlane.f32.xlu1 %v569_v60  ;;  %v8511_v62 = vand.u32 127, %v509_v23 }
 0x12e   : > { %v454_v0 = vpop.f32.mrb[14].mxu0  ;;  %v572_v1 = vmax.f32 %v8431_v61, %v8434_v63 }
 0x12f   : > { %v8439_v2 = vsub.f32 %v454_v0, %v8378_v28  ;;  %v456_v3 = vpop.f32.mrb[15].mxu0  ;;  %v8514_v0 = vadd.s32 128, %v8511_v62 }
 0x130   : > { %v8442_v4 = vsub.f32 %v456_v3, %v8380_v29  ;;  %573 = vmax.xlane.f32.xlu0 %v572_v1 }
 0x132   : > { %v460_v5 = vpop.f32.mrb[16].mxu0  ;;  %v575_v6 = vmax.f32 %v8439_v2, %v8442_v4 }
 0x133   : > { %v8447_v7 = vsub.f32 %v460_v5, %v8378_v28  ;;  %v462_v8 = vpop.f32.mrb[17].mxu0 }
 0x134   : > { %v8450_v9 = vsub.f32 %v462_v8, %v8380_v29  ;;  %576 = vmax.xlane.f32.xlu1 %v575_v6 }
 0x136   : > { %v466_v10 = vpop.f32.mrb[18].mxu0  ;;  %v578_v11 = vmax.f32 %v8447_v7, %v8450_v9 }
 0x137   : > { %v8455_v12 = vsub.f32 %v466_v10, %v8378_v28  ;;  %v468_v13 = vpop.f32.mrb[19].mxu0 }
 0x138   : > { %v8458_v14 = vsub.f32 %v468_v13, %v8380_v29  ;;  %579 = vmax.xlane.f32.xlu0 %v578_v11 }
 0x139   : > { %14140 = vst [vmem:[#allocation12_spill] sm:$0xff] %v8455_v12 }
 0x13a   : > { %14141 = vst [vmem:[#allocation13_spill] sm:$0xff] %v8458_v14  ;;  %v472_v15 = vpop.f32.mrb[20].mxu0  ;;  %v581_v16 = vmax.f32 %v8455_v12, %v8458_v14 }
 0x13b   : > { %v8463_v17 = vsub.f32 %v472_v15, %v8378_v28  ;;  %v474_v18 = vpop.f32.mrb[21].mxu0 }
 0x13c   : > { %v8466_v19 = vsub.f32 %v474_v18, %v8380_v29  ;;  %582 = vmax.xlane.f32.xlu1 %v581_v16 }
 0x13d   : > { %14142 = vst [vmem:[#allocation14_spill] sm:$0xff] %v8463_v17 }
 0x13e   : > { %14143 = vst [vmem:[#allocation15_spill] sm:$0xff] %v8466_v19  ;;  %v478_v20 = vpop.f32.mrb[22].mxu0  ;;  %v584_v21 = vmax.f32 %v8463_v17, %v8466_v19 }
 0x13f   : > { %v8471_v22 = vsub.f32 %v478_v20, %v8378_v28  ;;  %v480_v24 = vpop.f32.mrb[23].mxu0 }
 0x140   : > { %v8474_v25 = vsub.f32 %v480_v24, %v8380_v29  ;;  %585 = vmax.xlane.f32.xlu0 %v584_v21 }
 0x141   : > { %14144 = vst [vmem:[#allocation16_spill] sm:$0xff] %v8471_v22 }
 0x142   : > { %14145 = vst [vmem:[#allocation17_spill] sm:$0xff] %v8474_v25  ;;  %v484_v26 = vpop.f32.mrb[24].mxu0  ;;  %v587_v27 = vmax.f32 %v8471_v22, %v8474_v25 }
 0x143   : > { %v8479_v30 = vsub.f32 %v484_v26, %v8378_v28  ;;  %v486_v32 = vpop.f32.mrb[25].mxu0 }
 0x144   : > { %v8482_v34 = vsub.f32 %v486_v32, %v8380_v29  ;;  %588 = vmax.xlane.f32.xlu1 %v587_v27 }
 0x145   : > { %14146 = vst [vmem:[#allocation18_spill] sm:$0xff] %v8479_v30 }
 0x146   : > { %14147 = vst [vmem:[#allocation19_spill] sm:$0xff] %v8482_v34  ;;  %v490_v35 = vpop.f32.mrb[26].mxu0  ;;  %v590_v37 = vmax.f32 %v8479_v30, %v8482_v34 }
 0x147   : > { %v8487_v39 = vsub.f32 %v490_v35, %v8378_v28  ;;  %v492_v40 = vpop.f32.mrb[27].mxu0 }
 0x148   : > { %v8490_v42 = vsub.f32 %v492_v40, %v8380_v29  ;;  %591 = vmax.xlane.f32.xlu0 %v590_v37 }
 0x149   : > { %14148 = vst [vmem:[#allocation20_spill] sm:$0xff] %v8487_v39 }
 0x14a   : > { %14149 = vst [vmem:[#allocation21_spill] sm:$0xff] %v8490_v42  ;;  %v496_v44 = vpop.f32.mrb[28].mxu0  ;;  %v593_v45 = vmax.f32 %v8487_v39, %v8490_v42 }
 0x14b   : > { %v8495_v47 = vsub.f32 %v496_v44, %v8378_v28  ;;  %v498_v49 = vpop.f32.mrb[29].mxu0 }
 0x14c   : > { %v8498_v50 = vsub.f32 %v498_v49, %v8380_v29  ;;  %594 = vmax.xlane.f32.xlu1 %v593_v45 }
 0x14d   : > { %14150 = vst [vmem:[#allocation22_spill] sm:$0xff] %v8495_v47 }
 0x14e   : > { %14151 = vst [vmem:[#allocation23_spill] sm:$0xff] %v8498_v50  ;;  %v502_v52 = vpop.f32.mrb[30].mxu0  ;;  %v596_v54 = vmax.f32 %v8495_v47, %v8498_v50 }
 0x14f   : > { %v8503_v55 = vsub.f32 %v502_v52, %v8378_v28  ;;  %v504_v57 = vpop.f32.mrb[31].mxu0 }
 0x150   : > { %v8506_v59 = vsub.f32 %v504_v57, %v8380_v29  ;;  %597 = vmax.xlane.f32.xlu0 %v596_v54 }
 0x151   : > { %14152 = vst [vmem:[#allocation24_spill] sm:$0xff] %v8503_v55 }
 0x152   : > { %14153 = vst [vmem:[#allocation25_spill] sm:$0xff] %v8506_v59  ;;  %v599_v60 = vmax.f32 %v8503_v55, %v8506_v59 }
 0x154   : > { %600 = vmax.xlane.f32.xlu1 %v599_v60 }
 0x1a5   : > { %v556_v1 = vpop.xlane.xlu0 %555 }
 0x1a6   : > { %vm602_vm1 = vcmp.eq.f32.partialorder %v8383_v31, %v556_v1  ;;  %vm603_vm2 = vcmp.eq.f32.partialorder %v8386_v33, %v556_v1 }
 0x1a7   : > { %v634_v28 = vsel %vm602_vm1, %v8511_v62, 256  ;;  %v635_v29 = vsel %vm603_vm2, %v8514_v0, 256 }
 0x1a8   : > { %vm666_vm3 = vcmp.lt.s32.totalorder %v634_v28, %v635_v29 }
 0x1a9   : > { %v559_v3 = vpop.xlane.xlu0 %558  ;;  %v8520_v5 = vsel %vm666_vm3, %v634_v28, %v635_v29 }
 0x1aa   : > { %vm604_vm4 = vcmp.eq.f32.partialorder %v8391_v36, %v559_v3  ;;  %vm605_vm5 = vcmp.eq.f32.partialorder %v8394_v38, %v559_v3  ;;  %v669_v23 = vshra.s32 %v8520_v5, 16 }
 0x1ab   : > { %v636_v6 = vsel %vm604_vm4, %v8511_v62, 256  ;;  %v637_v8 = vsel %vm605_vm5, %v8514_v0, 256 }
 0x1ac   : > { %v8527_v10 = vcvt.s32.f32 %v669_v23  ;;  %vm682_vm6 = vcmp.lt.s32.totalorder %v636_v6, %v637_v8 }
 0x1ad   : > { %v562_v11 = vpop.xlane.xlu1 %561  ;;  %v8529_v13 = vsel %vm682_vm6, %v636_v6, %v637_v8 }
 0x1ae   : > { %vm606_vm7 = vcmp.eq.f32.partialorder %v8399_v41, %v562_v11  ;;  %vm607_vm8 = vcmp.eq.f32.partialorder %v8402_v43, %v562_v11  ;;  %672 = vmin.xlane.f32.xlu0 %v8527_v10  ;;  %v685_v15 = vshra.s32 %v8529_v13, 16 }
 0x1af   : > { %v638_v16 = vsel %vm606_vm7, %v8511_v62, 256  ;;  %v639_v18 = vsel %vm607_vm8, %v8514_v0, 256 }
 0x1b0   : > { %v8537_v20 = vcvt.s32.f32 %v685_v15  ;;  %vm698_vm9 = vcmp.lt.s32.totalorder %v638_v16, %v639_v18 }
 0x1b1   : > { %v565_v21 = vpop.xlane.xlu1 %564  ;;  %v8539_v24 = vsel %vm698_vm9, %v638_v16, %v639_v18 }
 0x1b2   : > { %vm608_vm10 = vcmp.eq.f32.partialorder %v8407_v46, %v565_v21  ;;  %vm609_vm11 = vcmp.eq.f32.partialorder %v8410_v48, %v565_v21  ;;  %688 = vmin.xlane.f32.xlu1 %v8537_v20  ;;  %v701_v26 = vshra.s32 %v8539_v24, 16 }
 0x1b3   : > { %v640_v27 = vsel %vm608_vm10, %v8511_v62, 256  ;;  %v641_v32 = vsel %vm609_vm11, %v8514_v0, 256 }
 0x1b4   : > { %v8547_v35 = vcvt.s32.f32 %v701_v26  ;;  %vm714_vm12 = vcmp.lt.s32.totalorder %v640_v27, %v641_v32 }
 0x1b5   : > { %v568_v37 = vpop.xlane.xlu0 %567  ;;  %v8549_v40 = vsel %vm714_vm12, %v640_v27, %v641_v32 }
 0x1b6   : > { %vm610_vm13 = vcmp.eq.f32.partialorder %v8415_v51, %v568_v37  ;;  %vm611_vm14 = vcmp.eq.f32.partialorder %v8418_v53, %v568_v37  ;;  %704 = vmin.xlane.f32.xlu0 %v8547_v35  ;;  %v717_v44 = vshra.s32 %v8549_v40, 16 }
 0x1b7   : > { %v642_v45 = vsel %vm610_vm13, %v8511_v62, 256  ;;  %v643_v49 = vsel %vm611_vm14, %v8514_v0, 256 }
 0x1b8   : > { %v8557_v52 = vcvt.s32.f32 %v717_v44  ;;  %vm730_vm15 = vcmp.lt.s32.totalorder %v642_v45, %v643_v49 }
 0x1b9   : > { %v571_v54 = vpop.xlane.xlu1 %570  ;;  %v8559_v57 = vsel %vm730_vm15, %v642_v45, %v643_v49 }
 0x1ba   : > { %vm612_vm0 = vcmp.eq.f32.partialorder %v8423_v56, %v571_v54  ;;  %vm613_vm1 = vcmp.eq.f32.partialorder %v8426_v58, %v571_v54  ;;  %720 = vmin.xlane.f32.xlu1 %v8557_v52  ;;  %v733_v60 = vshra.s32 %v8559_v57, 16 }
 0x1bb   : > { %v644_v1 = vsel %vm612_vm0, %v8511_v62, 256  ;;  %v645_v28 = vsel %vm613_vm1, %v8514_v0, 256 }
 0x1bc   : > { %v8567_v29 = vcvt.s32.f32 %v733_v60  ;;  %vm746_vm2 = vcmp.lt.s32.totalorder %v644_v1, %v645_v28 }
 0x1bd   : > { %v574_v3 = vpop.xlane.xlu0 %573  ;;  %v8569_v23 = vsel %vm746_vm2, %v644_v1, %v645_v28 }
 0x1be   : > { %vm614_vm3 = vcmp.eq.f32.partialorder %v8431_v61, %v574_v3  ;;  %vm615_vm4 = vcmp.eq.f32.partialorder %v8434_v63, %v574_v3  ;;  %736 = vmin.xlane.f32.xlu0 %v8567_v29  ;;  %v749_v6 = vshra.s32 %v8569_v23, 16 }
 0x1bf   : > { %v646_v8 = vsel %vm614_vm3, %v8511_v62, 256  ;;  %v647_v11 = vsel %vm615_vm4, %v8514_v0, 256 }
 0x1c0   : > { %v8577_v15 = vcvt.s32.f32 %v749_v6  ;;  %vm762_vm5 = vcmp.lt.s32.totalorder %v646_v8, %v647_v11 }
 0x1c1   : > { %v577_v16 = vpop.xlane.xlu1 %576  ;;  %v8579_v18 = vsel %vm762_vm5, %v646_v8, %v647_v11 }
 0x1c2   : > { %vm616_vm6 = vcmp.eq.f32.partialorder %v8439_v2, %v577_v16  ;;  %vm617_vm7 = vcmp.eq.f32.partialorder %v8442_v4, %v577_v16  ;;  %752 = vmin.xlane.f32.xlu1 %v8577_v15  ;;  %v765_v21 = vshra.s32 %v8579_v18, 16 }
 0x1c3   : > { %v648_v26 = vsel %vm616_vm6, %v8511_v62, 256  ;;  %v649_v27 = vsel %vm617_vm7, %v8514_v0, 256 }
 0x1c4   : > { %v8587_v32 = vcvt.s32.f32 %v765_v21  ;;  %vm778_vm8 = vcmp.lt.s32.totalorder %v648_v26, %v649_v27 }
 0x1c5   : > { %v580_v37 = vpop.xlane.xlu0 %579  ;;  %v8589_v44 = vsel %vm778_vm8, %v648_v26, %v649_v27 }
 0x1c6   : > { %vm618_vm9 = vcmp.eq.f32.partialorder %v8447_v7, %v580_v37  ;;  %vm619_vm10 = vcmp.eq.f32.partialorder %v8450_v9, %v580_v37  ;;  %768 = vmin.xlane.f32.xlu0 %v8587_v32  ;;  %v781_v45 = vshra.s32 %v8589_v44, 16 }
 0x1c7   : > { %v650_v49 = vsel %vm618_vm9, %v8511_v62, 256  ;;  %v651_v54 = vsel %vm619_vm10, %v8514_v0, 256 }
 0x1c8   : > { %v8597_v60 = vcvt.s32.f32 %v781_v45  ;;  %vm794_vm11 = vcmp.lt.s32.totalorder %v650_v49, %v651_v54 }
 0x1c9   : > { %v583_v1 = vpop.xlane.xlu1 %582  ;;  %v8599_v28 = vsel %vm794_vm11, %v650_v49, %v651_v54 }
 0x1ca   : > { %vm620_vm12 = vcmp.eq.f32.partialorder %v8455_v12, %v583_v1  ;;  %vm621_vm13 = vcmp.eq.f32.partialorder %v8458_v14, %v583_v1  ;;  %784 = vmin.xlane.f32.xlu1 %v8597_v60  ;;  %v797_v3 = vshra.s32 %v8599_v28, 16  ;;  %v5782_v14 = vld [vmem:[#allocation3 + $0x30] sm:$0xff]  ;;  %v5783_v12 = vld [vmem:[#allocation3 + $0x38] sm:$0xff] }
 0x1cb   : > { %v652_v6 = vsel %vm620_vm12, %v8511_v62, 256  ;;  %v653_v8 = vsel %vm621_vm13, %v8514_v0, 256 }
 0x1cc   : > { %v8607_v11 = vcvt.s32.f32 %v797_v3  ;;  %vm810_vm14 = vcmp.lt.s32.totalorder %v652_v6, %v653_v8 }
 0x1cd   : > { %v586_v16 = vpop.xlane.xlu0 %585  ;;  %v8609_v21 = vsel %vm810_vm14, %v652_v6, %v653_v8 }
 0x1ce   : > { %vm622_vm15 = vcmp.eq.f32.partialorder %v8463_v17, %v586_v16  ;;  %vm623_vm0 = vcmp.eq.f32.partialorder %v8466_v19, %v586_v16  ;;  %800 = vmin.xlane.f32.xlu0 %v8607_v11  ;;  %v813_v26 = vshra.s32 %v8609_v21, 16 }
 0x1cf   : > { %v654_v27 = vsel %vm622_vm15, %v8511_v62, 256  ;;  %v655_v37 = vsel %vm623_vm0, %v8514_v0, 256 }
 0x1d0   : > { %v8617_v45 = vcvt.s32.f32 %v813_v26  ;;  %vm826_vm1 = vcmp.lt.s32.totalorder %v654_v27, %v655_v37 }
 0x1d1   : > { %v589_v49 = vpop.xlane.xlu1 %588  ;;  %v8619_v54 = vsel %vm826_vm1, %v654_v27, %v655_v37 }
 0x1d2   : > { %vm624_vm2 = vcmp.eq.f32.partialorder %v8471_v22, %v589_v49  ;;  %vm625_vm3 = vcmp.eq.f32.partialorder %v8474_v25, %v589_v49  ;;  %816 = vmin.xlane.f32.xlu1 %v8617_v45  ;;  %v829_v1 = vshra.s32 %v8619_v54, 16 }
 0x1d3   : > { %v656_v3 = vsel %vm624_vm2, %v8511_v62, 256  ;;  %v657_v6 = vsel %vm625_vm3, %v8514_v0, 256 }
 0x1d4   : > { %v8627_v8 = vcvt.s32.f32 %v829_v1  ;;  %vm842_vm4 = vcmp.lt.s32.totalorder %v656_v3, %v657_v6 }
 0x1d5   : > { %v592_v16 = vpop.xlane.xlu0 %591  ;;  %v8629_v26 = vsel %vm842_vm4, %v656_v3, %v657_v6 }
 0x1d6   : > { %vm626_vm5 = vcmp.eq.f32.partialorder %v8479_v30, %v592_v16  ;;  %vm627_vm6 = vcmp.eq.f32.partialorder %v8482_v34, %v592_v16  ;;  %832 = vmin.xlane.f32.xlu0 %v8627_v8  ;;  %v845_v27 = vshra.s32 %v8629_v26, 16 }
 0x1d7   : > { %v658_v37 = vsel %vm626_vm5, %v8511_v62, 256  ;;  %v659_v49 = vsel %vm627_vm6, %v8514_v0, 256 }
 0x1d8   : > { %v8637_v25 = vcvt.s32.f32 %v845_v27  ;;  %vm858_vm7 = vcmp.lt.s32.totalorder %v658_v37, %v659_v49 }
 0x1d9   : > { %v595_v1 = vpop.xlane.xlu1 %594  ;;  %v8639_v22 = vsel %vm858_vm7, %v658_v37, %v659_v49 }
 0x1da   : > { %vm628_vm8 = vcmp.eq.f32.partialorder %v8487_v39, %v595_v1  ;;  %vm629_vm9 = vcmp.eq.f32.partialorder %v8490_v42, %v595_v1  ;;  %848 = vmin.xlane.f32.xlu1 %v8637_v25  ;;  %v861_v3 = vshra.s32 %v8639_v22, 16 }
 0x1db   : > { %v660_v6 = vsel %vm628_vm8, %v8511_v62, 256  ;;  %v661_v16 = vsel %vm629_vm9, %v8514_v0, 256 }
 0x1dc   : > { %v8647_v34 = vcvt.s32.f32 %v861_v3  ;;  %vm874_vm10 = vcmp.lt.s32.totalorder %v660_v6, %v661_v16 }
 0x1dd   : > { %v598_v27 = vpop.xlane.xlu0 %597  ;;  %v8649_v30 = vsel %vm874_vm10, %v660_v6, %v661_v16 }
 0x1de   : > { %vm630_vm11 = vcmp.eq.f32.partialorder %v8495_v47, %v598_v27  ;;  %vm631_vm12 = vcmp.eq.f32.partialorder %v8498_v50, %v598_v27  ;;  %864 = vmin.xlane.f32.xlu0 %v8647_v34  ;;  %v877_v37 = vshra.s32 %v8649_v30, 16  ;;  %v8198_v47 = vmov 0.0|0.0  }
 0x1df   : > { %v662_v49 = vsel %vm630_vm11, %v8511_v62, 256  ;;  %v663_v1 = vsel %vm631_vm12, %v8514_v0, 256  ;;  %7812 = vmatprep.subr.bf16.mxu0 %v8198_v47  ;;  %7860 = vmatprep.subr.bf16.mxu1 %v8198_v47 }
 0x1e0   : > { %v8657_v42 = vcvt.s32.f32 %v877_v37  ;;  %vm890_vm13 = vcmp.lt.s32.totalorder %v662_v49, %v663_v1 }
 0x1e1   : > { %v601_v3 = vpop.xlane.xlu1 %600  ;;  %v8659_v39 = vsel %vm890_vm13, %v662_v49, %v663_v1 }
 0x1e2   : > { %vm632_vm14 = vcmp.eq.f32.partialorder %v8503_v55, %v601_v3  ;;  %vm633_vm15 = vcmp.eq.f32.partialorder %v8506_v59, %v601_v3  ;;  %880 = vmin.xlane.f32.xlu1 %v8657_v42  ;;  %v893_v6 = vshra.s32 %v8659_v39, 16  ;;  %v5776_v3 = vld [vmem:[#allocation3] sm:$0xff]  ;;  %v5777_v59 = vld [vmem:[#allocation3 + $0x8] sm:$0xff]  ;;  %v5778_v55 = vld [vmem:[#allocation3 + $0x10] sm:$0xff] }
 0x1e3   : > { %v664_v16 = vsel %vm632_vm14, %v8511_v62, 256  ;;  %v665_v27 = vsel %vm633_vm15, %v8514_v0, 256  ;;  %v7813_v19 = vpack.c.bf16 %v5777_v59, %v5776_v3  ;;  %v7822_v59 = vpack.c.bf16 %v5783_v12, %v5782_v14  ;;  %v5788_v12 = vld [vmem:[#allocation3 + $0x60] sm:$0xff]  ;;  %v5789_v14 = vld [vmem:[#allocation3 + $0x68] sm:$0xff] }
 0x1e4   : > { %v8667_v50 = vcvt.s32.f32 %v893_v6  ;;  %vm906_vm0 = vcmp.lt.s32.totalorder %v664_v16, %v665_v27  ;;  %v5779_v6 = vld [vmem:[#allocation3 + $0x18] sm:$0xff] }
 0x1e5   : > { %v8669_v37 = vsel %vm906_vm0, %v664_v16, %v665_v27  ;;  %7814 = vmatpush1.bf16.msra.mxu0 %v7813_v19  ;;  %v7816_v16 = vpack.c.bf16 %v5779_v6, %v5778_v55  ;;  %7876 = vmatpush1.bf16.msra.mxu1 %v7813_v19  ;;  %v5780_v27 = vld [vmem:[#allocation3 + $0x20] sm:$0xff]  ;;  %v5785_v55 = vld [vmem:[#allocation3 + $0x48] sm:$0xff]  ;;  %v5786_v6 = vld [vmem:[#allocation3 + $0x50] sm:$0xff] }
 0x1e6   : > { %896 = vmin.xlane.f32.xlu0 %v8667_v50  ;;  %v909_v49 = vshra.s32 %v8669_v37, 16  ;;  %7815 = vmatprep.subr.bf16.mxu0 %v8198_v47  ;;  %v5784_v19 = vld [vmem:[#allocation3 + $0x40] sm:$0xff] }
 0x1e7   : > { %7861 = vmatprep.subr.bf16.mxu1 %v8198_v47  ;;  %v7825_v3 = vpack.c.bf16 %v5785_v55, %v5784_v19  ;;  %v5792_v55 = vld [vmem:[#allocation3 + $0x80] sm:$0xff] }
 0x1e8   : > { %v8673_v1 = vcvt.s32.f32 %v909_v49  ;;  %v5781_v49 = vld [vmem:[#allocation3 + $0x28] sm:$0xff] }
 0x1e9   : > { %7817 = vmatpush1.bf16.msra.mxu0 %v7816_v16  ;;  %v7819_v17 = vpack.c.bf16 %v5781_v49, %v5780_v27  ;;  %7877 = vmatpush1.bf16.msra.mxu1 %v7816_v16  ;;  %v5787_v16 = vld [vmem:[#allocation3 + $0x58] sm:$0xff]  ;;  %v5790_v49 = vld [vmem:[#allocation3 + $0x70] sm:$0xff] }
 0x1ea   : > { %912 = vmin.xlane.f32.xlu1 %v8673_v1  ;;  %7818 = vmatprep.subr.bf16.mxu0 %v8198_v47  ;;  %v7828_v27 = vpack.c.bf16 %v5787_v16, %v5786_v6  ;;  %v5794_v16 = vld [vmem:[#allocation3 + $0x90] sm:$0xff] }
 0x1eb   : > { %7862 = vmatprep.subr.bf16.mxu1 %v8198_v47 }
 0x1ed   : > { %7820 = vmatpush1.bf16.msra.mxu0 %v7819_v17  ;;  %7878 = vmatpush1.bf16.msra.mxu1 %v7819_v17  ;;  %v7831_v17 = vpack.c.bf16 %v5789_v14, %v5788_v12  ;;  %v5796_v14 = vld [vmem:[#allocation3 + $0xa0] sm:$0xff] }
 0x1ee   : > { %7821 = vmatprep.subr.bf16.mxu0 %v8198_v47  ;;  %7863 = vmatprep.subr.bf16.mxu1 %v8198_v47 }
 0x1f1   : > { %7823 = vmatpush1.bf16.msra.mxu0 %v7822_v59  ;;  %7879 = vmatpush1.bf16.msra.mxu1 %v7822_v59  ;;  %v5791_v59 = vld [vmem:[#allocation3 + $0x78] sm:$0xff] }
 0x1f2   : > { %7824 = vmatprep.subr.bf16.mxu0 %v8198_v47  ;;  %7864 = vmatprep.subr.bf16.mxu1 %v8198_v47  ;;  %v7834_v19 = vpack.c.bf16 %v5791_v59, %v5790_v49  ;;  %v5798_v59 = vld [vmem:[#allocation3 + $0xb0] sm:$0xff] }
 0x1f5   : > { %7826 = vmatpush1.bf16.msra.mxu0 %v7825_v3  ;;  %7880 = vmatpush1.bf16.msra.mxu1 %v7825_v3  ;;  %v5793_v3 = vld [vmem:[#allocation3 + $0x88] sm:$0xff] }
 0x1f6   : > { %7827 = vmatprep.subr.bf16.mxu0 %v8198_v47  ;;  %7865 = vmatprep.subr.bf16.mxu1 %v8198_v47  ;;  %v7837_v6 = vpack.c.bf16 %v5793_v3, %v5792_v55  ;;  %v5800_v3 = vld [vmem:[#allocation3 + $0xc0] sm:$0xff] }
 0x1f9   : > { %7829 = vmatpush1.bf16.msra.mxu0 %v7828_v27  ;;  %7881 = vmatpush1.bf16.msra.mxu1 %v7828_v27  ;;  %v5795_v27 = vld [vmem:[#allocation3 + $0x98] sm:$0xff] }
 0x1fa   : > { %7830 = vmatprep.subr.bf16.mxu0 %v8198_v47  ;;  %7866 = vmatprep.subr.bf16.mxu1 %v8198_v47  ;;  %v7840_v12 = vpack.c.bf16 %v5795_v27, %v5794_v16  ;;  %v5802_v27 = vld [vmem:[#allocation3 + $0xd0] sm:$0xff] }
 0x1fd   : > { %7832 = vmatpush1.bf16.msra.mxu0 %v7831_v17  ;;  %7882 = vmatpush1.bf16.msra.mxu1 %v7831_v17  ;;  %v5797_v17 = vld [vmem:[#allocation3 + $0xa8] sm:$0xff] }
 0x1fe   : > { %7833 = vmatprep.subr.bf16.mxu0 %v8198_v47  ;;  %7867 = vmatprep.subr.bf16.mxu1 %v8198_v47  ;;  %v7843_v49 = vpack.c.bf16 %v5797_v17, %v5796_v14  ;;  %v5804_v17 = vld [vmem:[#allocation3 + $0xe0] sm:$0xff] }
 0x201   : > { %7835 = vmatpush1.bf16.msra.mxu0 %v7834_v19  ;;  %7883 = vmatpush1.bf16.msra.mxu1 %v7834_v19  ;;  %v5799_v19 = vld [vmem:[#allocation3 + $0xb8] sm:$0xff] }
 0x202   : > { %7836 = vmatprep.subr.bf16.mxu0 %v8198_v47  ;;  %7868 = vmatprep.subr.bf16.mxu1 %v8198_v47  ;;  %v7846_v55 = vpack.c.bf16 %v5799_v19, %v5798_v59  ;;  %v668_v19 = vand.u32 65535, %v8520_v5 }
 0x205   : > { %7838 = vmatpush1.bf16.msra.mxu0 %v7837_v6  ;;  %7884 = vmatpush1.bf16.msra.mxu1 %v7837_v6  ;;  %v5801_v6 = vld [vmem:[#allocation3 + $0xc8] sm:$0xff] }
 0x206   : > { %7839 = vmatprep.subr.bf16.mxu0 %v8198_v47  ;;  %7869 = vmatprep.subr.bf16.mxu1 %v8198_v47  ;;  %v7849_v16 = vpack.c.bf16 %v5801_v6, %v5800_v3  ;;  %v670_v3 = vcvt.s32.f32 %v668_v19  ;;  %v684_v6 = vand.u32 65535, %v8529_v13  ;;  %v716_v13 = vand.u32 65535, %v8549_v40 }
 0x207   : > { %v748_v40 = vand.u32 65535, %v8569_v23 }
 0x209   : > { %7841 = vmatpush1.bf16.msra.mxu0 %v7840_v12  ;;  %7885 = vmatpush1.bf16.msra.mxu1 %v7840_v12  ;;  %v5803_v12 = vld [vmem:[#allocation3 + $0xd8] sm:$0xff] }
 0x20a   : > { %7842 = vmatprep.subr.bf16.mxu0 %v8198_v47  ;;  %7870 = vmatprep.subr.bf16.mxu1 %v8198_v47  ;;  %v7852_v14 = vpack.c.bf16 %v5803_v12, %v5802_v27  ;;  %v686_v12 = vcvt.s32.f32 %v684_v6  ;;  %v5807_v6 = vld [vmem:[#allocation3 + $0xf8] sm:$0xff] }
 0x20d   : > { %7844 = vmatpush1.bf16.msra.mxu0 %v7843_v49  ;;  %7886 = vmatpush1.bf16.msra.mxu1 %v7843_v49  ;;  %v5805_v49 = vld [vmem:[#allocation3 + $0xe8] sm:$0xff] }
 0x20e   : > { %7845 = vmatprep.subr.bf16.mxu0 %v8198_v47  ;;  %7871 = vmatprep.subr.bf16.mxu1 %v8198_v47  ;;  %v7855_v59 = vpack.c.bf16 %v5805_v49, %v5804_v17 }
 0x211   : > { %7847 = vmatpush1.bf16.msra.mxu0 %v7846_v55  ;;  %7887 = vmatpush1.bf16.msra.mxu1 %v7846_v55 }
 0x212   : > { %7848 = vmatprep.subr.bf16.mxu0 %v8198_v47  ;;  %7872 = vmatprep.subr.bf16.mxu1 %v8198_v47 }
 0x215   : > { %7850 = vmatpush1.bf16.msra.mxu0 %v7849_v16  ;;  %7888 = vmatpush1.bf16.msra.mxu1 %v7849_v16 }
 0x216   : > { %7851 = vmatprep.subr.bf16.mxu0 %v8198_v47  ;;  %7873 = vmatprep.subr.bf16.mxu1 %v8198_v47 }
 0x219   : > { %7853 = vmatpush1.bf16.msra.mxu0 %v7852_v14  ;;  %7889 = vmatpush1.bf16.msra.mxu1 %v7852_v14  ;;  %v700_v14 = vand.u32 65535, %v8539_v24  ;;  %v732_v24 = vand.u32 65535, %v8559_v57  ;;  %v750_v57 = vcvt.s32.f32 %v748_v40 }
 0x21a   : > { %7854 = vmatprep.subr.bf16.mxu0 %v8198_v47  ;;  %7874 = vmatprep.subr.bf16.mxu1 %v8198_v47 }
 0x21b   : > { %v702_v17 = vcvt.s32.f32 %v700_v14 }
 0x21d   : > { %7856 = vmatpush1.bf16.msra.mxu0 %v7855_v59  ;;  %7890 = vmatpush1.bf16.msra.mxu1 %v7855_v59  ;;  %v718_v59 = vcvt.s32.f32 %v716_v13 }
 0x21e   : > { %7857 = vmatprep.subr.bf16.mxu0 %v8198_v47  ;;  %7875 = vmatprep.subr.bf16.mxu1 %v8198_v47 }
 0x23b   : > { %v8709_v55 = vpop.xlane.xlu0 %672 }
 0x23c   : > { %vm674_vm1 = vcmp.eq.f32.partialorder %v8527_v10, %v8709_v55 }
 0x23d   : > { %v675_v16 = vsel %vm674_vm1, %v670_v3, inf  ;;  %v734_v3 = vcvt.s32.f32 %v732_v24 }
 0x23e   : > { %676 = vmin.xlane.f32.xlu0 %v675_v16 }
 0x23f   : > { %v8714_v27 = vpop.xlane.xlu1 %688 }
 0x240   : > { %vm690_vm2 = vcmp.eq.f32.partialorder %v8537_v20, %v8714_v27 }
 0x241   : > { %v691_v47 = vsel %vm690_vm2, %v686_v12, inf }
 0x242   : > { %692 = vmin.xlane.f32.xlu1 %v691_v47 }
 0x243   : > { %v8719_v5 = vpop.xlane.xlu0 %704 }
 0x244   : > { %vm706_vm3 = vcmp.eq.f32.partialorder %v8547_v35, %v8719_v5  ;;  %v5806_v35 = vld [vmem:[#allocation3 + $0xf0] sm:$0xff] }
 0x245   : > { %v707_v10 = vsel %vm706_vm3, %v702_v17, inf  ;;  %v7858_v12 = vpack.c.bf16 %v5807_v6, %v5806_v35  ;;  %v780_v17 = vand.u32 65535, %v8589_v44  ;;  %v812_v44 = vand.u32 65535, %v8609_v21 }
 0x246   : > { %708 = vmin.xlane.f32.xlu0 %v707_v10  ;;  %v844_v21 = vand.u32 65535, %v8629_v26  ;;  %v876_v26 = vand.u32 65535, %v8649_v30  ;;  %v908_v30 = vand.u32 65535, %v8669_v37 }
 0x247   : > { %v8724_v49 = vpop.xlane.xlu1 %720  ;;  %7859 = vmatpush1.bf16.msra.mxu0 %v7858_v12  ;;  %7891 = vmatpush1.bf16.msra.mxu1 %v7858_v12  ;;  %v814_v40 = vcvt.s32.f32 %v812_v44  ;;  %v695_v44 = vcvt.f32.s32 %v8714_v27 }
 0x248   : > { %vm722_vm4 = vcmp.eq.f32.partialorder %v8557_v52, %v8724_v49  ;;  %v764_v52 = vand.u32 65535, %v8579_v18  ;;  %v782_v18 = vcvt.s32.f32 %v780_v17  ;;  %v846_v12 = vcvt.s32.f32 %v844_v21 }
 0x249   : > { %v723_v20 = vsel %vm722_vm4, %v718_v59, inf  ;;  %v796_v59 = vand.u32 65535, %v8599_v28  ;;  %v828_v28 = vand.u32 65535, %v8619_v54  ;;  %v860_v54 = vand.u32 65535, %v8639_v22 }
 0x24a   : > { %724 = vmin.xlane.f32.xlu1 %v723_v20  ;;  %v892_v22 = vand.u32 65535, %v8659_v39 }
 0x24b   : > { %v8729_v19 = vpop.xlane.xlu0 %736  ;;  %v798_v20 = vcvt.s32.f32 %v796_v59  ;;  %v830_v6 = vcvt.s32.f32 %v828_v28  ;;  %v910_v59 = vcvt.s32.f32 %v908_v30  ;;  %v696_v28 = vshll.u32 %v695_v44, 16 }
 0x24c   : > { %vm738_vm5 = vcmp.eq.f32.partialorder %v8567_v29, %v8729_v19  ;;  %v766_v29 = vcvt.s32.f32 %v764_v52  ;;  %v862_v52 = vcvt.s32.f32 %v860_v54 }
 0x24d   : > { %v739_v16 = vsel %vm738_vm5, %v734_v3, inf }
 0x24e   : > { %740 = vmin.xlane.f32.xlu0 %v739_v16 }
 0x24f   : > { %v8734_v14 = vpop.xlane.xlu1 %752 }
 0x250   : > { %vm754_vm6 = vcmp.eq.f32.partialorder %v8577_v15, %v8734_v14  ;;  %v759_v30 = vcvt.f32.s32 %v8734_v14 }
 0x251   : > { %v755_v47 = vsel %vm754_vm6, %v750_v57, inf }
 0x252   : > { %756 = vmin.xlane.f32.xlu1 %v755_v47 }
 0x253   : > { %v8739_v23 = vpop.xlane.xlu0 %768 }
 0x254   : > { %vm770_vm7 = vcmp.eq.f32.partialorder %v8587_v32, %v8739_v23 }
 0x255   : > { %v771_v13 = vsel %vm770_vm7, %v766_v29, inf  ;;  %v878_v29 = vcvt.s32.f32 %v876_v26 }
 0x256   : > { %772 = vmin.xlane.f32.xlu0 %v771_v13  ;;  %v894_v13 = vcvt.s32.f32 %v892_v22 }
 0x257   : > { %v8744_v10 = vpop.xlane.xlu1 %784 }
 0x258   : > { %vm786_vm8 = vcmp.eq.f32.partialorder %v8597_v60, %v8744_v10 }
 0x259   : > { %v787_v15 = vsel %vm786_vm8, %v782_v18, inf }
 0x25a   : > { %788 = vmin.xlane.f32.xlu1 %v787_v15 }
 0x25b   : > { %v8749_v24 = vpop.xlane.xlu0 %800 }
 0x25c   : > { %vm802_vm9 = vcmp.eq.f32.partialorder %v8607_v11, %v8749_v24 }
 0x25d   : > { %v803_v32 = vsel %vm802_vm9, %v798_v20, inf }
 0x25e   : > { %804 = vmin.xlane.f32.xlu0 %v803_v32 }
 0x25f   : > { %v8754_v3 = vpop.xlane.xlu1 %816 }
 0x260   : > { %vm818_vm10 = vcmp.eq.f32.partialorder %v8617_v45, %v8754_v3 }
 0x261   : > { %v819_v60 = vsel %vm818_vm10, %v814_v40, inf }
 0x262   : > { %820 = vmin.xlane.f32.xlu1 %v819_v60 }
 0x263   : > { %v8759_v35 = vpop.xlane.xlu0 %832 }
 0x264   : > { %vm834_vm11 = vcmp.eq.f32.partialorder %v8627_v8, %v8759_v35 }
 0x265   : > { %v835_v11 = vsel %vm834_vm11, %v830_v6, inf }
 0x266   : > { %836 = vmin.xlane.f32.xlu0 %v835_v11 }
 0x267   : > { %v8764_v16 = vpop.xlane.xlu1 %848 }
 0x268   : > { %vm850_vm12 = vcmp.eq.f32.partialorder %v8637_v25, %v8764_v16 }
 0x269   : > { %v851_v45 = vsel %vm850_vm12, %v846_v12, inf  ;;  %v727_v12 = vcvt.f32.s32 %v8724_v49 }
 0x26a   : > { %852 = vmin.xlane.f32.xlu1 %v851_v45 }
 0x26b   : > { %v8769_v57 = vpop.xlane.xlu0 %864 }
 0x26c   : > { %vm866_vm13 = vcmp.eq.f32.partialorder %v8647_v34, %v8769_v57 }
 0x26d   : > { %v867_v8 = vsel %vm866_vm13, %v862_v52, inf  ;;  %v743_v52 = vcvt.f32.s32 %v8729_v19 }
 0x26e   : > { %868 = vmin.xlane.f32.xlu0 %v867_v8  ;;  %v728_v8 = vshll.u32 %v727_v12, 16 }
 0x26f   : > { %v8774_v47 = vpop.xlane.xlu1 %880 }
 0x270   : > { %vm882_vm14 = vcmp.eq.f32.partialorder %v8657_v42, %v8774_v47  ;;  %v679_v42 = vcvt.f32.s32 %v8709_v55 }
 0x271   : > { %v883_v25 = vsel %vm882_vm14, %v878_v29, inf }
 0x272   : > { %884 = vmin.xlane.f32.xlu1 %v883_v25  ;;  %v680_v20 = vshll.u32 %v679_v42, 16  ;;  %v744_v25 = vshll.u32 %v743_v52, 16 }
 0x273   : > { %v8779_v17 = vpop.xlane.xlu0 %896 }
 0x274   : > { %vm898_vm15 = vcmp.eq.f32.partialorder %v8667_v50, %v8779_v17  ;;  %v711_v50 = vcvt.f32.s32 %v8719_v5 }
 0x275   : > { %v899_v34 = vsel %vm898_vm15, %v894_v13, inf }
 0x276   : > { %900 = vmin.xlane.f32.xlu0 %v899_v34  ;;  %v712_v21 = vshll.u32 %v711_v50, 16 }
 0x277   : > { %v8784_v18 = vpop.xlane.xlu1 %912 }
 0x278   : > { %vm914_vm0 = vcmp.eq.f32.partialorder %v8673_v1, %v8784_v18  ;;  %v13908_v1 = vmov 1.0  }
 0x279   : > { %v915_v39 = vsel %vm914_vm0, %v910_v59, inf }
 0x27a   : > { %916 = vmin.xlane.f32.xlu1 %v915_v39  ;;  %v775_v39 = vcvt.f32.s32 %v8739_v23 }
 0x2cb   : > { %v677_v15 = vpop.xlane.xlu0 %676 }
 0x2cc   : > { %v678_v37 = vcvt.f32.s32 %v677_v15  ;;  %v760_v15 = vshll.u32 %v759_v30, 16 }
 0x2ce   : > { %v8790_v32 = vadd.s32 %v680_v20, %v678_v37  ;;  %v776_v37 = vshll.u32 %v775_v39, 16 }
 0x2cf   : > { %v693_v40 = vpop.xlane.xlu1 %692 }
 0x2d0   : > { %vm922_vm1 = vcmp.eq.s32.totalorder %v8511_v62, %v8790_v32  ;;  %v694_v60 = vcvt.f32.s32 %v693_v40  ;;  %vm923_vm2 = vcmp.eq.s32.totalorder %v8514_v0, %v8790_v32  ;;  %v791_v40 = vcvt.f32.s32 %v8744_v10 }
 0x2d1   : > { %7520 = vmatprep.mubr.msk.f32.mxu0 %vm923_vm2, %v13908_v1  ;;  %v8799_v55 = vsel %vm922_vm1, -inf, %v8383_v31  ;;  %v8802_v27 = vsel %vm923_vm2, -inf, %v8386_v33 }
 0x2d2   : > { %v8804_v6 = vadd.s32 %v696_v28, %v694_v60  ;;  %7521 = vmatmul.mubr.msk.f32.vlgmr.msra.gmra.mrb[32].mxu0 %vm922_vm1, %v13908_v1  ;;  %v1104_v5 = vmax.f32 %v8799_v55, %v8802_v27 }
 0x2d3   : > { %v709_v11 = vpop.xlane.xlu0 %708 }
 0x2d4   : > { %v710_v54 = vcvt.f32.s32 %v709_v11  ;;  %1105 = vmax.xlane.f32.xlu0 %v1104_v5  ;;  %vm925_vm3 = vcmp.eq.s32.totalorder %v8514_v0, %v8804_v6  ;;  %vm924_vm4 = vcmp.eq.s32.totalorder %v8511_v62, %v8804_v6  ;;  %v807_v5 = vcvt.f32.s32 %v8749_v24 }
 0x2d5   : > { %7522 = vmatprep.mubr.msk.f32.mxu0 %vm925_vm3, %v13908_v1  ;;  %v8816_v31 = vsel %vm924_vm4, -inf, %v8391_v36  ;;  %v8819_v33 = vsel %vm925_vm3, -inf, %v8394_v38  ;;  %v792_v11 = vshll.u32 %v791_v40, 16 }
 0x2d6   : > { %v8821_v45 = vadd.s32 %v712_v21, %v710_v54  ;;  %7523 = vmatmul.mubr.msk.f32.gmra.mrb[34].mxu0 %vm924_vm4, %v13908_v1  ;;  %v1107_v49 = vmax.f32 %v8816_v31, %v8819_v33 }
 0x2d7   : > { %v725_v26 = vpop.xlane.xlu1 %724 }
 0x2d8   : > { %v726_v29 = vcvt.f32.s32 %v725_v26  ;;  %1108 = vmax.xlane.f32.xlu1 %v1107_v49  ;;  %vm927_vm5 = vcmp.eq.s32.totalorder %v8514_v0, %v8821_v45  ;;  %vm926_vm6 = vcmp.eq.s32.totalorder %v8511_v62, %v8821_v45  ;;  %v808_v49 = vshll.u32 %v807_v5, 16  ;;  %v14175_v5 = vld [vmem:[#allocation14_spill] sm:$0xff] }
 0x2d9   : > { %7524 = vmatprep.mubr.msk.f32.mxu0 %vm927_vm5, %v13908_v1  ;;  %v8833_v36 = vsel %vm926_vm6, -inf, %v8399_v41  ;;  %v8836_v38 = vsel %vm927_vm5, -inf, %v8402_v43  ;;  %v823_v26 = vcvt.f32.s32 %v8754_v3 }
 0x2da   : > { %v8838_v22 = vadd.s32 %v728_v8, %v726_v29  ;;  %7525 = vmatmul.mubr.msk.f32.gmra.mrb[36].mxu0 %vm926_vm6, %v13908_v1  ;;  %v1110_v19 = vmax.f32 %v8833_v36, %v8836_v38 }
 0x2db   : > { %v741_v13 = vpop.xlane.xlu0 %740 }
 0x2dc   : > { %v742_v34 = vcvt.f32.s32 %v741_v13  ;;  %1111 = vmax.xlane.f32.xlu0 %v1110_v19  ;;  %vm929_vm7 = vcmp.eq.s32.totalorder %v8514_v0, %v8838_v22  ;;  %vm928_vm8 = vcmp.eq.s32.totalorder %v8511_v62, %v8838_v22  ;;  %v839_v19 = vcvt.f32.s32 %v8759_v35 }
 0x2dd   : > { %7526 = vmatprep.mubr.msk.f32.mxu0 %vm929_vm7, %v13908_v1  ;;  %v8850_v41 = vsel %vm928_vm8, -inf, %v8407_v46  ;;  %v8853_v43 = vsel %vm929_vm7, -inf, %v8410_v48  ;;  %v824_v13 = vshll.u32 %v823_v26, 16  ;;  %v887_v26 = vcvt.f32.s32 %v8774_v47 }
 0x2de   : > { %v8855_v59 = vadd.s32 %v744_v25, %v742_v34  ;;  %7527 = vmatmul.mubr.msk.f32.gmra.mrb[38].mxu0 %vm928_vm8, %v13908_v1  ;;  %v1113_v14 = vmax.f32 %v8850_v41, %v8853_v43 }
 0x2df   : > { %v757_v42 = vpop.xlane.xlu1 %756 }
 0x2e0   : > { %14154 = vst [vmem:[#allocation26_spill] sm:$0xff] %v8855_v59  ;;  %v758_v20 = vcvt.f32.s32 %v757_v42  ;;  %1114 = vmax.xlane.f32.xlu1 %v1113_v14  ;;  %vm931_vm9 = vcmp.eq.s32.totalorder %v8514_v0, %v8855_v59  ;;  %vm930_vm10 = vcmp.eq.s32.totalorder %v8511_v62, %v8855_v59  ;;  %v840_v14 = vshll.u32 %v839_v19, 16 }
 0x2e1   : > { %7528 = vmatprep.mubr.msk.f32.mxu0 %vm931_vm9, %v13908_v1  ;;  %v8867_v46 = vsel %vm930_vm10, -inf, %v8415_v51  ;;  %v8870_v48 = vsel %vm931_vm9, -inf, %v8418_v53  ;;  %v855_v42 = vcvt.f32.s32 %v8764_v16 }
 0x2e2   : > { %14155 = vst [vmem:[#allocation27_spill] sm:$0xff] %v8867_v46  ;;  %14156 = vst [vmem:[#allocation28_spill] sm:$0xff] %v8870_v48  ;;  %v8872_v44 = vadd.s32 %v760_v15, %v758_v20  ;;  %7529 = vmatmul.mubr.msk.f32.gmra.mrb[40].mxu0 %vm930_vm10, %v13908_v1  ;;  %v1116_v23 = vmax.f32 %v8867_v46, %v8870_v48  ;;  %v14172_v20 = vld [vmem:[#allocation13_spill] sm:$0xff] }
 0x2e3   : > { %v773_v50 = vpop.xlane.xlu0 %772 }
 0x2e4   : > { %14157 = vst [vmem:[#allocation29_spill] sm:$0xff] %v8872_v44  ;;  %v774_v28 = vcvt.f32.s32 %v773_v50  ;;  %1117 = vmax.xlane.f32.xlu0 %v1116_v23  ;;  %vm933_vm11 = vcmp.eq.s32.totalorder %v8514_v0, %v8872_v44  ;;  %vm932_vm12 = vcmp.eq.s32.totalorder %v8511_v62, %v8872_v44  ;;  %v871_v50 = vcvt.f32.s32 %v8769_v57 }
 0x2e5   : > { %7530 = vmatprep.mubr.msk.f32.mxu0 %vm933_vm11, %v13908_v1  ;;  %v8884_v51 = vsel %vm932_vm12, -inf, %v8423_v56  ;;  %v8887_v53 = vsel %vm933_vm11, -inf, %v8426_v58 }
 0x2e6   : > { %14158 = vst [vmem:[#allocation30_spill] sm:$0xff] %v8884_v51  ;;  %14159 = vst [vmem:[#allocation31_spill] sm:$0xff] %v8887_v53  ;;  %v8889_v60 = vadd.s32 %v776_v37, %v774_v28  ;;  %7531 = vmatmul.mubr.msk.f32.gmra.mrb[42].mxu0 %vm932_vm12, %v13908_v1  ;;  %v1119_v10 = vmax.f32 %v8884_v51, %v8887_v53  ;;  %v856_v28 = vshll.u32 %v855_v42, 16 }
 0x2e7   : > { %v789_v21 = vpop.xlane.xlu1 %788 }
 0x2e8   : > { %14160 = vst [vmem:[#allocation32_spill] sm:$0xff] %v8889_v60  ;;  %v790_v12 = vcvt.f32.s32 %v789_v21  ;;  %1120 = vmax.xlane.f32.xlu1 %v1119_v10  ;;  %vm935_vm13 = vcmp.eq.s32.totalorder %v8514_v0, %v8889_v60  ;;  %vm934_vm14 = vcmp.eq.s32.totalorder %v8511_v62, %v8889_v60 }
 0x2e9   : > { %7532 = vmatprep.mubr.msk.f32.mxu0 %vm935_vm13, %v13908_v1  ;;  %v8901_v56 = vsel %vm934_vm14, -inf, %v8431_v61  ;;  %v8904_v58 = vsel %vm935_vm13, -inf, %v8434_v63 }
 0x2ea   : > { %14161 = vst [vmem:[#allocation33_spill] sm:$0xff] %v8901_v56  ;;  %14162 = vst [vmem:[#allocation34_spill] sm:$0xff] %v8904_v58  ;;  %v8906_v54 = vadd.s32 %v792_v11, %v790_v12  ;;  %7533 = vmatmul.mubr.msk.f32.gmra.mrb[44].mxu0 %vm934_vm14, %v13908_v1  ;;  %v1122_v24 = vmax.f32 %v8901_v56, %v8904_v58  ;;  %v14177_v11 = vld [vmem:[#allocation15_spill] sm:$0xff] }
 0x2eb   : > { %v805_v52 = vpop.xlane.xlu0 %804 }
 0x2ec   : > { %14163 = vst [vmem:[#allocation35_spill] sm:$0xff] %v8906_v54  ;;  %v806_v8 = vcvt.f32.s32 %v805_v52  ;;  %1123 = vmax.xlane.f32.xlu0 %v1122_v24  ;;  %vm937_vm15 = vcmp.eq.s32.totalorder %v8514_v0, %v8906_v54  ;;  %vm936_vm0 = vcmp.eq.s32.totalorder %v8511_v62, %v8906_v54 }
 0x2ed   : > { %7534 = vmatprep.mubr.msk.f32.mxu0 %vm937_vm15, %v13908_v1  ;;  %v8918_v61 = vsel %vm936_vm0, -inf, %v8439_v2  ;;  %v8921_v63 = vsel %vm937_vm15, -inf, %v8442_v4 }
 0x2ee   : > { %14164 = vst [vmem:[#allocation36_spill] sm:$0xff] %v8918_v61  ;;  %14165 = vst [vmem:[#allocation37_spill] sm:$0xff] %v8921_v63  ;;  %v8923_v29 = vadd.s32 %v808_v49, %v806_v8  ;;  %7535 = vmatmul.mubr.msk.f32.gmra.mrb[46].mxu0 %vm936_vm0, %v13908_v1  ;;  %v1125_v3 = vmax.f32 %v8918_v61, %v8921_v63  ;;  %v872_v49 = vshll.u32 %v871_v50, 16 }
 0x2ef   : > { %v821_v25 = vpop.xlane.xlu1 %820 }
 0x2f0   : > { %14166 = vst [vmem:[#allocation38_spill] sm:$0xff] %v8923_v29  ;;  %v822_v30 = vcvt.f32.s32 %v821_v25  ;;  %1126 = vmax.xlane.f32.xlu1 %v1125_v3  ;;  %vm939_vm1 = vcmp.eq.s32.totalorder %v8514_v0, %v8923_v29  ;;  %vm938_vm2 = vcmp.eq.s32.totalorder %v8511_v62, %v8923_v29  ;;  %v14180_v3 = vld [vmem:[#allocation16_spill] sm:$0xff]  ;;  %v14182_v25 = vld [vmem:[#allocation17_spill] sm:$0xff] }
 0x2f1   : > { %7536 = vmatprep.mubr.msk.f32.mxu0 %vm939_vm1, %v13908_v1  ;;  %v8935_v2 = vsel %vm938_vm2, -inf, %v8447_v7  ;;  %v8938_v4 = vsel %vm939_vm1, -inf, %v8450_v9  ;;  %v14170_v7 = vld [vmem:[#allocation12_spill] sm:$0xff] }
 0x2f2   : > { %14167 = vst [vmem:[#allocation39_spill] sm:$0xff] %v8935_v2  ;;  %14168 = vst [vmem:[#allocation40_spill] sm:$0xff] %v8938_v4  ;;  %v8940_v34 = vadd.s32 %v824_v13, %v822_v30  ;;  %7537 = vmatmul.mubr.msk.f32.gmra.mrb[48].mxu0 %vm938_vm2, %v13908_v1  ;;  %v1128_v35 = vmax.f32 %v8935_v2, %v8938_v4 }
 0x2f3   : > { %v837_v39 = vpop.xlane.xlu0 %836 }
 0x2f4   : > { %14169 = vst [vmem:[#allocation41_spill] sm:$0xff] %v8940_v34  ;;  %v838_v15 = vcvt.f32.s32 %v837_v39  ;;  %1129 = vmax.xlane.f32.xlu0 %v1128_v35  ;;  %vm941_vm3 = vcmp.eq.s32.totalorder %v8514_v0, %v8940_v34  ;;  %vm940_vm4 = vcmp.eq.s32.totalorder %v8511_v62, %v8940_v34  ;;  %v903_v35 = vcvt.f32.s32 %v8779_v17 }
 0x2f5   : > { %7538 = vmatprep.mubr.msk.f32.mxu0 %vm941_vm3, %v13908_v1  ;;  %v8952_v9 = vsel %vm940_vm4, -inf, %v14170_v7  ;;  %v8955_v23 = vsel %vm941_vm3, -inf, %v14172_v20  ;;  %v888_v39 = vshll.u32 %v887_v26, 16  ;;  %v14187_v20 = vld [vmem:[#allocation19_spill] sm:$0xff] }
 0x2f6   : > { %14171 = vst [vmem:[#allocation12_spill] sm:$0xff] %v8952_v9  ;;  %14173 = vst [vmem:[#allocation13_spill] sm:$0xff] %v8955_v23  ;;  %v8957_v37 = vadd.s32 %v840_v14, %v838_v15  ;;  %7539 = vmatmul.mubr.msk.f32.gmra.mrb[50].mxu0 %vm940_vm4, %v13908_v1  ;;  %v1131_v16 = vmax.f32 %v8952_v9, %v8955_v23  ;;  %v14185_v15 = vld [vmem:[#allocation18_spill] sm:$0xff] }
 0x2f7   : > { %v853_v40 = vpop.xlane.xlu1 %852 }
 0x2f8   : > { %14174 = vst [vmem:[#allocation42_spill] sm:$0xff] %v8957_v37  ;;  %v854_v10 = vcvt.f32.s32 %v853_v40  ;;  %1132 = vmax.xlane.f32.xlu1 %v1131_v16  ;;  %vm943_vm5 = vcmp.eq.s32.totalorder %v8514_v0, %v8957_v37  ;;  %vm942_vm6 = vcmp.eq.s32.totalorder %v8511_v62, %v8957_v37  ;;  %v904_v40 = vshll.u32 %v903_v35, 16 }
 0x2f9   : > { %7540 = vmatprep.mubr.msk.f32.mxu0 %vm943_vm5, %v13908_v1  ;;  %v8969_v21 = vsel %vm942_vm6, -inf, %v14175_v5  ;;  %v8972_v12 = vsel %vm943_vm5, -inf, %v14177_v11  ;;  %v14190_v11 = vld [vmem:[#allocation20_spill] sm:$0xff] }
 0x2fa   : > { %14176 = vst [vmem:[#allocation14_spill] sm:$0xff] %v8969_v21  ;;  %14178 = vst [vmem:[#allocation15_spill] sm:$0xff] %v8972_v12  ;;  %v8974_v24 = vadd.s32 %v856_v28, %v854_v10  ;;  %7541 = vmatmul.mubr.msk.f32.gmra.mrb[52].mxu0 %vm942_vm6, %v13908_v1  ;;  %v1134_v57 = vmax.f32 %v8969_v21, %v8972_v12  ;;  %v919_v10 = vcvt.f32.s32 %v8784_v18 }
 0x2fb   : > { %v869_v52 = vpop.xlane.xlu0 %868 }
 0x2fc   : > { %14179 = vst [vmem:[#allocation43_spill] sm:$0xff] %v8974_v24  ;;  %v870_v8 = vcvt.f32.s32 %v869_v52  ;;  %1135 = vmax.xlane.f32.xlu0 %v1134_v57  ;;  %vm945_vm7 = vcmp.eq.s32.totalorder %v8514_v0, %v8974_v24  ;;  %vm944_vm8 = vcmp.eq.s32.totalorder %v8511_v62, %v8974_v24 }
 0x2fd   : > { %7542 = vmatprep.mubr.msk.f32.mxu0 %vm945_vm7, %v13908_v1  ;;  %v8986_v19 = vsel %vm944_vm8, -inf, %v14180_v3  ;;  %v8989_v13 = vsel %vm945_vm7, -inf, %v14182_v25  ;;  %v920_v3 = vshll.u32 %v919_v10, 16 }
 0x2fe   : > { %14181 = vst [vmem:[#allocation16_spill] sm:$0xff] %v8986_v19  ;;  %14183 = vst [vmem:[#allocation17_spill] sm:$0xff] %v8989_v13  ;;  %v8991_v30 = vadd.s32 %v872_v49, %v870_v8  ;;  %7543 = vmatmul.mubr.msk.f32.gmra.mrb[54].mxu0 %vm944_vm8, %v13908_v1  ;;  %v1137_v47 = vmax.f32 %v8986_v19, %v8989_v13  ;;  %v14192_v49 = vld [vmem:[#allocation21_spill] sm:$0xff] }
 0x2ff   : > { %v885_v14 = vpop.xlane.xlu1 %884 }
 0x300   : > { %14184 = vst [vmem:[#allocation44_spill] sm:$0xff] %v8991_v30  ;;  %v886_v42 = vcvt.f32.s32 %v885_v14  ;;  %1138 = vmax.xlane.f32.xlu1 %v1137_v47  ;;  %vm947_vm9 = vcmp.eq.s32.totalorder %v8514_v0, %v8991_v30  ;;  %vm946_vm10 = vcmp.eq.s32.totalorder %v8511_v62, %v8991_v30  ;;  %v14195_v47 = vld [vmem:[#allocation22_spill] sm:$0xff]  ;;  %v14197_v14 = vld [vmem:[#allocation23_spill] sm:$0xff] }
 0x301   : > { %7544 = vmatprep.mubr.msk.f32.mxu0 %vm947_vm9, %v13908_v1  ;;  %v9003_v7 = vsel %vm946_vm10, -inf, %v14185_v15  ;;  %v9006_v16 = vsel %vm947_vm9, -inf, %v14187_v20  ;;  %v14200_v20 = vld [vmem:[#allocation24_spill] sm:$0xff] }
 0x302   : > { %14186 = vst [vmem:[#allocation18_spill] sm:$0xff] %v9003_v7  ;;  %14188 = vst [vmem:[#allocation19_spill] sm:$0xff] %v9006_v16  ;;  %v9008_v50 = vadd.s32 %v888_v39, %v886_v42  ;;  %7545 = vmatmul.mubr.msk.f32.gmra.mrb[56].mxu0 %vm946_vm10, %v13908_v1  ;;  %v1140_v17 = vmax.f32 %v9003_v7, %v9006_v16 }
 0x303   : > { %v901_v28 = vpop.xlane.xlu0 %900 }
 0x304   : > { %14189 = vst [vmem:[#allocation45_spill] sm:$0xff] %v9008_v50  ;;  %v902_v5 = vcvt.f32.s32 %v901_v28  ;;  %1141 = vmax.xlane.f32.xlu0 %v1140_v17  ;;  %vm949_vm11 = vcmp.eq.s32.totalorder %v8514_v0, %v9008_v50  ;;  %vm948_vm12 = vcmp.eq.s32.totalorder %v8511_v62, %v9008_v50 }
 0x305   : > { %7546 = vmatprep.mubr.msk.f32.mxu0 %vm949_vm11, %v13908_v1  ;;  %v9020_v57 = vsel %vm948_vm12, -inf, %v14190_v11  ;;  %v9023_v52 = vsel %vm949_vm11, -inf, %v14192_v49 }
 0x306   : > { %14191 = vst [vmem:[#allocation20_spill] sm:$0xff] %v9020_v57  ;;  %14193 = vst [vmem:[#allocation21_spill] sm:$0xff] %v9023_v52  ;;  %v9025_v26 = vadd.s32 %v904_v40, %v902_v5  ;;  %7547 = vmatmul.mubr.msk.f32.gmra.mrb[58].mxu0 %vm948_vm12, %v13908_v1  ;;  %v1143_v18 = vmax.f32 %v9020_v57, %v9023_v52  ;;  %v14202_v40 = vld [vmem:[#allocation25_spill] sm:$0xff] }
 0x307   : > { %v917_v8 = vpop.xlane.xlu1 %916 }
 0x308   : > { %14194 = vst [vmem:[#allocation46_spill] sm:$0xff] %v9025_v26  ;;  %v918_v25 = vcvt.f32.s32 %v917_v8  ;;  %1144 = vmax.xlane.f32.xlu1 %v1143_v18  ;;  %vm951_vm13 = vcmp.eq.s32.totalorder %v8514_v0, %v9025_v26  ;;  %vm950_vm14 = vcmp.eq.s32.totalorder %v8511_v62, %v9025_v26 }
 0x309   : > { %7548 = vmatprep.mubr.msk.f32.mxu0 %vm951_vm13, %v13908_v1  ;;  %v9036_v35 = vsel %vm950_vm14, -inf, %v14195_v47  ;;  %v9039_v39 = vsel %vm951_vm13, -inf, %v14197_v14 }
 0x30a   : > { %14196 = vst [vmem:[#allocation22_spill] sm:$0xff] %v9036_v35  ;;  %14198 = vst [vmem:[#allocation23_spill] sm:$0xff] %v9039_v39  ;;  %v9041_v42 = vadd.s32 %v920_v3, %v918_v25  ;;  %7549 = vmatmul.mubr.msk.f32.gmra.mrb[60].mxu0 %vm950_vm14, %v13908_v1  ;;  %v1146_v15 = vmax.f32 %v9036_v35, %v9039_v39 }
 0x30c   : > { %14199 = vst [vmem:[#allocation47_spill] sm:$0xff] %v9041_v42  ;;  %1147 = vmax.xlane.f32.xlu0 %v1146_v15  ;;  %vm953_vm15 = vcmp.eq.s32.totalorder %v8514_v0, %v9041_v42  ;;  %vm952_vm0 = vcmp.eq.s32.totalorder %v8511_v62, %v9041_v42 }
 0x30d   : > { %7550 = vmatprep.mubr.msk.f32.mxu0 %vm953_vm15, %v13908_v1  ;;  %v9052_v17 = vsel %vm952_vm0, -inf, %v14200_v20  ;;  %v9055_v28 = vsel %vm953_vm15, -inf, %v14202_v40 }
 0x30e   : > { %14201 = vst [vmem:[#allocation24_spill] sm:$0xff] %v9052_v17  ;;  %14203 = vst [vmem:[#allocation25_spill] sm:$0xff] %v9055_v28  ;;  %7551 = vmatmul.mubr.msk.f32.gmra.mrb[62].mxu0 %vm952_vm0, %v13908_v1  ;;  %v1149_v10 = vmax.f32 %v9052_v17, %v9055_v28 }
 0x310   : > { %1150 = vmax.xlane.f32.xlu1 %v1149_v10 }
 0x361   : > { %v1106_v5 = vpop.xlane.xlu0 %1105 }
 0x362   : > { %vm1152_vm1 = vcmp.eq.f32.partialorder %v8799_v55, %v1106_v5  ;;  %vm1153_vm2 = vcmp.eq.f32.partialorder %v8802_v27, %v1106_v5 }
 0x363   : > { %v1184_v11 = vsel %vm1152_vm1, %v8511_v62, 256  ;;  %v1185_v49 = vsel %vm1153_vm2, %v8514_v0, 256 }
 0x364   : > { %vm1216_vm3 = vcmp.lt.s32.totalorder %v1184_v11, %v1185_v49 }
 0x365   : > { %v1109_v18 = vpop.xlane.xlu1 %1108  ;;  %v9064_v8 = vsel %vm1216_vm3, %v1184_v11, %v1185_v49 }
 0x366   : > { %vm1154_vm4 = vcmp.eq.f32.partialorder %v8816_v31, %v1109_v18  ;;  %vm1155_vm5 = vcmp.eq.f32.partialorder %v8819_v33, %v1109_v18  ;;  %v1219_v3 = vshra.s32 %v9064_v8, 16 }
 0x367   : > { %v1186_v25 = vsel %vm1154_vm4, %v8511_v62, 256  ;;  %v1187_v47 = vsel %vm1155_vm5, %v8514_v0, 256 }
 0x368   : > { %v9071_v14 = vcvt.s32.f32 %v1219_v3  ;;  %vm1232_vm6 = vcmp.lt.s32.totalorder %v1186_v25, %v1187_v47 }
 0x369   : > { %v1112_v15 = vpop.xlane.xlu0 %1111  ;;  %v9073_v20 = vsel %vm1232_vm6, %v1186_v25, %v1187_v47 }
 0x36a   : > { %vm1156_vm7 = vcmp.eq.f32.partialorder %v8833_v36, %v1112_v15  ;;  %vm1157_vm8 = vcmp.eq.f32.partialorder %v8836_v38, %v1112_v15  ;;  %1222 = vmin.xlane.f32.xlu0 %v9071_v14  ;;  %v1235_v40 = vshra.s32 %v9073_v20, 16 }
 0x36b   : > { %v1188_v10 = vsel %vm1156_vm7, %v8511_v62, 256  ;;  %v1189_v5 = vsel %vm1157_vm8, %v8514_v0, 256 }
 0x36c   : > { %v9081_v11 = vcvt.s32.f32 %v1235_v40  ;;  %vm1248_vm9 = vcmp.lt.s32.totalorder %v1188_v10, %v1189_v5 }
 0x36d   : > { %v1115_v49 = vpop.xlane.xlu1 %1114  ;;  %v9083_v18 = vsel %vm1248_vm9, %v1188_v10, %v1189_v5 }
 0x36e   : > { %vm1158_vm10 = vcmp.eq.f32.partialorder %v8850_v41, %v1115_v49  ;;  %vm1159_vm11 = vcmp.eq.f32.partialorder %v8853_v43, %v1115_v49  ;;  %1238 = vmin.xlane.f32.xlu1 %v9081_v11  ;;  %v1251_v3 = vshra.s32 %v9083_v18, 16 }
 0x36f   : > { %v1190_v25 = vsel %vm1158_vm10, %v8511_v62, 256  ;;  %v1191_v47 = vsel %vm1159_vm11, %v8514_v0, 256 }
 0x370   : > { %v9091_v15 = vcvt.s32.f32 %v1251_v3  ;;  %vm1264_vm12 = vcmp.lt.s32.totalorder %v1190_v25, %v1191_v47 }
 0x371   : > { %v1118_v40 = vpop.xlane.xlu0 %1117  ;;  %v9093_v1 = vsel %vm1264_vm12, %v1190_v25, %v1191_v47 }
 0x372   : > { %vm1160_vm13 = vcmp.eq.f32.partialorder %v8867_v46, %v1118_v40  ;;  %vm1161_vm14 = vcmp.eq.f32.partialorder %v8870_v48, %v1118_v40  ;;  %1254 = vmin.xlane.f32.xlu0 %v9091_v15  ;;  %v1267_v10 = vshra.s32 %v9093_v1, 16  ;;  %v291_v48 = vld [vmem:[%s9216_s12 + $0x70] sm:$0xff] }
 0x373   : > { %v1192_v5 = vsel %vm1160_vm13, %v8511_v62, 256  ;;  %v1193_v49 = vsel %vm1161_vm14, %v8514_v0, 256 }
 0x374   : > { %v9101_v42 = vcvt.s32.f32 %v1267_v10  ;;  %vm1280_vm15 = vcmp.lt.s32.totalorder %v1192_v5, %v1193_v49 }
 0x375   : > { %v1121_v3 = vpop.xlane.xlu1 %1120  ;;  %v9103_v26 = vsel %vm1280_vm15, %v1192_v5, %v1193_v49 }
 0x376   : > { %vm1162_vm0 = vcmp.eq.f32.partialorder %v8884_v51, %v1121_v3  ;;  %vm1163_vm1 = vcmp.eq.f32.partialorder %v8887_v53, %v1121_v3  ;;  %1270 = vmin.xlane.f32.xlu1 %v9101_v42  ;;  %v1283_v25 = vshra.s32 %v9103_v26, 16  ;;  %v280_v51 = vld [vmem:[%s9216_s12 + $0x18] sm:$0xff] }
 0x377   : > { %v1194_v47 = vsel %vm1162_vm0, %v8511_v62, 256  ;;  %v1195_v40 = vsel %vm1163_vm1, %v8514_v0, 256 }
 0x378   : > { %v9111_v50 = vcvt.s32.f32 %v1283_v25  ;;  %vm1296_vm2 = vcmp.lt.s32.totalorder %v1194_v47, %v1195_v40 }
 0x379   : > { %v1124_v10 = vpop.xlane.xlu0 %1123  ;;  %v9113_v30 = vsel %vm1296_vm2, %v1194_v47, %v1195_v40 }
 0x37a   : > { %vm1164_vm3 = vcmp.eq.f32.partialorder %v8901_v56, %v1124_v10  ;;  %vm1165_vm4 = vcmp.eq.f32.partialorder %v8904_v58, %v1124_v10  ;;  %1286 = vmin.xlane.f32.xlu0 %v9111_v50  ;;  %v1299_v5 = vshra.s32 %v9113_v30, 16  ;;  %v279_v56 = vld [vmem:[%s9216_s12 + $0x10] sm:$0xff] }
 0x37b   : > { %v1196_v49 = vsel %vm1164_vm3, %v8511_v62, 256  ;;  %v1197_v3 = vsel %vm1165_vm4, %v8514_v0, 256 }
 0x37c   : > { %v9121_v24 = vcvt.s32.f32 %v1299_v5  ;;  %vm1312_vm5 = vcmp.lt.s32.totalorder %v1196_v49, %v1197_v3 }
 0x37d   : > { %v1127_v25 = vpop.xlane.xlu1 %1126  ;;  %v9123_v37 = vsel %vm1312_vm5, %v1196_v49, %v1197_v3 }
 0x37e   : > { %vm1166_vm6 = vcmp.eq.f32.partialorder %v8918_v61, %v1127_v25  ;;  %vm1167_vm7 = vcmp.eq.f32.partialorder %v8921_v63, %v1127_v25  ;;  %1302 = vmin.xlane.f32.xlu1 %v9121_v24  ;;  %v1315_v47 = vshra.s32 %v9123_v37, 16 }
 0x37f   : > { %v1198_v40 = vsel %vm1166_vm6, %v8511_v62, 256  ;;  %v1199_v10 = vsel %vm1167_vm7, %v8514_v0, 256 }
 0x380   : > { %v9131_v34 = vcvt.s32.f32 %v1315_v47  ;;  %vm1328_vm8 = vcmp.lt.s32.totalorder %v1198_v40, %v1199_v10 }
 0x381   : > { %v1130_v5 = vpop.xlane.xlu0 %1129  ;;  %v9133_v29 = vsel %vm1328_vm8, %v1198_v40, %v1199_v10 }
 0x382   : > { %vm1168_vm9 = vcmp.eq.f32.partialorder %v8935_v2, %v1130_v5  ;;  %vm1169_vm10 = vcmp.eq.f32.partialorder %v8938_v4, %v1130_v5  ;;  %1318 = vmin.xlane.f32.xlu0 %v9131_v34  ;;  %v1331_v49 = vshra.s32 %v9133_v29, 16 }
 0x383   : > { %v1200_v3 = vsel %vm1168_vm9, %v8511_v62, 256  ;;  %v1201_v25 = vsel %vm1169_vm10, %v8514_v0, 256 }
 0x384   : > { %v9141_v61 = vcvt.s32.f32 %v1331_v49  ;;  %vm1344_vm11 = vcmp.lt.s32.totalorder %v1200_v3, %v1201_v25 }
 0x385   : > { %v1133_v47 = vpop.xlane.xlu1 %1132  ;;  %v9143_v63 = vsel %vm1344_vm11, %v1200_v3, %v1201_v25 }
 0x386   : > { %vm1170_vm12 = vcmp.eq.f32.partialorder %v8952_v9, %v1133_v47  ;;  %vm1171_vm13 = vcmp.eq.f32.partialorder %v8955_v23, %v1133_v47  ;;  %1334 = vmin.xlane.f32.xlu1 %v9141_v61  ;;  %v1347_v40 = vshra.s32 %v9143_v63, 16 }
 0x387   : > { %v1202_v10 = vsel %vm1170_vm12, %v8511_v62, 256  ;;  %v1203_v5 = vsel %vm1171_vm13, %v8514_v0, 256 }
 0x388   : > { %v9151_v2 = vcvt.s32.f32 %v1347_v40  ;;  %vm1360_vm14 = vcmp.lt.s32.totalorder %v1202_v10, %v1203_v5 }
 0x389   : > { %v1136_v49 = vpop.xlane.xlu0 %1135  ;;  %v9153_v4 = vsel %vm1360_vm14, %v1202_v10, %v1203_v5 }
 0x38a   : > { %vm1172_vm15 = vcmp.eq.f32.partialorder %v8969_v21, %v1136_v49  ;;  %vm1173_vm0 = vcmp.eq.f32.partialorder %v8972_v12, %v1136_v49  ;;  %1350 = vmin.xlane.f32.xlu0 %v9151_v2  ;;  %v1363_v3 = vshra.s32 %v9153_v4, 16 }
 0x38b   : > { %v1204_v25 = vsel %vm1172_vm15, %v8511_v62, 256  ;;  %v1205_v47 = vsel %vm1173_vm0, %v8514_v0, 256 }
 0x38c   : > { %v9161_v9 = vcvt.s32.f32 %v1363_v3  ;;  %vm1376_vm1 = vcmp.lt.s32.totalorder %v1204_v25, %v1205_v47 }
 0x38d   : > { %v1139_v40 = vpop.xlane.xlu1 %1138  ;;  %v9163_v23 = vsel %vm1376_vm1, %v1204_v25, %v1205_v47 }
 0x38e   : > { %vm1174_vm2 = vcmp.eq.f32.partialorder %v8986_v19, %v1139_v40  ;;  %vm1175_vm3 = vcmp.eq.f32.partialorder %v8989_v13, %v1139_v40  ;;  %1366 = vmin.xlane.f32.xlu1 %v9161_v9  ;;  %v1379_v10 = vshra.s32 %v9163_v23, 16 }
 0x38f   : > { %v1206_v5 = vsel %vm1174_vm2, %v8511_v62, 256  ;;  %v1207_v49 = vsel %vm1175_vm3, %v8514_v0, 256 }
 0x390   : > { %v9171_v21 = vcvt.s32.f32 %v1379_v10  ;;  %vm1392_vm4 = vcmp.lt.s32.totalorder %v1206_v5, %v1207_v49 }
 0x391   : > { %v1142_v3 = vpop.xlane.xlu0 %1141  ;;  %v9173_v12 = vsel %vm1392_vm4, %v1206_v5, %v1207_v49 }
 0x392   : > { %vm1176_vm5 = vcmp.eq.f32.partialorder %v9003_v7, %v1142_v3  ;;  %vm1177_vm6 = vcmp.eq.f32.partialorder %v9006_v16, %v1142_v3  ;;  %1382 = vmin.xlane.f32.xlu0 %v9171_v21  ;;  %v1395_v25 = vshra.s32 %v9173_v12, 16 }
 0x393   : > { %v1208_v47 = vsel %vm1176_vm5, %v8511_v62, 256  ;;  %v1209_v40 = vsel %vm1177_vm6, %v8514_v0, 256 }
 0x394   : > { %v9181_v19 = vcvt.s32.f32 %v1395_v25  ;;  %vm1408_vm7 = vcmp.lt.s32.totalorder %v1208_v47, %v1209_v40 }
 0x395   : > { %v1145_v10 = vpop.xlane.xlu1 %1144  ;;  %v9183_v13 = vsel %vm1408_vm7, %v1208_v47, %v1209_v40 }
 0x396   : > { %vm1178_vm8 = vcmp.eq.f32.partialorder %v9020_v57, %v1145_v10  ;;  %vm1179_vm9 = vcmp.eq.f32.partialorder %v9023_v52, %v1145_v10  ;;  %1398 = vmin.xlane.f32.xlu1 %v9181_v19  ;;  %v1411_v5 = vshra.s32 %v9183_v13, 16 }
 0x397   : > { %v1210_v49 = vsel %vm1178_vm8, %v8511_v62, 256  ;;  %v1211_v3 = vsel %vm1179_vm9, %v8514_v0, 256 }
 0x398   : > { %v9191_v7 = vcvt.s32.f32 %v1411_v5  ;;  %vm1424_vm10 = vcmp.lt.s32.totalorder %v1210_v49, %v1211_v3 }
 0x399   : > { %v1148_v25 = vpop.xlane.xlu0 %1147  ;;  %v9193_v16 = vsel %vm1424_vm10, %v1210_v49, %v1211_v3 }
 0x39a   : > { %vm1180_vm11 = vcmp.eq.f32.partialorder %v9036_v35, %v1148_v25  ;;  %vm1181_vm12 = vcmp.eq.f32.partialorder %v9039_v39, %v1148_v25  ;;  %1414 = vmin.xlane.f32.xlu0 %v9191_v7  ;;  %v1427_v47 = vshra.s32 %v9193_v16, 16 }
 0x39b   : > { %v1212_v40 = vsel %vm1180_vm11, %v8511_v62, 256  ;;  %v1213_v10 = vsel %vm1181_vm12, %v8514_v0, 256 }
 0x39c   : > { %v9201_v57 = vcvt.s32.f32 %v1427_v47  ;;  %vm1440_vm13 = vcmp.lt.s32.totalorder %v1212_v40, %v1213_v10 }
 0x39d   : > { %v1151_v5 = vpop.xlane.xlu1 %1150  ;;  %v9203_v52 = vsel %vm1440_vm13, %v1212_v40, %v1213_v10 }
 0x39e   : > { %vm1182_vm14 = vcmp.eq.f32.partialorder %v9052_v17, %v1151_v5  ;;  %vm1183_vm15 = vcmp.eq.f32.partialorder %v9055_v28, %v1151_v5  ;;  %1430 = vmin.xlane.f32.xlu1 %v9201_v57  ;;  %v1443_v49 = vshra.s32 %v9203_v52, 16  ;;  %v277_v5 = vld [vmem:[%s9216_s12] sm:$0xff] }
 0x39f   : > { %v1214_v3 = vsel %vm1182_vm14, %v8511_v62, 256  ;;  %v1215_v25 = vsel %vm1183_vm15, %v8514_v0, 256 }
 0x3a0   : > { %v9218_v47 = vcvt.s32.f32 %v1443_v49  ;;  %vm1456_vm0 = vcmp.lt.s32.totalorder %v1214_v3, %v1215_v25  ;;  %v278_v49 = vld [vmem:[%s9216_s12 + $0x8] sm:$0xff] }
 0x3a1   : > { %v9220_v40 = vsel %vm1456_vm0, %v1214_v3, %v1215_v25 }
 0x3a2   : > { %1446 = vmin.xlane.f32.xlu0 %v9218_v47  ;;  %v1459_v10 = vshra.s32 %v9220_v40, 16 }
 0x3a4   : > { %v9225_v17 = vcvt.s32.f32 %v1459_v10 }
 0x3a5   : > { %v5874_v28 = vpop.f32.mrb[32].mxu0 }
 0x3a6   : > { %v9227_v35 = vadd.f32 %v5874_v28, %v277_v5  ;;  %v5876_v39 = vpop.f32.mrb[33].mxu0  ;;  %1462 = vmin.xlane.f32.xlu1 %v9225_v17  ;;  %v281_v5 = vld [vmem:[%s9216_s12 + $0x20] sm:$0xff] }
 0x3a8   : > { %14204 = vst [vmem:[#allocation48_spill] sm:$0xff] %v9227_v35 }
 0x3a9   : > { %v5879_v54 = vpop.f32.mrb[34].mxu0 }
 0x3aa   : > { %v9231_v3 = vadd.f32 %v5879_v54, %v278_v49  ;;  %v5881_v25 = vpop.f32.mrb[35].mxu0  ;;  %v282_v49 = vld [vmem:[%s9216_s12 + $0x28] sm:$0xff] }
 0x3ac   : > { %14205 = vst [vmem:[#allocation49_spill] sm:$0xff] %v9231_v3 }
 0x3ad   : > { %v5884_v58 = vpop.f32.mrb[36].mxu0 }
 0x3ae   : > { %v9234_v60 = vadd.f32 %v5884_v58, %v279_v56  ;;  %v5886_v10 = vpop.f32.mrb[37].mxu0  ;;  %v283_v58 = vld [vmem:[%s9216_s12 + $0x30] sm:$0xff] }
 0x3b0   : > { %14206 = vst [vmem:[#allocation50_spill] sm:$0xff] %v9234_v60 }
 0x3b1   : > { %v5889_v53 = vpop.f32.mrb[38].mxu0 }
 0x3b2   : > { %v9237_v28 = vadd.f32 %v5889_v53, %v280_v51  ;;  %v5891_v39 = vpop.f32.mrb[39].mxu0  ;;  %v284_v53 = vld [vmem:[%s9216_s12 + $0x38] sm:$0xff] }
 0x3b4   : > { %14207 = vst [vmem:[#allocation51_spill] sm:$0xff] %v9237_v28 }
 0x3b5   : > { %v5894_v35 = vpop.f32.mrb[40].mxu0 }
 0x3b6   : > { %v9240_v44 = vadd.f32 %v5894_v35, %v281_v5  ;;  %v5896_v54 = vpop.f32.mrb[41].mxu0  ;;  %v285_v5 = vld [vmem:[%s9216_s12 + $0x40] sm:$0xff] }
 0x3b8   : > { %14208 = vst [vmem:[#allocation52_spill] sm:$0xff] %v9240_v44 }
 0x3b9   : > { %v5899_v25 = vpop.f32.mrb[42].mxu0 }
 0x3ba   : > { %v9243_v3 = vadd.f32 %v5899_v25, %v282_v49  ;;  %v5901_v56 = vpop.f32.mrb[43].mxu0  ;;  %v286_v25 = vld [vmem:[%s9216_s12 + $0x48] sm:$0xff] }
 0x3bc   : > { %14209 = vst [vmem:[#allocation53_spill] sm:$0xff] %v9243_v3 }
 0x3bd   : > { %v5904_v10 = vpop.f32.mrb[44].mxu0 }
 0x3be   : > { %v9246_v60 = vadd.f32 %v5904_v10, %v283_v58  ;;  %v5906_v51 = vpop.f32.mrb[45].mxu0  ;;  %v287_v10 = vld [vmem:[%s9216_s12 + $0x50] sm:$0xff] }
 0x3c0   : > { %14210 = vst [vmem:[#allocation54_spill] sm:$0xff] %v9246_v60 }
 0x3c1   : > { %v5909_v39 = vpop.f32.mrb[46].mxu0 }
 0x3c2   : > { %v9249_v28 = vadd.f32 %v5909_v39, %v284_v53  ;;  %v5911_v35 = vpop.f32.mrb[47].mxu0  ;;  %v288_v39 = vld [vmem:[%s9216_s12 + $0x58] sm:$0xff] }
 0x3c4   : > { %14211 = vst [vmem:[#allocation55_spill] sm:$0xff] %v9249_v28 }
 0x3c5   : > { %v5914_v54 = vpop.f32.mrb[48].mxu0 }
 0x3c6   : > { %v9252_v44 = vadd.f32 %v5914_v54, %v285_v5  ;;  %v5916_v49 = vpop.f32.mrb[49].mxu0  ;;  %v289_v54 = vld [vmem:[%s9216_s12 + $0x60] sm:$0xff] }
 0x3c8   : > { %14212 = vst [vmem:[#allocation56_spill] sm:$0xff] %v9252_v44 }
 0x3c9   : > { %v5919_v56 = vpop.f32.mrb[50].mxu0 }
 0x3ca   : > { %v9255_v3 = vadd.f32 %v5919_v56, %v286_v25  ;;  %v5921_v58 = vpop.f32.mrb[51].mxu0  ;;  %v290_v25 = vld [vmem:[%s9216_s12 + $0x68] sm:$0xff] }
 0x3cc   : > { %14213 = vst [vmem:[#allocation57_spill] sm:$0xff] %v9255_v3 }
 0x3cd   : > { %v5924_v51 = vpop.f32.mrb[52].mxu0 }
 0x3ce   : > { %v9258_v60 = vadd.f32 %v5924_v51, %v287_v10  ;;  %v5926_v53 = vpop.f32.mrb[53].mxu0 }
 0x3d0   : > { %14214 = vst [vmem:[#allocation58_spill] sm:$0xff] %v9258_v60  ;;  %v292_v60 = vld [vmem:[%s9216_s12 + $0x78] sm:$0xff] }
 0x3d1   : > { %v5929_v35 = vpop.f32.mrb[54].mxu0 }
 0x3d2   : > { %v9261_v28 = vadd.f32 %v5929_v35, %v288_v39  ;;  %v5931_v5 = vpop.f32.mrb[55].mxu0 }
 0x3d3   : > { %v1218_v5 = vand.u32 65535, %v9064_v8 }
 0x3d5   : > { %v5934_v49 = vpop.f32.mrb[56].mxu0 }
 0x3d6   : > { %v9264_v44 = vadd.f32 %v5934_v49, %v289_v54  ;;  %v5936_v46 = vpop.f32.mrb[57].mxu0  ;;  %v1234_v49 = vand.u32 65535, %v9073_v20  ;;  %v1266_v20 = vand.u32 65535, %v9093_v1  ;;  %v1298_v1 = vand.u32 65535, %v9113_v30 }
 0x3d7   : > { %v1220_v46 = vcvt.s32.f32 %v1218_v5  ;;  %v1330_v30 = vand.u32 65535, %v9133_v29  ;;  %v1362_v29 = vand.u32 65535, %v9153_v4  ;;  %v1394_v4 = vand.u32 65535, %v9173_v12 }
 0x3d8   : > { %v1426_v12 = vand.u32 65535, %v9193_v16  ;;  %v1458_v16 = vand.u32 65535, %v9220_v40 }
 0x3d9   : > { %v5939_v56 = vpop.f32.mrb[58].mxu0 }
 0x3da   : > { %v9267_v58 = vadd.f32 %v5939_v56, %v290_v25  ;;  %v5941_v3 = vpop.f32.mrb[59].mxu0  ;;  %v1236_v25 = vcvt.s32.f32 %v1234_v49  ;;  %v1250_v56 = vand.u32 65535, %v9083_v18  ;;  %v1282_v18 = vand.u32 65535, %v9103_v26 }
 0x3db   : > { %v1300_v49 = vcvt.s32.f32 %v1298_v1  ;;  %v1314_v26 = vand.u32 65535, %v9123_v37  ;;  %v1346_v37 = vand.u32 65535, %v9143_v63  ;;  %v1378_v63 = vand.u32 65535, %v9163_v23 }
 0x3dc   : > { %v1252_v8 = vcvt.s32.f32 %v1250_v56  ;;  %v1284_v5 = vcvt.s32.f32 %v1282_v18  ;;  %v1396_v1 = vcvt.s32.f32 %v1394_v4  ;;  %v1410_v23 = vand.u32 65535, %v9183_v13 }
 0x3dd   : > { %v5944_v10 = vpop.f32.mrb[60].mxu0  ;;  %v1442_v13 = vand.u32 65535, %v9203_v52 }
 0x3de   : > { %v9270_v51 = vadd.f32 %v5944_v10, %v291_v48  ;;  %v5946_v53 = vpop.f32.mrb[61].mxu0 }
 0x3df   : > { %v1268_v53 = vcvt.s32.f32 %v1266_v20  ;;  %v1348_v20 = vcvt.s32.f32 %v1346_v37 }
 0x3e1   : > { %v5949_v59 = vpop.f32.mrb[62].mxu0 }
 0x3e2   : > { %v9273_v39 = vadd.f32 %v5949_v59, %v292_v60  ;;  %v5951_v35 = vpop.f32.mrb[63].mxu0 }
 0x3f7   : > { %v9276_v54 = vpop.xlane.xlu0 %1222 }
 0x3f8   : > { %vm1224_vm1 = vcmp.eq.f32.partialorder %v9071_v14, %v9276_v54 }
 0x3f9   : > { %v1225_v3 = vsel %vm1224_vm1, %v1220_v46, inf  ;;  %vm954_vm1 = vcmp.eq.s32.totalorder %v8511_v62, 0 }
 0x3fa   : > { %1226 = vmin.xlane.f32.xlu0 %v1225_v3  ;;  %v958_v4 = vsel %vm954_vm1, %v8804_v6, 0 }
 0x3fb   : > { %v9281_v48 = vpop.xlane.xlu1 %1238 }
 0x3fc   : > { %vm1240_vm2 = vcmp.eq.f32.partialorder %v9081_v11, %v9281_v48  ;;  %v1245_v37 = vcvt.f32.s32 %v9281_v48 }
 0x3fd   : > { %v1241_v59 = vsel %vm1240_vm2, %v1236_v25, inf  ;;  %v1316_v25 = vcvt.s32.f32 %v1314_v26  ;;  %vm1504_vm2 = vcmp.eq.s32.totalorder %v8511_v62, 1 }
 0x3fe   : > { %1242 = vmin.xlane.f32.xlu1 %v1241_v59  ;;  %v1332_v59 = vcvt.s32.f32 %v1330_v30  ;;  %v1444_v30 = vcvt.s32.f32 %v1442_v13 }
 0x3ff   : > { %v9286_v60 = vpop.xlane.xlu0 %1254 }
 0x400   : > { %vm1256_vm3 = vcmp.eq.f32.partialorder %v9091_v15, %v9286_v60 }
 0x401   : > { %v1257_v14 = vsel %vm1256_vm3, %v1252_v8, inf }
 0x402   : > { %1258 = vmin.xlane.f32.xlu0 %v1257_v14 }
 0x403   : > { %v9291_v10 = vpop.xlane.xlu1 %1270 }
 0x404   : > { %vm1272_vm4 = vcmp.eq.f32.partialorder %v9101_v42, %v9291_v10 }
 0x405   : > { %v1273_v11 = vsel %vm1272_vm4, %v1268_v53, inf  ;;  %v1364_v53 = vcvt.s32.f32 %v1362_v29  ;;  %v957_v29 = vsel %vm954_vm1, %v8790_v32, 0 }
 0x406   : > { %1274 = vmin.xlane.f32.xlu1 %v1273_v11  ;;  %v1380_v11 = vcvt.s32.f32 %v1378_v63  ;;  %v14215_v63 = vmov 1.0  }
 0x407   : > { %v9296_v35 = vpop.xlane.xlu0 %1286 }
 0x408   : > { %vm1288_vm5 = vcmp.eq.f32.partialorder %v9111_v50, %v9296_v35 }
 0x409   : > { %v1289_v15 = vsel %vm1288_vm5, %v1284_v5, inf }
 0x40a   : > { %1290 = vmin.xlane.f32.xlu0 %v1289_v15 }
 0x40b   : > { %v9301_v46 = vpop.xlane.xlu1 %1302 }
 0x40c   : > { %vm1304_vm6 = vcmp.eq.f32.partialorder %v9121_v24, %v9301_v46 }
 0x40d   : > { %v1305_v42 = vsel %vm1304_vm6, %v1300_v49, inf  ;;  %v1412_v49 = vcvt.s32.f32 %v1410_v23 }
 0x40e   : > { %1306 = vmin.xlane.f32.xlu1 %v1305_v42  ;;  %v1428_v42 = vcvt.s32.f32 %v1426_v12  ;;  %v959_v12 = vsel %vm954_vm1, %v8821_v45, 0 }
 0x40f   : > { %v9306_v3 = vpop.xlane.xlu0 %1318 }
 0x410   : > { %vm1320_vm7 = vcmp.eq.f32.partialorder %v9131_v34, %v9306_v3 }
 0x411   : > { %v1321_v50 = vsel %vm1320_vm7, %v1316_v25, inf }
 0x412   : > { %1322 = vmin.xlane.f32.xlu0 %v1321_v50 }
 0x413   : > { %v9311_v56 = vpop.xlane.xlu1 %1334 }
 0x414   : > { %vm1336_vm8 = vcmp.eq.f32.partialorder %v9141_v61, %v9311_v56 }
 0x415   : > { %v1337_v24 = vsel %vm1336_vm8, %v1332_v59, inf  ;;  %v1460_v59 = vcvt.s32.f32 %v1458_v16  ;;  %v960_v16 = vsel %vm954_vm1, %v8838_v22, 0 }
 0x416   : > { %1338 = vmin.xlane.f32.xlu1 %v1337_v24 }
 0x417   : > { %v9316_v8 = vpop.xlane.xlu0 %1350 }
 0x418   : > { %vm1352_vm9 = vcmp.eq.f32.partialorder %v9151_v2, %v9316_v8 }
 0x419   : > { %v1353_v34 = vsel %vm1352_vm9, %v1348_v20, inf }
 0x41a   : > { %1354 = vmin.xlane.f32.xlu0 %v1353_v34  ;;  %v1246_v34 = vshll.u32 %v1245_v37, 16 }
 0x41b   : > { %v9321_v14 = vpop.xlane.xlu1 %1366 }
 0x41c   : > { %vm1368_vm10 = vcmp.eq.f32.partialorder %v9161_v9, %v9321_v14 }
 0x41d   : > { %v1369_v61 = vsel %vm1368_vm10, %v1364_v53, inf }
 0x41e   : > { %1370 = vmin.xlane.f32.xlu1 %v1369_v61 }
 0x41f   : > { %v9326_v18 = vpop.xlane.xlu0 %1382 }
 0x420   : > { %vm1384_vm11 = vcmp.eq.f32.partialorder %v9171_v21, %v9326_v18 }
 0x421   : > { %v1385_v2 = vsel %vm1384_vm11, %v1380_v11, inf }
 0x422   : > { %1386 = vmin.xlane.f32.xlu0 %v1385_v2 }
 0x423   : > { %v9331_v5 = vpop.xlane.xlu1 %1398 }
 0x424   : > { %vm1400_vm12 = vcmp.eq.f32.partialorder %v9181_v19, %v9331_v5 }
 0x425   : > { %v1401_v9 = vsel %vm1400_vm12, %v1396_v1, inf  ;;  %v1277_v1 = vcvt.f32.s32 %v9291_v10 }
 0x426   : > { %1402 = vmin.xlane.f32.xlu1 %v1401_v9 }
 0x427   : > { %v9336_v15 = vpop.xlane.xlu0 %1414 }
 0x428   : > { %vm1416_vm13 = vcmp.eq.f32.partialorder %v9191_v7, %v9336_v15 }
 0x429   : > { %v1417_v21 = vsel %vm1416_vm13, %v1412_v49, inf }
 0x42a   : > { %1418 = vmin.xlane.f32.xlu0 %v1417_v21  ;;  %v1278_v21 = vshll.u32 %v1277_v1, 16  ;;  %v1341_v1 = vcvt.f32.s32 %v9311_v56 }
 0x42b   : > { %v9341_v26 = vpop.xlane.xlu1 %1430 }
 0x42c   : > { %vm1432_vm14 = vcmp.eq.f32.partialorder %v9201_v57, %v9341_v26  ;;  %v1229_v57 = vcvt.f32.s32 %v9276_v54 }
 0x42d   : > { %v1433_v19 = vsel %vm1432_vm14, %v1428_v42, inf  ;;  %v1293_v42 = vcvt.f32.s32 %v9296_v35 }
 0x42e   : > { %1434 = vmin.xlane.f32.xlu1 %v1433_v19  ;;  %v1230_v40 = vshll.u32 %v1229_v57, 16 }
 0x42f   : > { %v9346_v25 = vpop.xlane.xlu0 %1446 }
 0x430   : > { %vm1448_vm15 = vcmp.eq.f32.partialorder %v9218_v47, %v9346_v25 }
 0x431   : > { %v1449_v7 = vsel %vm1448_vm15, %v1444_v30, inf }
 0x432   : > { %1450 = vmin.xlane.f32.xlu0 %v1449_v7  ;;  %v1294_v7 = vshll.u32 %v1293_v42, 16 }
 0x433   : > { %v9351_v50 = vpop.xlane.xlu1 %1462 }
 0x434   : > { %vm1464_vm0 = vcmp.eq.f32.partialorder %v9225_v17, %v9351_v50  ;;  %v1261_v17 = vcvt.f32.s32 %v9286_v60 }
 0x435   : > { %v1465_v52 = vsel %vm1464_vm0, %v1460_v59, inf  ;;  %v1309_v59 = vcvt.f32.s32 %v9301_v46 }
 0x436   : > { %1466 = vmin.xlane.f32.xlu1 %v1465_v52  ;;  %v1262_v2 = vshll.u32 %v1261_v17, 16 }
 0x487   : > { %v1227_v24 = vpop.xlane.xlu0 %1226 }
 0x488   : > { %v1228_v20 = vcvt.f32.s32 %v1227_v24  ;;  %v14223_v24 = vld [vmem:[#allocation26_spill] sm:$0xff] }
 0x48a   : > { %v1231_v47 = vadd.s32 %v1230_v40, %v1228_v20  ;;  %v961_v40 = vsel %vm954_vm1, %v14223_v24, 0  ;;  %v1310_v20 = vshll.u32 %v1309_v59, 16 }
 0x48b   : > { %v1243_v53 = vpop.xlane.xlu1 %1242 }
 0x48c   : > { %v9365_v54 = vsel %vm1504_vm2, %v1231_v47, %v957_v29  ;;  %v1244_v48 = vcvt.f32.s32 %v1243_v53  ;;  %vm1473_vm3 = vcmp.eq.s32.totalorder %v8514_v0, %v1231_v47  ;;  %vm1472_vm4 = vcmp.eq.s32.totalorder %v8511_v62, %v1231_v47  ;;  %v14227_v53 = vld [vmem:[#allocation27_spill] sm:$0xff] }
 0x48d   : > { %7552 = vmatprep.mubr.msk.f32.mxu0 %vm1473_vm3, %v14215_v63  ;;  %v9371_v61 = vsel %vm1472_vm4, -inf, %v8799_v55  ;;  %v9374_v32 = vsel %vm1473_vm3, -inf, %v8802_v27  ;;  %v1325_v47 = vcvt.f32.s32 %v9306_v3 }
 0x48e   : > { %v1247_v11 = vadd.s32 %v1246_v34, %v1244_v48  ;;  %7553 = vmatmul.mubr.msk.f32.gmra.mrb[64].mxu0 %vm1472_vm4, %v14215_v63  ;;  %v1654_v60 = vmax.f32 %v9371_v61, %v9374_v32  ;;  %v14225_v34 = vld [vmem:[#allocation28_spill] sm:$0xff] }
 0x48f   : > { %v1259_v23 = vpop.xlane.xlu0 %1258 }
 0x490   : > { %v9385_v55 = vsel %vm1504_vm2, %v1247_v11, %v958_v4  ;;  %v1260_v27 = vcvt.f32.s32 %v1259_v23  ;;  %1655 = vmax.xlane.f32.xlu0 %v1654_v60  ;;  %vm1475_vm5 = vcmp.eq.s32.totalorder %v8514_v0, %v1247_v11  ;;  %vm1474_vm6 = vcmp.eq.s32.totalorder %v8511_v62, %v1247_v11  ;;  %v14229_v60 = vld [vmem:[#allocation29_spill] sm:$0xff] }
 0x491   : > { %7554 = vmatprep.mubr.msk.f32.mxu0 %vm1475_vm5, %v14215_v63  ;;  %v9391_v9 = vsel %vm1474_vm6, -inf, %v8816_v31  ;;  %v9394_v6 = vsel %vm1475_vm5, -inf, %v8819_v33  ;;  %v962_v4 = vsel %vm954_vm1, %v14229_v60, 0 }
 0x492   : > { %14216 = vst [vmem:[#allocation59_spill] sm:$0xff] %v9391_v9  ;;  %v1263_v10 = vadd.s32 %v1262_v2, %v1260_v27  ;;  %7555 = vmatmul.mubr.msk.f32.gmra.mrb[66].mxu0 %vm1474_vm6, %v14215_v63  ;;  %v1657_v49 = vmax.f32 %v9391_v9, %v9394_v6  ;;  %v1326_v2 = vshll.u32 %v1325_v47, 16 }
 0x493   : > { %v1275_v13 = vpop.xlane.xlu1 %1274 }
 0x494   : > { %v9405_v31 = vsel %vm1504_vm2, %v1263_v10, %v959_v12  ;;  %v1276_v33 = vcvt.f32.s32 %v1275_v13  ;;  %1658 = vmax.xlane.f32.xlu1 %v1657_v49  ;;  %vm1477_vm7 = vcmp.eq.s32.totalorder %v8514_v0, %v1263_v10  ;;  %vm1476_vm8 = vcmp.eq.s32.totalorder %v8511_v62, %v1263_v10  ;;  %v14231_v49 = vld [vmem:[#allocation31_spill] sm:$0xff] }
 0x495   : > { %14217 = vst [vmem:[#allocation60_spill] sm:$0xff] %v9405_v31  ;;  %v9410_v19 = vsel %vm1477_vm7, -inf, %v8836_v38  ;;  %7556 = vmatprep.mubr.msk.f32.mxu0 %vm1477_vm7, %v14215_v63  ;;  %v9414_v45 = vsel %vm1476_vm8, -inf, %v8833_v36  ;;  %v14299_v31 = vld [vmem:[#allocation50_spill] sm:$0xff] }
 0x496   : > { %14218 = vst [vmem:[#allocation61_spill] sm:$0xff] %v9410_v19  ;;  %14219 = vst [vmem:[#allocation62_spill] sm:$0xff] %v9414_v45  ;;  %v1279_v35 = vadd.s32 %v1278_v21, %v1276_v33  ;;  %7557 = vmatmul.mubr.msk.f32.gmra.mrb[68].mxu0 %vm1476_vm8, %v14215_v63  ;;  %v1660_v30 = vmax.f32 %v9414_v45, %v9410_v19  ;;  %v14233_v21 = vld [vmem:[#allocation30_spill] sm:$0xff]  ;;  %v14235_v33 = vld [vmem:[#allocation32_spill] sm:$0xff] }
 0x497   : > { %v1291_v38 = vpop.xlane.xlu0 %1290 }
 0x498   : > { %v9425_v52 = vsel %vm1504_vm2, %v1279_v35, %v960_v16  ;;  %v1292_v36 = vcvt.f32.s32 %v1291_v38  ;;  %1661 = vmax.xlane.f32.xlu0 %v1660_v30  ;;  %vm1479_vm9 = vcmp.eq.s32.totalorder %v8514_v0, %v1279_v35  ;;  %vm1478_vm10 = vcmp.eq.s32.totalorder %v8511_v62, %v1279_v35 }
 0x499   : > { %14220 = vst [vmem:[#allocation63_spill] sm:$0xff] %v9425_v52  ;;  %v9430_v57 = vsel %vm1479_vm9, -inf, %v8853_v43  ;;  %7558 = vmatprep.mubr.msk.f32.mxu0 %vm1479_vm9, %v14215_v63  ;;  %v9434_v22 = vsel %vm1478_vm10, -inf, %v8850_v41  ;;  %v963_v35 = vsel %vm954_vm1, %v14235_v33, 0  ;;  %v1342_v30 = vshll.u32 %v1341_v1, 16 }
 0x49a   : > { %14221 = vst [vmem:[#allocation64_spill] sm:$0xff] %v9430_v57  ;;  %14222 = vst [vmem:[#allocation65_spill] sm:$0xff] %v9434_v22  ;;  %v1295_v46 = vadd.s32 %v1294_v7, %v1292_v36  ;;  %7559 = vmatmul.mubr.msk.f32.gmra.mrb[70].mxu0 %vm1478_vm10, %v14215_v63  ;;  %v1663_v37 = vmax.f32 %v9434_v22, %v9430_v57  ;;  %v1357_v16 = vcvt.f32.s32 %v9316_v8  ;;  %v14237_v36 = vld [vmem:[#allocation34_spill] sm:$0xff] }
 0x49b   : > { %v1307_v43 = vpop.xlane.xlu1 %1306 }
 0x49c   : > { %v9445_v29 = vsel %vm1504_vm2, %v1295_v46, %v961_v40  ;;  %v1308_v41 = vcvt.f32.s32 %v1307_v43  ;;  %1664 = vmax.xlane.f32.xlu1 %v1663_v37  ;;  %vm1481_vm11 = vcmp.eq.s32.totalorder %v8514_v0, %v1295_v46  ;;  %vm1480_vm12 = vcmp.eq.s32.totalorder %v8511_v62, %v1295_v46  ;;  %v14239_v37 = vld [vmem:[#allocation33_spill] sm:$0xff] }
 0x49d   : > { %14224 = vst [vmem:[#allocation26_spill] sm:$0xff] %v9445_v29  ;;  %v9450_v17 = vsel %vm1481_vm11, -inf, %v14225_v34  ;;  %7560 = vmatprep.mubr.msk.f32.mxu0 %vm1481_vm11, %v14215_v63  ;;  %v9454_v48 = vsel %vm1480_vm12, -inf, %v14227_v53  ;;  %v1358_v43 = vshll.u32 %v1357_v16, 16  ;;  %v14251_v16 = vld [vmem:[#allocation39_spill] sm:$0xff] }
 0x49e   : > { %14226 = vst [vmem:[#allocation28_spill] sm:$0xff] %v9450_v17  ;;  %14228 = vst [vmem:[#allocation27_spill] sm:$0xff] %v9454_v48  ;;  %v1311_v3 = vadd.s32 %v1310_v20, %v1308_v41  ;;  %7561 = vmatmul.mubr.msk.f32.gmra.mrb[72].mxu0 %vm1480_vm12, %v14215_v63  ;;  %v1666_v11 = vmax.f32 %v9454_v48, %v9450_v17  ;;  %v14241_v20 = vld [vmem:[#allocation35_spill] sm:$0xff]  ;;  %v1373_v41 = vcvt.f32.s32 %v9321_v14 }
 0x49f   : > { %v1323_v23 = vpop.xlane.xlu0 %1322  ;;  %v964_v47 = vsel %vm954_vm1, %v14241_v20, 0 }
 0x4a0   : > { %v9465_v27 = vsel %vm1504_vm2, %v1311_v3, %v962_v4  ;;  %v1324_v10 = vcvt.f32.s32 %v1323_v23  ;;  %1667 = vmax.xlane.f32.xlu0 %v1666_v11  ;;  %vm1483_vm13 = vcmp.eq.s32.totalorder %v8514_v0, %v1311_v3  ;;  %vm1482_vm14 = vcmp.eq.s32.totalorder %v8511_v62, %v1311_v3  ;;  %v14243_v11 = vld [vmem:[#allocation37_spill] sm:$0xff]  ;;  %v14245_v4 = vld [vmem:[#allocation36_spill] sm:$0xff]  ;;  %v14247_v23 = vld [vmem:[#allocation38_spill] sm:$0xff] }
 0x4a1   : > { %14230 = vst [vmem:[#allocation29_spill] sm:$0xff] %v9465_v27  ;;  %v9470_v12 = vsel %vm1483_vm13, -inf, %v14231_v49  ;;  %7562 = vmatprep.mubr.msk.f32.mxu0 %vm1483_vm13, %v14215_v63  ;;  %v9474_v42 = vsel %vm1482_vm14, -inf, %v14233_v21  ;;  %v1374_v49 = vshll.u32 %v1373_v41, 16  ;;  %v1389_v21 = vcvt.f32.s32 %v9326_v18  ;;  %v14255_v41 = vld [vmem:[#allocation13_spill] sm:$0xff]  ;;  %v14295_v27 = vld [vmem:[#allocation48_spill] sm:$0xff] }
 0x4a2   : > { %14232 = vst [vmem:[#allocation31_spill] sm:$0xff] %v9470_v12  ;;  %14234 = vst [vmem:[#allocation30_spill] sm:$0xff] %v9474_v42  ;;  %v1327_v56 = vadd.s32 %v1326_v2, %v1324_v10  ;;  %7563 = vmatmul.mubr.msk.f32.gmra.mrb[74].mxu0 %vm1482_vm14, %v14215_v63  ;;  %v1669_v13 = vmax.f32 %v9474_v42, %v9470_v12  ;;  %v965_v10 = vsel %vm954_vm1, %v14247_v23, 0 }
 0x4a3   : > { %v1339_v7 = vpop.xlane.xlu1 %1338 }
 0x4a4   : > { %v9485_v59 = vsel %vm1504_vm2, %v1327_v56, %v963_v35  ;;  %v1340_v38 = vcvt.f32.s32 %v1339_v7  ;;  %1670 = vmax.xlane.f32.xlu1 %v1669_v13  ;;  %vm1485_vm15 = vcmp.eq.s32.totalorder %v8514_v0, %v1327_v56  ;;  %vm1484_vm0 = vcmp.eq.s32.totalorder %v8511_v62, %v1327_v56  ;;  %v14249_v35 = vld [vmem:[#allocation40_spill] sm:$0xff] }
 0x4a5   : > { %14236 = vst [vmem:[#allocation32_spill] sm:$0xff] %v9485_v59  ;;  %v9490_v46 = vsel %vm1485_vm15, -inf, %v14237_v36  ;;  %7564 = vmatprep.mubr.msk.f32.mxu0 %vm1485_vm15, %v14215_v63  ;;  %v9494_v24 = vsel %vm1484_vm0, -inf, %v14239_v37  ;;  %v14253_v36 = vld [vmem:[#allocation41_spill] sm:$0xff] }
 0x4a6   : > { %14238 = vst [vmem:[#allocation34_spill] sm:$0xff] %v9490_v46  ;;  %14240 = vst [vmem:[#allocation33_spill] sm:$0xff] %v9494_v24  ;;  %v1343_v8 = vadd.s32 %v1342_v30, %v1340_v38  ;;  %7565 = vmatmul.mubr.msk.f32.gmra.mrb[76].mxu0 %vm1484_vm0, %v14215_v63  ;;  %v1672_v40 = vmax.f32 %v9494_v24, %v9490_v46  ;;  %v966_v37 = vsel %vm954_vm1, %v14253_v36, 0  ;;  %v14265_v36 = vld [vmem:[#allocation43_spill] sm:$0xff] }
 0x4a7   : > { %v1355_v34 = vpop.xlane.xlu0 %1354 }
 0x4a8   : > { %v9505_v53 = vsel %vm1504_vm2, %v1343_v8, %v964_v47  ;;  %v1356_v3 = vcvt.f32.s32 %v1355_v34  ;;  %1673 = vmax.xlane.f32.xlu0 %v1672_v40  ;;  %vm1487_vm3 = vcmp.eq.s32.totalorder %v8514_v0, %v1343_v8  ;;  %vm1486_vm4 = vcmp.eq.s32.totalorder %v8511_v62, %v1343_v8 }
 0x4a9   : > { %14242 = vst [vmem:[#allocation35_spill] sm:$0xff] %v9505_v53  ;;  %v9510_v60 = vsel %vm1487_vm3, -inf, %v14243_v11  ;;  %7566 = vmatprep.mubr.msk.f32.mxu0 %vm1487_vm3, %v14215_v63  ;;  %v9514_v2 = vsel %vm1486_vm4, -inf, %v14245_v4  ;;  %v1390_v8 = vshll.u32 %v1389_v21, 16  ;;  %v1405_v40 = vcvt.f32.s32 %v9331_v5 }
 0x4aa   : > { %14244 = vst [vmem:[#allocation37_spill] sm:$0xff] %v9510_v60  ;;  %14246 = vst [vmem:[#allocation36_spill] sm:$0xff] %v9514_v2  ;;  %v1359_v14 = vadd.s32 %v1358_v43, %v1356_v3  ;;  %7567 = vmatmul.mubr.msk.f32.gmra.mrb[78].mxu0 %vm1486_vm4, %v14215_v63  ;;  %v1675_v1 = vmax.f32 %v9514_v2, %v9510_v60  ;;  %v14257_v3 = vld [vmem:[#allocation12_spill] sm:$0xff] }
 0x4ab   : > { %v1371_v56 = vpop.xlane.xlu1 %1370  ;;  %v1406_v23 = vshll.u32 %v1405_v40, 16  ;;  %v1437_v40 = vcvt.f32.s32 %v9341_v26 }
 0x4ac   : > { %v9525_v13 = vsel %vm1504_vm2, %v1359_v14, %v965_v10  ;;  %v1372_v33 = vcvt.f32.s32 %v1371_v56  ;;  %1676 = vmax.xlane.f32.xlu1 %v1675_v1  ;;  %vm1489_vm5 = vcmp.eq.s32.totalorder %v8514_v0, %v1359_v14  ;;  %vm1488_vm6 = vcmp.eq.s32.totalorder %v8511_v62, %v1359_v14  ;;  %v14259_v14 = vld [vmem:[#allocation42_spill] sm:$0xff] }
 0x4ad   : > { %14248 = vst [vmem:[#allocation38_spill] sm:$0xff] %v9525_v13  ;;  %v9530_v30 = vsel %vm1489_vm5, -inf, %v14249_v35  ;;  %7568 = vmatprep.mubr.msk.f32.mxu0 %vm1489_vm5, %v14215_v63  ;;  %v9534_v7 = vsel %vm1488_vm6, -inf, %v14251_v16  ;;  %v967_v1 = vsel %vm954_vm1, %v14259_v14, 0  ;;  %v1421_v10 = vcvt.f32.s32 %v9336_v15  ;;  %v14263_v16 = vld [vmem:[#allocation14_spill] sm:$0xff] }
 0x4ae   : > { %14250 = vst [vmem:[#allocation40_spill] sm:$0xff] %v9530_v30  ;;  %14252 = vst [vmem:[#allocation39_spill] sm:$0xff] %v9534_v7  ;;  %v1375_v18 = vadd.s32 %v1374_v49, %v1372_v33  ;;  %7569 = vmatmul.mubr.msk.f32.gmra.mrb[80].mxu0 %vm1488_vm6, %v14215_v63  ;;  %v1678_v38 = vmax.f32 %v9534_v7, %v9530_v30  ;;  %v14261_v33 = vld [vmem:[#allocation15_spill] sm:$0xff] }
 0x4af   : > { %v1387_v20 = vpop.xlane.xlu0 %1386 }
 0x4b0   : > { %v9545_v47 = vsel %vm1504_vm2, %v1375_v18, %v966_v37  ;;  %v1388_v43 = vcvt.f32.s32 %v1387_v20  ;;  %1679 = vmax.xlane.f32.xlu0 %v1678_v38  ;;  %vm1491_vm7 = vcmp.eq.s32.totalorder %v8514_v0, %v1375_v18  ;;  %vm1490_vm8 = vcmp.eq.s32.totalorder %v8511_v62, %v1375_v18 }
 0x4b1   : > { %14254 = vst [vmem:[#allocation41_spill] sm:$0xff] %v9545_v47  ;;  %v9550_v34 = vsel %vm1491_vm7, -inf, %v14255_v41  ;;  %7570 = vmatprep.mubr.msk.f32.mxu0 %vm1491_vm7, %v14215_v63  ;;  %v9554_v11 = vsel %vm1490_vm8, -inf, %v14257_v3  ;;  %v968_v37 = vsel %vm954_vm1, %v14265_v36, 0  ;;  %v14267_v3 = vld [vmem:[#allocation17_spill] sm:$0xff] }
 0x4b2   : > { %14256 = vst [vmem:[#allocation13_spill] sm:$0xff] %v9550_v34  ;;  %14258 = vst [vmem:[#allocation12_spill] sm:$0xff] %v9554_v11  ;;  %v1391_v5 = vadd.s32 %v1390_v8, %v1388_v43  ;;  %7571 = vmatmul.mubr.msk.f32.gmra.mrb[82].mxu0 %vm1490_vm8, %v14215_v63  ;;  %v1681_v4 = vmax.f32 %v9554_v11, %v9550_v34  ;;  %v1422_v8 = vshll.u32 %v1421_v10, 16 }
 0x4b3   : > { %v1403_v49 = vpop.xlane.xlu1 %1402 }
 0x4b4   : > { %v9565_v21 = vsel %vm1504_vm2, %v1391_v5, %v967_v1  ;;  %v1404_v56 = vcvt.f32.s32 %v1403_v49  ;;  %1682 = vmax.xlane.f32.xlu1 %v1681_v4  ;;  %vm1493_vm9 = vcmp.eq.s32.totalorder %v8514_v0, %v1391_v5  ;;  %vm1492_vm10 = vcmp.eq.s32.totalorder %v8511_v62, %v1391_v5  ;;  %v14269_v4 = vld [vmem:[#allocation16_spill] sm:$0xff] }
 0x4b5   : > { %14260 = vst [vmem:[#allocation42_spill] sm:$0xff] %v9565_v21  ;;  %v9570_v35 = vsel %vm1493_vm9, -inf, %v14261_v33  ;;  %7572 = vmatprep.mubr.msk.f32.mxu0 %vm1493_vm9, %v14215_v63  ;;  %v9574_v18 = vsel %vm1492_vm10, -inf, %v14263_v16  ;;  %v1438_v49 = vshll.u32 %v1437_v40, 16 }
 0x4b6   : > { %14262 = vst [vmem:[#allocation15_spill] sm:$0xff] %v9570_v35  ;;  %14264 = vst [vmem:[#allocation14_spill] sm:$0xff] %v9574_v18  ;;  %v1407_v15 = vadd.s32 %v1406_v23, %v1404_v56  ;;  %7573 = vmatmul.mubr.msk.f32.gmra.mrb[84].mxu0 %vm1492_vm10, %v14215_v63  ;;  %v1684_v38 = vmax.f32 %v9574_v18, %v9570_v35  ;;  %v14271_v23 = vld [vmem:[#allocation44_spill] sm:$0xff]  ;;  %v1453_v56 = vcvt.f32.s32 %v9346_v25 }
 0x4b7   : > { %v1419_v20 = vpop.xlane.xlu0 %1418  ;;  %v969_v10 = vsel %vm954_vm1, %v14271_v23, 0 }
 0x4b8   : > { %v9585_v43 = vsel %vm1504_vm2, %v1407_v15, %v968_v37  ;;  %v1420_v41 = vcvt.f32.s32 %v1419_v20  ;;  %1685 = vmax.xlane.f32.xlu0 %v1684_v38  ;;  %vm1495_vm11 = vcmp.eq.s32.totalorder %v8514_v0, %v1407_v15  ;;  %vm1494_vm12 = vcmp.eq.s32.totalorder %v8511_v62, %v1407_v15  ;;  %v14273_v38 = vld [vmem:[#allocation19_spill] sm:$0xff]  ;;  %v14275_v37 = vld [vmem:[#allocation18_spill] sm:$0xff]  ;;  %v14277_v20 = vld [vmem:[#allocation45_spill] sm:$0xff] }
 0x4b9   : > { %14266 = vst [vmem:[#allocation43_spill] sm:$0xff] %v9585_v43  ;;  %v9590_v5 = vsel %vm1495_vm11, -inf, %v14267_v3  ;;  %7574 = vmatprep.mubr.msk.f32.mxu0 %vm1495_vm11, %v14215_v63  ;;  %v9594_v14 = vsel %vm1494_vm12, -inf, %v14269_v4  ;;  %v1454_v3 = vshll.u32 %v1453_v56, 16  ;;  %v1469_v4 = vcvt.f32.s32 %v9351_v50 }
 0x4ba   : > { %14268 = vst [vmem:[#allocation17_spill] sm:$0xff] %v9590_v5  ;;  %14270 = vst [vmem:[#allocation16_spill] sm:$0xff] %v9594_v14  ;;  %v1423_v26 = vadd.s32 %v1422_v8, %v1420_v41  ;;  %7575 = vmatmul.mubr.msk.f32.gmra.mrb[86].mxu0 %vm1494_vm12, %v14215_v63  ;;  %v1687_v1 = vmax.f32 %v9594_v14, %v9590_v5  ;;  %v970_v41 = vsel %vm954_vm1, %v14277_v20, 0 }
 0x4bb   : > { %v1435_v33 = vpop.xlane.xlu1 %1434 }
 0x4bc   : > { %v9605_v16 = vsel %vm1504_vm2, %v1423_v26, %v969_v10  ;;  %v1436_v15 = vcvt.f32.s32 %v1435_v33  ;;  %1688 = vmax.xlane.f32.xlu1 %v1687_v1  ;;  %vm1497_vm13 = vcmp.eq.s32.totalorder %v8514_v0, %v1423_v26  ;;  %vm1496_vm14 = vcmp.eq.s32.totalorder %v8511_v62, %v1423_v26  ;;  %v14279_v10 = vld [vmem:[#allocation21_spill] sm:$0xff]  ;;  %v14281_v33 = vld [vmem:[#allocation20_spill] sm:$0xff] }
 0x4bd   : > { %14272 = vst [vmem:[#allocation44_spill] sm:$0xff] %v9605_v16  ;;  %v9610_v36 = vsel %vm1497_vm13, -inf, %v14273_v38  ;;  %7576 = vmatprep.mubr.msk.f32.mxu0 %vm1497_vm13, %v14215_v63  ;;  %v9614_v8 = vsel %vm1496_vm14, -inf, %v14275_v37  ;;  %v14283_v38 = vld [vmem:[#allocation46_spill] sm:$0xff] }
 0x4be   : > { %14274 = vst [vmem:[#allocation19_spill] sm:$0xff] %v9610_v36  ;;  %14276 = vst [vmem:[#allocation18_spill] sm:$0xff] %v9614_v8  ;;  %v1439_v25 = vadd.s32 %v1438_v49, %v1436_v15  ;;  %7577 = vmatmul.mubr.msk.f32.gmra.mrb[88].mxu0 %vm1496_vm14, %v14215_v63  ;;  %v1690_v40 = vmax.f32 %v9614_v8, %v9610_v36  ;;  %v971_v37 = vsel %vm954_vm1, %v14283_v38, 0  ;;  %v14289_v38 = vld [vmem:[#allocation47_spill] sm:$0xff] }
 0x4bf   : > { %v1451_v26 = vpop.xlane.xlu0 %1450 }
 0x4c0   : > { %v9625_v1 = vsel %vm1504_vm2, %v1439_v25, %v970_v41  ;;  %v1452_v23 = vcvt.f32.s32 %v1451_v26  ;;  %1691 = vmax.xlane.f32.xlu0 %v1690_v40  ;;  %vm1499_vm15 = vcmp.eq.s32.totalorder %v8514_v0, %v1439_v25  ;;  %vm1498_vm0 = vcmp.eq.s32.totalorder %v8511_v62, %v1439_v25 }
 0x4c1   : > { %14278 = vst [vmem:[#allocation45_spill] sm:$0xff] %v9625_v1  ;;  %v9630_v49 = vsel %vm1499_vm15, -inf, %v14279_v10  ;;  %7578 = vmatprep.mubr.msk.f32.mxu0 %vm1499_vm15, %v14215_v63  ;;  %v9634_v56 = vsel %vm1498_vm0, -inf, %v14281_v33  ;;  %v1470_v40 = vshll.u32 %v1469_v4, 16 }
 0x4c2   : > { %14280 = vst [vmem:[#allocation21_spill] sm:$0xff] %v9630_v49  ;;  %14282 = vst [vmem:[#allocation20_spill] sm:$0xff] %v9634_v56  ;;  %v1455_v50 = vadd.s32 %v1454_v3, %v1452_v23  ;;  %7579 = vmatmul.mubr.msk.f32.gmra.mrb[90].mxu0 %vm1498_vm0, %v14215_v63  ;;  %v1693_v15 = vmax.f32 %v9634_v56, %v9630_v49  ;;  %v14285_v3 = vld [vmem:[#allocation23_spill] sm:$0xff]  ;;  %v14287_v23 = vld [vmem:[#allocation22_spill] sm:$0xff] }
 0x4c3   : > { %v1467_v25 = vpop.xlane.xlu1 %1466 }
 0x4c4   : > { %v9644_v20 = vsel %vm1504_vm2, %v1455_v50, %v971_v37  ;;  %v1468_v41 = vcvt.f32.s32 %v1467_v25  ;;  %1694 = vmax.xlane.f32.xlu1 %v1693_v15  ;;  %vm1501_vm3 = vcmp.eq.s32.totalorder %v8514_v0, %v1455_v50  ;;  %vm1500_vm4 = vcmp.eq.s32.totalorder %v8511_v62, %v1455_v50  ;;  %v14291_v37 = vld [vmem:[#allocation25_spill] sm:$0xff]  ;;  %v14293_v25 = vld [vmem:[#allocation24_spill] sm:$0xff] }
 0x4c5   : > { %14284 = vst [vmem:[#allocation46_spill] sm:$0xff] %v9644_v20  ;;  %v9649_v26 = vsel %vm1501_vm3, -inf, %v14285_v3  ;;  %7580 = vmatprep.mubr.msk.f32.mxu0 %vm1501_vm3, %v14215_v63  ;;  %v9653_v10 = vsel %vm1500_vm4, -inf, %v14287_v23  ;;  %v972_v15 = vsel %vm954_vm1, %v14289_v38, 0 }
 0x4c6   : > { %14286 = vst [vmem:[#allocation23_spill] sm:$0xff] %v9649_v26  ;;  %14288 = vst [vmem:[#allocation22_spill] sm:$0xff] %v9653_v10  ;;  %v1471_v4 = vadd.s32 %v1470_v40, %v1468_v41  ;;  %7581 = vmatmul.mubr.msk.f32.gmra.mrb[92].mxu0 %vm1500_vm4, %v14215_v63  ;;  %v1696_v33 = vmax.f32 %v9653_v10, %v9649_v26 }
 0x4c8   : > { %v9663_v50 = vsel %vm1504_vm2, %v1471_v4, %v972_v15  ;;  %1697 = vmax.xlane.f32.xlu0 %v1696_v33  ;;  %vm1503_vm5 = vcmp.eq.s32.totalorder %v8514_v0, %v1471_v4  ;;  %vm1502_vm6 = vcmp.eq.s32.totalorder %v8511_v62, %v1471_v4 }
 0x4c9   : > { %14290 = vst [vmem:[#allocation47_spill] sm:$0xff] %v9663_v50  ;;  %v9668_v40 = vsel %vm1503_vm5, -inf, %v14291_v37  ;;  %7582 = vmatprep.mubr.msk.f32.mxu0 %vm1503_vm5, %v14215_v63  ;;  %v9672_v41 = vsel %vm1502_vm6, -inf, %v14293_v25 }
 0x4ca   : > { %14292 = vst [vmem:[#allocation25_spill] sm:$0xff] %v9668_v40  ;;  %14294 = vst [vmem:[#allocation24_spill] sm:$0xff] %v9672_v41  ;;  %7583 = vmatmul.mubr.msk.f32.gmra.mrb[94].mxu0 %vm1502_vm6, %v14215_v63  ;;  %v1699_v3 = vmax.f32 %v9672_v41, %v9668_v40 }
 0x4cc   : > { %1700 = vmax.xlane.f32.xlu1 %v1699_v3 }
 0x51d   : > { %v1656_v23 = vpop.xlane.xlu0 %1655 }
 0x51e   : > { %vm1702_vm1 = vcmp.eq.f32.partialorder %v9371_v61, %v1656_v23  ;;  %vm1703_vm2 = vcmp.eq.f32.partialorder %v9374_v32, %v1656_v23 }
 0x51f   : > { %v1734_v4 = vsel %vm1702_vm1, %v8511_v62, 256  ;;  %v1735_v33 = vsel %vm1703_vm2, %v8514_v0, 256 }
 0x520   : > { %vm1766_vm7 = vcmp.lt.s32.totalorder %v1734_v4, %v1735_v33 }
 0x521   : > { %v1659_v38 = vpop.xlane.xlu1 %1658  ;;  %v9681_v15 = vsel %vm1766_vm7, %v1734_v4, %v1735_v33 }
 0x522   : > { %vm1704_vm8 = vcmp.eq.f32.partialorder %v9391_v9, %v1659_v38  ;;  %vm1705_vm9 = vcmp.eq.f32.partialorder %v9394_v6, %v1659_v38  ;;  %v1769_v37 = vshra.s32 %v9681_v15, 16 }
 0x523   : > { %v1736_v25 = vsel %vm1704_vm8, %v8511_v62, 256  ;;  %v1737_v3 = vsel %vm1705_vm9, %v8514_v0, 256 }
 0x524   : > { %vm1782_vm10 = vcmp.lt.s32.totalorder %v1736_v25, %v1737_v3  ;;  %v9688_v23 = vcvt.s32.f32 %v1769_v37 }
 0x525   : > { %v1662_v50 = vpop.xlane.xlu0 %1661  ;;  %v9690_v20 = vsel %vm1782_vm10, %v1736_v25, %v1737_v3 }
 0x526   : > { %vm1706_vm11 = vcmp.eq.f32.partialorder %v9414_v45, %v1662_v50  ;;  %vm1707_vm12 = vcmp.eq.f32.partialorder %v9410_v19, %v1662_v50  ;;  %1772 = vmin.xlane.f32.xlu0 %v9688_v23  ;;  %v1785_v4 = vshra.s32 %v9690_v20, 16 }
 0x527   : > { %v1738_v33 = vsel %vm1706_vm11, %v8511_v62, 256  ;;  %v1739_v38 = vsel %vm1707_vm12, %v8514_v0, 256 }
 0x528   : > { %vm1798_vm13 = vcmp.lt.s32.totalorder %v1738_v33, %v1739_v38  ;;  %v9698_v1 = vcvt.s32.f32 %v1785_v4 }
 0x529   : > { %v1665_v37 = vpop.xlane.xlu1 %1664  ;;  %v9700_v16 = vsel %vm1798_vm13, %v1738_v33, %v1739_v38 }
 0x52a   : > { %vm1708_vm14 = vcmp.eq.f32.partialorder %v9434_v22, %v1665_v37  ;;  %vm1709_vm15 = vcmp.eq.f32.partialorder %v9430_v57, %v1665_v37  ;;  %1788 = vmin.xlane.f32.xlu1 %v9698_v1  ;;  %v1801_v50 = vshra.s32 %v9700_v16, 16  ;;  %v14297_v57 = vld [vmem:[#allocation49_spill] sm:$0xff] }
 0x52b   : > { %v1740_v25 = vsel %vm1708_vm14, %v8511_v62, 256  ;;  %v1741_v3 = vsel %vm1709_vm15, %v8514_v0, 256 }
 0x52c   : > { %vm1814_vm0 = vcmp.lt.s32.totalorder %v1740_v25, %v1741_v3  ;;  %v9708_v43 = vcvt.s32.f32 %v1801_v50 }
 0x52d   : > { %v1668_v4 = vpop.xlane.xlu0 %1667  ;;  %v9710_v21 = vsel %vm1814_vm0, %v1740_v25, %v1741_v3 }
 0x52e   : > { %vm1710_vm3 = vcmp.eq.f32.partialorder %v9454_v48, %v1668_v4  ;;  %vm1711_vm4 = vcmp.eq.f32.partialorder %v9450_v17, %v1668_v4  ;;  %1804 = vmin.xlane.f32.xlu0 %v9708_v43  ;;  %v1817_v33 = vshra.s32 %v9710_v21, 16  ;;  %v6609_v48 = vmax.f32 %v14295_v27, 0.0 }
 0x52f   : > { %v1742_v38 = vsel %vm1710_vm3, %v8511_v62, 256  ;;  %v1743_v37 = vsel %vm1711_vm4, %v8514_v0, 256  ;;  %v6611_v27 = vmax.f32 %v14299_v31, 0.0 }
 0x530   : > { %vm1830_vm5 = vcmp.lt.s32.totalorder %v1742_v38, %v1743_v37  ;;  %v9718_v47 = vcvt.s32.f32 %v1817_v33 }
 0x531   : > { %v1671_v50 = vpop.xlane.xlu1 %1670  ;;  %v9720_v13 = vsel %vm1830_vm5, %v1742_v38, %v1743_v37 }
 0x532   : > { %vm1712_vm6 = vcmp.eq.f32.partialorder %v9474_v42, %v1671_v50  ;;  %vm1713_vm1 = vcmp.eq.f32.partialorder %v9470_v12, %v1671_v50  ;;  %1820 = vmin.xlane.f32.xlu1 %v9718_v47  ;;  %v1833_v25 = vshra.s32 %v9720_v13, 16 }
 0x533   : > { %v1744_v3 = vsel %vm1712_vm6, %v8511_v62, 256  ;;  %v1745_v4 = vsel %vm1713_vm1, %v8514_v0, 256 }
 0x534   : > { %vm1846_vm2 = vcmp.lt.s32.totalorder %v1744_v3, %v1745_v4  ;;  %v9728_v53 = vcvt.s32.f32 %v1833_v25 }
 0x535   : > { %v1674_v33 = vpop.xlane.xlu0 %1673  ;;  %v9730_v59 = vsel %vm1846_vm2, %v1744_v3, %v1745_v4 }
 0x536   : > { %vm1714_vm7 = vcmp.eq.f32.partialorder %v9494_v24, %v1674_v33  ;;  %vm1715_vm8 = vcmp.eq.f32.partialorder %v9490_v46, %v1674_v33  ;;  %1836 = vmin.xlane.f32.xlu0 %v9728_v53  ;;  %v1849_v38 = vshra.s32 %v9730_v59, 16 }
 0x537   : > { %v1746_v37 = vsel %vm1714_vm7, %v8511_v62, 256  ;;  %v1747_v50 = vsel %vm1715_vm8, %v8514_v0, 256 }
 0x538   : > { %vm1862_vm9 = vcmp.lt.s32.totalorder %v1746_v37, %v1747_v50  ;;  %v9738_v42 = vcvt.s32.f32 %v1849_v38 }
 0x539   : > { %v1677_v25 = vpop.xlane.xlu1 %1676  ;;  %v9740_v12 = vsel %vm1862_vm9, %v1746_v37, %v1747_v50 }
 0x53a   : > { %vm1716_vm10 = vcmp.eq.f32.partialorder %v9514_v2, %v1677_v25  ;;  %vm1717_vm11 = vcmp.eq.f32.partialorder %v9510_v60, %v1677_v25  ;;  %1852 = vmin.xlane.f32.xlu1 %v9738_v42  ;;  %v1865_v3 = vshra.s32 %v9740_v12, 16 }
 0x53b   : > { %v1748_v4 = vsel %vm1716_vm10, %v8511_v62, 256  ;;  %v1749_v33 = vsel %vm1717_vm11, %v8514_v0, 256 }
 0x53c   : > { %vm1878_vm12 = vcmp.lt.s32.totalorder %v1748_v4, %v1749_v33  ;;  %v9748_v24 = vcvt.s32.f32 %v1865_v3 }
 0x53d   : > { %v1680_v38 = vpop.xlane.xlu0 %1679  ;;  %v9750_v46 = vsel %vm1878_vm12, %v1748_v4, %v1749_v33 }
 0x53e   : > { %vm1718_vm13 = vcmp.eq.f32.partialorder %v9534_v7, %v1680_v38  ;;  %vm1719_vm14 = vcmp.eq.f32.partialorder %v9530_v30, %v1680_v38  ;;  %1868 = vmin.xlane.f32.xlu0 %v9748_v24  ;;  %v1881_v37 = vshra.s32 %v9750_v46, 16 }
 0x53f   : > { %v1750_v50 = vsel %vm1718_vm13, %v8511_v62, 256  ;;  %v1751_v25 = vsel %vm1719_vm14, %v8514_v0, 256 }
 0x540   : > { %vm1894_vm15 = vcmp.lt.s32.totalorder %v1750_v50, %v1751_v25  ;;  %v9758_v2 = vcvt.s32.f32 %v1881_v37 }
 0x541   : > { %v1683_v3 = vpop.xlane.xlu1 %1682  ;;  %v9760_v60 = vsel %vm1894_vm15, %v1750_v50, %v1751_v25 }
 0x542   : > { %vm1720_vm0 = vcmp.eq.f32.partialorder %v9554_v11, %v1683_v3  ;;  %vm1721_vm3 = vcmp.eq.f32.partialorder %v9550_v34, %v1683_v3  ;;  %1884 = vmin.xlane.f32.xlu1 %v9758_v2  ;;  %v1897_v4 = vshra.s32 %v9760_v60, 16 }
 0x543   : > { %v1752_v33 = vsel %vm1720_vm0, %v8511_v62, 256  ;;  %v1753_v38 = vsel %vm1721_vm3, %v8514_v0, 256 }
 0x544   : > { %vm1910_vm4 = vcmp.lt.s32.totalorder %v1752_v33, %v1753_v38  ;;  %v9768_v7 = vcvt.s32.f32 %v1897_v4 }
 0x545   : > { %v1686_v37 = vpop.xlane.xlu0 %1685  ;;  %v9770_v30 = vsel %vm1910_vm4, %v1752_v33, %v1753_v38 }
 0x546   : > { %vm1722_vm5 = vcmp.eq.f32.partialorder %v9574_v18, %v1686_v37  ;;  %vm1723_vm6 = vcmp.eq.f32.partialorder %v9570_v35, %v1686_v37  ;;  %1900 = vmin.xlane.f32.xlu0 %v9768_v7  ;;  %v1913_v50 = vshra.s32 %v9770_v30, 16 }
 0x547   : > { %v1754_v25 = vsel %vm1722_vm5, %v8511_v62, 256  ;;  %v1755_v3 = vsel %vm1723_vm6, %v8514_v0, 256 }
 0x548   : > { %vm1926_vm1 = vcmp.lt.s32.totalorder %v1754_v25, %v1755_v3  ;;  %v9778_v11 = vcvt.s32.f32 %v1913_v50 }
 0x549   : > { %v1689_v4 = vpop.xlane.xlu1 %1688  ;;  %v9780_v34 = vsel %vm1926_vm1, %v1754_v25, %v1755_v3 }
 0x54a   : > { %vm1724_vm2 = vcmp.eq.f32.partialorder %v9594_v14, %v1689_v4  ;;  %vm1725_vm7 = vcmp.eq.f32.partialorder %v9590_v5, %v1689_v4  ;;  %1916 = vmin.xlane.f32.xlu1 %v9778_v11  ;;  %v1929_v33 = vshra.s32 %v9780_v34, 16 }
 0x54b   : > { %v1756_v38 = vsel %vm1724_vm2, %v8511_v62, 256  ;;  %v1757_v37 = vsel %vm1725_vm7, %v8514_v0, 256 }
 0x54c   : > { %vm1942_vm8 = vcmp.lt.s32.totalorder %v1756_v38, %v1757_v37  ;;  %v9788_v18 = vcvt.s32.f32 %v1929_v33 }
 0x54d   : > { %v1692_v50 = vpop.xlane.xlu0 %1691  ;;  %v9790_v35 = vsel %vm1942_vm8, %v1756_v38, %v1757_v37 }
 0x54e   : > { %vm1726_vm9 = vcmp.eq.f32.partialorder %v9614_v8, %v1692_v50  ;;  %vm1727_vm10 = vcmp.eq.f32.partialorder %v9610_v36, %v1692_v50  ;;  %1932 = vmin.xlane.f32.xlu0 %v9788_v18  ;;  %v1945_v25 = vshra.s32 %v9790_v35, 16 }
 0x54f   : > { %v1758_v3 = vsel %vm1726_vm9, %v8511_v62, 256  ;;  %v1759_v4 = vsel %vm1727_vm10, %v8514_v0, 256 }
 0x550   : > { %vm1958_vm11 = vcmp.lt.s32.totalorder %v1758_v3, %v1759_v4  ;;  %v9798_v14 = vcvt.s32.f32 %v1945_v25 }
 0x551   : > { %v1695_v33 = vpop.xlane.xlu1 %1694  ;;  %v9800_v5 = vsel %vm1958_vm11, %v1758_v3, %v1759_v4 }
 0x552   : > { %vm1728_vm12 = vcmp.eq.f32.partialorder %v9634_v56, %v1695_v33  ;;  %vm1729_vm13 = vcmp.eq.f32.partialorder %v9630_v49, %v1695_v33  ;;  %1948 = vmin.xlane.f32.xlu1 %v9798_v14  ;;  %v1961_v38 = vshra.s32 %v9800_v5, 16 }
 0x553   : > { %v1760_v37 = vsel %vm1728_vm12, %v8511_v62, 256  ;;  %v1761_v50 = vsel %vm1729_vm13, %v8514_v0, 256 }
 0x554   : > { %vm1974_vm14 = vcmp.lt.s32.totalorder %v1760_v37, %v1761_v50  ;;  %v9808_v8 = vcvt.s32.f32 %v1961_v38 }
 0x555   : > { %v1698_v25 = vpop.xlane.xlu0 %1697  ;;  %v9810_v36 = vsel %vm1974_vm14, %v1760_v37, %v1761_v50 }
 0x556   : > { %vm1730_vm15 = vcmp.eq.f32.partialorder %v9653_v10, %v1698_v25  ;;  %vm1731_vm0 = vcmp.eq.f32.partialorder %v9649_v26, %v1698_v25  ;;  %1964 = vmin.xlane.f32.xlu0 %v9808_v8  ;;  %v1977_v3 = vshra.s32 %v9810_v36, 16 }
 0x557   : > { %v1762_v4 = vsel %vm1730_vm15, %v8511_v62, 256  ;;  %v1763_v33 = vsel %vm1731_vm0, %v8514_v0, 256 }
 0x558   : > { %vm1990_vm3 = vcmp.lt.s32.totalorder %v1762_v4, %v1763_v33  ;;  %v9818_v56 = vcvt.s32.f32 %v1977_v3 }
 0x559   : > { %v1701_v38 = vpop.xlane.xlu1 %1700  ;;  %v9820_v49 = vsel %vm1990_vm3, %v1762_v4, %v1763_v33 }
 0x55a   : > { %vm1732_vm4 = vcmp.eq.f32.partialorder %v9672_v41, %v1701_v38  ;;  %vm1733_vm5 = vcmp.eq.f32.partialorder %v9668_v40, %v1701_v38  ;;  %1980 = vmin.xlane.f32.xlu1 %v9818_v56  ;;  %v1993_v37 = vshra.s32 %v9820_v49, 16  ;;  %v7954_v41 = vld [vmem:[%s9216_s12] sm:$0xff] }
 0x55b   : > { %v1764_v50 = vsel %vm1732_vm4, %v8511_v62, 256  ;;  %v1765_v25 = vsel %vm1733_vm5, %v8514_v0, 256 }
 0x55c   : > { %vm2006_vm6 = vcmp.lt.s32.totalorder %v1764_v50, %v1765_v25  ;;  %v9828_v3 = vcvt.s32.f32 %v1993_v37 }
 0x55d   : > { %v9830_v10 = vsel %vm2006_vm6, %v1764_v50, %v1765_v25  ;;  %v7955_v25 = vld [vmem:[%s9216_s12 + $0x8] sm:$0xff] }
 0x55e   : > { %1996 = vmin.xlane.f32.xlu0 %v9828_v3  ;;  %v2009_v4 = vshra.s32 %v9830_v10, 16 }
 0x560   : > { %v9834_v33 = vcvt.s32.f32 %v2009_v4  ;;  %v6610_v4 = vmax.f32 %v14297_v57, 0.0 }
 0x561   : > { %v5954_v38 = vpop.f32.mrb[64].mxu0 }
 0x562   : > { %v6641_v40 = vadd.f32 %v7954_v41, %v5954_v38  ;;  %v5956_v26 = vpop.f32.mrb[65].mxu0  ;;  %2012 = vmin.xlane.f32.xlu1 %v9834_v33 }
 0x563   : > { %v7956_v26 = vld [vmem:[%s9216_s12 + $0x10] sm:$0xff] }
 0x564   : > { %v6657_v17 = vmax.f32 %v6641_v40, 0.0 }
 0x565   : > { %v5959_v37 = vpop.f32.mrb[66].mxu0 }
 0x566   : > { %v9839_v50 = vadd.f32 %v6657_v17, %v6609_v48  ;;  %v6642_v29 = vadd.f32 %v7955_v25, %v5959_v37  ;;  %v5961_v22 = vpop.f32.mrb[67].mxu0  ;;  %v7957_v48 = vld [vmem:[%s9216_s12 + $0x18] sm:$0xff] }
 0x567   : > { %v14301_v25 = vld [vmem:[#allocation51_spill] sm:$0xff] }
 0x568   : > { %14296 = vst [vmem:[#allocation48_spill] sm:$0xff] %v9839_v50  ;;  %v6658_v52 = vmax.f32 %v6642_v29, 0.0  ;;  %v6612_v57 = vmax.f32 %v14301_v25, 0.0 }
 0x569   : > { %v5964_v45 = vpop.f32.mrb[68].mxu0 }
 0x56a   : > { %v9843_v19 = vadd.f32 %v6658_v52, %v6610_v4  ;;  %v6643_v41 = vadd.f32 %v7956_v26, %v5964_v45  ;;  %v5966_v38 = vpop.f32.mrb[69].mxu0  ;;  %v7958_v4 = vld [vmem:[%s9216_s12 + $0x20] sm:$0xff] }
 0x56b   : > { %v14303_v38 = vld [vmem:[#allocation52_spill] sm:$0xff] }
 0x56c   : > { %14298 = vst [vmem:[#allocation49_spill] sm:$0xff] %v9843_v19  ;;  %v6659_v40 = vmax.f32 %v6643_v41, 0.0  ;;  %v6613_v31 = vmax.f32 %v14303_v38, 0.0 }
 0x56d   : > { %v5969_v9 = vpop.f32.mrb[70].mxu0 }
 0x56e   : > { %v9847_v17 = vadd.f32 %v6659_v40, %v6611_v27  ;;  %v6644_v37 = vadd.f32 %v7957_v48, %v5969_v9  ;;  %v5971_v22 = vpop.f32.mrb[71].mxu0  ;;  %v7959_v40 = vld [vmem:[%s9216_s12 + $0x28] sm:$0xff] }
 0x56f   : > { %v14305_v22 = vld [vmem:[#allocation53_spill] sm:$0xff] }
 0x570   : > { %14300 = vst [vmem:[#allocation50_spill] sm:$0xff] %v9847_v17  ;;  %v6660_v29 = vmax.f32 %v6644_v37, 0.0  ;;  %v6614_v25 = vmax.f32 %v14305_v22, 0.0 }
 0x571   : > { %v5974_v50 = vpop.f32.mrb[72].mxu0 }
 0x572   : > { %v9851_v52 = vadd.f32 %v6660_v29, %v6612_v57  ;;  %v6645_v45 = vadd.f32 %v7958_v4, %v5974_v50  ;;  %v5976_v26 = vpop.f32.mrb[73].mxu0  ;;  %v7960_v29 = vld [vmem:[%s9216_s12 + $0x30] sm:$0xff] }
 0x573   : > { %v14307_v26 = vld [vmem:[#allocation54_spill] sm:$0xff] }
 0x574   : > { %14302 = vst [vmem:[#allocation51_spill] sm:$0xff] %v9851_v52  ;;  %v6661_v41 = vmax.f32 %v6645_v45, 0.0  ;;  %v6615_v38 = vmax.f32 %v14307_v26, 0.0 }
 0x575   : > { %v5979_v19 = vpop.f32.mrb[74].mxu0 }
 0x576   : > { %v9855_v27 = vadd.f32 %v6661_v41, %v6613_v31  ;;  %v6646_v9 = vadd.f32 %v7959_v40, %v5979_v19  ;;  %v5981_v48 = vpop.f32.mrb[75].mxu0  ;;  %v7961_v41 = vld [vmem:[%s9216_s12 + $0x38] sm:$0xff] }
 0x577   : > { %v14309_v48 = vld [vmem:[#allocation55_spill] sm:$0xff] }
 0x578   : > { %14304 = vst [vmem:[#allocation52_spill] sm:$0xff] %v9855_v27  ;;  %v6662_v37 = vmax.f32 %v6646_v9, 0.0  ;;  %v6616_v22 = vmax.f32 %v14309_v48, 0.0 }
 0x579   : > { %v5984_v17 = vpop.f32.mrb[76].mxu0 }
 0x57a   : > { %v9859_v57 = vadd.f32 %v6662_v37, %v6614_v25  ;;  %v6647_v50 = vadd.f32 %v7960_v29, %v5984_v17  ;;  %v5986_v4 = vpop.f32.mrb[77].mxu0  ;;  %v7962_v37 = vld [vmem:[%s9216_s12 + $0x40] sm:$0xff] }
 0x57b   : > { %v14311_v4 = vld [vmem:[#allocation56_spill] sm:$0xff] }
 0x57c   : > { %14306 = vst [vmem:[#allocation53_spill] sm:$0xff] %v9859_v57  ;;  %v6663_v45 = vmax.f32 %v6647_v50, 0.0  ;;  %v6617_v26 = vmax.f32 %v14311_v4, 0.0 }
 0x57d   : > { %v5989_v52 = vpop.f32.mrb[78].mxu0 }
 0x57e   : > { %v9863_v31 = vadd.f32 %v6663_v45, %v6615_v38  ;;  %v6648_v19 = vadd.f32 %v7961_v41, %v5989_v52  ;;  %v5991_v40 = vpop.f32.mrb[79].mxu0  ;;  %v7963_v45 = vld [vmem:[%s9216_s12 + $0x48] sm:$0xff] }
 0x57f   : > { %v14312_v40 = vld [vmem:[#allocation57_spill] sm:$0xff] }
 0x580   : > { %14308 = vst [vmem:[#allocation54_spill] sm:$0xff] %v9863_v31  ;;  %v6664_v9 = vmax.f32 %v6648_v19, 0.0  ;;  %v6618_v48 = vmax.f32 %v14312_v40, 0.0 }
 0x581   : > { %v5994_v27 = vpop.f32.mrb[80].mxu0 }
 0x582   : > { %v9867_v25 = vadd.f32 %v6664_v9, %v6616_v22  ;;  %v6649_v17 = vadd.f32 %v7962_v37, %v5994_v27  ;;  %v5996_v29 = vpop.f32.mrb[81].mxu0  ;;  %v7964_v9 = vld [vmem:[%s9216_s12 + $0x50] sm:$0xff] }
 0x583   : > { %v14313_v29 = vld [vmem:[#allocation58_spill] sm:$0xff] }
 0x584   : > { %14310 = vst [vmem:[#allocation55_spill] sm:$0xff] %v9867_v25  ;;  %v6665_v50 = vmax.f32 %v6649_v17, 0.0  ;;  %v6619_v4 = vmax.f32 %v14313_v29, 0.0 }
 0x585   : > { %v5999_v57 = vpop.f32.mrb[82].mxu0 }
 0x586   : > { %v9871_v38 = vadd.f32 %v6665_v50, %v6617_v26  ;;  %v6650_v52 = vadd.f32 %v7963_v45, %v5999_v57  ;;  %v6001_v41 = vpop.f32.mrb[83].mxu0  ;;  %v7965_v50 = vld [vmem:[%s9216_s12 + $0x58] sm:$0xff] }
 0x587   : > { %v6620_v41 = vmax.f32 %v9261_v28, 0.0  ;;  %v6622_v28 = vmax.f32 %v9267_v58, 0.0 }
 0x588   : > { %v6666_v19 = vmax.f32 %v6650_v52, 0.0 }
 0x589   : > { %v6004_v31 = vpop.f32.mrb[84].mxu0 }
 0x58a   : > { %v9875_v22 = vadd.f32 %v6666_v19, %v6618_v48  ;;  %v6651_v27 = vadd.f32 %v7964_v9, %v6004_v31  ;;  %v6006_v37 = vpop.f32.mrb[85].mxu0  ;;  %v7966_v19 = vld [vmem:[%s9216_s12 + $0x60] sm:$0xff] }
 0x58b   : > { %v6621_v37 = vmax.f32 %v9264_v44, 0.0 }
 0x58c   : > { %v6667_v17 = vmax.f32 %v6651_v27, 0.0 }
 0x58d   : > { %v6009_v25 = vpop.f32.mrb[86].mxu0 }
 0x58e   : > { %v9879_v26 = vadd.f32 %v6667_v17, %v6619_v4  ;;  %v6652_v57 = vadd.f32 %v7965_v50, %v6009_v25  ;;  %v6011_v45 = vpop.f32.mrb[87].mxu0  ;;  %v7967_v17 = vld [vmem:[%s9216_s12 + $0x68] sm:$0xff] }
 0x590   : > { %14314 = vst [vmem:[#allocation56_spill] sm:$0xff] %v9879_v26  ;;  %v6668_v52 = vmax.f32 %v6652_v57, 0.0 }
 0x591   : > { %v6014_v40 = vpop.f32.mrb[88].mxu0 }
 0x592   : > { %v9883_v48 = vadd.f32 %v6668_v52, %v6620_v41  ;;  %v6653_v31 = vadd.f32 %v7966_v19, %v6014_v40  ;;  %v6016_v9 = vpop.f32.mrb[89].mxu0  ;;  %v7968_v41 = vld [vmem:[%s9216_s12 + $0x70] sm:$0xff]  ;;  %v6623_v19 = vmax.f32 %v9270_v51, 0.0 }
 0x594   : > { %v6669_v27 = vmax.f32 %v6653_v31, 0.0 }
 0x595   : > { %v6019_v29 = vpop.f32.mrb[90].mxu0 }
 0x596   : > { %v9887_v4 = vadd.f32 %v6669_v27, %v6621_v37  ;;  %v6654_v25 = vadd.f32 %v7967_v17, %v6019_v29  ;;  %v6021_v50 = vpop.f32.mrb[91].mxu0  ;;  %v7969_v37 = vld [vmem:[%s9216_s12 + $0x78] sm:$0xff]  ;;  %v6624_v29 = vmax.f32 %v9273_v39, 0.0  ;;  %v1800_v39 = vand.u32 65535, %v9700_v16 }
 0x597   : > { %v1832_v16 = vand.u32 65535, %v9720_v13  ;;  %v1864_v13 = vand.u32 65535, %v9740_v12  ;;  %v1896_v12 = vand.u32 65535, %v9760_v60  ;;  %v1928_v60 = vand.u32 65535, %v9780_v34 }
 0x598   : > { %14315 = vst [vmem:[#allocation57_spill] sm:$0xff] %v9887_v4  ;;  %v6670_v57 = vmax.f32 %v6654_v25, 0.0  ;;  %v1768_v25 = vand.u32 65535, %v9681_v15  ;;  %v1960_v34 = vand.u32 65535, %v9800_v5  ;;  %v1992_v5 = vand.u32 65535, %v9820_v49 }
 0x599   : > { %v6024_v45 = vpop.f32.mrb[92].mxu0 }
 0x59a   : > { %v9891_v26 = vadd.f32 %v6670_v57, %v6622_v28  ;;  %v6655_v52 = vadd.f32 %v7968_v41, %v6024_v45  ;;  %v6026_v40 = vpop.f32.mrb[93].mxu0  ;;  %v1770_v28 = vcvt.s32.f32 %v1768_v25  ;;  %v1784_v57 = vand.u32 65535, %v9690_v20 }
 0x59b   : > { %v1816_v20 = vand.u32 65535, %v9710_v21  ;;  %v1848_v21 = vand.u32 65535, %v9730_v59  ;;  %v1880_v59 = vand.u32 65535, %v9750_v46  ;;  %v1912_v46 = vand.u32 65535, %v9770_v30 }
 0x59c   : > { %v6671_v44 = vmax.f32 %v6655_v52, 0.0  ;;  %v1802_v52 = vcvt.s32.f32 %v1800_v39  ;;  %v1944_v30 = vand.u32 65535, %v9790_v35  ;;  %v1976_v35 = vand.u32 65535, %v9810_v36 }
 0x59d   : > { %v6029_v31 = vpop.f32.mrb[94].mxu0  ;;  %v1914_v39 = vcvt.s32.f32 %v1912_v46  ;;  %v2008_v36 = vand.u32 65535, %v9830_v10 }
 0x59e   : > { %v9895_v9 = vadd.f32 %v6671_v44, %v6623_v19  ;;  %v6656_v27 = vadd.f32 %v7969_v37, %v6029_v31  ;;  %v6031_v4 = vpop.f32.mrb[95].mxu0  ;;  %v1818_v19 = vcvt.s32.f32 %v1816_v20  ;;  %v1834_v31 = vcvt.s32.f32 %v1832_v16 }
 0x59f   : > { %v1786_v4 = vcvt.s32.f32 %v1784_v57  ;;  %v1962_v16 = vcvt.s32.f32 %v1960_v34 }
 0x5a0   : > { %v6672_v17 = vmax.f32 %v6656_v27, 0.0  ;;  %v1850_v27 = vcvt.s32.f32 %v1848_v21 }
 0x5a2   : > { %v9899_v58 = vadd.f32 %v6672_v17, %v6624_v29  ;;  %v1866_v17 = vcvt.s32.f32 %v1864_v13  ;;  %v2010_v13 = vcvt.s32.f32 %v2008_v36  ;;  %v14324_v36 = vld [vmem:[#allocation63_spill] sm:$0xff] }
 0x5b3   : > { %v9902_v50 = vpop.xlane.xlu0 %1772 }
 0x5b4   : > { %vm1774_vm1 = vcmp.eq.f32.partialorder %v9688_v23, %v9902_v50 }
 0x5b5   : > { %v1775_v51 = vsel %vm1774_vm1, %v1770_v28, inf  ;;  %v1882_v28 = vcvt.s32.f32 %v1880_v59  ;;  %vm2054_vm1 = vcmp.eq.s32.totalorder %v8511_v62, 2 }
 0x5b6   : > { %1776 = vmin.xlane.f32.xlu0 %v1775_v51  ;;  %v1898_v51 = vcvt.s32.f32 %v1896_v12 }
 0x5b7   : > { %v9907_v45 = vpop.xlane.xlu1 %1788 }
 0x5b8   : > { %vm1790_vm2 = vcmp.eq.f32.partialorder %v9698_v1, %v9907_v45 }
 0x5b9   : > { %v1791_v41 = vsel %vm1790_vm2, %v1786_v4, inf }
 0x5ba   : > { %1792 = vmin.xlane.f32.xlu1 %v1791_v41 }
 0x5bb   : > { %v9912_v15 = vpop.xlane.xlu0 %1804 }
 0x5bc   : > { %vm1806_vm7 = vcmp.eq.f32.partialorder %v9708_v43, %v9912_v15 }
 0x5bd   : > { %v1807_v23 = vsel %vm1806_vm7, %v1802_v52, inf  ;;  %v1930_v52 = vcvt.s32.f32 %v1928_v60  ;;  %v14316_v60 = vld [vmem:[#allocation59_spill] sm:$0xff] }
 0x5be   : > { %1808 = vmin.xlane.f32.xlu0 %v1807_v23  ;;  %v1946_v23 = vcvt.s32.f32 %v1944_v30 }
 0x5bf   : > { %v9917_v40 = vpop.xlane.xlu1 %1820 }
 0x5c0   : > { %vm1822_vm8 = vcmp.eq.f32.partialorder %v9718_v47, %v9917_v40  ;;  %v1827_v46 = vcvt.f32.s32 %v9917_v40 }
 0x5c1   : > { %v1823_v1 = vsel %vm1822_vm8, %v1818_v19, inf }
 0x5c2   : > { %1824 = vmin.xlane.f32.xlu1 %v1823_v1 }
 0x5c3   : > { %v9922_v44 = vpop.xlane.xlu0 %1836 }
 0x5c4   : > { %vm1838_vm9 = vcmp.eq.f32.partialorder %v9728_v53, %v9922_v44  ;;  %v1843_v30 = vcvt.f32.s32 %v9922_v44 }
 0x5c5   : > { %v1839_v43 = vsel %vm1838_vm9, %v1834_v31, inf  ;;  %v1978_v31 = vcvt.s32.f32 %v1976_v35  ;;  %v14322_v35 = vld [vmem:[#allocation62_spill] sm:$0xff] }
 0x5c6   : > { %1840 = vmin.xlane.f32.xlu0 %v1839_v43  ;;  %v1994_v43 = vcvt.s32.f32 %v1992_v5  ;;  %v1844_v5 = vshll.u32 %v1843_v30, 16 }
 0x5c7   : > { %v9927_v37 = vpop.xlane.xlu1 %1852 }
 0x5c8   : > { %vm1854_vm10 = vcmp.eq.f32.partialorder %v9738_v42, %v9927_v37 }
 0x5c9   : > { %v1855_v47 = vsel %vm1854_vm10, %v1850_v27, inf }
 0x5ca   : > { %1856 = vmin.xlane.f32.xlu1 %v1855_v47  ;;  %v1795_v47 = vcvt.f32.s32 %v9907_v45 }
 0x5cb   : > { %v9932_v29 = vpop.xlane.xlu0 %1868 }
 0x5cc   : > { %vm1870_vm11 = vcmp.eq.f32.partialorder %v9748_v24, %v9932_v29 }
 0x5cd   : > { %v1871_v53 = vsel %vm1870_vm11, %v1866_v17, inf }
 0x5ce   : > { %1872 = vmin.xlane.f32.xlu0 %v1871_v53  ;;  %v1796_v53 = vshll.u32 %v1795_v47, 16  ;;  %v14328_v47 = vld [vmem:[#allocation65_spill] sm:$0xff] }
 0x5cf   : > { %v9937_v25 = vpop.xlane.xlu1 %1884 }
 0x5d0   : > { %vm1886_vm12 = vcmp.eq.f32.partialorder %v9758_v2, %v9937_v25 }
 0x5d1   : > { %v1887_v42 = vsel %vm1886_vm12, %v1882_v28, inf  ;;  %v1811_v28 = vcvt.f32.s32 %v9912_v15 }
 0x5d2   : > { %1888 = vmin.xlane.f32.xlu1 %v1887_v42 }
 0x5d3   : > { %v9942_v57 = vpop.xlane.xlu0 %1900 }
 0x5d4   : > { %vm1902_vm13 = vcmp.eq.f32.partialorder %v9768_v7, %v9942_v57 }
 0x5d5   : > { %v1903_v24 = vsel %vm1902_vm13, %v1898_v51, inf  ;;  %v1812_v51 = vshll.u32 %v1811_v28, 16  ;;  %v14330_v28 = vld [vmem:[#allocation26_spill] sm:$0xff] }
 0x5d6   : > { %1904 = vmin.xlane.f32.xlu0 %v1903_v24 }
 0x5d7   : > { %v9947_v4 = vpop.xlane.xlu1 %1916 }
 0x5d8   : > { %vm1918_vm14 = vcmp.eq.f32.partialorder %v9778_v11, %v9947_v4 }
 0x5d9   : > { %v1919_v2 = vsel %vm1918_vm14, %v1914_v39, inf }
 0x5da   : > { %1920 = vmin.xlane.f32.xlu1 %v1919_v2 }
 0x5db   : > { %v9952_v41 = vpop.xlane.xlu0 %1932 }
 0x5dc   : > { %vm1934_vm15 = vcmp.eq.f32.partialorder %v9788_v18, %v9952_v41 }
 0x5dd   : > { %v1935_v7 = vsel %vm1934_vm15, %v1930_v52, inf  ;;  %v1828_v52 = vshll.u32 %v1827_v46, 16 }
 0x5de   : > { %1936 = vmin.xlane.f32.xlu0 %v1935_v7 }
 0x5df   : > { %v9957_v20 = vpop.xlane.xlu1 %1948 }
 0x5e0   : > { %vm1950_vm0 = vcmp.eq.f32.partialorder %v9798_v14, %v9957_v20 }
 0x5e1   : > { %v1951_v11 = vsel %vm1950_vm0, %v1946_v23, inf  ;;  %v14318_v23 = vld [vmem:[#allocation60_spill] sm:$0xff] }
 0x5e2   : > { %1952 = vmin.xlane.f32.xlu1 %v1951_v11  ;;  %v14320_v11 = vld [vmem:[#allocation61_spill] sm:$0xff] }
 0x5e3   : > { %v9962_v19 = vpop.xlane.xlu0 %1964 }
 0x5e4   : > { %vm1966_vm3 = vcmp.eq.f32.partialorder %v9808_v8, %v9962_v19 }
 0x5e5   : > { %v1967_v18 = vsel %vm1966_vm3, %v1962_v16, inf }
 0x5e6   : > { %1968 = vmin.xlane.f32.xlu0 %v1967_v18 }
 0x5e7   : > { %v9967_v1 = vpop.xlane.xlu1 %1980 }
 0x5e8   : > { %vm1982_vm4 = vcmp.eq.f32.partialorder %v9818_v56, %v9967_v1  ;;  %v1779_v56 = vcvt.f32.s32 %v9902_v50 }
 0x5e9   : > { %v1983_v14 = vsel %vm1982_vm4, %v1978_v31, inf }
 0x5ea   : > { %1984 = vmin.xlane.f32.xlu1 %v1983_v14  ;;  %v1780_v59 = vshll.u32 %v1779_v56, 16  ;;  %v1859_v14 = vcvt.f32.s32 %v9927_v37 }
 0x5eb   : > { %v9972_v21 = vpop.xlane.xlu0 %1996 }
 0x5ec   : > { %vm1998_vm5 = vcmp.eq.f32.partialorder %v9828_v3, %v9972_v21 }
 0x5ed   : > { %v1999_v8 = vsel %vm1998_vm5, %v1994_v43, inf }
 0x5ee   : > { %2000 = vmin.xlane.f32.xlu0 %v1999_v8 }
 0x5ef   : > { %v9977_v27 = vpop.xlane.xlu1 %2012 }
 0x5f0   : > { %vm2014_vm6 = vcmp.eq.f32.partialorder %v9834_v33, %v9977_v27 }
 0x5f1   : > { %v2015_v49 = vsel %vm2014_vm6, %v2010_v13, inf }
 0x5f2   : > { %2016 = vmin.xlane.f32.xlu1 %v2015_v49  ;;  %v14326_v49 = vld [vmem:[#allocation64_spill] sm:$0xff] }
 0x643   : > { %v1777_v17 = vpop.xlane.xlu0 %1776 }
 0x644   : > { %v1778_v10 = vcvt.f32.s32 %v1777_v17 }
 0x646   : > { %v1781_v3 = vadd.s32 %v1780_v59, %v1778_v10  ;;  %v1860_v10 = vshll.u32 %v1859_v14, 16  ;;  %v14342_v14 = vld [vmem:[#allocation32_spill] sm:$0xff] }
 0x647   : > { %v1793_v12 = vpop.xlane.xlu1 %1792 }
 0x648   : > { %v9988_v33 = vsel %vm2054_vm1, %v1781_v3, %v9365_v54  ;;  %v1794_v42 = vcvt.f32.s32 %v1793_v12  ;;  %vm2023_vm2 = vcmp.eq.s32.totalorder %v8514_v0, %v1781_v3  ;;  %vm2022_vm7 = vcmp.eq.s32.totalorder %v8511_v62, %v1781_v3 }
 0x649   : > { %v9993_v50 = vsel %vm2023_vm2, -inf, %v9374_v32  ;;  %7584 = vmatprep.mubr.msk.f32.mxu0 %vm2023_vm2, %v14215_v63  ;;  %v9997_v45 = vsel %vm2022_vm7, -inf, %v9371_v61  ;;  %v1875_v3 = vcvt.f32.s32 %v9932_v29 }
 0x64a   : > { %v1797_v15 = vadd.s32 %v1796_v53, %v1794_v42  ;;  %7585 = vmatmul.mubr.msk.f32.gmra.mrb[96].mxu0 %vm2022_vm7, %v14215_v63  ;;  %v2204_v54 = vmax.f32 %v9997_v45, %v9993_v50 }
 0x64b   : > { %v1809_v24 = vpop.xlane.xlu0 %1808 }
 0x64c   : > { %v10006_v32 = vsel %vm2054_vm1, %v1797_v15, %v9385_v55  ;;  %v1810_v39 = vcvt.f32.s32 %v1809_v24  ;;  %2205 = vmax.xlane.f32.xlu0 %v2204_v54  ;;  %vm2025_vm8 = vcmp.eq.s32.totalorder %v8514_v0, %v1797_v15  ;;  %vm2024_vm9 = vcmp.eq.s32.totalorder %v8511_v62, %v1797_v15  ;;  %v14332_v15 = vld [vmem:[#allocation28_spill] sm:$0xff] }
 0x64d   : > { %v10011_v61 = vsel %vm2025_vm8, -inf, %v9394_v6  ;;  %7586 = vmatprep.mubr.msk.f32.mxu0 %vm2025_vm8, %v14215_v63  ;;  %v10015_v2 = vsel %vm2024_vm9, -inf, %v14316_v60  ;;  %v1891_v60 = vcvt.f32.s32 %v9937_v25 }
 0x64e   : > { %14317 = vst [vmem:[#allocation58_spill] sm:$0xff] %v10015_v2  ;;  %v1813_v40 = vadd.s32 %v1812_v51, %v1810_v39  ;;  %7587 = vmatmul.mubr.msk.f32.gmra.mrb[98].mxu0 %vm2024_vm9, %v14215_v63  ;;  %v2207_v55 = vmax.f32 %v10015_v2, %v10011_v61  ;;  %v14334_v51 = vld [vmem:[#allocation27_spill] sm:$0xff]  ;;  %v1876_v39 = vshll.u32 %v1875_v3, 16  ;;  %v1923_v3 = vcvt.f32.s32 %v9947_v4 }
 0x64f   : > { %v1825_v7 = vpop.xlane.xlu1 %1824 }
 0x650   : > { %v10024_v6 = vsel %vm2054_vm1, %v1813_v40, %v14318_v23  ;;  %v1826_v34 = vcvt.f32.s32 %v1825_v7  ;;  %2208 = vmax.xlane.f32.xlu1 %v2207_v55  ;;  %vm2027_vm10 = vcmp.eq.s32.totalorder %v8514_v0, %v1813_v40  ;;  %vm2026_vm11 = vcmp.eq.s32.totalorder %v8511_v62, %v1813_v40  ;;  %v14336_v55 = vld [vmem:[#allocation29_spill] sm:$0xff]  ;;  %v14338_v7 = vld [vmem:[#allocation31_spill] sm:$0xff] }
 0x651   : > { %14319 = vst [vmem:[#allocation59_spill] sm:$0xff] %v10024_v6  ;;  %v10029_v16 = vsel %vm2027_vm10, -inf, %v14320_v11  ;;  %7588 = vmatprep.mubr.msk.f32.mxu0 %vm2027_vm10, %v14215_v63  ;;  %v10033_v18 = vsel %vm2026_vm11, -inf, %v14322_v35 }
 0x652   : > { %14321 = vst [vmem:[#allocation60_spill] sm:$0xff] %v10029_v16  ;;  %14323 = vst [vmem:[#allocation61_spill] sm:$0xff] %v10033_v18  ;;  %v1829_v44 = vadd.s32 %v1828_v52, %v1826_v34  ;;  %7589 = vmatmul.mubr.msk.f32.gmra.mrb[100].mxu0 %vm2026_vm11, %v14215_v63  ;;  %v2210_v31 = vmax.f32 %v10033_v18, %v10029_v16  ;;  %v14340_v34 = vld [vmem:[#allocation30_spill] sm:$0xff] }
 0x653   : > { %v1841_v43 = vpop.xlane.xlu0 %1840 }
 0x654   : > { %v10042_v8 = vsel %vm2054_vm1, %v1829_v44, %v14324_v36  ;;  %v1842_v13 = vcvt.f32.s32 %v1841_v43  ;;  %2211 = vmax.xlane.f32.xlu0 %v2210_v31  ;;  %vm2029_vm12 = vcmp.eq.s32.totalorder %v8514_v0, %v1829_v44  ;;  %vm2028_vm13 = vcmp.eq.s32.totalorder %v8511_v62, %v1829_v44 }
 0x655   : > { %14325 = vst [vmem:[#allocation62_spill] sm:$0xff] %v10042_v8  ;;  %v10047_v56 = vsel %vm2029_vm12, -inf, %v14326_v49  ;;  %7590 = vmatprep.mubr.msk.f32.mxu0 %vm2029_vm12, %v14215_v63  ;;  %v10051_v17 = vsel %vm2028_vm13, -inf, %v14328_v47  ;;  %v1892_v44 = vshll.u32 %v1891_v60, 16  ;;  %v1907_v31 = vcvt.f32.s32 %v9942_v57  ;;  %v14346_v47 = vld [vmem:[#allocation33_spill] sm:$0xff] }
 0x656   : > { %14327 = vst [vmem:[#allocation63_spill] sm:$0xff] %v10047_v56  ;;  %14329 = vst [vmem:[#allocation64_spill] sm:$0xff] %v10051_v17  ;;  %v1845_v37 = vadd.s32 %v1844_v5, %v1842_v13  ;;  %7591 = vmatmul.mubr.msk.f32.gmra.mrb[102].mxu0 %vm2028_vm13, %v14215_v63  ;;  %v2213_v59 = vmax.f32 %v10051_v17, %v10047_v56  ;;  %v14344_v13 = vld [vmem:[#allocation34_spill] sm:$0xff] }
 0x657   : > { %v1857_v53 = vpop.xlane.xlu1 %1856 }
 0x658   : > { %v10060_v12 = vsel %vm2054_vm1, %v1845_v37, %v14330_v28  ;;  %v1858_v42 = vcvt.f32.s32 %v1857_v53  ;;  %2214 = vmax.xlane.f32.xlu1 %v2213_v59  ;;  %vm2031_vm14 = vcmp.eq.s32.totalorder %v8514_v0, %v1845_v37  ;;  %vm2030_vm15 = vcmp.eq.s32.totalorder %v8511_v62, %v1845_v37  ;;  %v14348_v28 = vld [vmem:[#allocation35_spill] sm:$0xff] }
 0x659   : > { %14331 = vst [vmem:[#allocation65_spill] sm:$0xff] %v10060_v12  ;;  %v10065_v54 = vsel %vm2031_vm14, -inf, %v14332_v15  ;;  %7592 = vmatprep.mubr.msk.f32.mxu0 %vm2031_vm14, %v14215_v63  ;;  %v10069_v46 = vsel %vm2030_vm15, -inf, %v14334_v51  ;;  %v14350_v51 = vld [vmem:[#allocation37_spill] sm:$0xff] }
 0x65a   : > { %14333 = vst [vmem:[#allocation26_spill] sm:$0xff] %v10065_v54  ;;  %14335 = vst [vmem:[#allocation28_spill] sm:$0xff] %v10069_v46  ;;  %v1861_v29 = vadd.s32 %v1860_v10, %v1858_v42  ;;  %7593 = vmatmul.mubr.msk.f32.gmra.mrb[104].mxu0 %vm2030_vm15, %v14215_v63  ;;  %v2216_v24 = vmax.f32 %v10069_v46, %v10065_v54  ;;  %v1908_v10 = vshll.u32 %v1907_v31, 16  ;;  %v14358_v31 = vld [vmem:[#allocation39_spill] sm:$0xff] }
 0x65b   : > { %v1873_v40 = vpop.xlane.xlu0 %1872 }
 0x65c   : > { %v10078_v52 = vsel %vm2054_vm1, %v1861_v29, %v14336_v55  ;;  %v1874_v30 = vcvt.f32.s32 %v1873_v40  ;;  %2217 = vmax.xlane.f32.xlu0 %v2216_v24  ;;  %vm2033_vm0 = vcmp.eq.s32.totalorder %v8514_v0, %v1861_v29  ;;  %vm2032_vm3 = vcmp.eq.s32.totalorder %v8511_v62, %v1861_v29  ;;  %v14352_v24 = vld [vmem:[#allocation36_spill] sm:$0xff] }
 0x65d   : > { %14337 = vst [vmem:[#allocation27_spill] sm:$0xff] %v10078_v52  ;;  %v10083_v23 = vsel %vm2033_vm0, -inf, %v14338_v7  ;;  %7594 = vmatprep.mubr.msk.f32.mxu0 %vm2033_vm0, %v14215_v63  ;;  %v10087_v11 = vsel %vm2032_vm3, -inf, %v14340_v34  ;;  %v1924_v40 = vshll.u32 %v1923_v3, 16  ;;  %v1939_v55 = vcvt.f32.s32 %v9952_v41  ;;  %v14354_v7 = vld [vmem:[#allocation38_spill] sm:$0xff]  ;;  %v14362_v3 = vld [vmem:[#allocation13_spill] sm:$0xff] }
 0x65e   : > { %14339 = vst [vmem:[#allocation29_spill] sm:$0xff] %v10083_v23  ;;  %14341 = vst [vmem:[#allocation31_spill] sm:$0xff] %v10087_v11  ;;  %v1877_v25 = vadd.s32 %v1876_v39, %v1874_v30  ;;  %7595 = vmatmul.mubr.msk.f32.gmra.mrb[106].mxu0 %vm2032_vm3, %v14215_v63  ;;  %v2219_v35 = vmax.f32 %v10087_v11, %v10083_v23 }
 0x65f   : > { %v1889_v5 = vpop.xlane.xlu1 %1888 }
 0x660   : > { %v10096_v43 = vsel %vm2054_vm1, %v1877_v25, %v14342_v14  ;;  %v1890_v36 = vcvt.f32.s32 %v1889_v5  ;;  %2220 = vmax.xlane.f32.xlu1 %v2219_v35  ;;  %vm2035_vm4 = vcmp.eq.s32.totalorder %v8514_v0, %v1877_v25  ;;  %vm2034_vm5 = vcmp.eq.s32.totalorder %v8511_v62, %v1877_v25  ;;  %v14356_v35 = vld [vmem:[#allocation40_spill] sm:$0xff] }
 0x661   : > { %14343 = vst [vmem:[#allocation30_spill] sm:$0xff] %v10096_v43  ;;  %v10101_v49 = vsel %vm2035_vm4, -inf, %v14344_v13  ;;  %7596 = vmatprep.mubr.msk.f32.mxu0 %vm2035_vm4, %v14215_v63  ;;  %v10105_v37 = vsel %vm2034_vm5, -inf, %v14346_v47  ;;  %v1955_v13 = vcvt.f32.s32 %v9957_v20 }
 0x662   : > { %14345 = vst [vmem:[#allocation32_spill] sm:$0xff] %v10101_v49  ;;  %14347 = vst [vmem:[#allocation34_spill] sm:$0xff] %v10105_v37  ;;  %v1893_v57 = vadd.s32 %v1892_v44, %v1890_v36  ;;  %7597 = vmatmul.mubr.msk.f32.gmra.mrb[108].mxu0 %vm2034_vm5, %v14215_v63  ;;  %v2222_v59 = vmax.f32 %v10105_v37, %v10101_v49  ;;  %v1940_v36 = vshll.u32 %v1939_v55, 16 }
 0x663   : > { %v1905_v53 = vpop.xlane.xlu0 %1904 }
 0x664   : > { %v10114_v42 = vsel %vm2054_vm1, %v1893_v57, %v14348_v28  ;;  %v1906_v15 = vcvt.f32.s32 %v1905_v53  ;;  %2223 = vmax.xlane.f32.xlu0 %v2222_v59  ;;  %vm2037_vm6 = vcmp.eq.s32.totalorder %v8514_v0, %v1893_v57  ;;  %vm2036_vm2 = vcmp.eq.s32.totalorder %v8511_v62, %v1893_v57  ;;  %v14360_v57 = vld [vmem:[#allocation41_spill] sm:$0xff]  ;;  %v14364_v28 = vld [vmem:[#allocation12_spill] sm:$0xff] }
 0x665   : > { %14349 = vst [vmem:[#allocation33_spill] sm:$0xff] %v10114_v42  ;;  %v10119_v29 = vsel %vm2037_vm6, -inf, %v14350_v51  ;;  %7598 = vmatprep.mubr.msk.f32.mxu0 %vm2037_vm6, %v14215_v63  ;;  %v10123_v39 = vsel %vm2036_vm2, -inf, %v14352_v24  ;;  %v1956_v24 = vshll.u32 %v1955_v13, 16 }
 0x666   : > { %14351 = vst [vmem:[#allocation35_spill] sm:$0xff] %v10119_v29  ;;  %14353 = vst [vmem:[#allocation37_spill] sm:$0xff] %v10123_v39  ;;  %v1909_v4 = vadd.s32 %v1908_v10, %v1906_v15  ;;  %7599 = vmatmul.mubr.msk.f32.gmra.mrb[110].mxu0 %vm2036_vm2, %v14215_v63  ;;  %v2225_v60 = vmax.f32 %v10123_v39, %v10119_v29 }
 0x667   : > { %v1921_v30 = vpop.xlane.xlu1 %1920 }
 0x668   : > { %v10132_v34 = vsel %vm2054_vm1, %v1909_v4, %v14354_v7  ;;  %v1922_v25 = vcvt.f32.s32 %v1921_v30  ;;  %2226 = vmax.xlane.f32.xlu1 %v2225_v60  ;;  %vm2039_vm7 = vcmp.eq.s32.totalorder %v8514_v0, %v1909_v4  ;;  %vm2038_vm8 = vcmp.eq.s32.totalorder %v8511_v62, %v1909_v4  ;;  %v14368_v7 = vld [vmem:[#allocation15_spill] sm:$0xff] }
 0x669   : > { %14355 = vst [vmem:[#allocation36_spill] sm:$0xff] %v10132_v34  ;;  %v10137_v44 = vsel %vm2039_vm7, -inf, %v14356_v35  ;;  %7600 = vmatprep.mubr.msk.f32.mxu0 %vm2039_vm7, %v14215_v63  ;;  %v10141_v5 = vsel %vm2038_vm8, -inf, %v14358_v31  ;;  %v1971_v4 = vcvt.f32.s32 %v9962_v19  ;;  %v14370_v35 = vld [vmem:[#allocation14_spill] sm:$0xff] }
 0x66a   : > { %14357 = vst [vmem:[#allocation38_spill] sm:$0xff] %v10137_v44  ;;  %14359 = vst [vmem:[#allocation40_spill] sm:$0xff] %v10141_v5  ;;  %v1925_v41 = vadd.s32 %v1924_v40, %v1922_v25  ;;  %7601 = vmatmul.mubr.msk.f32.gmra.mrb[112].mxu0 %vm2038_vm8, %v14215_v63  ;;  %v2228_v14 = vmax.f32 %v10141_v5, %v10137_v44  ;;  %v14366_v40 = vld [vmem:[#allocation42_spill] sm:$0xff] }
 0x66b   : > { %v1937_v47 = vpop.xlane.xlu0 %1936 }
 0x66c   : > { %v10150_v59 = vsel %vm2054_vm1, %v1925_v41, %v14360_v57  ;;  %v1938_v10 = vcvt.f32.s32 %v1937_v47  ;;  %2229 = vmax.xlane.f32.xlu0 %v2228_v14  ;;  %vm2041_vm9 = vcmp.eq.s32.totalorder %v8514_v0, %v1925_v41  ;;  %vm2040_vm10 = vcmp.eq.s32.totalorder %v8511_v62, %v1925_v41  ;;  %v14372_v47 = vld [vmem:[#allocation43_spill] sm:$0xff] }
 0x66d   : > { %14361 = vst [vmem:[#allocation39_spill] sm:$0xff] %v10150_v59  ;;  %v10155_v53 = vsel %vm2041_vm9, -inf, %v14362_v3  ;;  %7602 = vmatprep.mubr.msk.f32.mxu0 %vm2041_vm9, %v14215_v63  ;;  %v10159_v15 = vsel %vm2040_vm10, -inf, %v14364_v28  ;;  %v1972_v14 = vshll.u32 %v1971_v4, 16  ;;  %v14374_v3 = vld [vmem:[#allocation17_spill] sm:$0xff] }
 0x66e   : > { %14363 = vst [vmem:[#allocation41_spill] sm:$0xff] %v10155_v53  ;;  %14365 = vst [vmem:[#allocation13_spill] sm:$0xff] %v10159_v15  ;;  %v1941_v20 = vadd.s32 %v1940_v36, %v1938_v10  ;;  %7603 = vmatmul.mubr.msk.f32.gmra.mrb[114].mxu0 %vm2040_vm10, %v14215_v63  ;;  %v2231_v51 = vmax.f32 %v10159_v15, %v10155_v53  ;;  %v1987_v36 = vcvt.f32.s32 %v9967_v1 }
 0x66f   : > { %v1953_v60 = vpop.xlane.xlu1 %1952 }
 0x670   : > { %v10168_v55 = vsel %vm2054_vm1, %v1941_v20, %v14366_v40  ;;  %v1954_v30 = vcvt.f32.s32 %v1953_v60  ;;  %2232 = vmax.xlane.f32.xlu1 %v2231_v51  ;;  %vm2043_vm11 = vcmp.eq.s32.totalorder %v8514_v0, %v1941_v20  ;;  %vm2042_vm12 = vcmp.eq.s32.totalorder %v8511_v62, %v1941_v20  ;;  %v14376_v20 = vld [vmem:[#allocation16_spill] sm:$0xff] }
 0x671   : > { %14367 = vst [vmem:[#allocation12_spill] sm:$0xff] %v10168_v55  ;;  %v10173_v25 = vsel %vm2043_vm11, -inf, %v14368_v7  ;;  %7604 = vmatprep.mubr.msk.f32.mxu0 %vm2043_vm11, %v14215_v63  ;;  %v10177_v31 = vsel %vm2042_vm12, -inf, %v14370_v35  ;;  %v1988_v4 = vshll.u32 %v1987_v36, 16  ;;  %v2003_v60 = vcvt.f32.s32 %v9972_v21 }
 0x672   : > { %14369 = vst [vmem:[#allocation42_spill] sm:$0xff] %v10173_v25  ;;  %14371 = vst [vmem:[#allocation15_spill] sm:$0xff] %v10177_v31  ;;  %v1957_v19 = vadd.s32 %v1956_v24, %v1954_v30  ;;  %7605 = vmatmul.mubr.msk.f32.gmra.mrb[116].mxu0 %vm2042_vm12, %v14215_v63  ;;  %v2234_v41 = vmax.f32 %v10177_v31, %v10173_v25  ;;  %v14378_v30 = vld [vmem:[#allocation44_spill] sm:$0xff] }
 0x673   : > { %v1969_v13 = vpop.xlane.xlu0 %1968 }
 0x674   : > { %v10186_v57 = vsel %vm2054_vm1, %v1957_v19, %v14372_v47  ;;  %v1970_v10 = vcvt.f32.s32 %v1969_v13  ;;  %2235 = vmax.xlane.f32.xlu0 %v2234_v41  ;;  %vm2045_vm13 = vcmp.eq.s32.totalorder %v8514_v0, %v1957_v19  ;;  %vm2044_vm14 = vcmp.eq.s32.totalorder %v8511_v62, %v1957_v19  ;;  %v14380_v19 = vld [vmem:[#allocation19_spill] sm:$0xff] }
 0x675   : > { %14373 = vst [vmem:[#allocation14_spill] sm:$0xff] %v10186_v57  ;;  %v10191_v28 = vsel %vm2045_vm13, -inf, %v14374_v3  ;;  %7606 = vmatprep.mubr.msk.f32.mxu0 %vm2045_vm13, %v14215_v63  ;;  %v10195_v51 = vsel %vm2044_vm14, -inf, %v14376_v20  ;;  %v2004_v47 = vshll.u32 %v2003_v60, 16  ;;  %v14384_v20 = vld [vmem:[#allocation45_spill] sm:$0xff]  ;;  %v14388_v60 = vld [vmem:[#allocation20_spill] sm:$0xff] }
 0x676   : > { %14375 = vst [vmem:[#allocation43_spill] sm:$0xff] %v10191_v28  ;;  %14377 = vst [vmem:[#allocation17_spill] sm:$0xff] %v10195_v51  ;;  %v1973_v1 = vadd.s32 %v1972_v14, %v1970_v10  ;;  %7607 = vmatmul.mubr.msk.f32.gmra.mrb[118].mxu0 %vm2044_vm14, %v14215_v63  ;;  %v2237_v24 = vmax.f32 %v10195_v51, %v10191_v28  ;;  %v14382_v14 = vld [vmem:[#allocation18_spill] sm:$0xff]  ;;  %v2019_v10 = vcvt.f32.s32 %v9977_v27 }
 0x677   : > { %v1985_v40 = vpop.xlane.xlu1 %1984 }
 0x678   : > { %v10204_v7 = vsel %vm2054_vm1, %v1973_v1, %v14378_v30  ;;  %v1986_v35 = vcvt.f32.s32 %v1985_v40  ;;  %2238 = vmax.xlane.f32.xlu1 %v2237_v24  ;;  %vm2047_vm15 = vcmp.eq.s32.totalorder %v8514_v0, %v1973_v1  ;;  %vm2046_vm0 = vcmp.eq.s32.totalorder %v8511_v62, %v1973_v1 }
 0x679   : > { %14379 = vst [vmem:[#allocation16_spill] sm:$0xff] %v10204_v7  ;;  %v10209_v41 = vsel %vm2047_vm15, -inf, %v14380_v19  ;;  %7608 = vmatprep.mubr.msk.f32.mxu0 %vm2047_vm15, %v14215_v63  ;;  %v10213_v36 = vsel %vm2046_vm0, -inf, %v14382_v14  ;;  %v2020_v19 = vshll.u32 %v2019_v10, 16 }
 0x67a   : > { %14381 = vst [vmem:[#allocation44_spill] sm:$0xff] %v10209_v41  ;;  %14383 = vst [vmem:[#allocation19_spill] sm:$0xff] %v10213_v36  ;;  %v1989_v21 = vadd.s32 %v1988_v4, %v1986_v35  ;;  %7609 = vmatmul.mubr.msk.f32.gmra.mrb[120].mxu0 %vm2046_vm0, %v14215_v63  ;;  %v2240_v13 = vmax.f32 %v10213_v36, %v10209_v41  ;;  %v14386_v4 = vld [vmem:[#allocation21_spill] sm:$0xff] }
 0x67b   : > { %v2001_v3 = vpop.xlane.xlu0 %2000 }
 0x67c   : > { %v10222_v1 = vsel %vm2054_vm1, %v1989_v21, %v14384_v20  ;;  %v2002_v24 = vcvt.f32.s32 %v2001_v3  ;;  %2241 = vmax.xlane.f32.xlu0 %v2240_v13  ;;  %vm2049_vm3 = vcmp.eq.s32.totalorder %v8514_v0, %v1989_v21  ;;  %vm2048_vm4 = vcmp.eq.s32.totalorder %v8511_v62, %v1989_v21  ;;  %v14390_v13 = vld [vmem:[#allocation46_spill] sm:$0xff]  ;;  %v14392_v20 = vld [vmem:[#allocation23_spill] sm:$0xff] }
 0x67d   : > { %14385 = vst [vmem:[#allocation18_spill] sm:$0xff] %v10222_v1  ;;  %v10227_v40 = vsel %vm2049_vm3, -inf, %v14386_v4  ;;  %7610 = vmatprep.mubr.msk.f32.mxu0 %vm2049_vm3, %v14215_v63  ;;  %v10231_v30 = vsel %vm2048_vm4, -inf, %v14388_v60 }
 0x67e   : > { %14387 = vst [vmem:[#allocation45_spill] sm:$0xff] %v10227_v40  ;;  %14389 = vst [vmem:[#allocation21_spill] sm:$0xff] %v10231_v30  ;;  %v2005_v27 = vadd.s32 %v2004_v47, %v2002_v24  ;;  %7611 = vmatmul.mubr.msk.f32.gmra.mrb[122].mxu0 %vm2048_vm4, %v14215_v63  ;;  %v2243_v35 = vmax.f32 %v10231_v30, %v10227_v40  ;;  %v14394_v24 = vld [vmem:[#allocation22_spill] sm:$0xff] }
 0x67f   : > { %v2017_v14 = vpop.xlane.xlu1 %2016 }
 0x680   : > { %v10239_v21 = vsel %vm2054_vm1, %v2005_v27, %v14390_v13  ;;  %v2018_v3 = vcvt.f32.s32 %v2017_v14  ;;  %2244 = vmax.xlane.f32.xlu1 %v2243_v35  ;;  %vm2051_vm5 = vcmp.eq.s32.totalorder %v8514_v0, %v2005_v27  ;;  %vm2050_vm6 = vcmp.eq.s32.totalorder %v8511_v62, %v2005_v27  ;;  %v14396_v14 = vld [vmem:[#allocation47_spill] sm:$0xff]  ;;  %v14398_v27 = vld [vmem:[#allocation25_spill] sm:$0xff] }
 0x681   : > { %14391 = vst [vmem:[#allocation20_spill] sm:$0xff] %v10239_v21  ;;  %v10244_v47 = vsel %vm2051_vm5, -inf, %v14392_v20  ;;  %7612 = vmatprep.mubr.msk.f32.mxu0 %vm2051_vm5, %v14215_v63  ;;  %v10248_v4 = vsel %vm2050_vm6, -inf, %v14394_v24 }
 0x682   : > { %14393 = vst [vmem:[#allocation46_spill] sm:$0xff] %v10244_v47  ;;  %14395 = vst [vmem:[#allocation23_spill] sm:$0xff] %v10248_v4  ;;  %v2021_v10 = vadd.s32 %v2020_v19, %v2018_v3  ;;  %7613 = vmatmul.mubr.msk.f32.gmra.mrb[124].mxu0 %vm2050_vm6, %v14215_v63  ;;  %v2246_v60 = vmax.f32 %v10248_v4, %v10244_v47  ;;  %v14400_v19 = vld [vmem:[#allocation24_spill] sm:$0xff] }
 0x684   : > { %v10256_v35 = vsel %vm2054_vm1, %v2021_v10, %v14396_v14  ;;  %2247 = vmax.xlane.f32.xlu0 %v2246_v60  ;;  %vm2053_vm2 = vcmp.eq.s32.totalorder %v8514_v0, %v2021_v10  ;;  %vm2052_vm7 = vcmp.eq.s32.totalorder %v8511_v62, %v2021_v10 }
 0x685   : > { %14397 = vst [vmem:[#allocation22_spill] sm:$0xff] %v10256_v35  ;;  %v10261_v13 = vsel %vm2053_vm2, -inf, %v14398_v27  ;;  %7614 = vmatprep.mubr.msk.f32.mxu0 %vm2053_vm2, %v14215_v63  ;;  %v10265_v3 = vsel %vm2052_vm7, -inf, %v14400_v19 }
 0x686   : > { %14399 = vst [vmem:[#allocation47_spill] sm:$0xff] %v10261_v13  ;;  %14401 = vst [vmem:[#allocation25_spill] sm:$0xff] %v10265_v3  ;;  %7615 = vmatmul.mubr.msk.f32.gmra.mrb[126].mxu0 %vm2052_vm7, %v14215_v63  ;;  %v2249_v20 = vmax.f32 %v10265_v3, %v10261_v13 }
 0x688   : > { %2250 = vmax.xlane.f32.xlu1 %v2249_v20 }
 0x6d9   : > { %v2206_v24 = vpop.xlane.xlu0 %2205 }
 0x6da   : > { %vm2252_vm1 = vcmp.eq.f32.partialorder %v9997_v45, %v2206_v24  ;;  %vm2253_vm8 = vcmp.eq.f32.partialorder %v9993_v50, %v2206_v24 }
 0x6db   : > { %v2284_v10 = vsel %vm2252_vm1, %v8511_v62, 256  ;;  %v2285_v60 = vsel %vm2253_vm8, %v8514_v0, 256 }
 0x6dc   : > { %vm2316_vm9 = vcmp.lt.s32.totalorder %v2284_v10, %v2285_v60 }
 0x6dd   : > { %v2209_v14 = vpop.xlane.xlu1 %2208  ;;  %v10274_v27 = vsel %vm2316_vm9, %v2284_v10, %v2285_v60 }
 0x6de   : > { %vm2254_vm10 = vcmp.eq.f32.partialorder %v10015_v2, %v2209_v14  ;;  %vm2255_vm11 = vcmp.eq.f32.partialorder %v10011_v61, %v2209_v14  ;;  %v2319_v19 = vshra.s32 %v10274_v27, 16 }
 0x6df   : > { %v2286_v20 = vsel %vm2254_vm10, %v8511_v62, 256  ;;  %v2287_v35 = vsel %vm2255_vm11, %v8514_v0, 256 }
 0x6e0   : > { %vm2332_vm12 = vcmp.lt.s32.totalorder %v2286_v20, %v2287_v35  ;;  %v10281_v24 = vcvt.s32.f32 %v2319_v19 }
 0x6e1   : > { %v2212_v21 = vpop.xlane.xlu0 %2211  ;;  %v10283_v1 = vsel %vm2332_vm12, %v2286_v20, %v2287_v35 }
 0x6e2   : > { %vm2256_vm13 = vcmp.eq.f32.partialorder %v10033_v18, %v2212_v21  ;;  %vm2257_vm14 = vcmp.eq.f32.partialorder %v10029_v16, %v2212_v21  ;;  %2322 = vmin.xlane.f32.xlu0 %v10281_v24  ;;  %v2335_v10 = vshra.s32 %v10283_v1, 16  ;;  %v7972_v16 = vld [vmem:[%s9216_s12 + $0x10] sm:$0xff] }
 0x6e3   : > { %v2288_v60 = vsel %vm2256_vm13, %v8511_v62, 256  ;;  %v2289_v14 = vsel %vm2257_vm14, %v8514_v0, 256 }
 0x6e4   : > { %vm2348_vm15 = vcmp.lt.s32.totalorder %v2288_v60, %v2289_v14  ;;  %v10291_v7 = vcvt.s32.f32 %v2335_v10 }
 0x6e5   : > { %v2215_v19 = vpop.xlane.xlu1 %2214  ;;  %v10293_v57 = vsel %vm2348_vm15, %v2288_v60, %v2289_v14 }
 0x6e6   : > { %vm2258_vm0 = vcmp.eq.f32.partialorder %v10051_v17, %v2215_v19  ;;  %vm2259_vm3 = vcmp.eq.f32.partialorder %v10047_v56, %v2215_v19  ;;  %2338 = vmin.xlane.f32.xlu1 %v10291_v7  ;;  %v2351_v21 = vshra.s32 %v10293_v57, 16 }
 0x6e7   : > { %v2290_v35 = vsel %vm2258_vm0, %v8511_v62, 256  ;;  %v2291_v20 = vsel %vm2259_vm3, %v8514_v0, 256 }
 0x6e8   : > { %vm2364_vm4 = vcmp.lt.s32.totalorder %v2290_v35, %v2291_v20  ;;  %v10301_v55 = vcvt.s32.f32 %v2351_v21 }
 0x6e9   : > { %v2218_v10 = vpop.xlane.xlu0 %2217  ;;  %v10303_v59 = vsel %vm2364_vm4, %v2290_v35, %v2291_v20 }
 0x6ea   : > { %vm2260_vm5 = vcmp.eq.f32.partialorder %v10069_v46, %v2218_v10  ;;  %vm2261_vm6 = vcmp.eq.f32.partialorder %v10065_v54, %v2218_v10  ;;  %2354 = vmin.xlane.f32.xlu0 %v10301_v55  ;;  %v2367_v60 = vshra.s32 %v10303_v59, 16 }
 0x6eb   : > { %v2292_v14 = vsel %vm2260_vm5, %v8511_v62, 256  ;;  %v2293_v19 = vsel %vm2261_vm6, %v8514_v0, 256 }
 0x6ec   : > { %vm2380_vm2 = vcmp.lt.s32.totalorder %v2292_v14, %v2293_v19  ;;  %v10311_v34 = vcvt.s32.f32 %v2367_v60 }
 0x6ed   : > { %v2221_v21 = vpop.xlane.xlu1 %2220  ;;  %v10313_v42 = vsel %vm2380_vm2, %v2292_v14, %v2293_v19 }
 0x6ee   : > { %vm2262_vm7 = vcmp.eq.f32.partialorder %v10087_v11, %v2221_v21  ;;  %vm2263_vm1 = vcmp.eq.f32.partialorder %v10083_v23, %v2221_v21  ;;  %2370 = vmin.xlane.f32.xlu1 %v10311_v34  ;;  %v2383_v35 = vshra.s32 %v10313_v42, 16 }
 0x6ef   : > { %v2294_v20 = vsel %vm2262_vm7, %v8511_v62, 256  ;;  %v2295_v10 = vsel %vm2263_vm1, %v8514_v0, 256 }
 0x6f0   : > { %vm2396_vm8 = vcmp.lt.s32.totalorder %v2294_v20, %v2295_v10  ;;  %v10321_v43 = vcvt.s32.f32 %v2383_v35 }
 0x6f1   : > { %v2224_v60 = vpop.xlane.xlu0 %2223  ;;  %v10323_v52 = vsel %vm2396_vm8, %v2294_v20, %v2295_v10 }
 0x6f2   : > { %vm2264_vm9 = vcmp.eq.f32.partialorder %v10105_v37, %v2224_v60  ;;  %vm2265_vm10 = vcmp.eq.f32.partialorder %v10101_v49, %v2224_v60  ;;  %2386 = vmin.xlane.f32.xlu0 %v10321_v43  ;;  %v2399_v14 = vshra.s32 %v10323_v52, 16 }
 0x6f3   : > { %v2296_v19 = vsel %vm2264_vm9, %v8511_v62, 256  ;;  %v2297_v21 = vsel %vm2265_vm10, %v8514_v0, 256 }
 0x6f4   : > { %vm2412_vm11 = vcmp.lt.s32.totalorder %v2296_v19, %v2297_v21  ;;  %v10331_v11 = vcvt.s32.f32 %v2399_v14 }
 0x6f5   : > { %v2227_v35 = vpop.xlane.xlu1 %2226  ;;  %v10333_v23 = vsel %vm2412_vm11, %v2296_v19, %v2297_v21 }
 0x6f6   : > { %vm2266_vm12 = vcmp.eq.f32.partialorder %v10123_v39, %v2227_v35  ;;  %vm2267_vm13 = vcmp.eq.f32.partialorder %v10119_v29, %v2227_v35  ;;  %2402 = vmin.xlane.f32.xlu1 %v10331_v11  ;;  %v2415_v20 = vshra.s32 %v10333_v23, 16 }
 0x6f7   : > { %v2298_v10 = vsel %vm2266_vm12, %v8511_v62, 256  ;;  %v2299_v60 = vsel %vm2267_vm13, %v8514_v0, 256 }
 0x6f8   : > { %vm2428_vm14 = vcmp.lt.s32.totalorder %v2298_v10, %v2299_v60  ;;  %v10341_v37 = vcvt.s32.f32 %v2415_v20 }
 0x6f9   : > { %v2230_v14 = vpop.xlane.xlu0 %2229  ;;  %v10343_v49 = vsel %vm2428_vm14, %v2298_v10, %v2299_v60 }
 0x6fa   : > { %vm2268_vm15 = vcmp.eq.f32.partialorder %v10141_v5, %v2230_v14  ;;  %vm2269_vm0 = vcmp.eq.f32.partialorder %v10137_v44, %v2230_v14  ;;  %2418 = vmin.xlane.f32.xlu0 %v10341_v37  ;;  %v2431_v19 = vshra.s32 %v10343_v49, 16 }
 0x6fb   : > { %v2300_v21 = vsel %vm2268_vm15, %v8511_v62, 256  ;;  %v2301_v35 = vsel %vm2269_vm0, %v8514_v0, 256 }
 0x6fc   : > { %vm2444_vm3 = vcmp.lt.s32.totalorder %v2300_v21, %v2301_v35  ;;  %v10351_v39 = vcvt.s32.f32 %v2431_v19 }
 0x6fd   : > { %v2233_v20 = vpop.xlane.xlu1 %2232  ;;  %v10353_v29 = vsel %vm2444_vm3, %v2300_v21, %v2301_v35 }
 0x6fe   : > { %vm2270_vm4 = vcmp.eq.f32.partialorder %v10159_v15, %v2233_v20  ;;  %vm2271_vm5 = vcmp.eq.f32.partialorder %v10155_v53, %v2233_v20  ;;  %2434 = vmin.xlane.f32.xlu1 %v10351_v39  ;;  %v2447_v10 = vshra.s32 %v10353_v29, 16 }
 0x6ff   : > { %v2302_v60 = vsel %vm2270_vm4, %v8511_v62, 256  ;;  %v2303_v14 = vsel %vm2271_vm5, %v8514_v0, 256 }
 0x700   : > { %vm2460_vm6 = vcmp.lt.s32.totalorder %v2302_v60, %v2303_v14  ;;  %v10361_v5 = vcvt.s32.f32 %v2447_v10 }
 0x701   : > { %v2236_v19 = vpop.xlane.xlu0 %2235  ;;  %v10363_v44 = vsel %vm2460_vm6, %v2302_v60, %v2303_v14 }
 0x702   : > { %vm2272_vm2 = vcmp.eq.f32.partialorder %v10177_v31, %v2236_v19  ;;  %vm2273_vm7 = vcmp.eq.f32.partialorder %v10173_v25, %v2236_v19  ;;  %2450 = vmin.xlane.f32.xlu0 %v10361_v5  ;;  %v2463_v21 = vshra.s32 %v10363_v44, 16 }
 0x703   : > { %v2304_v35 = vsel %vm2272_vm2, %v8511_v62, 256  ;;  %v2305_v20 = vsel %vm2273_vm7, %v8514_v0, 256 }
 0x704   : > { %vm2476_vm1 = vcmp.lt.s32.totalorder %v2304_v35, %v2305_v20  ;;  %v10371_v15 = vcvt.s32.f32 %v2463_v21 }
 0x705   : > { %v2239_v10 = vpop.xlane.xlu1 %2238  ;;  %v10373_v53 = vsel %vm2476_vm1, %v2304_v35, %v2305_v20 }
 0x706   : > { %vm2274_vm8 = vcmp.eq.f32.partialorder %v10195_v51, %v2239_v10  ;;  %vm2275_vm9 = vcmp.eq.f32.partialorder %v10191_v28, %v2239_v10  ;;  %2466 = vmin.xlane.f32.xlu1 %v10371_v15  ;;  %v2479_v60 = vshra.s32 %v10373_v53, 16 }
 0x707   : > { %v2306_v14 = vsel %vm2274_vm8, %v8511_v62, 256  ;;  %v2307_v19 = vsel %vm2275_vm9, %v8514_v0, 256 }
 0x708   : > { %vm2492_vm10 = vcmp.lt.s32.totalorder %v2306_v14, %v2307_v19  ;;  %v10381_v31 = vcvt.s32.f32 %v2479_v60 }
 0x709   : > { %v2242_v21 = vpop.xlane.xlu0 %2241  ;;  %v10383_v25 = vsel %vm2492_vm10, %v2306_v14, %v2307_v19 }
 0x70a   : > { %vm2276_vm11 = vcmp.eq.f32.partialorder %v10213_v36, %v2242_v21  ;;  %vm2277_vm12 = vcmp.eq.f32.partialorder %v10209_v41, %v2242_v21  ;;  %2482 = vmin.xlane.f32.xlu0 %v10381_v31  ;;  %v2495_v35 = vshra.s32 %v10383_v25, 16 }
 0x70b   : > { %v2308_v20 = vsel %vm2276_vm11, %v8511_v62, 256  ;;  %v2309_v10 = vsel %vm2277_vm12, %v8514_v0, 256 }
 0x70c   : > { %vm2508_vm13 = vcmp.lt.s32.totalorder %v2308_v20, %v2309_v10  ;;  %v10391_v51 = vcvt.s32.f32 %v2495_v35 }
 0x70d   : > { %v2245_v60 = vpop.xlane.xlu1 %2244  ;;  %v10393_v28 = vsel %vm2508_vm13, %v2308_v20, %v2309_v10 }
 0x70e   : > { %vm2278_vm14 = vcmp.eq.f32.partialorder %v10231_v30, %v2245_v60  ;;  %vm2279_vm15 = vcmp.eq.f32.partialorder %v10227_v40, %v2245_v60  ;;  %2498 = vmin.xlane.f32.xlu1 %v10391_v51  ;;  %v2511_v14 = vshra.s32 %v10393_v28, 16 }
 0x70f   : > { %v2310_v19 = vsel %vm2278_vm14, %v8511_v62, 256  ;;  %v2311_v21 = vsel %vm2279_vm15, %v8514_v0, 256 }
 0x710   : > { %vm2524_vm0 = vcmp.lt.s32.totalorder %v2310_v19, %v2311_v21  ;;  %v10401_v36 = vcvt.s32.f32 %v2511_v14 }
 0x711   : > { %v2248_v35 = vpop.xlane.xlu0 %2247  ;;  %v10403_v41 = vsel %vm2524_vm0, %v2310_v19, %v2311_v21 }
 0x712   : > { %vm2280_vm3 = vcmp.eq.f32.partialorder %v10248_v4, %v2248_v35  ;;  %vm2281_vm4 = vcmp.eq.f32.partialorder %v10244_v47, %v2248_v35  ;;  %2514 = vmin.xlane.f32.xlu0 %v10401_v36  ;;  %v2527_v20 = vshra.s32 %v10403_v41, 16 }
 0x713   : > { %v2312_v10 = vsel %vm2280_vm3, %v8511_v62, 256  ;;  %v2313_v60 = vsel %vm2281_vm4, %v8514_v0, 256 }
 0x714   : > { %vm2540_vm5 = vcmp.lt.s32.totalorder %v2312_v10, %v2313_v60  ;;  %v10411_v30 = vcvt.s32.f32 %v2527_v20 }
 0x715   : > { %v2251_v14 = vpop.xlane.xlu1 %2250  ;;  %v10413_v40 = vsel %vm2540_vm5, %v2312_v10, %v2313_v60 }
 0x716   : > { %vm2282_vm6 = vcmp.eq.f32.partialorder %v10265_v3, %v2251_v14  ;;  %vm2283_vm2 = vcmp.eq.f32.partialorder %v10261_v13, %v2251_v14  ;;  %2530 = vmin.xlane.f32.xlu1 %v10411_v30  ;;  %v2543_v19 = vshra.s32 %v10413_v40, 16  ;;  %v7970_v3 = vld [vmem:[%s9216_s12] sm:$0xff] }
 0x717   : > { %v2314_v21 = vsel %vm2282_vm6, %v8511_v62, 256  ;;  %v2315_v35 = vsel %vm2283_vm2, %v8514_v0, 256 }
 0x718   : > { %vm2556_vm7 = vcmp.lt.s32.totalorder %v2314_v21, %v2315_v35  ;;  %v10421_v20 = vcvt.s32.f32 %v2543_v19  ;;  %v14402_v19 = vld [vmem:[#allocation48_spill] sm:$0xff] }
 0x719   : > { %v10423_v4 = vsel %vm2556_vm7, %v2314_v21, %v2315_v35  ;;  %v7971_v21 = vld [vmem:[%s9216_s12 + $0x8] sm:$0xff] }
 0x71a   : > { %2546 = vmin.xlane.f32.xlu0 %v10421_v20  ;;  %v2559_v10 = vshra.s32 %v10423_v4, 16 }
 0x71c   : > { %v10427_v60 = vcvt.s32.f32 %v2559_v10  ;;  %v14404_v10 = vld [vmem:[#allocation49_spill] sm:$0xff] }
 0x71d   : > { %v6034_v14 = vpop.f32.mrb[96].mxu0 }
 0x71e   : > { %v6689_v13 = vadd.f32 %v7970_v3, %v6034_v14  ;;  %v6036_v47 = vpop.f32.mrb[97].mxu0  ;;  %2562 = vmin.xlane.f32.xlu1 %v10427_v60 }
 0x720   : > { %v6705_v46 = vmax.f32 %v6689_v13, 0.0  ;;  %v14406_v13 = vld [vmem:[#allocation50_spill] sm:$0xff] }
 0x721   : > { %v6039_v54 = vpop.f32.mrb[98].mxu0 }
 0x722   : > { %v10432_v12 = vadd.f32 %v6705_v46, %v14402_v19  ;;  %v6690_v35 = vadd.f32 %v7971_v21, %v6039_v54  ;;  %v6041_v17 = vpop.f32.mrb[99].mxu0  ;;  %v7973_v46 = vld [vmem:[%s9216_s12 + $0x18] sm:$0xff] }
 0x723   : > { %v14408_v21 = vld [vmem:[#allocation51_spill] sm:$0xff] }
 0x724   : > { %14403 = vst [vmem:[#allocation24_spill] sm:$0xff] %v10432_v12  ;;  %v6706_v56 = vmax.f32 %v6690_v35, 0.0 }
 0x725   : > { %v6044_v8 = vpop.f32.mrb[100].mxu0 }
 0x726   : > { %v10436_v18 = vadd.f32 %v6706_v56, %v14404_v10  ;;  %v6691_v3 = vadd.f32 %v7972_v16, %v6044_v8  ;;  %v6046_v47 = vpop.f32.mrb[101].mxu0  ;;  %v7974_v56 = vld [vmem:[%s9216_s12 + $0x20] sm:$0xff] }
 0x728   : > { %14405 = vst [vmem:[#allocation48_spill] sm:$0xff] %v10436_v18  ;;  %v6707_v14 = vmax.f32 %v6691_v3, 0.0  ;;  %v14410_v3 = vld [vmem:[#allocation52_spill] sm:$0xff] }
 0x729   : > { %v6049_v6 = vpop.f32.mrb[102].mxu0 }
 0x72a   : > { %v10440_v2 = vadd.f32 %v6707_v14, %v14406_v13  ;;  %v6692_v19 = vadd.f32 %v7973_v46, %v6049_v6  ;;  %v6051_v12 = vpop.f32.mrb[103].mxu0  ;;  %v7975_v14 = vld [vmem:[%s9216_s12 + $0x28] sm:$0xff] }
 0x72b   : > { %v14412_v46 = vld [vmem:[#allocation53_spill] sm:$0xff] }
 0x72c   : > { %14407 = vst [vmem:[#allocation49_spill] sm:$0xff] %v10440_v2  ;;  %v6708_v17 = vmax.f32 %v6692_v19, 0.0 }
 0x72d   : > { %v6054_v54 = vpop.f32.mrb[104].mxu0 }
 0x72e   : > { %v10444_v35 = vadd.f32 %v6708_v17, %v14408_v21  ;;  %v6693_v10 = vadd.f32 %v7974_v56, %v6054_v54  ;;  %v6056_v18 = vpop.f32.mrb[105].mxu0  ;;  %v7976_v17 = vld [vmem:[%s9216_s12 + $0x30] sm:$0xff] }
 0x72f   : > { %v14414_v56 = vld [vmem:[#allocation54_spill] sm:$0xff] }
 0x730   : > { %14409 = vst [vmem:[#allocation50_spill] sm:$0xff] %v10444_v35  ;;  %v6709_v16 = vmax.f32 %v6693_v10, 0.0 }
 0x731   : > { %v6059_v8 = vpop.f32.mrb[106].mxu0 }
 0x732   : > { %v10448_v47 = vadd.f32 %v6709_v16, %v14410_v3  ;;  %v6694_v13 = vadd.f32 %v7975_v14, %v6059_v8  ;;  %v6061_v2 = vpop.f32.mrb[107].mxu0  ;;  %v7977_v16 = vld [vmem:[%s9216_s12 + $0x38] sm:$0xff] }
 0x733   : > { %v14415_v14 = vld [vmem:[#allocation55_spill] sm:$0xff] }
 0x734   : > { %14411 = vst [vmem:[#allocation51_spill] sm:$0xff] %v10448_v47  ;;  %v6710_v6 = vmax.f32 %v6694_v13, 0.0 }
 0x735   : > { %v6064_v12 = vpop.f32.mrb[108].mxu0 }
 0x736   : > { %v10452_v19 = vadd.f32 %v6710_v6, %v14412_v46  ;;  %v6695_v21 = vadd.f32 %v7976_v17, %v6064_v12  ;;  %v6066_v35 = vpop.f32.mrb[109].mxu0  ;;  %v7978_v6 = vld [vmem:[%s9216_s12 + $0x40] sm:$0xff] }
 0x738   : > { %14413 = vst [vmem:[#allocation52_spill] sm:$0xff] %v10452_v19  ;;  %v6711_v18 = vmax.f32 %v6695_v21, 0.0  ;;  %v7979_v21 = vld [vmem:[%s9216_s12 + $0x48] sm:$0xff] }
 0x739   : > { %v6069_v54 = vpop.f32.mrb[110].mxu0 }
 0x73a   : > { %v10456_v10 = vadd.f32 %v6711_v18, %v14414_v56  ;;  %v6696_v3 = vadd.f32 %v7977_v16, %v6069_v54  ;;  %v6071_v47 = vpop.f32.mrb[111].mxu0 }
 0x73c   : > { %v6712_v2 = vmax.f32 %v6696_v3, 0.0  ;;  %v7980_v3 = vld [vmem:[%s9216_s12 + $0x50] sm:$0xff] }
 0x73d   : > { %v6074_v8 = vpop.f32.mrb[112].mxu0 }
 0x73e   : > { %v10460_v13 = vadd.f32 %v6712_v2, %v14415_v14  ;;  %v6697_v46 = vadd.f32 %v7978_v6, %v6074_v8  ;;  %v6076_v19 = vpop.f32.mrb[113].mxu0  ;;  %v14417_v6 = vld [vmem:[#allocation56_spill] sm:$0xff] }
 0x740   : > { %v6713_v35 = vmax.f32 %v6697_v46, 0.0 }
 0x741   : > { %v6079_v12 = vpop.f32.mrb[114].mxu0 }
 0x742   : > { %v10464_v17 = vadd.f32 %v6713_v35, %v9871_v38  ;;  %v6698_v18 = vadd.f32 %v7979_v21, %v6079_v12  ;;  %v6081_v56 = vpop.f32.mrb[115].mxu0  ;;  %v7981_v38 = vld [vmem:[%s9216_s12 + $0x58] sm:$0xff] }
 0x744   : > { %14416 = vst [vmem:[#allocation53_spill] sm:$0xff] %v10464_v17  ;;  %v6714_v47 = vmax.f32 %v6698_v18, 0.0 }
 0x745   : > { %v6084_v54 = vpop.f32.mrb[116].mxu0 }
 0x746   : > { %v10468_v16 = vadd.f32 %v6714_v47, %v9875_v22  ;;  %v6699_v2 = vadd.f32 %v7980_v3, %v6084_v54  ;;  %v6086_v14 = vpop.f32.mrb[117].mxu0  ;;  %v7982_v22 = vld [vmem:[%s9216_s12 + $0x60] sm:$0xff] }
 0x748   : > { %v6715_v19 = vmax.f32 %v6699_v2, 0.0  ;;  %v14420_v2 = vld [vmem:[#allocation57_spill] sm:$0xff] }
 0x749   : > { %v6089_v8 = vpop.f32.mrb[118].mxu0 }
 0x74a   : > { %v10472_v46 = vadd.f32 %v6715_v19, %v14417_v6  ;;  %v6700_v35 = vadd.f32 %v7981_v38, %v6089_v8  ;;  %v6091_v17 = vpop.f32.mrb[119].mxu0  ;;  %v7983_v19 = vld [vmem:[%s9216_s12 + $0x68] sm:$0xff] }
 0x74c   : > { %14418 = vst [vmem:[#allocation54_spill] sm:$0xff] %v10472_v46  ;;  %v6716_v12 = vmax.f32 %v6700_v35, 0.0  ;;  %v7984_v35 = vld [vmem:[%s9216_s12 + $0x70] sm:$0xff] }
 0x74d   : > { %v6094_v21 = vpop.f32.mrb[120].mxu0 }
 0x74e   : > { %v10476_v18 = vadd.f32 %v6716_v12, %v9883_v48  ;;  %v6701_v56 = vadd.f32 %v7982_v22, %v6094_v21  ;;  %v6096_v47 = vpop.f32.mrb[121].mxu0 }
 0x750   : > { %14419 = vst [vmem:[#allocation55_spill] sm:$0xff] %v10476_v18  ;;  %v6717_v54 = vmax.f32 %v6701_v56, 0.0  ;;  %v7985_v56 = vld [vmem:[%s9216_s12 + $0x78] sm:$0xff] }
 0x751   : > { %v6099_v3 = vpop.f32.mrb[122].mxu0 }
 0x752   : > { %v10480_v14 = vadd.f32 %v6717_v54, %v14420_v2  ;;  %v6702_v6 = vadd.f32 %v7983_v19, %v6099_v3  ;;  %v6101_v46 = vpop.f32.mrb[123].mxu0 }
 0x753   : > { %v2318_v46 = vand.u32 65535, %v10274_v27 }
 0x754   : > { %v6718_v8 = vmax.f32 %v6702_v6, 0.0  ;;  %v2334_v6 = vand.u32 65535, %v10283_v1  ;;  %v2366_v1 = vand.u32 65535, %v10303_v59  ;;  %v2398_v59 = vand.u32 65535, %v10323_v52 }
 0x755   : > { %v6104_v17 = vpop.f32.mrb[124].mxu0  ;;  %v2430_v52 = vand.u32 65535, %v10343_v49  ;;  %v2462_v49 = vand.u32 65535, %v10363_v44  ;;  %v2494_v44 = vand.u32 65535, %v10383_v25  ;;  %v2526_v25 = vand.u32 65535, %v10403_v41 }
 0x756   : > { %v10484_v38 = vadd.f32 %v6718_v8, %v9891_v26  ;;  %v6703_v48 = vadd.f32 %v7984_v35, %v6104_v17  ;;  %v6106_v12 = vpop.f32.mrb[125].mxu0  ;;  %v2320_v26 = vcvt.s32.f32 %v2318_v46  ;;  %v2350_v17 = vand.u32 65535, %v10293_v57 }
 0x757   : > { %v2368_v12 = vcvt.s32.f32 %v2366_v1  ;;  %v2382_v57 = vand.u32 65535, %v10313_v42  ;;  %v2414_v42 = vand.u32 65535, %v10333_v23  ;;  %v2446_v23 = vand.u32 65535, %v10353_v29 }
 0x758   : > { %v6719_v18 = vmax.f32 %v6703_v48, 0.0  ;;  %v2352_v35 = vcvt.s32.f32 %v2350_v17  ;;  %v2478_v29 = vand.u32 65535, %v10373_v53  ;;  %v2510_v53 = vand.u32 65535, %v10393_v28 }
 0x759   : > { %v6109_v21 = vpop.f32.mrb[126].mxu0  ;;  %v2416_v46 = vcvt.s32.f32 %v2414_v42  ;;  %v2542_v28 = vand.u32 65535, %v10413_v40  ;;  %v2558_v41 = vand.u32 65535, %v10423_v4 }
 0x75a   : > { %v10488_v22 = vadd.f32 %v6719_v18, %v9895_v9  ;;  %v6704_v47 = vadd.f32 %v7985_v56, %v6109_v21  ;;  %v6111_v54 = vpop.f32.mrb[127].mxu0  ;;  %v2336_v18 = vcvt.s32.f32 %v2334_v6  ;;  %v2384_v56 = vcvt.s32.f32 %v2382_v57 }
 0x75b   : > { %v2400_v54 = vcvt.s32.f32 %v2398_v59  ;;  %v2432_v6 = vcvt.s32.f32 %v2430_v52  ;;  %v2480_v1 = vcvt.s32.f32 %v2478_v29  ;;  %v2528_v59 = vcvt.s32.f32 %v2526_v25 }
 0x75c   : > { %v6720_v2 = vmax.f32 %v6704_v47, 0.0 }
 0x75e   : > { %v10492_v3 = vadd.f32 %v6720_v2, %v9899_v58 }
 0x76f   : > { %v10495_v19 = vpop.xlane.xlu0 %2322 }
 0x770   : > { %vm2324_vm1 = vcmp.eq.f32.partialorder %v10281_v24, %v10495_v19 }
 0x771   : > { %v2325_v8 = vsel %vm2324_vm1, %v2320_v26, inf  ;;  %vm2604_vm1 = vcmp.eq.s32.totalorder %v8511_v62, 3 }
 0x772   : > { %2326 = vmin.xlane.f32.xlu0 %v2325_v8 }
 0x773   : > { %v10500_v9 = vpop.xlane.xlu1 %2338 }
 0x774   : > { %vm2340_vm8 = vcmp.eq.f32.partialorder %v10291_v7, %v10500_v9 }
 0x775   : > { %v2341_v58 = vsel %vm2340_vm8, %v2336_v18, inf  ;;  %v2448_v18 = vcvt.s32.f32 %v2446_v23 }
 0x776   : > { %2342 = vmin.xlane.f32.xlu1 %v2341_v58  ;;  %v2464_v58 = vcvt.s32.f32 %v2462_v49 }
 0x777   : > { %v10505_v27 = vpop.xlane.xlu0 %2354 }
 0x778   : > { %vm2356_vm9 = vcmp.eq.f32.partialorder %v10301_v55, %v10505_v27  ;;  %v2361_v23 = vcvt.f32.s32 %v10505_v27 }
 0x779   : > { %v2357_v24 = vsel %vm2356_vm9, %v2352_v35, inf }
 0x77a   : > { %2358 = vmin.xlane.f32.xlu0 %v2357_v24  ;;  %v2362_v49 = vshll.u32 %v2361_v23, 16 }
 0x77b   : > { %v10510_v48 = vpop.xlane.xlu1 %2370 }
 0x77c   : > { %vm2372_vm10 = vcmp.eq.f32.partialorder %v10311_v34, %v10510_v48 }
 0x77d   : > { %v2373_v7 = vsel %vm2372_vm10, %v2368_v12, inf  ;;  %v2496_v12 = vcvt.s32.f32 %v2494_v44 }
 0x77e   : > { %2374 = vmin.xlane.f32.xlu1 %v2373_v7  ;;  %v2512_v7 = vcvt.s32.f32 %v2510_v53  ;;  %v14424_v53 = vld [vmem:[#allocation59_spill] sm:$0xff] }
 0x77f   : > { %v10515_v21 = vpop.xlane.xlu0 %2386 }
 0x780   : > { %vm2388_vm11 = vcmp.eq.f32.partialorder %v10321_v43, %v10515_v21 }
 0x781   : > { %v2389_v55 = vsel %vm2388_vm11, %v2384_v56, inf }
 0x782   : > { %2390 = vmin.xlane.f32.xlu0 %v2389_v55 }
 0x783   : > { %v10520_v47 = vpop.xlane.xlu1 %2402 }
 0x784   : > { %vm2404_vm12 = vcmp.eq.f32.partialorder %v10331_v11, %v10520_v47 }
 0x785   : > { %v2405_v34 = vsel %vm2404_vm12, %v2400_v54, inf  ;;  %v2544_v54 = vcvt.s32.f32 %v2542_v28 }
 0x786   : > { %2406 = vmin.xlane.f32.xlu1 %v2405_v34  ;;  %v2560_v34 = vcvt.s32.f32 %v2558_v41 }
 0x787   : > { %v10525_v2 = vpop.xlane.xlu0 %2418 }
 0x788   : > { %vm2420_vm13 = vcmp.eq.f32.partialorder %v10341_v37, %v10525_v2 }
 0x789   : > { %v2421_v43 = vsel %vm2420_vm13, %v2416_v46, inf  ;;  %v2345_v46 = vcvt.f32.s32 %v10500_v9 }
 0x78a   : > { %2422 = vmin.xlane.f32.xlu0 %v2421_v43 }
 0x78b   : > { %v10530_v26 = vpop.xlane.xlu1 %2434 }
 0x78c   : > { %vm2436_vm14 = vcmp.eq.f32.partialorder %v10351_v39, %v10530_v26 }
 0x78d   : > { %v2437_v11 = vsel %vm2436_vm14, %v2432_v6, inf  ;;  %v2346_v6 = vshll.u32 %v2345_v46, 16 }
 0x78e   : > { %2438 = vmin.xlane.f32.xlu1 %v2437_v11 }
 0x78f   : > { %v10535_v8 = vpop.xlane.xlu0 %2450 }
 0x790   : > { %vm2452_vm15 = vcmp.eq.f32.partialorder %v10361_v5, %v10535_v8 }
 0x791   : > { %v2453_v37 = vsel %vm2452_vm15, %v2448_v18, inf }
 0x792   : > { %2454 = vmin.xlane.f32.xlu0 %v2453_v37  ;;  %v2377_v37 = vcvt.f32.s32 %v10510_v48 }
 0x793   : > { %v10540_v17 = vpop.xlane.xlu1 %2466 }
 0x794   : > { %vm2468_vm0 = vcmp.eq.f32.partialorder %v10371_v15, %v10540_v17  ;;  %v2378_v44 = vshll.u32 %v2377_v37, 16  ;;  %v14440_v37 = vld [vmem:[#allocation28_spill] sm:$0xff] }
 0x795   : > { %v2469_v39 = vsel %vm2468_vm0, %v2464_v58, inf }
 0x796   : > { %2470 = vmin.xlane.f32.xlu1 %v2469_v39  ;;  %v14422_v39 = vld [vmem:[#allocation58_spill] sm:$0xff] }
 0x797   : > { %v10545_v35 = vpop.xlane.xlu0 %2482 }
 0x798   : > { %vm2484_vm3 = vcmp.eq.f32.partialorder %v10381_v31, %v10545_v35 }
 0x799   : > { %v2485_v5 = vsel %vm2484_vm3, %v2480_v1, inf }
 0x79a   : > { %2486 = vmin.xlane.f32.xlu0 %v2485_v5  ;;  %v2393_v5 = vcvt.f32.s32 %v10515_v21 }
 0x79b   : > { %v10550_v24 = vpop.xlane.xlu1 %2498 }
 0x79c   : > { %vm2500_vm4 = vcmp.eq.f32.partialorder %v10391_v51, %v10550_v24 }
 0x79d   : > { %v2501_v15 = vsel %vm2500_vm4, %v2496_v12, inf }
 0x79e   : > { %2502 = vmin.xlane.f32.xlu1 %v2501_v15 }
 0x79f   : > { %v10555_v57 = vpop.xlane.xlu0 %2514 }
 0x7a0   : > { %vm2516_vm5 = vcmp.eq.f32.partialorder %v10401_v36, %v10555_v57 }
 0x7a1   : > { %v2517_v31 = vsel %vm2516_vm5, %v2512_v7, inf  ;;  %v14426_v7 = vld [vmem:[#allocation60_spill] sm:$0xff] }
 0x7a2   : > { %2518 = vmin.xlane.f32.xlu0 %v2517_v31  ;;  %v14428_v31 = vld [vmem:[#allocation61_spill] sm:$0xff] }
 0x7a3   : > { %v10560_v56 = vpop.xlane.xlu1 %2530 }
 0x7a4   : > { %vm2532_vm6 = vcmp.eq.f32.partialorder %v10411_v30, %v10560_v56  ;;  %v2329_v30 = vcvt.f32.s32 %v10495_v19 }
 0x7a5   : > { %v2533_v51 = vsel %vm2532_vm6, %v2528_v59, inf }
 0x7a6   : > { %2534 = vmin.xlane.f32.xlu1 %v2533_v51  ;;  %v2330_v43 = vshll.u32 %v2329_v30, 16  ;;  %v2394_v51 = vshll.u32 %v2393_v5, 16  ;;  %v14432_v30 = vld [vmem:[#allocation63_spill] sm:$0xff] }
 0x7a7   : > { %v10565_v55 = vpop.xlane.xlu0 %2546 }
 0x7a8   : > { %vm2548_vm2 = vcmp.eq.f32.partialorder %v10421_v20, %v10565_v55 }
 0x7a9   : > { %v2549_v36 = vsel %vm2548_vm2, %v2544_v54, inf  ;;  %v2409_v54 = vcvt.f32.s32 %v10520_v47 }
 0x7aa   : > { %2550 = vmin.xlane.f32.xlu0 %v2549_v36  ;;  %v14430_v36 = vld [vmem:[#allocation62_spill] sm:$0xff] }
 0x7ab   : > { %v10570_v42 = vpop.xlane.xlu1 %2562 }
 0x7ac   : > { %vm2564_vm7 = vcmp.eq.f32.partialorder %v10427_v60, %v10570_v42 }
 0x7ad   : > { %v2565_v40 = vsel %vm2564_vm7, %v2560_v34, inf }
 0x7ae   : > { %2566 = vmin.xlane.f32.xlu1 %v2565_v40 }
 0x7ff   : > { %v2327_v52 = vpop.xlane.xlu0 %2326 }
 0x800   : > { %v2328_v4 = vcvt.f32.s32 %v2327_v52  ;;  %v14434_v52 = vld [vmem:[#allocation64_spill] sm:$0xff] }
 0x802   : > { %v2331_v20 = vadd.s32 %v2330_v43, %v2328_v4 }
 0x803   : > { %v2343_v11 = vpop.xlane.xlu1 %2342 }
 0x804   : > { %v10581_v60 = vsel %vm2604_vm1, %v2331_v20, %v9988_v33  ;;  %v2344_v18 = vcvt.f32.s32 %v2343_v11  ;;  %vm2573_vm8 = vcmp.eq.s32.totalorder %v8514_v0, %v2331_v20  ;;  %vm2572_vm9 = vcmp.eq.s32.totalorder %v8511_v62, %v2331_v20  ;;  %v14436_v11 = vld [vmem:[#allocation65_spill] sm:$0xff] }
 0x805   : > { %v10586_v19 = vsel %vm2573_vm8, -inf, %v9993_v50  ;;  %7616 = vmatprep.mubr.msk.f32.mxu0 %vm2573_vm8, %v14215_v63  ;;  %v10590_v9 = vsel %vm2572_vm9, -inf, %v9997_v45  ;;  %v2410_v20 = vshll.u32 %v2409_v54, 16 }
 0x806   : > { %v2347_v27 = vadd.s32 %v2346_v6, %v2344_v18  ;;  %7617 = vmatmul.mubr.msk.f32.gmra.mrb[128].mxu0 %vm2572_vm9, %v14215_v63  ;;  %v2754_v33 = vmax.f32 %v10590_v9, %v10586_v19  ;;  %v2425_v6 = vcvt.f32.s32 %v10525_v2 }
 0x807   : > { %v2359_v58 = vpop.xlane.xlu0 %2358 }
 0x808   : > { %v10599_v50 = vsel %vm2604_vm1, %v2347_v27, %v10006_v32  ;;  %v2360_v29 = vcvt.f32.s32 %v2359_v58  ;;  %2755 = vmax.xlane.f32.xlu0 %v2754_v33  ;;  %vm2575_vm10 = vcmp.eq.s32.totalorder %v8514_v0, %v2347_v27  ;;  %vm2574_vm11 = vcmp.eq.s32.totalorder %v8511_v62, %v2347_v27  ;;  %v14438_v33 = vld [vmem:[#allocation26_spill] sm:$0xff] }
 0x809   : > { %v10604_v45 = vsel %vm2575_vm10, -inf, %v10011_v61  ;;  %7618 = vmatprep.mubr.msk.f32.mxu0 %vm2575_vm10, %v14215_v63  ;;  %v10608_v1 = vsel %vm2574_vm11, -inf, %v14422_v39  ;;  %v2426_v39 = vshll.u32 %v2425_v6, 16 }
 0x80a   : > { %14421 = vst [vmem:[#allocation56_spill] sm:$0xff] %v10604_v45  ;;  %14423 = vst [vmem:[#allocation57_spill] sm:$0xff] %v10608_v1  ;;  %v2363_v48 = vadd.s32 %v2362_v49, %v2360_v29  ;;  %7619 = vmatmul.mubr.msk.f32.gmra.mrb[130].mxu0 %vm2574_vm11, %v14215_v63  ;;  %v2757_v32 = vmax.f32 %v10608_v1, %v10604_v45 }
 0x80b   : > { %v2375_v12 = vpop.xlane.xlu1 %2374 }
 0x80c   : > { %v10617_v61 = vsel %vm2604_vm1, %v2363_v48, %v14424_v53  ;;  %v2376_v15 = vcvt.f32.s32 %v2375_v12  ;;  %2758 = vmax.xlane.f32.xlu1 %v2757_v32  ;;  %vm2577_vm12 = vcmp.eq.s32.totalorder %v8514_v0, %v2363_v48  ;;  %vm2576_vm13 = vcmp.eq.s32.totalorder %v8511_v62, %v2363_v48  ;;  %v14444_v53 = vld [vmem:[#allocation29_spill] sm:$0xff] }
 0x80d   : > { %14425 = vst [vmem:[#allocation58_spill] sm:$0xff] %v10617_v61  ;;  %v10622_v25 = vsel %vm2577_vm12, -inf, %v14426_v7  ;;  %7620 = vmatprep.mubr.msk.f32.mxu0 %vm2577_vm12, %v14215_v63  ;;  %v10626_v59 = vsel %vm2576_vm13, -inf, %v14428_v31  ;;  %v2441_v48 = vcvt.f32.s32 %v10530_v26  ;;  %v14446_v7 = vld [vmem:[#allocation31_spill] sm:$0xff]  ;;  %v7988_v61 = vld [vmem:[%s9216_s12 + $0x10] sm:$0xff] }
 0x80e   : > { %14427 = vst [vmem:[#allocation59_spill] sm:$0xff] %v10622_v25  ;;  %14429 = vst [vmem:[#allocation60_spill] sm:$0xff] %v10626_v59  ;;  %v2379_v21 = vadd.s32 %v2378_v44, %v2376_v15  ;;  %7621 = vmatmul.mubr.msk.f32.gmra.mrb[132].mxu0 %vm2576_vm13, %v14215_v63  ;;  %v2760_v28 = vmax.f32 %v10626_v59, %v10622_v25  ;;  %v14442_v44 = vld [vmem:[#allocation27_spill] sm:$0xff] }
 0x80f   : > { %v2391_v41 = vpop.xlane.xlu0 %2390 }
 0x810   : > { %v10635_v34 = vsel %vm2604_vm1, %v2379_v21, %v14430_v36  ;;  %v2392_v40 = vcvt.f32.s32 %v2391_v41  ;;  %2761 = vmax.xlane.f32.xlu0 %v2760_v28  ;;  %vm2579_vm14 = vcmp.eq.s32.totalorder %v8514_v0, %v2379_v21  ;;  %vm2578_vm15 = vcmp.eq.s32.totalorder %v8511_v62, %v2379_v21  ;;  %v14448_v41 = vld [vmem:[#allocation30_spill] sm:$0xff] }
 0x811   : > { %14431 = vst [vmem:[#allocation61_spill] sm:$0xff] %v10635_v34  ;;  %v10640_v46 = vsel %vm2579_vm14, -inf, %v14432_v30  ;;  %7622 = vmatprep.mubr.msk.f32.mxu0 %vm2579_vm14, %v14215_v63  ;;  %v10644_v43 = vsel %vm2578_vm15, -inf, %v14434_v52  ;;  %v2442_v28 = vshll.u32 %v2441_v48, 16  ;;  %v14450_v30 = vld [vmem:[#allocation32_spill] sm:$0xff] }
 0x812   : > { %14433 = vst [vmem:[#allocation62_spill] sm:$0xff] %v10640_v46  ;;  %14435 = vst [vmem:[#allocation63_spill] sm:$0xff] %v10644_v43  ;;  %v2395_v47 = vadd.s32 %v2394_v51, %v2392_v40  ;;  %7623 = vmatmul.mubr.msk.f32.gmra.mrb[134].mxu0 %vm2578_vm15, %v14215_v63  ;;  %v2763_v4 = vmax.f32 %v10644_v43, %v10640_v46  ;;  %v2457_v51 = vcvt.f32.s32 %v10535_v8 }
 0x813   : > { %v2407_v23 = vpop.xlane.xlu1 %2406 }
 0x814   : > { %v10653_v18 = vsel %vm2604_vm1, %v2395_v47, %v14436_v11  ;;  %v2408_v27 = vcvt.f32.s32 %v2407_v23  ;;  %2764 = vmax.xlane.f32.xlu1 %v2763_v4  ;;  %vm2581_vm0 = vcmp.eq.s32.totalorder %v8514_v0, %v2395_v47  ;;  %vm2580_vm3 = vcmp.eq.s32.totalorder %v8511_v62, %v2395_v47  ;;  %v14452_v47 = vld [vmem:[#allocation34_spill] sm:$0xff] }
 0x815   : > { %14437 = vst [vmem:[#allocation64_spill] sm:$0xff] %v10653_v18  ;;  %v10658_v49 = vsel %vm2581_vm0, -inf, %v14438_v33  ;;  %7624 = vmatprep.mubr.msk.f32.mxu0 %vm2581_vm0, %v14215_v63  ;;  %v10662_v58 = vsel %vm2580_vm3, -inf, %v14440_v37  ;;  %v2458_v6 = vshll.u32 %v2457_v51, 16  ;;  %v2473_v23 = vcvt.f32.s32 %v10540_v17 }
 0x816   : > { %14439 = vst [vmem:[#allocation65_spill] sm:$0xff] %v10658_v49  ;;  %14441 = vst [vmem:[#allocation26_spill] sm:$0xff] %v10662_v58  ;;  %v2411_v2 = vadd.s32 %v2410_v20, %v2408_v27  ;;  %7625 = vmatmul.mubr.msk.f32.gmra.mrb[136].mxu0 %vm2580_vm3, %v14215_v63  ;;  %v2766_v29 = vmax.f32 %v10662_v58, %v10658_v49  ;;  %v14454_v27 = vld [vmem:[#allocation33_spill] sm:$0xff] }
 0x817   : > { %v2423_v32 = vpop.xlane.xlu0 %2422 }
 0x818   : > { %v10671_v5 = vsel %vm2604_vm1, %v2411_v2, %v14442_v44  ;;  %v2424_v12 = vcvt.f32.s32 %v2423_v32  ;;  %2767 = vmax.xlane.f32.xlu0 %v2766_v29  ;;  %vm2583_vm4 = vcmp.eq.s32.totalorder %v8514_v0, %v2411_v2  ;;  %vm2582_vm5 = vcmp.eq.s32.totalorder %v8511_v62, %v2411_v2  ;;  %v14456_v2 = vld [vmem:[#allocation35_spill] sm:$0xff] }
 0x819   : > { %14443 = vst [vmem:[#allocation28_spill] sm:$0xff] %v10671_v5  ;;  %v10676_v15 = vsel %vm2583_vm4, -inf, %v14444_v53  ;;  %7626 = vmatprep.mubr.msk.f32.mxu0 %vm2583_vm4, %v14215_v63  ;;  %v10680_v31 = vsel %vm2582_vm5, -inf, %v14446_v7  ;;  %v2474_v44 = vshll.u32 %v2473_v23, 16  ;;  %v14460_v7 = vld [vmem:[#allocation36_spill] sm:$0xff] }
 0x81a   : > { %14445 = vst [vmem:[#allocation27_spill] sm:$0xff] %v10676_v15  ;;  %14447 = vst [vmem:[#allocation29_spill] sm:$0xff] %v10680_v31  ;;  %v2427_v26 = vadd.s32 %v2426_v39, %v2424_v12  ;;  %7627 = vmatmul.mubr.msk.f32.gmra.mrb[138].mxu0 %vm2582_vm5, %v14215_v63  ;;  %v2769_v21 = vmax.f32 %v10680_v31, %v10676_v15  ;;  %v14458_v39 = vld [vmem:[#allocation37_spill] sm:$0xff]  ;;  %v2489_v12 = vcvt.f32.s32 %v10545_v35 }
 0x81b   : > { %v2439_v54 = vpop.xlane.xlu1 %2438 }
 0x81c   : > { %v10689_v36 = vsel %vm2604_vm1, %v2427_v26, %v14448_v41  ;;  %v2440_v40 = vcvt.f32.s32 %v2439_v54  ;;  %2770 = vmax.xlane.f32.xlu1 %v2769_v21  ;;  %vm2585_vm6 = vcmp.eq.s32.totalorder %v8514_v0, %v2427_v26  ;;  %vm2584_vm2 = vcmp.eq.s32.totalorder %v8511_v62, %v2427_v26  ;;  %v14464_v54 = vld [vmem:[#allocation40_spill] sm:$0xff] }
 0x81d   : > { %14449 = vst [vmem:[#allocation31_spill] sm:$0xff] %v10689_v36  ;;  %v10694_v52 = vsel %vm2585_vm6, -inf, %v14450_v30  ;;  %7628 = vmatprep.mubr.msk.f32.mxu0 %vm2585_vm6, %v14215_v63  ;;  %v10698_v4 = vsel %vm2584_vm2, -inf, %v14452_v47  ;;  %v2490_v30 = vshll.u32 %v2489_v12, 16  ;;  %v2505_v47 = vcvt.f32.s32 %v10550_v24  ;;  %v14472_v12 = vld [vmem:[#allocation12_spill] sm:$0xff] }
 0x81e   : > { %14451 = vst [vmem:[#allocation30_spill] sm:$0xff] %v10694_v52  ;;  %14453 = vst [vmem:[#allocation32_spill] sm:$0xff] %v10698_v4  ;;  %v2443_v8 = vadd.s32 %v2442_v28, %v2440_v40  ;;  %7629 = vmatmul.mubr.msk.f32.gmra.mrb[140].mxu0 %vm2584_vm2, %v14215_v63  ;;  %v2772_v20 = vmax.f32 %v10698_v4, %v10694_v52  ;;  %v14462_v28 = vld [vmem:[#allocation38_spill] sm:$0xff] }
 0x81f   : > { %v2455_v11 = vpop.xlane.xlu0 %2454 }
 0x820   : > { %v10707_v33 = vsel %vm2604_vm1, %v2443_v8, %v14454_v27  ;;  %v2456_v37 = vcvt.f32.s32 %v2455_v11  ;;  %2773 = vmax.xlane.f32.xlu0 %v2772_v20  ;;  %vm2587_vm7 = vcmp.eq.s32.totalorder %v8514_v0, %v2443_v8  ;;  %vm2586_vm8 = vcmp.eq.s32.totalorder %v8511_v62, %v2443_v8  ;;  %v14466_v20 = vld [vmem:[#allocation39_spill] sm:$0xff]  ;;  %v14468_v11 = vld [vmem:[#allocation41_spill] sm:$0xff] }
 0x821   : > { %14455 = vst [vmem:[#allocation34_spill] sm:$0xff] %v10707_v33  ;;  %v10712_v29 = vsel %vm2587_vm7, -inf, %v14456_v2  ;;  %7630 = vmatprep.mubr.msk.f32.mxu0 %vm2587_vm7, %v14215_v63  ;;  %v10716_v48 = vsel %vm2586_vm8, -inf, %v14458_v39 }
 0x822   : > { %14457 = vst [vmem:[#allocation33_spill] sm:$0xff] %v10712_v29  ;;  %14459 = vst [vmem:[#allocation35_spill] sm:$0xff] %v10716_v48  ;;  %v2459_v17 = vadd.s32 %v2458_v6, %v2456_v37  ;;  %7631 = vmatmul.mubr.msk.f32.gmra.mrb[142].mxu0 %vm2586_vm8, %v14215_v63  ;;  %v2775_v32 = vmax.f32 %v10716_v48, %v10712_v29  ;;  %v14470_v37 = vld [vmem:[#allocation13_spill] sm:$0xff] }
 0x823   : > { %v2471_v53 = vpop.xlane.xlu1 %2470 }
 0x824   : > { %v10725_v26 = vsel %vm2604_vm1, %v2459_v17, %v14460_v7  ;;  %v2472_v21 = vcvt.f32.s32 %v2471_v53  ;;  %2776 = vmax.xlane.f32.xlu1 %v2775_v32  ;;  %vm2589_vm9 = vcmp.eq.s32.totalorder %v8514_v0, %v2459_v17  ;;  %vm2588_vm10 = vcmp.eq.s32.totalorder %v8511_v62, %v2459_v17 }
 0x825   : > { %14461 = vst [vmem:[#allocation37_spill] sm:$0xff] %v10725_v26  ;;  %v10730_v51 = vsel %vm2589_vm9, -inf, %v14462_v28  ;;  %7632 = vmatprep.mubr.msk.f32.mxu0 %vm2589_vm9, %v14215_v63  ;;  %v10734_v41 = vsel %vm2588_vm10, -inf, %v14464_v54  ;;  %v2506_v17 = vshll.u32 %v2505_v47, 16  ;;  %v2521_v32 = vcvt.f32.s32 %v10555_v57  ;;  %v14476_v54 = vld [vmem:[#allocation15_spill] sm:$0xff] }
 0x826   : > { %14463 = vst [vmem:[#allocation36_spill] sm:$0xff] %v10730_v51  ;;  %14465 = vst [vmem:[#allocation38_spill] sm:$0xff] %v10734_v41  ;;  %v2475_v35 = vadd.s32 %v2474_v44, %v2472_v21  ;;  %7633 = vmatmul.mubr.msk.f32.gmra.mrb[144].mxu0 %vm2588_vm10, %v14215_v63  ;;  %v2778_v40 = vmax.f32 %v10734_v41, %v10730_v51  ;;  %v14474_v21 = vld [vmem:[#allocation42_spill] sm:$0xff]  ;;  %v2537_v47 = vcvt.f32.s32 %v10560_v56 }
 0x827   : > { %v2487_v8 = vpop.xlane.xlu0 %2486 }
 0x828   : > { %v10743_v6 = vsel %vm2604_vm1, %v2475_v35, %v14466_v20  ;;  %v2488_v23 = vcvt.f32.s32 %v2487_v8  ;;  %2779 = vmax.xlane.f32.xlu0 %v2778_v40  ;;  %vm2591_vm11 = vcmp.eq.s32.totalorder %v8514_v0, %v2475_v35  ;;  %vm2590_vm12 = vcmp.eq.s32.totalorder %v8511_v62, %v2475_v35  ;;  %v14478_v20 = vld [vmem:[#allocation14_spill] sm:$0xff] }
 0x829   : > { %14467 = vst [vmem:[#allocation40_spill] sm:$0xff] %v10743_v6  ;;  %v10748_v27 = vsel %vm2591_vm11, -inf, %v14468_v11  ;;  %7634 = vmatprep.mubr.msk.f32.mxu0 %vm2591_vm11, %v14215_v63  ;;  %v10752_v2 = vsel %vm2590_vm12, -inf, %v14470_v37  ;;  %v14480_v37 = vld [vmem:[#allocation43_spill] sm:$0xff] }
 0x82a   : > { %14469 = vst [vmem:[#allocation39_spill] sm:$0xff] %v10748_v27  ;;  %14471 = vst [vmem:[#allocation41_spill] sm:$0xff] %v10752_v2  ;;  %v2491_v24 = vadd.s32 %v2490_v30, %v2488_v23  ;;  %7635 = vmatmul.mubr.msk.f32.gmra.mrb[146].mxu0 %vm2590_vm12, %v14215_v63  ;;  %v2781_v39 = vmax.f32 %v10752_v2, %v10748_v27  ;;  %v2522_v30 = vshll.u32 %v2521_v32, 16 }
 0x82b   : > { %v2503_v44 = vpop.xlane.xlu1 %2502 }
 0x82c   : > { %v10761_v53 = vsel %vm2604_vm1, %v2491_v24, %v14472_v12  ;;  %v2504_v7 = vcvt.f32.s32 %v2503_v44  ;;  %2782 = vmax.xlane.f32.xlu1 %v2781_v39  ;;  %vm2593_vm13 = vcmp.eq.s32.totalorder %v8514_v0, %v2491_v24  ;;  %vm2592_vm14 = vcmp.eq.s32.totalorder %v8511_v62, %v2491_v24  ;;  %v14482_v39 = vld [vmem:[#allocation17_spill] sm:$0xff] }
 0x82d   : > { %14473 = vst [vmem:[#allocation13_spill] sm:$0xff] %v10761_v53  ;;  %v10766_v28 = vsel %vm2593_vm13, -inf, %v14474_v21  ;;  %7636 = vmatprep.mubr.msk.f32.mxu0 %vm2593_vm13, %v14215_v63  ;;  %v10770_v35 = vsel %vm2592_vm14, -inf, %v14476_v54  ;;  %v2538_v44 = vshll.u32 %v2537_v47, 16  ;;  %v2553_v12 = vcvt.f32.s32 %v10565_v55  ;;  %v14484_v21 = vld [vmem:[#allocation16_spill] sm:$0xff]  ;;  %v14488_v47 = vld [vmem:[#allocation19_spill] sm:$0xff] }
 0x82e   : > { %14475 = vst [vmem:[#allocation12_spill] sm:$0xff] %v10766_v28  ;;  %14477 = vst [vmem:[#allocation42_spill] sm:$0xff] %v10770_v35  ;;  %v2507_v57 = vadd.s32 %v2506_v17, %v2504_v7  ;;  %7637 = vmatmul.mubr.msk.f32.gmra.mrb[148].mxu0 %vm2592_vm14, %v14215_v63  ;;  %v2784_v40 = vmax.f32 %v10770_v35, %v10766_v28 }
 0x82f   : > { %v2519_v8 = vpop.xlane.xlu0 %2518 }
 0x830   : > { %v10779_v23 = vsel %vm2604_vm1, %v2507_v57, %v14478_v20  ;;  %v2520_v11 = vcvt.f32.s32 %v2519_v8  ;;  %2785 = vmax.xlane.f32.xlu0 %v2784_v40  ;;  %vm2595_vm15 = vcmp.eq.s32.totalorder %v8514_v0, %v2507_v57  ;;  %vm2594_vm0 = vcmp.eq.s32.totalorder %v8511_v62, %v2507_v57  ;;  %v14486_v40 = vld [vmem:[#allocation44_spill] sm:$0xff] }
 0x831   : > { %14479 = vst [vmem:[#allocation15_spill] sm:$0xff] %v10779_v23  ;;  %v10784_v24 = vsel %vm2595_vm15, -inf, %v14480_v37  ;;  %7638 = vmatprep.mubr.msk.f32.mxu0 %vm2595_vm15, %v14215_v63  ;;  %v10788_v17 = vsel %vm2594_vm0, -inf, %v14482_v39  ;;  %v2569_v37 = vcvt.f32.s32 %v10570_v42 }
 0x832   : > { %14481 = vst [vmem:[#allocation14_spill] sm:$0xff] %v10784_v24  ;;  %14483 = vst [vmem:[#allocation43_spill] sm:$0xff] %v10788_v17  ;;  %v2523_v56 = vadd.s32 %v2522_v30, %v2520_v11  ;;  %7639 = vmatmul.mubr.msk.f32.gmra.mrb[150].mxu0 %vm2594_vm0, %v14215_v63  ;;  %v2787_v32 = vmax.f32 %v10788_v17, %v10784_v24  ;;  %v2554_v11 = vshll.u32 %v2553_v12, 16  ;;  %v14494_v12 = vld [vmem:[#allocation21_spill] sm:$0xff] }
 0x833   : > { %v2535_v7 = vpop.xlane.xlu1 %2534 }
 0x834   : > { %v10797_v54 = vsel %vm2604_vm1, %v2523_v56, %v14484_v21  ;;  %v2536_v57 = vcvt.f32.s32 %v2535_v7  ;;  %2788 = vmax.xlane.f32.xlu1 %v2787_v32  ;;  %vm2597_vm3 = vcmp.eq.s32.totalorder %v8514_v0, %v2523_v56  ;;  %vm2596_vm4 = vcmp.eq.s32.totalorder %v8511_v62, %v2523_v56  ;;  %v14490_v32 = vld [vmem:[#allocation18_spill] sm:$0xff] }
 0x835   : > { %14485 = vst [vmem:[#allocation17_spill] sm:$0xff] %v10797_v54  ;;  %v10802_v30 = vsel %vm2597_vm3, -inf, %v14486_v40  ;;  %7640 = vmatprep.mubr.msk.f32.mxu0 %vm2597_vm3, %v14215_v63  ;;  %v10806_v8 = vsel %vm2596_vm4, -inf, %v14488_v47  ;;  %v2570_v47 = vshll.u32 %v2569_v37, 16 }
 0x836   : > { %14487 = vst [vmem:[#allocation16_spill] sm:$0xff] %v10802_v30  ;;  %14489 = vst [vmem:[#allocation44_spill] sm:$0xff] %v10806_v8  ;;  %v2539_v55 = vadd.s32 %v2538_v44, %v2536_v57  ;;  %7641 = vmatmul.mubr.msk.f32.gmra.mrb[152].mxu0 %vm2596_vm4, %v14215_v63  ;;  %v2790_v20 = vmax.f32 %v10806_v8, %v10802_v30  ;;  %v14492_v44 = vld [vmem:[#allocation45_spill] sm:$0xff] }
 0x837   : > { %v2551_v39 = vpop.xlane.xlu0 %2550 }
 0x838   : > { %v10815_v56 = vsel %vm2604_vm1, %v2539_v55, %v14490_v32  ;;  %v2552_v7 = vcvt.f32.s32 %v2551_v39  ;;  %2791 = vmax.xlane.f32.xlu0 %v2790_v20  ;;  %vm2599_vm5 = vcmp.eq.s32.totalorder %v8514_v0, %v2539_v55  ;;  %vm2598_vm6 = vcmp.eq.s32.totalorder %v8511_v62, %v2539_v55  ;;  %v14496_v39 = vld [vmem:[#allocation20_spill] sm:$0xff] }
 0x839   : > { %14491 = vst [vmem:[#allocation19_spill] sm:$0xff] %v10815_v56  ;;  %v10820_v21 = vsel %vm2599_vm5, -inf, %v14492_v44  ;;  %7642 = vmatprep.mubr.msk.f32.mxu0 %vm2599_vm5, %v14215_v63  ;;  %v10824_v57 = vsel %vm2598_vm6, -inf, %v14494_v12  ;;  %v14498_v44 = vld [vmem:[#allocation46_spill] sm:$0xff] }
 0x83a   : > { %14493 = vst [vmem:[#allocation18_spill] sm:$0xff] %v10820_v21  ;;  %14495 = vst [vmem:[#allocation45_spill] sm:$0xff] %v10824_v57  ;;  %v2555_v42 = vadd.s32 %v2554_v11, %v2552_v7  ;;  %7643 = vmatmul.mubr.msk.f32.gmra.mrb[154].mxu0 %vm2598_vm6, %v14215_v63  ;;  %v2793_v40 = vmax.f32 %v10824_v57, %v10820_v21  ;;  %v14500_v7 = vld [vmem:[#allocation23_spill] sm:$0xff] }
 0x83b   : > { %v2567_v20 = vpop.xlane.xlu1 %2566 }
 0x83c   : > { %v10832_v55 = vsel %vm2604_vm1, %v2555_v42, %v14496_v39  ;;  %v2568_v32 = vcvt.f32.s32 %v2567_v20  ;;  %2794 = vmax.xlane.f32.xlu1 %v2793_v40  ;;  %vm2601_vm2 = vcmp.eq.s32.totalorder %v8514_v0, %v2555_v42  ;;  %vm2600_vm7 = vcmp.eq.s32.totalorder %v8511_v62, %v2555_v42  ;;  %v14502_v20 = vld [vmem:[#allocation22_spill] sm:$0xff]  ;;  %v14504_v42 = vld [vmem:[#allocation47_spill] sm:$0xff] }
 0x83d   : > { %14497 = vst [vmem:[#allocation21_spill] sm:$0xff] %v10832_v55  ;;  %v10837_v11 = vsel %vm2601_vm2, -inf, %v14498_v44  ;;  %7644 = vmatprep.mubr.msk.f32.mxu0 %vm2601_vm2, %v14215_v63  ;;  %v10841_v12 = vsel %vm2600_vm7, -inf, %v14500_v7 }
 0x83e   : > { %14499 = vst [vmem:[#allocation20_spill] sm:$0xff] %v10837_v11  ;;  %14501 = vst [vmem:[#allocation46_spill] sm:$0xff] %v10841_v12  ;;  %v2571_v37 = vadd.s32 %v2570_v47, %v2568_v32  ;;  %7645 = vmatmul.mubr.msk.f32.gmra.mrb[156].mxu0 %vm2600_vm7, %v14215_v63  ;;  %v2796_v39 = vmax.f32 %v10841_v12, %v10837_v11  ;;  %v14506_v47 = vld [vmem:[#allocation25_spill] sm:$0xff] }
 0x840   : > { %v10849_v40 = vsel %vm2604_vm1, %v2571_v37, %v14502_v20  ;;  %2797 = vmax.xlane.f32.xlu0 %v2796_v39  ;;  %vm2603_vm8 = vcmp.eq.s32.totalorder %v8514_v0, %v2571_v37  ;;  %vm2602_vm9 = vcmp.eq.s32.totalorder %v8511_v62, %v2571_v37 }
 0x841   : > { %14503 = vst [vmem:[#allocation23_spill] sm:$0xff] %v10849_v40  ;;  %v10854_v44 = vsel %vm2603_vm8, -inf, %v14504_v42  ;;  %7646 = vmatprep.mubr.msk.f32.mxu0 %vm2603_vm8, %v14215_v63  ;;  %v10858_v32 = vsel %vm2602_vm9, -inf, %v14506_v47 }
 0x842   : > { %14505 = vst [vmem:[#allocation22_spill] sm:$0xff] %v10854_v44  ;;  %14507 = vst [vmem:[#allocation47_spill] sm:$0xff] %v10858_v32  ;;  %7647 = vmatmul.mubr.msk.f32.gmra.mrb[158].mxu0 %vm2602_vm9, %v14215_v63  ;;  %v2799_v7 = vmax.f32 %v10858_v32, %v10854_v44 }
 0x844   : > { %2800 = vmax.xlane.f32.xlu1 %v2799_v7 }
 0x895   : > { %v2756_v20 = vpop.xlane.xlu0 %2755 }
 0x896   : > { %vm2802_vm1 = vcmp.eq.f32.partialorder %v10590_v9, %v2756_v20  ;;  %vm2803_vm10 = vcmp.eq.f32.partialorder %v10586_v19, %v2756_v20 }
 0x897   : > { %v2834_v37 = vsel %vm2802_vm1, %v8511_v62, 256  ;;  %v2835_v39 = vsel %vm2803_vm10, %v8514_v0, 256 }
 0x898   : > { %vm2866_vm11 = vcmp.lt.s32.totalorder %v2834_v37, %v2835_v39 }
 0x899   : > { %v2759_v42 = vpop.xlane.xlu1 %2758  ;;  %v10867_v40 = vsel %vm2866_vm11, %v2834_v37, %v2835_v39 }
 0x89a   : > { %vm2804_vm12 = vcmp.eq.f32.partialorder %v10608_v1, %v2759_v42  ;;  %vm2805_vm13 = vcmp.eq.f32.partialorder %v10604_v45, %v2759_v42  ;;  %v2869_v47 = vshra.s32 %v10867_v40, 16 }
 0x89b   : > { %v2836_v7 = vsel %vm2804_vm12, %v8511_v62, 256  ;;  %v2837_v55 = vsel %vm2805_vm13, %v8514_v0, 256 }
 0x89c   : > { %vm2882_vm14 = vcmp.lt.s32.totalorder %v2836_v7, %v2837_v55  ;;  %v10874_v20 = vcvt.s32.f32 %v2869_v47 }
 0x89d   : > { %v2762_v56 = vpop.xlane.xlu0 %2761  ;;  %v10876_v54 = vsel %vm2882_vm14, %v2836_v7, %v2837_v55 }
 0x89e   : > { %vm2806_vm15 = vcmp.eq.f32.partialorder %v10626_v59, %v2762_v56  ;;  %vm2807_vm0 = vcmp.eq.f32.partialorder %v10622_v25, %v2762_v56  ;;  %2872 = vmin.xlane.f32.xlu0 %v10874_v20  ;;  %v2885_v37 = vshra.s32 %v10876_v54, 16 }
 0x89f   : > { %v2838_v39 = vsel %vm2806_vm15, %v8511_v62, 256  ;;  %v2839_v42 = vsel %vm2807_vm0, %v8514_v0, 256 }
 0x8a0   : > { %vm2898_vm3 = vcmp.lt.s32.totalorder %v2838_v39, %v2839_v42  ;;  %v10884_v23 = vcvt.s32.f32 %v2885_v37 }
 0x8a1   : > { %v2765_v47 = vpop.xlane.xlu1 %2764  ;;  %v10886_v53 = vsel %vm2898_vm3, %v2838_v39, %v2839_v42 }
 0x8a2   : > { %vm2808_vm4 = vcmp.eq.f32.partialorder %v10644_v43, %v2765_v47  ;;  %vm2809_vm5 = vcmp.eq.f32.partialorder %v10640_v46, %v2765_v47  ;;  %2888 = vmin.xlane.f32.xlu1 %v10884_v23  ;;  %v2901_v56 = vshra.s32 %v10886_v53, 16 }
 0x8a3   : > { %v2840_v55 = vsel %vm2808_vm4, %v8511_v62, 256  ;;  %v2841_v7 = vsel %vm2809_vm5, %v8514_v0, 256 }
 0x8a4   : > { %vm2914_vm6 = vcmp.lt.s32.totalorder %v2840_v55, %v2841_v7  ;;  %v10894_v6 = vcvt.s32.f32 %v2901_v56 }
 0x8a5   : > { %v2768_v37 = vpop.xlane.xlu0 %2767  ;;  %v10896_v26 = vsel %vm2914_vm6, %v2840_v55, %v2841_v7 }
 0x8a6   : > { %vm2810_vm2 = vcmp.eq.f32.partialorder %v10662_v58, %v2768_v37  ;;  %vm2811_vm7 = vcmp.eq.f32.partialorder %v10658_v49, %v2768_v37  ;;  %2904 = vmin.xlane.f32.xlu0 %v10894_v6  ;;  %v2917_v39 = vshra.s32 %v10896_v26, 16 }
 0x8a7   : > { %v2842_v42 = vsel %vm2810_vm2, %v8511_v62, 256  ;;  %v2843_v47 = vsel %vm2811_vm7, %v8514_v0, 256 }
 0x8a8   : > { %vm2930_vm8 = vcmp.lt.s32.totalorder %v2842_v42, %v2843_v47  ;;  %v10904_v33 = vcvt.s32.f32 %v2917_v39 }
 0x8a9   : > { %v2771_v56 = vpop.xlane.xlu1 %2770  ;;  %v10906_v36 = vsel %vm2930_vm8, %v2842_v42, %v2843_v47 }
 0x8aa   : > { %vm2812_vm9 = vcmp.eq.f32.partialorder %v10680_v31, %v2771_v56  ;;  %vm2813_vm1 = vcmp.eq.f32.partialorder %v10676_v15, %v2771_v56  ;;  %2920 = vmin.xlane.f32.xlu1 %v10904_v33  ;;  %v2933_v55 = vshra.s32 %v10906_v36, 16 }
 0x8ab   : > { %v2844_v7 = vsel %vm2812_vm9, %v8511_v62, 256  ;;  %v2845_v37 = vsel %vm2813_vm1, %v8514_v0, 256 }
 0x8ac   : > { %vm2946_vm10 = vcmp.lt.s32.totalorder %v2844_v7, %v2845_v37  ;;  %v10914_v5 = vcvt.s32.f32 %v2933_v55 }
 0x8ad   : > { %v2774_v39 = vpop.xlane.xlu0 %2773  ;;  %v10916_v58 = vsel %vm2946_vm10, %v2844_v7, %v2845_v37 }
 0x8ae   : > { %vm2814_vm11 = vcmp.eq.f32.partialorder %v10698_v4, %v2774_v39  ;;  %vm2815_vm12 = vcmp.eq.f32.partialorder %v10694_v52, %v2774_v39  ;;  %2936 = vmin.xlane.f32.xlu0 %v10914_v5  ;;  %v2949_v42 = vshra.s32 %v10916_v58, 16 }
 0x8af   : > { %v2846_v47 = vsel %vm2814_vm11, %v8511_v62, 256  ;;  %v2847_v56 = vsel %vm2815_vm12, %v8514_v0, 256 }
 0x8b0   : > { %vm2962_vm13 = vcmp.lt.s32.totalorder %v2846_v47, %v2847_v56  ;;  %v10924_v31 = vcvt.s32.f32 %v2949_v42 }
 0x8b1   : > { %v2777_v55 = vpop.xlane.xlu1 %2776  ;;  %v10926_v15 = vsel %vm2962_vm13, %v2846_v47, %v2847_v56 }
 0x8b2   : > { %vm2816_vm14 = vcmp.eq.f32.partialorder %v10716_v48, %v2777_v55  ;;  %vm2817_vm15 = vcmp.eq.f32.partialorder %v10712_v29, %v2777_v55  ;;  %2952 = vmin.xlane.f32.xlu1 %v10924_v31  ;;  %v2965_v7 = vshra.s32 %v10926_v15, 16 }
 0x8b3   : > { %v2848_v37 = vsel %vm2816_vm14, %v8511_v62, 256  ;;  %v2849_v39 = vsel %vm2817_vm15, %v8514_v0, 256 }
 0x8b4   : > { %vm2978_vm0 = vcmp.lt.s32.totalorder %v2848_v37, %v2849_v39  ;;  %v10934_v4 = vcvt.s32.f32 %v2965_v7 }
 0x8b5   : > { %v2780_v42 = vpop.xlane.xlu0 %2779  ;;  %v10936_v52 = vsel %vm2978_vm0, %v2848_v37, %v2849_v39 }
 0x8b6   : > { %vm2818_vm3 = vcmp.eq.f32.partialorder %v10734_v41, %v2780_v42  ;;  %vm2819_vm4 = vcmp.eq.f32.partialorder %v10730_v51, %v2780_v42  ;;  %2968 = vmin.xlane.f32.xlu0 %v10934_v4  ;;  %v2981_v47 = vshra.s32 %v10936_v52, 16 }
 0x8b7   : > { %v2850_v56 = vsel %vm2818_vm3, %v8511_v62, 256  ;;  %v2851_v55 = vsel %vm2819_vm4, %v8514_v0, 256 }
 0x8b8   : > { %vm2994_vm5 = vcmp.lt.s32.totalorder %v2850_v56, %v2851_v55  ;;  %v10944_v48 = vcvt.s32.f32 %v2981_v47 }
 0x8b9   : > { %v2783_v7 = vpop.xlane.xlu1 %2782  ;;  %v10946_v29 = vsel %vm2994_vm5, %v2850_v56, %v2851_v55 }
 0x8ba   : > { %vm2820_vm6 = vcmp.eq.f32.partialorder %v10752_v2, %v2783_v7  ;;  %vm2821_vm2 = vcmp.eq.f32.partialorder %v10748_v27, %v2783_v7  ;;  %2984 = vmin.xlane.f32.xlu1 %v10944_v48  ;;  %v2997_v37 = vshra.s32 %v10946_v29, 16 }
 0x8bb   : > { %v2852_v39 = vsel %vm2820_vm6, %v8511_v62, 256  ;;  %v2853_v42 = vsel %vm2821_vm2, %v8514_v0, 256 }
 0x8bc   : > { %vm3010_vm7 = vcmp.lt.s32.totalorder %v2852_v39, %v2853_v42  ;;  %v10954_v41 = vcvt.s32.f32 %v2997_v37 }
 0x8bd   : > { %v2786_v47 = vpop.xlane.xlu0 %2785  ;;  %v10956_v51 = vsel %vm3010_vm7, %v2852_v39, %v2853_v42 }
 0x8be   : > { %vm2822_vm8 = vcmp.eq.f32.partialorder %v10770_v35, %v2786_v47  ;;  %vm2823_vm9 = vcmp.eq.f32.partialorder %v10766_v28, %v2786_v47  ;;  %3000 = vmin.xlane.f32.xlu0 %v10954_v41  ;;  %v3013_v56 = vshra.s32 %v10956_v51, 16 }
 0x8bf   : > { %v2854_v55 = vsel %vm2822_vm8, %v8511_v62, 256  ;;  %v2855_v7 = vsel %vm2823_vm9, %v8514_v0, 256 }
 0x8c0   : > { %vm3026_vm1 = vcmp.lt.s32.totalorder %v2854_v55, %v2855_v7  ;;  %v10964_v2 = vcvt.s32.f32 %v3013_v56 }
 0x8c1   : > { %v2789_v37 = vpop.xlane.xlu1 %2788  ;;  %v10966_v27 = vsel %vm3026_vm1, %v2854_v55, %v2855_v7 }
 0x8c2   : > { %vm2824_vm10 = vcmp.eq.f32.partialorder %v10788_v17, %v2789_v37  ;;  %vm2825_vm11 = vcmp.eq.f32.partialorder %v10784_v24, %v2789_v37  ;;  %3016 = vmin.xlane.f32.xlu1 %v10964_v2  ;;  %v3029_v39 = vshra.s32 %v10966_v27, 16 }
 0x8c3   : > { %v2856_v42 = vsel %vm2824_vm10, %v8511_v62, 256  ;;  %v2857_v47 = vsel %vm2825_vm11, %v8514_v0, 256 }
 0x8c4   : > { %vm3042_vm12 = vcmp.lt.s32.totalorder %v2856_v42, %v2857_v47  ;;  %v10974_v35 = vcvt.s32.f32 %v3029_v39 }
 0x8c5   : > { %v2792_v56 = vpop.xlane.xlu0 %2791  ;;  %v10976_v28 = vsel %vm3042_vm12, %v2856_v42, %v2857_v47 }
 0x8c6   : > { %vm2826_vm13 = vcmp.eq.f32.partialorder %v10806_v8, %v2792_v56  ;;  %vm2827_vm14 = vcmp.eq.f32.partialorder %v10802_v30, %v2792_v56  ;;  %3032 = vmin.xlane.f32.xlu0 %v10974_v35  ;;  %v3045_v55 = vshra.s32 %v10976_v28, 16 }
 0x8c7   : > { %v2858_v7 = vsel %vm2826_vm13, %v8511_v62, 256  ;;  %v2859_v37 = vsel %vm2827_vm14, %v8514_v0, 256 }
 0x8c8   : > { %vm3058_vm15 = vcmp.lt.s32.totalorder %v2858_v7, %v2859_v37  ;;  %v10984_v17 = vcvt.s32.f32 %v3045_v55 }
 0x8c9   : > { %v2795_v39 = vpop.xlane.xlu1 %2794  ;;  %v10986_v24 = vsel %vm3058_vm15, %v2858_v7, %v2859_v37 }
 0x8ca   : > { %vm2828_vm0 = vcmp.eq.f32.partialorder %v10824_v57, %v2795_v39  ;;  %vm2829_vm3 = vcmp.eq.f32.partialorder %v10820_v21, %v2795_v39  ;;  %3048 = vmin.xlane.f32.xlu1 %v10984_v17  ;;  %v3061_v42 = vshra.s32 %v10986_v24, 16 }
 0x8cb   : > { %v2860_v47 = vsel %vm2828_vm0, %v8511_v62, 256  ;;  %v2861_v56 = vsel %vm2829_vm3, %v8514_v0, 256 }
 0x8cc   : > { %vm3074_vm4 = vcmp.lt.s32.totalorder %v2860_v47, %v2861_v56  ;;  %v10994_v8 = vcvt.s32.f32 %v3061_v42 }
 0x8cd   : > { %v2798_v55 = vpop.xlane.xlu0 %2797  ;;  %v10996_v30 = vsel %vm3074_vm4, %v2860_v47, %v2861_v56 }
 0x8ce   : > { %vm2830_vm5 = vcmp.eq.f32.partialorder %v10841_v12, %v2798_v55  ;;  %vm2831_vm6 = vcmp.eq.f32.partialorder %v10837_v11, %v2798_v55  ;;  %3064 = vmin.xlane.f32.xlu0 %v10994_v8  ;;  %v3077_v7 = vshra.s32 %v10996_v30, 16 }
 0x8cf   : > { %v2862_v37 = vsel %vm2830_vm5, %v8511_v62, 256  ;;  %v2863_v39 = vsel %vm2831_vm6, %v8514_v0, 256 }
 0x8d0   : > { %vm3090_vm2 = vcmp.lt.s32.totalorder %v2862_v37, %v2863_v39  ;;  %v11004_v57 = vcvt.s32.f32 %v3077_v7 }
 0x8d1   : > { %v2801_v42 = vpop.xlane.xlu1 %2800  ;;  %v11006_v21 = vsel %vm3090_vm2, %v2862_v37, %v2863_v39 }
 0x8d2   : > { %vm2832_vm7 = vcmp.eq.f32.partialorder %v10858_v32, %v2801_v42  ;;  %vm2833_vm8 = vcmp.eq.f32.partialorder %v10854_v44, %v2801_v42  ;;  %3080 = vmin.xlane.f32.xlu1 %v11004_v57  ;;  %v3093_v47 = vshra.s32 %v11006_v21, 16  ;;  %v7986_v32 = vld [vmem:[%s9216_s12] sm:$0xff] }
 0x8d3   : > { %v2864_v56 = vsel %vm2832_vm7, %v8511_v62, 256  ;;  %v2865_v55 = vsel %vm2833_vm8, %v8514_v0, 256 }
 0x8d4   : > { %vm3106_vm9 = vcmp.lt.s32.totalorder %v2864_v56, %v2865_v55  ;;  %v11014_v7 = vcvt.s32.f32 %v3093_v47  ;;  %v14508_v47 = vld [vmem:[#allocation24_spill] sm:$0xff] }
 0x8d5   : > { %v11016_v12 = vsel %vm3106_vm9, %v2864_v56, %v2865_v55  ;;  %v7987_v56 = vld [vmem:[%s9216_s12 + $0x8] sm:$0xff] }
 0x8d6   : > { %3096 = vmin.xlane.f32.xlu0 %v11014_v7  ;;  %v3109_v37 = vshra.s32 %v11016_v12, 16 }
 0x8d8   : > { %v11020_v39 = vcvt.s32.f32 %v3109_v37  ;;  %v14510_v37 = vld [vmem:[#allocation48_spill] sm:$0xff] }
 0x8d9   : > { %v6114_v42 = vpop.f32.mrb[128].mxu0 }
 0x8da   : > { %v6737_v44 = vadd.f32 %v7986_v32, %v6114_v42  ;;  %v6116_v11 = vpop.f32.mrb[129].mxu0  ;;  %3112 = vmin.xlane.f32.xlu1 %v11020_v39 }
 0x8dc   : > { %v6753_v49 = vmax.f32 %v6737_v44, 0.0  ;;  %v14512_v44 = vld [vmem:[#allocation49_spill] sm:$0xff] }
 0x8dd   : > { %v6119_v18 = vpop.f32.mrb[130].mxu0 }
 0x8de   : > { %v11025_v43 = vadd.f32 %v6753_v49, %v14508_v47  ;;  %v6738_v55 = vadd.f32 %v7987_v56, %v6119_v18  ;;  %v6121_v46 = vpop.f32.mrb[131].mxu0  ;;  %v7989_v49 = vld [vmem:[%s9216_s12 + $0x18] sm:$0xff]  ;;  %v14514_v56 = vld [vmem:[#allocation50_spill] sm:$0xff] }
 0x8e0   : > { %14509 = vst [vmem:[#allocation25_spill] sm:$0xff] %v11025_v43  ;;  %v6754_v34 = vmax.f32 %v6738_v55, 0.0 }
 0x8e1   : > { %v6124_v59 = vpop.f32.mrb[132].mxu0 }
 0x8e2   : > { %v11029_v25 = vadd.f32 %v6754_v34, %v14510_v37  ;;  %v6739_v32 = vadd.f32 %v7988_v61, %v6124_v59  ;;  %v6126_v11 = vpop.f32.mrb[133].mxu0  ;;  %v7990_v34 = vld [vmem:[%s9216_s12 + $0x20] sm:$0xff] }
 0x8e4   : > { %14511 = vst [vmem:[#allocation24_spill] sm:$0xff] %v11029_v25  ;;  %v6755_v42 = vmax.f32 %v6739_v32, 0.0  ;;  %v14516_v32 = vld [vmem:[#allocation51_spill] sm:$0xff] }
 0x8e5   : > { %v6129_v1 = vpop.f32.mrb[134].mxu0 }
 0x8e6   : > { %v11033_v45 = vadd.f32 %v6755_v42, %v14512_v44  ;;  %v6740_v47 = vadd.f32 %v7989_v49, %v6129_v1  ;;  %v6131_v43 = vpop.f32.mrb[135].mxu0  ;;  %v7991_v42 = vld [vmem:[%s9216_s12 + $0x28] sm:$0xff]  ;;  %v14517_v49 = vld [vmem:[#allocation52_spill] sm:$0xff] }
 0x8e8   : > { %14513 = vst [vmem:[#allocation48_spill] sm:$0xff] %v11033_v45  ;;  %v6756_v46 = vmax.f32 %v6740_v47, 0.0 }
 0x8e9   : > { %v6134_v18 = vpop.f32.mrb[136].mxu0 }
 0x8ea   : > { %v11037_v55 = vadd.f32 %v6756_v46, %v14514_v56  ;;  %v6741_v37 = vadd.f32 %v7990_v34, %v6134_v18  ;;  %v6136_v25 = vpop.f32.mrb[137].mxu0  ;;  %v7992_v46 = vld [vmem:[%s9216_s12 + $0x30] sm:$0xff] }
 0x8ec   : > { %14515 = vst [vmem:[#allocation49_spill] sm:$0xff] %v11037_v55  ;;  %v6757_v61 = vmax.f32 %v6741_v37, 0.0  ;;  %v7993_v37 = vld [vmem:[%s9216_s12 + $0x38] sm:$0xff] }
 0x8ed   : > { %v6139_v59 = vpop.f32.mrb[138].mxu0 }
 0x8ee   : > { %v11041_v11 = vadd.f32 %v6757_v61, %v14516_v32  ;;  %v6742_v44 = vadd.f32 %v7991_v42, %v6139_v59  ;;  %v6141_v45 = vpop.f32.mrb[139].mxu0 }
 0x8f0   : > { %v6758_v1 = vmax.f32 %v6742_v44, 0.0  ;;  %v7994_v44 = vld [vmem:[%s9216_s12 + $0x40] sm:$0xff] }
 0x8f1   : > { %v6144_v43 = vpop.f32.mrb[140].mxu0 }
 0x8f2   : > { %v11045_v47 = vadd.f32 %v6758_v1, %v14517_v49  ;;  %v6743_v56 = vadd.f32 %v7992_v46, %v6144_v43  ;;  %v6146_v55 = vpop.f32.mrb[141].mxu0  ;;  %v14519_v46 = vld [vmem:[#allocation53_spill] sm:$0xff] }
 0x8f4   : > { %v6759_v25 = vmax.f32 %v6743_v56, 0.0 }
 0x8f5   : > { %v6149_v18 = vpop.f32.mrb[142].mxu0 }
 0x8f6   : > { %v11049_v34 = vadd.f32 %v6759_v25, %v10456_v10  ;;  %v6744_v61 = vadd.f32 %v7993_v37, %v6149_v18  ;;  %v6151_v32 = vpop.f32.mrb[143].mxu0  ;;  %v7995_v10 = vld [vmem:[%s9216_s12 + $0x48] sm:$0xff] }
 0x8f8   : > { %14518 = vst [vmem:[#allocation50_spill] sm:$0xff] %v11049_v34  ;;  %v6760_v45 = vmax.f32 %v6744_v61, 0.0 }
 0x8f9   : > { %v6154_v59 = vpop.f32.mrb[144].mxu0 }
 0x8fa   : > { %v11053_v42 = vadd.f32 %v6760_v45, %v10460_v13  ;;  %v6745_v1 = vadd.f32 %v7994_v44, %v6154_v59  ;;  %v6156_v49 = vpop.f32.mrb[145].mxu0  ;;  %v7996_v13 = vld [vmem:[%s9216_s12 + $0x50] sm:$0xff] }
 0x8fc   : > { %v6761_v55 = vmax.f32 %v6745_v1, 0.0  ;;  %v14522_v1 = vld [vmem:[#allocation54_spill] sm:$0xff] }
 0x8fd   : > { %v6159_v43 = vpop.f32.mrb[146].mxu0 }
 0x8fe   : > { %v11057_v56 = vadd.f32 %v6761_v55, %v14519_v46  ;;  %v6746_v25 = vadd.f32 %v7995_v10, %v6159_v43  ;;  %v6161_v34 = vpop.f32.mrb[147].mxu0  ;;  %v7997_v55 = vld [vmem:[%s9216_s12 + $0x58] sm:$0xff] }
 0x8ff   : > { %v14523_v10 = vld [vmem:[#allocation55_spill] sm:$0xff] }
 0x900   : > { %14520 = vst [vmem:[#allocation51_spill] sm:$0xff] %v11057_v56  ;;  %v6762_v18 = vmax.f32 %v6746_v25, 0.0 }
 0x901   : > { %v6164_v37 = vpop.f32.mrb[148].mxu0 }
 0x902   : > { %v11061_v61 = vadd.f32 %v6762_v18, %v10468_v16  ;;  %v6747_v32 = vadd.f32 %v7996_v13, %v6164_v37  ;;  %v6166_v45 = vpop.f32.mrb[149].mxu0  ;;  %v7998_v16 = vld [vmem:[%s9216_s12 + $0x60] sm:$0xff] }
 0x903   : > { %v7999_v45 = vld [vmem:[%s9216_s12 + $0x68] sm:$0xff] }
 0x904   : > { %14521 = vst [vmem:[#allocation52_spill] sm:$0xff] %v11061_v61  ;;  %v6763_v59 = vmax.f32 %v6747_v32, 0.0 }
 0x905   : > { %v6169_v44 = vpop.f32.mrb[150].mxu0 }
 0x906   : > { %v11065_v49 = vadd.f32 %v6763_v59, %v14522_v1  ;;  %v6748_v46 = vadd.f32 %v7997_v55, %v6169_v44  ;;  %v6171_v56 = vpop.f32.mrb[151].mxu0 }
 0x908   : > { %v6764_v34 = vmax.f32 %v6748_v46, 0.0  ;;  %v8000_v46 = vld [vmem:[%s9216_s12 + $0x70] sm:$0xff] }
 0x909   : > { %v6174_v43 = vpop.f32.mrb[152].mxu0 }
 0x90a   : > { %v11069_v25 = vadd.f32 %v6764_v34, %v14523_v10  ;;  %v6749_v18 = vadd.f32 %v7998_v16, %v6174_v43  ;;  %v6176_v61 = vpop.f32.mrb[153].mxu0  ;;  %v8001_v16 = vld [vmem:[%s9216_s12 + $0x78] sm:$0xff] }
 0x90c   : > { %14524 = vst [vmem:[#allocation53_spill] sm:$0xff] %v11069_v25  ;;  %v6765_v37 = vmax.f32 %v6749_v18, 0.0 }
 0x90d   : > { %v6179_v13 = vpop.f32.mrb[154].mxu0 }
 0x90e   : > { %v11073_v32 = vadd.f32 %v6765_v37, %v10480_v14  ;;  %v6750_v59 = vadd.f32 %v7999_v45, %v6179_v13  ;;  %v6181_v1 = vpop.f32.mrb[155].mxu0  ;;  %v2868_v45 = vand.u32 65535, %v10867_v40 }
 0x90f   : > { %v2884_v1 = vand.u32 65535, %v10876_v54  ;;  %v2916_v54 = vand.u32 65535, %v10896_v26  ;;  %v2948_v26 = vand.u32 65535, %v10916_v58  ;;  %v2980_v58 = vand.u32 65535, %v10936_v52 }
 0x910   : > { %v6766_v44 = vmax.f32 %v6750_v59, 0.0  ;;  %v3012_v52 = vand.u32 65535, %v10956_v51  ;;  %v3044_v51 = vand.u32 65535, %v10976_v28  ;;  %v3076_v28 = vand.u32 65535, %v10996_v30 }
 0x911   : > { %v6184_v56 = vpop.f32.mrb[156].mxu0  ;;  %v3108_v30 = vand.u32 65535, %v11016_v12 }
 0x912   : > { %v11077_v55 = vadd.f32 %v6766_v44, %v10484_v38  ;;  %v6751_v34 = vadd.f32 %v8000_v46, %v6184_v56  ;;  %v6186_v10 = vpop.f32.mrb[157].mxu0  ;;  %v2870_v38 = vcvt.s32.f32 %v2868_v45  ;;  %v2900_v56 = vand.u32 65535, %v10886_v53 }
 0x913   : > { %v2918_v10 = vcvt.s32.f32 %v2916_v54  ;;  %v2932_v53 = vand.u32 65535, %v10906_v36  ;;  %v2964_v36 = vand.u32 65535, %v10926_v15  ;;  %v2996_v15 = vand.u32 65535, %v10946_v29 }
 0x914   : > { %v6767_v25 = vmax.f32 %v6751_v34, 0.0  ;;  %v2902_v46 = vcvt.s32.f32 %v2900_v56  ;;  %v3028_v29 = vand.u32 65535, %v10966_v27  ;;  %v3060_v27 = vand.u32 65535, %v10986_v24 }
 0x915   : > { %v6189_v43 = vpop.f32.mrb[158].mxu0  ;;  %v2966_v45 = vcvt.s32.f32 %v2964_v36  ;;  %v3092_v24 = vand.u32 65535, %v11006_v21 }
 0x916   : > { %v11081_v61 = vadd.f32 %v6767_v25, %v10488_v22  ;;  %v6752_v18 = vadd.f32 %v8001_v16, %v6189_v43  ;;  %v6191_v14 = vpop.f32.mrb[159].mxu0  ;;  %v2886_v25 = vcvt.s32.f32 %v2884_v1  ;;  %v2934_v16 = vcvt.s32.f32 %v2932_v53 }
 0x917   : > { %v2950_v14 = vcvt.s32.f32 %v2948_v26  ;;  %v2982_v1 = vcvt.s32.f32 %v2980_v58  ;;  %v3030_v54 = vcvt.s32.f32 %v3028_v29  ;;  %v3078_v26 = vcvt.s32.f32 %v3076_v28 }
 0x918   : > { %v6768_v37 = vmax.f32 %v6752_v18, 0.0 }
 0x91a   : > { %v11085_v13 = vadd.f32 %v6768_v37, %v10492_v3 }
 0x92b   : > { %v11088_v59 = vpop.xlane.xlu0 %2872 }
 0x92c   : > { %vm2874_vm1 = vcmp.eq.f32.partialorder %v10874_v20, %v11088_v59 }
 0x92d   : > { %v2875_v44 = vsel %vm2874_vm1, %v2870_v38, inf  ;;  %vm3154_vm1 = vcmp.eq.s32.totalorder %v8511_v62, 4 }
 0x92e   : > { %2876 = vmin.xlane.f32.xlu0 %v2875_v44 }
 0x92f   : > { %v11093_v22 = vpop.xlane.xlu1 %2888 }
 0x930   : > { %vm2890_vm10 = vcmp.eq.f32.partialorder %v10884_v23, %v11093_v22 }
 0x931   : > { %v2891_v3 = vsel %vm2890_vm10, %v2886_v25, inf  ;;  %v2998_v25 = vcvt.s32.f32 %v2996_v15 }
 0x932   : > { %2892 = vmin.xlane.f32.xlu1 %v2891_v3  ;;  %v3014_v3 = vcvt.s32.f32 %v3012_v52 }
 0x933   : > { %v11098_v40 = vpop.xlane.xlu0 %2904 }
 0x934   : > { %vm2906_vm11 = vcmp.eq.f32.partialorder %v10894_v6, %v11098_v40  ;;  %v2911_v15 = vcvt.f32.s32 %v11098_v40 }
 0x935   : > { %v2907_v20 = vsel %vm2906_vm11, %v2902_v46, inf }
 0x936   : > { %2908 = vmin.xlane.f32.xlu0 %v2907_v20  ;;  %v2912_v52 = vshll.u32 %v2911_v15, 16 }
 0x937   : > { %v11103_v34 = vpop.xlane.xlu1 %2920 }
 0x938   : > { %vm2922_vm12 = vcmp.eq.f32.partialorder %v10904_v33, %v11103_v34 }
 0x939   : > { %v2923_v23 = vsel %vm2922_vm12, %v2918_v10, inf  ;;  %v3046_v10 = vcvt.s32.f32 %v3044_v51 }
 0x93a   : > { %2924 = vmin.xlane.f32.xlu1 %v2923_v23  ;;  %v3062_v23 = vcvt.s32.f32 %v3060_v27 }
 0x93b   : > { %v11108_v43 = vpop.xlane.xlu0 %2936 }
 0x93c   : > { %vm2938_vm13 = vcmp.eq.f32.partialorder %v10914_v5, %v11108_v43 }
 0x93d   : > { %v2939_v6 = vsel %vm2938_vm13, %v2934_v16, inf }
 0x93e   : > { %2940 = vmin.xlane.f32.xlu0 %v2939_v6 }
 0x93f   : > { %v11113_v18 = vpop.xlane.xlu1 %2952 }
 0x940   : > { %vm2954_vm14 = vcmp.eq.f32.partialorder %v10924_v31, %v11113_v18 }
 0x941   : > { %v2955_v33 = vsel %vm2954_vm14, %v2950_v14, inf  ;;  %v3094_v14 = vcvt.s32.f32 %v3092_v24  ;;  %v14534_v24 = vld [vmem:[#allocation60_spill] sm:$0xff] }
 0x942   : > { %2956 = vmin.xlane.f32.xlu1 %v2955_v33  ;;  %v3110_v33 = vcvt.s32.f32 %v3108_v30 }
 0x943   : > { %v11118_v37 = vpop.xlane.xlu0 %2968 }
 0x944   : > { %vm2970_vm15 = vcmp.eq.f32.partialorder %v10934_v4, %v11118_v37 }
 0x945   : > { %v2971_v5 = vsel %vm2970_vm15, %v2966_v45, inf  ;;  %v2895_v45 = vcvt.f32.s32 %v11093_v22 }
 0x946   : > { %2972 = vmin.xlane.f32.xlu0 %v2971_v5 }
 0x947   : > { %v11123_v38 = vpop.xlane.xlu1 %2984 }
 0x948   : > { %vm2986_vm0 = vcmp.eq.f32.partialorder %v10944_v48, %v11123_v38 }
 0x949   : > { %v2987_v31 = vsel %vm2986_vm0, %v2982_v1, inf  ;;  %v2896_v1 = vshll.u32 %v2895_v45, 16 }
 0x94a   : > { %2988 = vmin.xlane.f32.xlu1 %v2987_v31 }
 0x94b   : > { %v11128_v44 = vpop.xlane.xlu0 %3000 }
 0x94c   : > { %vm3002_vm3 = vcmp.eq.f32.partialorder %v10954_v41, %v11128_v44 }
 0x94d   : > { %v3003_v4 = vsel %vm3002_vm3, %v2998_v25, inf }
 0x94e   : > { %3004 = vmin.xlane.f32.xlu0 %v3003_v4  ;;  %v2927_v4 = vcvt.f32.s32 %v11103_v34 }
 0x94f   : > { %v11133_v56 = vpop.xlane.xlu1 %3016 }
 0x950   : > { %vm3018_vm4 = vcmp.eq.f32.partialorder %v10964_v2, %v11133_v56 }
 0x951   : > { %v3019_v48 = vsel %vm3018_vm4, %v3014_v3, inf }
 0x952   : > { %3020 = vmin.xlane.f32.xlu1 %v3019_v48 }
 0x953   : > { %v11138_v46 = vpop.xlane.xlu0 %3032 }
 0x954   : > { %vm3034_vm5 = vcmp.eq.f32.partialorder %v10974_v35, %v11138_v46 }
 0x955   : > { %v3035_v41 = vsel %vm3034_vm5, %v3030_v54, inf  ;;  %v14528_v54 = vld [vmem:[#allocation57_spill] sm:$0xff] }
 0x956   : > { %3036 = vmin.xlane.f32.xlu0 %v3035_v41  ;;  %v2928_v41 = vshll.u32 %v2927_v4, 16  ;;  %v14544_v4 = vld [vmem:[#allocation65_spill] sm:$0xff] }
 0x957   : > { %v11143_v20 = vpop.xlane.xlu1 %3048 }
 0x958   : > { %vm3050_vm6 = vcmp.eq.f32.partialorder %v10984_v17, %v11143_v20 }
 0x959   : > { %v3051_v2 = vsel %vm3050_vm6, %v3046_v10, inf  ;;  %v2943_v10 = vcvt.f32.s32 %v11108_v43 }
 0x95a   : > { %3052 = vmin.xlane.f32.xlu1 %v3051_v2  ;;  %v14530_v2 = vld [vmem:[#allocation58_spill] sm:$0xff] }
 0x95b   : > { %v11148_v53 = vpop.xlane.xlu0 %3064  ;;  %v2944_v30 = vshll.u32 %v2943_v10, 16  ;;  %v14548_v10 = vld [vmem:[#allocation28_spill] sm:$0xff] }
 0x95c   : > { %vm3066_vm2 = vcmp.eq.f32.partialorder %v10994_v8, %v11148_v53 }
 0x95d   : > { %v3067_v35 = vsel %vm3066_vm2, %v3062_v23, inf }
 0x95e   : > { %3068 = vmin.xlane.f32.xlu0 %v3067_v35  ;;  %v14532_v35 = vld [vmem:[#allocation59_spill] sm:$0xff] }
 0x95f   : > { %v11153_v16 = vpop.xlane.xlu1 %3080 }
 0x960   : > { %vm3082_vm7 = vcmp.eq.f32.partialorder %v11004_v57, %v11153_v16  ;;  %v2879_v57 = vcvt.f32.s32 %v11088_v59 }
 0x961   : > { %v3083_v17 = vsel %vm3082_vm7, %v3078_v26, inf }
 0x962   : > { %3084 = vmin.xlane.f32.xlu1 %v3083_v17  ;;  %v2880_v5 = vshll.u32 %v2879_v57, 16 }
 0x963   : > { %v11158_v6 = vpop.xlane.xlu0 %3096 }
 0x964   : > { %vm3098_vm8 = vcmp.eq.f32.partialorder %v11014_v7, %v11158_v6 }
 0x965   : > { %v3099_v8 = vsel %vm3098_vm8, %v3094_v14, inf }
 0x966   : > { %3100 = vmin.xlane.f32.xlu0 %v3099_v8  ;;  %v2959_v8 = vcvt.f32.s32 %v11113_v18 }
 0x967   : > { %v11163_v36 = vpop.xlane.xlu1 %3112 }
 0x968   : > { %vm3114_vm9 = vcmp.eq.f32.partialorder %v11020_v39, %v11163_v36  ;;  %v2960_v15 = vshll.u32 %v2959_v8, 16  ;;  %v3007_v8 = vcvt.f32.s32 %v11128_v44 }
 0x969   : > { %v3115_v21 = vsel %vm3114_vm9, %v3110_v33, inf }
 0x96a   : > { %3116 = vmin.xlane.f32.xlu1 %v3115_v21  ;;  %v14536_v21 = vld [vmem:[#allocation61_spill] sm:$0xff] }
 0x9bb   : > { %v2877_v58 = vpop.xlane.xlu0 %2876 }
 0x9bc   : > { %v2878_v12 = vcvt.f32.s32 %v2877_v58  ;;  %v14538_v58 = vld [vmem:[#allocation62_spill] sm:$0xff] }
 0x9be   : > { %v2881_v7 = vadd.s32 %v2880_v5, %v2878_v12  ;;  %v14540_v12 = vld [vmem:[#allocation63_spill] sm:$0xff] }
 0x9bf   : > { %v2893_v31 = vpop.xlane.xlu1 %2892 }
 0x9c0   : > { %v11174_v39 = vsel %vm3154_vm1, %v2881_v7, %v10581_v60  ;;  %v2894_v25 = vcvt.f32.s32 %v2893_v31  ;;  %vm3123_vm10 = vcmp.eq.s32.totalorder %v8514_v0, %v2881_v7  ;;  %vm3122_vm11 = vcmp.eq.s32.totalorder %v8511_v62, %v2881_v7 }
 0x9c1   : > { %v11179_v59 = vsel %vm3123_vm10, -inf, %v10586_v19  ;;  %7648 = vmatprep.mubr.msk.f32.mxu0 %vm3123_vm10, %v14215_v63  ;;  %v11183_v22 = vsel %vm3122_vm11, -inf, %v10590_v9  ;;  %v14526_v9 = vld [vmem:[#allocation56_spill] sm:$0xff]  ;;  %v2975_v31 = vcvt.f32.s32 %v11118_v37 }
 0x9c2   : > { %v2897_v40 = vadd.s32 %v2896_v1, %v2894_v25  ;;  %7649 = vmatmul.mubr.msk.f32.gmra.mrb[160].mxu0 %vm3122_vm11, %v14215_v63  ;;  %v3304_v60 = vmax.f32 %v11183_v22, %v11179_v59 }
 0x9c3   : > { %v2909_v3 = vpop.xlane.xlu0 %2908 }
 0x9c4   : > { %v11192_v19 = vsel %vm3154_vm1, %v2897_v40, %v10599_v50  ;;  %v2910_v29 = vcvt.f32.s32 %v2909_v3  ;;  %3305 = vmax.xlane.f32.xlu0 %v3304_v60  ;;  %vm3125_vm12 = vcmp.eq.s32.totalorder %v8514_v0, %v2897_v40  ;;  %vm3124_vm13 = vcmp.eq.s32.totalorder %v8511_v62, %v2897_v40  ;;  %v14542_v40 = vld [vmem:[#allocation64_spill] sm:$0xff] }
 0x9c5   : > { %14525 = vst [vmem:[#allocation54_spill] sm:$0xff] %v11192_v19  ;;  %v11197_v48 = vsel %vm3125_vm12, -inf, %v14526_v9  ;;  %7650 = vmatprep.mubr.msk.f32.mxu0 %vm3125_vm12, %v14215_v63  ;;  %v11201_v51 = vsel %vm3124_vm13, -inf, %v14528_v54 }
 0x9c6   : > { %14527 = vst [vmem:[#allocation55_spill] sm:$0xff] %v11197_v48  ;;  %14529 = vst [vmem:[#allocation56_spill] sm:$0xff] %v11201_v51  ;;  %v2913_v34 = vadd.s32 %v2912_v52, %v2910_v29  ;;  %7651 = vmatmul.mubr.msk.f32.gmra.mrb[162].mxu0 %vm3124_vm13, %v14215_v63  ;;  %v3307_v50 = vmax.f32 %v11201_v51, %v11197_v48  ;;  %v14546_v29 = vld [vmem:[#allocation26_spill] sm:$0xff] }
 0x9c7   : > { %v2925_v27 = vpop.xlane.xlu1 %2924 }
 0x9c8   : > { %v11210_v23 = vsel %vm3154_vm1, %v2913_v34, %v14530_v2  ;;  %v2926_v28 = vcvt.f32.s32 %v2925_v27  ;;  %3308 = vmax.xlane.f32.xlu1 %v3307_v50  ;;  %vm3127_vm14 = vcmp.eq.s32.totalorder %v8514_v0, %v2913_v34  ;;  %vm3126_vm15 = vcmp.eq.s32.totalorder %v8511_v62, %v2913_v34 }
 0x9c9   : > { %14531 = vst [vmem:[#allocation57_spill] sm:$0xff] %v11210_v23  ;;  %v11215_v26 = vsel %vm3127_vm14, -inf, %v14532_v35  ;;  %7652 = vmatprep.mubr.msk.f32.mxu0 %vm3127_vm14, %v14215_v63  ;;  %v11219_v17 = vsel %vm3126_vm15, -inf, %v14534_v24  ;;  %v2976_v34 = vshll.u32 %v2975_v31, 16  ;;  %v2991_v50 = vcvt.f32.s32 %v11123_v38  ;;  %v14552_v24 = vld [vmem:[#allocation29_spill] sm:$0xff] }
 0x9ca   : > { %14533 = vst [vmem:[#allocation58_spill] sm:$0xff] %v11215_v26  ;;  %14535 = vst [vmem:[#allocation59_spill] sm:$0xff] %v11219_v17  ;;  %v2929_v43 = vadd.s32 %v2928_v41, %v2926_v28  ;;  %7653 = vmatmul.mubr.msk.f32.gmra.mrb[164].mxu0 %vm3126_vm15, %v14215_v63  ;;  %v3310_v14 = vmax.f32 %v11219_v17, %v11215_v26  ;;  %v14550_v28 = vld [vmem:[#allocation27_spill] sm:$0xff] }
 0x9cb   : > { %v2941_v33 = vpop.xlane.xlu0 %2940 }
 0x9cc   : > { %v11228_v57 = vsel %vm3154_vm1, %v2929_v43, %v14536_v21  ;;  %v2942_v45 = vcvt.f32.s32 %v2941_v33  ;;  %3311 = vmax.xlane.f32.xlu0 %v3310_v14  ;;  %vm3129_vm0 = vcmp.eq.s32.totalorder %v8514_v0, %v2929_v43  ;;  %vm3128_vm3 = vcmp.eq.s32.totalorder %v8511_v62, %v2929_v43  ;;  %v14554_v21 = vld [vmem:[#allocation31_spill] sm:$0xff] }
 0x9cd   : > { %14537 = vst [vmem:[#allocation60_spill] sm:$0xff] %v11228_v57  ;;  %v11233_v5 = vsel %vm3129_vm0, -inf, %v14538_v58  ;;  %7654 = vmatprep.mubr.msk.f32.mxu0 %vm3129_vm0, %v14215_v63  ;;  %v11237_v7 = vsel %vm3128_vm3, -inf, %v14540_v12  ;;  %v14556_v12 = vld [vmem:[#allocation30_spill] sm:$0xff] }
 0x9ce   : > { %14539 = vst [vmem:[#allocation61_spill] sm:$0xff] %v11233_v5  ;;  %14541 = vst [vmem:[#allocation62_spill] sm:$0xff] %v11237_v7  ;;  %v2945_v18 = vadd.s32 %v2944_v30, %v2942_v45  ;;  %7655 = vmatmul.mubr.msk.f32.gmra.mrb[166].mxu0 %vm3128_vm3, %v14215_v63  ;;  %v3313_v1 = vmax.f32 %v11237_v7, %v11233_v5  ;;  %v2992_v30 = vshll.u32 %v2991_v50, 16  ;;  %v14564_v50 = vld [vmem:[#allocation35_spill] sm:$0xff] }
 0x9cf   : > { %v2957_v25 = vpop.xlane.xlu1 %2956 }
 0x9d0   : > { %v11246_v60 = vsel %vm3154_vm1, %v2945_v18, %v14542_v40  ;;  %v2958_v52 = vcvt.f32.s32 %v2957_v25  ;;  %3314 = vmax.xlane.f32.xlu1 %v3313_v1  ;;  %vm3131_vm4 = vcmp.eq.s32.totalorder %v8514_v0, %v2945_v18  ;;  %vm3130_vm5 = vcmp.eq.s32.totalorder %v8511_v62, %v2945_v18  ;;  %v14558_v1 = vld [vmem:[#allocation32_spill] sm:$0xff] }
 0x9d1   : > { %14543 = vst [vmem:[#allocation63_spill] sm:$0xff] %v11246_v60  ;;  %v11251_v3 = vsel %vm3131_vm4, -inf, %v14544_v4  ;;  %7656 = vmatprep.mubr.msk.f32.mxu0 %vm3131_vm4, %v14215_v63  ;;  %v11255_v9 = vsel %vm3130_vm5, -inf, %v14546_v29  ;;  %v3008_v25 = vshll.u32 %v3007_v8, 16  ;;  %v3023_v40 = vcvt.f32.s32 %v11133_v56  ;;  %v14560_v4 = vld [vmem:[#allocation34_spill] sm:$0xff]  ;;  %v14568_v8 = vld [vmem:[#allocation36_spill] sm:$0xff] }
 0x9d2   : > { %14545 = vst [vmem:[#allocation64_spill] sm:$0xff] %v11251_v3  ;;  %14547 = vst [vmem:[#allocation65_spill] sm:$0xff] %v11255_v9  ;;  %v2961_v37 = vadd.s32 %v2960_v15, %v2958_v52  ;;  %7657 = vmatmul.mubr.msk.f32.gmra.mrb[168].mxu0 %vm3130_vm5, %v14215_v63  ;;  %v3316_v54 = vmax.f32 %v11255_v9, %v11251_v3 }
 0x9d3   : > { %v2973_v41 = vpop.xlane.xlu0 %2972 }
 0x9d4   : > { %v11264_v27 = vsel %vm3154_vm1, %v2961_v37, %v14548_v10  ;;  %v2974_v2 = vcvt.f32.s32 %v2973_v41  ;;  %3317 = vmax.xlane.f32.xlu0 %v3316_v54  ;;  %vm3133_vm6 = vcmp.eq.s32.totalorder %v8514_v0, %v2961_v37  ;;  %vm3132_vm2 = vcmp.eq.s32.totalorder %v8511_v62, %v2961_v37  ;;  %v14562_v54 = vld [vmem:[#allocation33_spill] sm:$0xff] }
 0x9d5   : > { %14549 = vst [vmem:[#allocation26_spill] sm:$0xff] %v11264_v27  ;;  %v11269_v35 = vsel %vm3133_vm6, -inf, %v14550_v28  ;;  %7658 = vmatprep.mubr.msk.f32.mxu0 %vm3133_vm6, %v14215_v63  ;;  %v11273_v43 = vsel %vm3132_vm2, -inf, %v14552_v24  ;;  %v3039_v28 = vcvt.f32.s32 %v11138_v46 }
 0x9d6   : > { %14551 = vst [vmem:[#allocation28_spill] sm:$0xff] %v11269_v35  ;;  %14553 = vst [vmem:[#allocation27_spill] sm:$0xff] %v11273_v43  ;;  %v2977_v38 = vadd.s32 %v2976_v34, %v2974_v2  ;;  %7659 = vmatmul.mubr.msk.f32.gmra.mrb[170].mxu0 %vm3132_vm2, %v14215_v63  ;;  %v3319_v14 = vmax.f32 %v11273_v43, %v11269_v35  ;;  %v3024_v2 = vshll.u32 %v3023_v40, 16 }
 0x9d7   : > { %v2989_v33 = vpop.xlane.xlu1 %2988 }
 0x9d8   : > { %v11282_v45 = vsel %vm3154_vm1, %v2977_v38, %v14554_v21  ;;  %v2990_v58 = vcvt.f32.s32 %v2989_v33  ;;  %3320 = vmax.xlane.f32.xlu1 %v3319_v14  ;;  %vm3135_vm7 = vcmp.eq.s32.totalorder %v8514_v0, %v2977_v38  ;;  %vm3134_vm8 = vcmp.eq.s32.totalorder %v8511_v62, %v2977_v38  ;;  %v14566_v38 = vld [vmem:[#allocation37_spill] sm:$0xff]  ;;  %v14570_v21 = vld [vmem:[#allocation38_spill] sm:$0xff] }
 0x9d9   : > { %14555 = vst [vmem:[#allocation29_spill] sm:$0xff] %v11282_v45  ;;  %v11287_v18 = vsel %vm3135_vm7, -inf, %v14556_v12  ;;  %7660 = vmatprep.mubr.msk.f32.mxu0 %vm3135_vm7, %v14215_v63  ;;  %v11291_v15 = vsel %vm3134_vm8, -inf, %v14558_v1  ;;  %v3040_v1 = vshll.u32 %v3039_v28, 16 }
 0x9da   : > { %14557 = vst [vmem:[#allocation31_spill] sm:$0xff] %v11287_v18  ;;  %14559 = vst [vmem:[#allocation30_spill] sm:$0xff] %v11291_v15  ;;  %v2993_v44 = vadd.s32 %v2992_v30, %v2990_v58  ;;  %7661 = vmatmul.mubr.msk.f32.gmra.mrb[172].mxu0 %vm3134_vm8, %v14215_v63  ;;  %v3322_v31 = vmax.f32 %v11291_v15, %v11287_v18 }
 0x9db   : > { %v3005_v52 = vpop.xlane.xlu0 %3004 }
 0x9dc   : > { %v11300_v29 = vsel %vm3154_vm1, %v2993_v44, %v14560_v4  ;;  %v3006_v37 = vcvt.f32.s32 %v3005_v52  ;;  %3323 = vmax.xlane.f32.xlu0 %v3322_v31  ;;  %vm3137_vm9 = vcmp.eq.s32.totalorder %v8514_v0, %v2993_v44  ;;  %vm3136_vm10 = vcmp.eq.s32.totalorder %v8511_v62, %v2993_v44  ;;  %v14574_v4 = vld [vmem:[#allocation39_spill] sm:$0xff] }
 0x9dd   : > { %14561 = vst [vmem:[#allocation32_spill] sm:$0xff] %v11300_v29  ;;  %v11305_v34 = vsel %vm3137_vm9, -inf, %v14562_v54  ;;  %7662 = vmatprep.mubr.msk.f32.mxu1 %vm3137_vm9, %v14215_v63  ;;  %v11309_v41 = vsel %vm3136_vm10, -inf, %v14564_v50  ;;  %v3055_v44 = vcvt.f32.s32 %v11143_v20  ;;  %v14576_v54 = vld [vmem:[#allocation41_spill] sm:$0xff] }
 0x9de   : > { %14563 = vst [vmem:[#allocation34_spill] sm:$0xff] %v11305_v34  ;;  %14565 = vst [vmem:[#allocation33_spill] sm:$0xff] %v11309_v41  ;;  %v3009_v56 = vadd.s32 %v3008_v25, %v3006_v37  ;;  %7663 = vmatmul.mubr.msk.f32.vlgmr.msra.gmra.mrb[0].mxu1 %vm3136_vm10, %v14215_v63  ;;  %v3325_v10 = vmax.f32 %v11309_v41, %v11305_v34  ;;  %v14572_v25 = vld [vmem:[#allocation40_spill] sm:$0xff] }
 0x9df   : > { %v3021_v24 = vpop.xlane.xlu1 %3020 }
 0x9e0   : > { %v11318_v14 = vsel %vm3154_vm1, %v3009_v56, %v14566_v38  ;;  %v3022_v30 = vcvt.f32.s32 %v3021_v24  ;;  %3326 = vmax.xlane.f32.xlu1 %v3325_v10  ;;  %vm3139_vm11 = vcmp.eq.s32.totalorder %v8514_v0, %v3009_v56  ;;  %vm3138_vm12 = vcmp.eq.s32.totalorder %v8511_v62, %v3009_v56  ;;  %v14578_v24 = vld [vmem:[#allocation13_spill] sm:$0xff] }
 0x9e1   : > { %14567 = vst [vmem:[#allocation35_spill] sm:$0xff] %v11318_v14  ;;  %v11323_v33 = vsel %vm3139_vm11, -inf, %v14568_v8  ;;  %7664 = vmatprep.mubr.msk.f32.mxu1 %vm3139_vm11, %v14215_v63  ;;  %v11327_v58 = vsel %vm3138_vm12, -inf, %v14570_v21  ;;  %v3056_v10 = vshll.u32 %v3055_v44, 16  ;;  %v14580_v8 = vld [vmem:[#allocation12_spill] sm:$0xff] }
 0x9e2   : > { %14569 = vst [vmem:[#allocation37_spill] sm:$0xff] %v11323_v33  ;;  %14571 = vst [vmem:[#allocation36_spill] sm:$0xff] %v11327_v58  ;;  %v3025_v46 = vadd.s32 %v3024_v2, %v3022_v30  ;;  %7665 = vmatmul.mubr.msk.f32.gmra.mrb[2].mxu1 %vm3138_vm12, %v14215_v63  ;;  %v3328_v12 = vmax.f32 %v11327_v58, %v11323_v33  ;;  %v3071_v2 = vcvt.f32.s32 %v11148_v53 }
 0x9e3   : > { %v3037_v31 = vpop.xlane.xlu0 %3036 }
 0x9e4   : > { %v11336_v40 = vsel %vm3154_vm1, %v3025_v46, %v14572_v25  ;;  %v3038_v52 = vcvt.f32.s32 %v3037_v31  ;;  %3329 = vmax.xlane.f32.xlu0 %v3328_v12  ;;  %vm3141_vm13 = vcmp.eq.s32.totalorder %v8514_v0, %v3025_v46  ;;  %vm3140_vm14 = vcmp.eq.s32.totalorder %v8511_v62, %v3025_v46  ;;  %v14582_v46 = vld [vmem:[#allocation42_spill] sm:$0xff] }
 0x9e5   : > { %14573 = vst [vmem:[#allocation38_spill] sm:$0xff] %v11336_v40  ;;  %v11341_v37 = vsel %vm3141_vm13, -inf, %v14574_v4  ;;  %7666 = vmatprep.mubr.msk.f32.mxu1 %vm3141_vm13, %v14215_v63  ;;  %v11345_v50 = vsel %vm3140_vm14, -inf, %v14576_v54  ;;  %v3072_v44 = vshll.u32 %v3071_v2, 16  ;;  %v3087_v31 = vcvt.f32.s32 %v11153_v16 }
 0x9e6   : > { %14575 = vst [vmem:[#allocation40_spill] sm:$0xff] %v11341_v37  ;;  %14577 = vst [vmem:[#allocation39_spill] sm:$0xff] %v11345_v50  ;;  %v3041_v20 = vadd.s32 %v3040_v1, %v3038_v52  ;;  %7667 = vmatmul.mubr.msk.f32.gmra.mrb[4].mxu1 %vm3140_vm14, %v14215_v63  ;;  %v3331_v56 = vmax.f32 %v11345_v50, %v11341_v37  ;;  %v14584_v52 = vld [vmem:[#allocation15_spill] sm:$0xff] }
 0x9e7   : > { %v3053_v28 = vpop.xlane.xlu1 %3052 }
 0x9e8   : > { %v11354_v38 = vsel %vm3154_vm1, %v3041_v20, %v14578_v24  ;;  %v3054_v30 = vcvt.f32.s32 %v3053_v28  ;;  %3332 = vmax.xlane.f32.xlu1 %v3331_v56  ;;  %vm3143_vm15 = vcmp.eq.s32.totalorder %v8514_v0, %v3041_v20  ;;  %vm3142_vm0 = vcmp.eq.s32.totalorder %v8511_v62, %v3041_v20  ;;  %v14586_v20 = vld [vmem:[#allocation14_spill] sm:$0xff] }
 0x9e9   : > { %14579 = vst [vmem:[#allocation41_spill] sm:$0xff] %v11354_v38  ;;  %v11359_v21 = vsel %vm3143_vm15, -inf, %v14580_v8  ;;  %7668 = vmatprep.mubr.msk.f32.mxu1 %vm3143_vm15, %v14215_v63  ;;  %v11363_v12 = vsel %vm3142_vm0, -inf, %v14582_v46  ;;  %v3088_v24 = vshll.u32 %v3087_v31, 16  ;;  %v14590_v46 = vld [vmem:[#allocation17_spill] sm:$0xff]  ;;  %v14594_v31 = vld [vmem:[#allocation44_spill] sm:$0xff] }
 0x9ea   : > { %14581 = vst [vmem:[#allocation13_spill] sm:$0xff] %v11359_v21  ;;  %14583 = vst [vmem:[#allocation12_spill] sm:$0xff] %v11363_v12  ;;  %v3057_v53 = vadd.s32 %v3056_v10, %v3054_v30  ;;  %7669 = vmatmul.mubr.msk.f32.gmra.mrb[6].mxu1 %vm3142_vm0, %v14215_v63  ;;  %v3334_v1 = vmax.f32 %v11363_v12, %v11359_v21  ;;  %v14588_v10 = vld [vmem:[#allocation43_spill] sm:$0xff]  ;;  %v3103_v30 = vcvt.f32.s32 %v11158_v6 }
 0x9eb   : > { %v3069_v25 = vpop.xlane.xlu0 %3068 }
 0x9ec   : > { %v11372_v4 = vsel %vm3154_vm1, %v3057_v53, %v14584_v52  ;;  %v3070_v54 = vcvt.f32.s32 %v3069_v25  ;;  %3335 = vmax.xlane.f32.xlu0 %v3334_v1  ;;  %vm3145_vm3 = vcmp.eq.s32.totalorder %v8514_v0, %v3057_v53  ;;  %vm3144_vm4 = vcmp.eq.s32.totalorder %v8511_v62, %v3057_v53 }
 0x9ed   : > { %14585 = vst [vmem:[#allocation42_spill] sm:$0xff] %v11372_v4  ;;  %v11377_v56 = vsel %vm3145_vm3, -inf, %v14586_v20  ;;  %7670 = vmatprep.mubr.msk.f32.mxu1 %vm3145_vm3, %v14215_v63  ;;  %v11381_v2 = vsel %vm3144_vm4, -inf, %v14588_v10  ;;  %v3104_v20 = vshll.u32 %v3103_v30, 16  ;;  %v3119_v10 = vcvt.f32.s32 %v11163_v36  ;;  %v14600_v30 = vld [vmem:[#allocation45_spill] sm:$0xff] }
 0x9ee   : > { %14587 = vst [vmem:[#allocation15_spill] sm:$0xff] %v11377_v56  ;;  %14589 = vst [vmem:[#allocation14_spill] sm:$0xff] %v11381_v2  ;;  %v3073_v16 = vadd.s32 %v3072_v44, %v3070_v54  ;;  %7671 = vmatmul.mubr.msk.f32.gmra.mrb[8].mxu1 %vm3144_vm4, %v14215_v63  ;;  %v3337_v28 = vmax.f32 %v11381_v2, %v11377_v56  ;;  %v14592_v44 = vld [vmem:[#allocation16_spill] sm:$0xff] }
 0x9ef   : > { %v3085_v8 = vpop.xlane.xlu1 %3084 }
 0x9f0   : > { %v11390_v53 = vsel %vm3154_vm1, %v3073_v16, %v14590_v46  ;;  %v3086_v1 = vcvt.f32.s32 %v3085_v8  ;;  %3338 = vmax.xlane.f32.xlu1 %v3337_v28  ;;  %vm3147_vm5 = vcmp.eq.s32.totalorder %v8514_v0, %v3073_v16  ;;  %vm3146_vm6 = vcmp.eq.s32.totalorder %v8511_v62, %v3073_v16  ;;  %v14596_v8 = vld [vmem:[#allocation19_spill] sm:$0xff] }
 0x9f1   : > { %14591 = vst [vmem:[#allocation43_spill] sm:$0xff] %v11390_v53  ;;  %v11395_v25 = vsel %vm3147_vm5, -inf, %v14592_v44  ;;  %7672 = vmatprep.mubr.msk.f32.mxu1 %vm3147_vm5, %v14215_v63  ;;  %v11399_v52 = vsel %vm3146_vm6, -inf, %v14594_v31 }
 0x9f2   : > { %14593 = vst [vmem:[#allocation17_spill] sm:$0xff] %v11395_v25  ;;  %14595 = vst [vmem:[#allocation16_spill] sm:$0xff] %v11399_v52  ;;  %v3089_v6 = vadd.s32 %v3088_v24, %v3086_v1  ;;  %7673 = vmatmul.mubr.msk.f32.gmra.mrb[10].mxu1 %vm3146_vm6, %v14215_v63  ;;  %v3340_v54 = vmax.f32 %v11399_v52, %v11395_v25  ;;  %v14598_v24 = vld [vmem:[#allocation18_spill] sm:$0xff] }
 0x9f3   : > { %v3101_v28 = vpop.xlane.xlu0 %3100 }
 0x9f4   : > { %v11408_v16 = vsel %vm3154_vm1, %v3089_v6, %v14596_v8  ;;  %v3102_v46 = vcvt.f32.s32 %v3101_v28  ;;  %3341 = vmax.xlane.f32.xlu0 %v3340_v54  ;;  %vm3149_vm2 = vcmp.eq.s32.totalorder %v8514_v0, %v3089_v6  ;;  %vm3148_vm7 = vcmp.eq.s32.totalorder %v8511_v62, %v3089_v6  ;;  %v14602_v8 = vld [vmem:[#allocation21_spill] sm:$0xff] }
 0x9f5   : > { %14597 = vst [vmem:[#allocation44_spill] sm:$0xff] %v11408_v16  ;;  %v11413_v1 = vsel %vm3149_vm2, -inf, %v14598_v24  ;;  %7674 = vmatprep.mubr.msk.f32.mxu1 %vm3149_vm2, %v14215_v63  ;;  %v11417_v44 = vsel %vm3148_vm7, -inf, %v14600_v30  ;;  %v3120_v28 = vshll.u32 %v3119_v10, 16  ;;  %v14604_v30 = vld [vmem:[#allocation20_spill] sm:$0xff] }
 0x9f6   : > { %14599 = vst [vmem:[#allocation19_spill] sm:$0xff] %v11413_v1  ;;  %14601 = vst [vmem:[#allocation18_spill] sm:$0xff] %v11417_v44  ;;  %v3105_v36 = vadd.s32 %v3104_v20, %v3102_v46  ;;  %7675 = vmatmul.mubr.msk.f32.gmra.mrb[12].mxu1 %vm3148_vm7, %v14215_v63  ;;  %v3343_v31 = vmax.f32 %v11417_v44, %v11413_v1  ;;  %v14606_v46 = vld [vmem:[#allocation46_spill] sm:$0xff] }
 0x9f7   : > { %v3117_v54 = vpop.xlane.xlu1 %3116 }
 0x9f8   : > { %v11425_v6 = vsel %vm3154_vm1, %v3105_v36, %v14602_v8  ;;  %v3118_v24 = vcvt.f32.s32 %v3117_v54  ;;  %3344 = vmax.xlane.f32.xlu1 %v3343_v31  ;;  %vm3151_vm8 = vcmp.eq.s32.totalorder %v8514_v0, %v3105_v36  ;;  %vm3150_vm9 = vcmp.eq.s32.totalorder %v8511_v62, %v3105_v36  ;;  %v14608_v54 = vld [vmem:[#allocation23_spill] sm:$0xff]  ;;  %v14610_v36 = vld [vmem:[#allocation22_spill] sm:$0xff] }
 0x9f9   : > { %14603 = vst [vmem:[#allocation45_spill] sm:$0xff] %v11425_v6  ;;  %v11430_v20 = vsel %vm3151_vm8, -inf, %v14604_v30  ;;  %7676 = vmatprep.mubr.msk.f32.mxu1 %vm3151_vm8, %v14215_v63  ;;  %v11434_v16 = vsel %vm3150_vm9, -inf, %v14606_v46 }
 0x9fa   : > { %14605 = vst [vmem:[#allocation21_spill] sm:$0xff] %v11430_v20  ;;  %14607 = vst [vmem:[#allocation20_spill] sm:$0xff] %v11434_v16  ;;  %v3121_v10 = vadd.s32 %v3120_v28, %v3118_v24  ;;  %7677 = vmatmul.mubr.msk.f32.gmra.mrb[14].mxu1 %vm3150_vm9, %v14215_v63  ;;  %v3346_v8 = vmax.f32 %v11434_v16, %v11430_v20  ;;  %v14612_v28 = vld [vmem:[#allocation47_spill] sm:$0xff] }
 0x9fc   : > { %v11442_v31 = vsel %vm3154_vm1, %v3121_v10, %v14608_v54  ;;  %3347 = vmax.xlane.f32.xlu0 %v3346_v8  ;;  %vm3153_vm10 = vcmp.eq.s32.totalorder %v8514_v0, %v3121_v10  ;;  %vm3152_vm11 = vcmp.eq.s32.totalorder %v8511_v62, %v3121_v10 }
 0x9fd   : > { %14609 = vst [vmem:[#allocation46_spill] sm:$0xff] %v11442_v31  ;;  %v11447_v30 = vsel %vm3153_vm10, -inf, %v14610_v36  ;;  %7678 = vmatprep.mubr.msk.f32.mxu1 %vm3153_vm10, %v14215_v63  ;;  %v11451_v24 = vsel %vm3152_vm11, -inf, %v14612_v28 }
 0x9fe   : > { %14611 = vst [vmem:[#allocation23_spill] sm:$0xff] %v11447_v30  ;;  %14613 = vst [vmem:[#allocation22_spill] sm:$0xff] %v11451_v24  ;;  %7679 = vmatmul.mubr.msk.f32.gmra.mrb[16].mxu1 %vm3152_vm11, %v14215_v63  ;;  %v3349_v46 = vmax.f32 %v11451_v24, %v11447_v30 }
 0xa00   : > { %3350 = vmax.xlane.f32.xlu1 %v3349_v46 }
 0xa51   : > { %v3306_v54 = vpop.xlane.xlu0 %3305 }
 0xa52   : > { %vm3352_vm1 = vcmp.eq.f32.partialorder %v11183_v22, %v3306_v54  ;;  %vm3353_vm12 = vcmp.eq.f32.partialorder %v11179_v59, %v3306_v54 }
 0xa53   : > { %v3384_v10 = vsel %vm3352_vm1, %v8511_v62, 256  ;;  %v3385_v8 = vsel %vm3353_vm12, %v8514_v0, 256 }
 0xa54   : > { %vm3416_vm13 = vcmp.lt.s32.totalorder %v3384_v10, %v3385_v8 }
 0xa55   : > { %v3309_v36 = vpop.xlane.xlu1 %3308  ;;  %v11460_v31 = vsel %vm3416_vm13, %v3384_v10, %v3385_v8 }
 0xa56   : > { %vm3354_vm14 = vcmp.eq.f32.partialorder %v11201_v51, %v3309_v36  ;;  %vm3355_vm15 = vcmp.eq.f32.partialorder %v11197_v48, %v3309_v36  ;;  %v3419_v28 = vshra.s32 %v11460_v31, 16  ;;  %v8004_v51 = vld [vmem:[%s9216_s12 + $0x10] sm:$0xff] }
 0xa57   : > { %v3386_v46 = vsel %vm3354_vm14, %v8511_v62, 256  ;;  %v3387_v6 = vsel %vm3355_vm15, %v8514_v0, 256 }
 0xa58   : > { %vm3432_vm0 = vcmp.lt.s32.totalorder %v3386_v46, %v3387_v6  ;;  %v11467_v54 = vcvt.s32.f32 %v3419_v28 }
 0xa59   : > { %v3312_v53 = vpop.xlane.xlu0 %3311  ;;  %v11469_v4 = vsel %vm3432_vm0, %v3386_v46, %v3387_v6 }
 0xa5a   : > { %vm3356_vm3 = vcmp.eq.f32.partialorder %v11219_v17, %v3312_v53  ;;  %vm3357_vm4 = vcmp.eq.f32.partialorder %v11215_v26, %v3312_v53  ;;  %3422 = vmin.xlane.f32.xlu0 %v11467_v54  ;;  %v3435_v10 = vshra.s32 %v11469_v4, 16 }
 0xa5b   : > { %v3388_v8 = vsel %vm3356_vm3, %v8511_v62, 256  ;;  %v3389_v36 = vsel %vm3357_vm4, %v8514_v0, 256 }
 0xa5c   : > { %vm3448_vm5 = vcmp.lt.s32.totalorder %v3388_v8, %v3389_v36  ;;  %v11477_v38 = vcvt.s32.f32 %v3435_v10 }
 0xa5d   : > { %v3315_v28 = vpop.xlane.xlu1 %3314  ;;  %v11479_v40 = vsel %vm3448_vm5, %v3388_v8, %v3389_v36 }
 0xa5e   : > { %vm3358_vm6 = vcmp.eq.f32.partialorder %v11237_v7, %v3315_v28  ;;  %vm3359_vm2 = vcmp.eq.f32.partialorder %v11233_v5, %v3315_v28  ;;  %3438 = vmin.xlane.f32.xlu1 %v11477_v38  ;;  %v3451_v53 = vshra.s32 %v11479_v40, 16 }
 0xa5f   : > { %v3390_v6 = vsel %vm3358_vm6, %v8511_v62, 256  ;;  %v3391_v46 = vsel %vm3359_vm2, %v8514_v0, 256 }
 0xa60   : > { %vm3464_vm7 = vcmp.lt.s32.totalorder %v3390_v6, %v3391_v46  ;;  %v11487_v14 = vcvt.s32.f32 %v3451_v53 }
 0xa61   : > { %v3318_v10 = vpop.xlane.xlu0 %3317  ;;  %v11489_v29 = vsel %vm3464_vm7, %v3390_v6, %v3391_v46 }
 0xa62   : > { %vm3360_vm8 = vcmp.eq.f32.partialorder %v11255_v9, %v3318_v10  ;;  %vm3361_vm9 = vcmp.eq.f32.partialorder %v11251_v3, %v3318_v10  ;;  %3454 = vmin.xlane.f32.xlu0 %v11487_v14  ;;  %v3467_v8 = vshra.s32 %v11489_v29, 16 }
 0xa63   : > { %v3392_v36 = vsel %vm3360_vm8, %v8511_v62, 256  ;;  %v3393_v28 = vsel %vm3361_vm9, %v8514_v0, 256 }
 0xa64   : > { %vm3480_vm10 = vcmp.lt.s32.totalorder %v3392_v36, %v3393_v28  ;;  %v11497_v45 = vcvt.s32.f32 %v3467_v8 }
 0xa65   : > { %v3321_v53 = vpop.xlane.xlu1 %3320  ;;  %v11499_v27 = vsel %vm3480_vm10, %v3392_v36, %v3393_v28 }
 0xa66   : > { %vm3362_vm11 = vcmp.eq.f32.partialorder %v11273_v43, %v3321_v53  ;;  %vm3363_vm1 = vcmp.eq.f32.partialorder %v11269_v35, %v3321_v53  ;;  %3470 = vmin.xlane.f32.xlu1 %v11497_v45  ;;  %v3483_v6 = vshra.s32 %v11499_v27, 16 }
 0xa67   : > { %v3394_v46 = vsel %vm3362_vm11, %v8511_v62, 256  ;;  %v3395_v10 = vsel %vm3363_vm1, %v8514_v0, 256 }
 0xa68   : > { %vm3496_vm12 = vcmp.lt.s32.totalorder %v3394_v46, %v3395_v10  ;;  %v11507_v9 = vcvt.s32.f32 %v3483_v6 }
 0xa69   : > { %v3324_v8 = vpop.xlane.xlu0 %3323  ;;  %v11509_v3 = vsel %vm3496_vm12, %v3394_v46, %v3395_v10 }
 0xa6a   : > { %vm3364_vm13 = vcmp.eq.f32.partialorder %v11291_v15, %v3324_v8  ;;  %vm3365_vm14 = vcmp.eq.f32.partialorder %v11287_v18, %v3324_v8  ;;  %3486 = vmin.xlane.f32.xlu0 %v11507_v9  ;;  %v3499_v36 = vshra.s32 %v11509_v3, 16 }
 0xa6b   : > { %v3396_v28 = vsel %vm3364_vm13, %v8511_v62, 256  ;;  %v3397_v53 = vsel %vm3365_vm14, %v8514_v0, 256 }
 0xa6c   : > { %vm3512_vm15 = vcmp.lt.s32.totalorder %v3396_v28, %v3397_v53  ;;  %v11517_v43 = vcvt.s32.f32 %v3499_v36 }
 0xa6d   : > { %v3327_v6 = vpop.xlane.xlu1 %3326  ;;  %v11519_v35 = vsel %vm3512_vm15, %v3396_v28, %v3397_v53 }
 0xa6e   : > { %vm3366_vm0 = vcmp.eq.f32.partialorder %v11309_v41, %v3327_v6  ;;  %vm3367_vm3 = vcmp.eq.f32.partialorder %v11305_v34, %v3327_v6  ;;  %3502 = vmin.xlane.f32.xlu1 %v11517_v43  ;;  %v3515_v46 = vshra.s32 %v11519_v35, 16 }
 0xa6f   : > { %v3398_v10 = vsel %vm3366_vm0, %v8511_v62, 256  ;;  %v3399_v8 = vsel %vm3367_vm3, %v8514_v0, 256 }
 0xa70   : > { %vm3528_vm4 = vcmp.lt.s32.totalorder %v3398_v10, %v3399_v8  ;;  %v11527_v15 = vcvt.s32.f32 %v3515_v46 }
 0xa71   : > { %v3330_v36 = vpop.xlane.xlu0 %3329  ;;  %v11529_v18 = vsel %vm3528_vm4, %v3398_v10, %v3399_v8 }
 0xa72   : > { %vm3368_vm5 = vcmp.eq.f32.partialorder %v11327_v58, %v3330_v36  ;;  %vm3369_vm6 = vcmp.eq.f32.partialorder %v11323_v33, %v3330_v36  ;;  %3518 = vmin.xlane.f32.xlu0 %v11527_v15  ;;  %v3531_v28 = vshra.s32 %v11529_v18, 16 }
 0xa73   : > { %v3400_v53 = vsel %vm3368_vm5, %v8511_v62, 256  ;;  %v3401_v6 = vsel %vm3369_vm6, %v8514_v0, 256 }
 0xa74   : > { %vm3544_vm2 = vcmp.lt.s32.totalorder %v3400_v53, %v3401_v6  ;;  %v11537_v41 = vcvt.s32.f32 %v3531_v28 }
 0xa75   : > { %v3333_v46 = vpop.xlane.xlu1 %3332  ;;  %v11539_v34 = vsel %vm3544_vm2, %v3400_v53, %v3401_v6 }
 0xa76   : > { %vm3370_vm7 = vcmp.eq.f32.partialorder %v11345_v50, %v3333_v46  ;;  %vm3371_vm8 = vcmp.eq.f32.partialorder %v11341_v37, %v3333_v46  ;;  %3534 = vmin.xlane.f32.xlu1 %v11537_v41  ;;  %v3547_v10 = vshra.s32 %v11539_v34, 16 }
 0xa77   : > { %v3402_v8 = vsel %vm3370_vm7, %v8511_v62, 256  ;;  %v3403_v36 = vsel %vm3371_vm8, %v8514_v0, 256 }
 0xa78   : > { %vm3560_vm9 = vcmp.lt.s32.totalorder %v3402_v8, %v3403_v36  ;;  %v11547_v58 = vcvt.s32.f32 %v3547_v10 }
 0xa79   : > { %v3336_v28 = vpop.xlane.xlu0 %3335  ;;  %v11549_v33 = vsel %vm3560_vm9, %v3402_v8, %v3403_v36 }
 0xa7a   : > { %vm3372_vm10 = vcmp.eq.f32.partialorder %v11363_v12, %v3336_v28  ;;  %vm3373_vm11 = vcmp.eq.f32.partialorder %v11359_v21, %v3336_v28  ;;  %3550 = vmin.xlane.f32.xlu0 %v11547_v58  ;;  %v3563_v53 = vshra.s32 %v11549_v33, 16 }
 0xa7b   : > { %v3404_v6 = vsel %vm3372_vm10, %v8511_v62, 256  ;;  %v3405_v46 = vsel %vm3373_vm11, %v8514_v0, 256 }
 0xa7c   : > { %vm3576_vm1 = vcmp.lt.s32.totalorder %v3404_v6, %v3405_v46  ;;  %v11557_v50 = vcvt.s32.f32 %v3563_v53 }
 0xa7d   : > { %v3339_v10 = vpop.xlane.xlu1 %3338  ;;  %v11559_v37 = vsel %vm3576_vm1, %v3404_v6, %v3405_v46 }
 0xa7e   : > { %vm3374_vm12 = vcmp.eq.f32.partialorder %v11381_v2, %v3339_v10  ;;  %vm3375_vm13 = vcmp.eq.f32.partialorder %v11377_v56, %v3339_v10  ;;  %3566 = vmin.xlane.f32.xlu1 %v11557_v50  ;;  %v3579_v8 = vshra.s32 %v11559_v37, 16 }
 0xa7f   : > { %v3406_v36 = vsel %vm3374_vm12, %v8511_v62, 256  ;;  %v3407_v28 = vsel %vm3375_vm13, %v8514_v0, 256 }
 0xa80   : > { %vm3592_vm14 = vcmp.lt.s32.totalorder %v3406_v36, %v3407_v28  ;;  %v11567_v12 = vcvt.s32.f32 %v3579_v8 }
 0xa81   : > { %v3342_v53 = vpop.xlane.xlu0 %3341  ;;  %v11569_v21 = vsel %vm3592_vm14, %v3406_v36, %v3407_v28 }
 0xa82   : > { %vm3376_vm15 = vcmp.eq.f32.partialorder %v11399_v52, %v3342_v53  ;;  %vm3377_vm0 = vcmp.eq.f32.partialorder %v11395_v25, %v3342_v53  ;;  %3582 = vmin.xlane.f32.xlu0 %v11567_v12  ;;  %v3595_v6 = vshra.s32 %v11569_v21, 16 }
 0xa83   : > { %v3408_v46 = vsel %vm3376_vm15, %v8511_v62, 256  ;;  %v3409_v10 = vsel %vm3377_vm0, %v8514_v0, 256 }
 0xa84   : > { %vm3608_vm3 = vcmp.lt.s32.totalorder %v3408_v46, %v3409_v10  ;;  %v11577_v2 = vcvt.s32.f32 %v3595_v6 }
 0xa85   : > { %v3345_v8 = vpop.xlane.xlu1 %3344  ;;  %v11579_v56 = vsel %vm3608_vm3, %v3408_v46, %v3409_v10 }
 0xa86   : > { %vm3378_vm4 = vcmp.eq.f32.partialorder %v11417_v44, %v3345_v8  ;;  %vm3379_vm5 = vcmp.eq.f32.partialorder %v11413_v1, %v3345_v8  ;;  %3598 = vmin.xlane.f32.xlu1 %v11577_v2  ;;  %v3611_v36 = vshra.s32 %v11579_v56, 16 }
 0xa87   : > { %v3410_v28 = vsel %vm3378_vm4, %v8511_v62, 256  ;;  %v3411_v53 = vsel %vm3379_vm5, %v8514_v0, 256 }
 0xa88   : > { %vm3624_vm6 = vcmp.lt.s32.totalorder %v3410_v28, %v3411_v53  ;;  %v11587_v52 = vcvt.s32.f32 %v3611_v36 }
 0xa89   : > { %v3348_v6 = vpop.xlane.xlu0 %3347  ;;  %v11589_v25 = vsel %vm3624_vm6, %v3410_v28, %v3411_v53 }
 0xa8a   : > { %vm3380_vm2 = vcmp.eq.f32.partialorder %v11434_v16, %v3348_v6  ;;  %vm3381_vm7 = vcmp.eq.f32.partialorder %v11430_v20, %v3348_v6  ;;  %3614 = vmin.xlane.f32.xlu0 %v11587_v52  ;;  %v3627_v46 = vshra.s32 %v11589_v25, 16 }
 0xa8b   : > { %v3412_v10 = vsel %vm3380_vm2, %v8511_v62, 256  ;;  %v3413_v8 = vsel %vm3381_vm7, %v8514_v0, 256 }
 0xa8c   : > { %vm3640_vm8 = vcmp.lt.s32.totalorder %v3412_v10, %v3413_v8  ;;  %v11597_v44 = vcvt.s32.f32 %v3627_v46 }
 0xa8d   : > { %v3351_v36 = vpop.xlane.xlu1 %3350  ;;  %v11599_v1 = vsel %vm3640_vm8, %v3412_v10, %v3413_v8 }
 0xa8e   : > { %vm3382_vm9 = vcmp.eq.f32.partialorder %v11451_v24, %v3351_v36  ;;  %vm3383_vm10 = vcmp.eq.f32.partialorder %v11447_v30, %v3351_v36  ;;  %3630 = vmin.xlane.f32.xlu1 %v11597_v44  ;;  %v3643_v28 = vshra.s32 %v11599_v1, 16  ;;  %v8002_v24 = vld [vmem:[%s9216_s12] sm:$0xff] }
 0xa8f   : > { %v3414_v53 = vsel %vm3382_vm9, %v8511_v62, 256  ;;  %v3415_v6 = vsel %vm3383_vm10, %v8514_v0, 256 }
 0xa90   : > { %vm3656_vm11 = vcmp.lt.s32.totalorder %v3414_v53, %v3415_v6  ;;  %v11607_v46 = vcvt.s32.f32 %v3643_v28  ;;  %v14614_v28 = vld [vmem:[#allocation25_spill] sm:$0xff] }
 0xa91   : > { %v11609_v16 = vsel %vm3656_vm11, %v3414_v53, %v3415_v6  ;;  %v8003_v53 = vld [vmem:[%s9216_s12 + $0x8] sm:$0xff] }
 0xa92   : > { %3646 = vmin.xlane.f32.xlu0 %v11607_v46  ;;  %v3659_v10 = vshra.s32 %v11609_v16, 16 }
 0xa94   : > { %v11613_v8 = vcvt.s32.f32 %v3659_v10  ;;  %v14616_v10 = vld [vmem:[#allocation24_spill] sm:$0xff] }
 0xa95   : > { %v6194_v36 = vpop.f32.mrb[160].mxu0 }
 0xa96   : > { %v6785_v30 = vadd.f32 %v8002_v24, %v6194_v36  ;;  %v6196_v20 = vpop.f32.mrb[161].mxu0  ;;  %3662 = vmin.xlane.f32.xlu1 %v11613_v8 }
 0xa98   : > { %v6801_v60 = vmax.f32 %v6785_v30, 0.0  ;;  %v14618_v30 = vld [vmem:[#allocation48_spill] sm:$0xff] }
 0xa99   : > { %v6199_v7 = vpop.f32.mrb[162].mxu0 }
 0xa9a   : > { %v11618_v5 = vadd.f32 %v6801_v60, %v14614_v28  ;;  %v6786_v6 = vadd.f32 %v8003_v53, %v6199_v7  ;;  %v6201_v57 = vpop.f32.mrb[163].mxu0  ;;  %v8005_v60 = vld [vmem:[%s9216_s12 + $0x18] sm:$0xff]  ;;  %v14619_v53 = vld [vmem:[#allocation49_spill] sm:$0xff] }
 0xa9c   : > { %14615 = vst [vmem:[#allocation47_spill] sm:$0xff] %v11618_v5  ;;  %v6802_v17 = vmax.f32 %v6786_v6, 0.0 }
 0xa9d   : > { %v6204_v26 = vpop.f32.mrb[164].mxu0 }
 0xa9e   : > { %v11622_v23 = vadd.f32 %v6802_v17, %v14616_v10  ;;  %v6787_v24 = vadd.f32 %v8004_v51, %v6204_v26  ;;  %v6206_v20 = vpop.f32.mrb[165].mxu0  ;;  %v8006_v17 = vld [vmem:[%s9216_s12 + $0x20] sm:$0xff] }
 0xa9f   : > { %v8007_v20 = vld [vmem:[%s9216_s12 + $0x28] sm:$0xff] }
 0xaa0   : > { %14617 = vst [vmem:[#allocation25_spill] sm:$0xff] %v11622_v23  ;;  %v6803_v36 = vmax.f32 %v6787_v24, 0.0 }
 0xaa1   : > { %v6209_v48 = vpop.f32.mrb[166].mxu0 }
 0xaa2   : > { %v11626_v19 = vadd.f32 %v6803_v36, %v14618_v30  ;;  %v6788_v28 = vadd.f32 %v8005_v60, %v6209_v48  ;;  %v6211_v5 = vpop.f32.mrb[167].mxu0 }
 0xaa4   : > { %v6804_v57 = vmax.f32 %v6788_v28, 0.0  ;;  %v8008_v28 = vld [vmem:[%s9216_s12 + $0x30] sm:$0xff] }
 0xaa5   : > { %v6214_v7 = vpop.f32.mrb[168].mxu0 }
 0xaa6   : > { %v11630_v6 = vadd.f32 %v6804_v57, %v14619_v53  ;;  %v6789_v10 = vadd.f32 %v8006_v17, %v6214_v7  ;;  %v6216_v23 = vpop.f32.mrb[169].mxu0  ;;  %v14621_v17 = vld [vmem:[#allocation50_spill] sm:$0xff] }
 0xaa8   : > { %v6805_v51 = vmax.f32 %v6789_v10, 0.0 }
 0xaa9   : > { %v6219_v26 = vpop.f32.mrb[170].mxu0 }
 0xaaa   : > { %v11634_v24 = vadd.f32 %v6805_v51, %v11041_v11  ;;  %v6790_v36 = vadd.f32 %v8007_v20, %v6219_v26  ;;  %v6221_v30 = vpop.f32.mrb[171].mxu0  ;;  %v8009_v11 = vld [vmem:[%s9216_s12 + $0x38] sm:$0xff] }
 0xaac   : > { %14620 = vst [vmem:[#allocation24_spill] sm:$0xff] %v11634_v24  ;;  %v6806_v48 = vmax.f32 %v6790_v36, 0.0 }
 0xaad   : > { %v6224_v5 = vpop.f32.mrb[172].mxu0 }
 0xaae   : > { %v11638_v60 = vadd.f32 %v6806_v48, %v11045_v47  ;;  %v6791_v57 = vadd.f32 %v8008_v28, %v6224_v5  ;;  %v6226_v53 = vpop.f32.mrb[173].mxu0  ;;  %v8010_v47 = vld [vmem:[%s9216_s12 + $0x40] sm:$0xff] }
 0xab0   : > { %v6807_v23 = vmax.f32 %v6791_v57, 0.0  ;;  %v14624_v57 = vld [vmem:[#allocation51_spill] sm:$0xff] }
 0xab1   : > { %v6229_v7 = vpop.f32.mrb[0].mxu1 }
 0xab2   : > { %v11642_v10 = vadd.f32 %v6807_v23, %v14621_v17  ;;  %v6792_v51 = vadd.f32 %v8009_v11, %v6229_v7  ;;  %v6231_v24 = vpop.f32.mrb[1].mxu1  ;;  %v8011_v23 = vld [vmem:[%s9216_s12 + $0x48] sm:$0xff]  ;;  %v14625_v11 = vld [vmem:[#allocation52_spill] sm:$0xff] }
 0xab4   : > { %14622 = vst [vmem:[#allocation48_spill] sm:$0xff] %v11642_v10  ;;  %v6808_v26 = vmax.f32 %v6792_v51, 0.0 }
 0xab5   : > { %v6234_v20 = vpop.f32.mrb[2].mxu1 }
 0xab6   : > { %v11646_v36 = vadd.f32 %v6808_v26, %v11053_v42  ;;  %v6793_v30 = vadd.f32 %v8010_v47, %v6234_v20  ;;  %v6236_v48 = vpop.f32.mrb[3].mxu1  ;;  %v8012_v42 = vld [vmem:[%s9216_s12 + $0x50] sm:$0xff] }
 0xab7   : > { %v8013_v48 = vld [vmem:[%s9216_s12 + $0x58] sm:$0xff] }
 0xab8   : > { %14623 = vst [vmem:[#allocation49_spill] sm:$0xff] %v11646_v36  ;;  %v6809_v5 = vmax.f32 %v6793_v30, 0.0 }
 0xab9   : > { %v6239_v28 = vpop.f32.mrb[4].mxu1 }
 0xaba   : > { %v11650_v53 = vadd.f32 %v6809_v5, %v14624_v57  ;;  %v6794_v17 = vadd.f32 %v8011_v23, %v6239_v28  ;;  %v6241_v10 = vpop.f32.mrb[5].mxu1  ;;  %v14627_v23 = vld [vmem:[#allocation53_spill] sm:$0xff] }
 0xabc   : > { %v6810_v24 = vmax.f32 %v6794_v17, 0.0 }
 0xabd   : > { %v6244_v7 = vpop.f32.mrb[6].mxu1 }
 0xabe   : > { %v11654_v51 = vadd.f32 %v6810_v24, %v14625_v11  ;;  %v6795_v26 = vadd.f32 %v8012_v42, %v6244_v7  ;;  %v6246_v36 = vpop.f32.mrb[7].mxu1  ;;  %v8014_v24 = vld [vmem:[%s9216_s12 + $0x60] sm:$0xff] }
 0xac0   : > { %14626 = vst [vmem:[#allocation50_spill] sm:$0xff] %v11654_v51  ;;  %v6811_v20 = vmax.f32 %v6795_v26, 0.0 }
 0xac1   : > { %v6249_v47 = vpop.f32.mrb[8].mxu1 }
 0xac2   : > { %v11658_v30 = vadd.f32 %v6811_v20, %v11065_v49  ;;  %v6796_v5 = vadd.f32 %v8013_v48, %v6249_v47  ;;  %v6251_v57 = vpop.f32.mrb[9].mxu1  ;;  %v8015_v49 = vld [vmem:[%s9216_s12 + $0x68] sm:$0xff] }
 0xac3   : > { %v8016_v57 = vld [vmem:[%s9216_s12 + $0x70] sm:$0xff] }
 0xac4   : > { %v6812_v10 = vmax.f32 %v6796_v5, 0.0 }
 0xac5   : > { %v6254_v28 = vpop.f32.mrb[10].mxu1 }
 0xac6   : > { %v11662_v17 = vadd.f32 %v6812_v10, %v14627_v23  ;;  %v6797_v11 = vadd.f32 %v8014_v24, %v6254_v28  ;;  %v6256_v51 = vpop.f32.mrb[11].mxu1  ;;  %v8017_v24 = vld [vmem:[%s9216_s12 + $0x78] sm:$0xff] }
 0xac8   : > { %14628 = vst [vmem:[#allocation51_spill] sm:$0xff] %v11662_v17  ;;  %v6813_v36 = vmax.f32 %v6797_v11, 0.0 }
 0xac9   : > { %v6259_v7 = vpop.f32.mrb[12].mxu1 }
 0xaca   : > { %v11666_v42 = vadd.f32 %v6813_v36, %v11073_v32  ;;  %v6798_v26 = vadd.f32 %v8015_v49, %v6259_v7  ;;  %v6261_v20 = vpop.f32.mrb[13].mxu1  ;;  %v3418_v49 = vand.u32 65535, %v11460_v31 }
 0xacb   : > { %v3434_v20 = vand.u32 65535, %v11469_v4  ;;  %v3466_v4 = vand.u32 65535, %v11489_v29  ;;  %v3498_v29 = vand.u32 65535, %v11509_v3  ;;  %v3530_v3 = vand.u32 65535, %v11529_v18 }
 0xacc   : > { %v6814_v47 = vmax.f32 %v6798_v26, 0.0  ;;  %v3562_v18 = vand.u32 65535, %v11549_v33  ;;  %v3594_v33 = vand.u32 65535, %v11569_v21  ;;  %v3626_v21 = vand.u32 65535, %v11589_v25 }
 0xacd   : > { %v6264_v48 = vpop.f32.mrb[14].mxu1  ;;  %v3658_v25 = vand.u32 65535, %v11609_v16 }
 0xace   : > { %v11670_v5 = vadd.f32 %v6814_v47, %v11077_v55  ;;  %v6799_v10 = vadd.f32 %v8016_v57, %v6264_v48  ;;  %v6266_v23 = vpop.f32.mrb[15].mxu1  ;;  %v3420_v55 = vcvt.s32.f32 %v3418_v49  ;;  %v3450_v48 = vand.u32 65535, %v11479_v40 }
 0xacf   : > { %v3468_v23 = vcvt.s32.f32 %v3466_v4  ;;  %v3482_v40 = vand.u32 65535, %v11499_v27  ;;  %v3514_v27 = vand.u32 65535, %v11519_v35  ;;  %v3546_v35 = vand.u32 65535, %v11539_v34 }
 0xad0   : > { %v6815_v17 = vmax.f32 %v6799_v10, 0.0  ;;  %v3452_v57 = vcvt.s32.f32 %v3450_v48  ;;  %v3578_v34 = vand.u32 65535, %v11559_v37  ;;  %v3610_v37 = vand.u32 65535, %v11579_v56 }
 0xad1   : > { %v6269_v28 = vpop.f32.mrb[16].mxu1  ;;  %v3516_v49 = vcvt.s32.f32 %v3514_v27  ;;  %v3642_v56 = vand.u32 65535, %v11599_v1 }
 0xad2   : > { %v11674_v51 = vadd.f32 %v6815_v17, %v11081_v61  ;;  %v6800_v11 = vadd.f32 %v8017_v24, %v6269_v28  ;;  %v6271_v32 = vpop.f32.mrb[17].mxu1  ;;  %v3436_v17 = vcvt.s32.f32 %v3434_v20  ;;  %v3484_v24 = vcvt.s32.f32 %v3482_v40 }
 0xad3   : > { %v3500_v32 = vcvt.s32.f32 %v3498_v29  ;;  %v3532_v20 = vcvt.s32.f32 %v3530_v3  ;;  %v3580_v4 = vcvt.s32.f32 %v3578_v34  ;;  %v3628_v29 = vcvt.s32.f32 %v3626_v21  ;;  %v14629_v34 = vld [vmem:[#allocation54_spill] sm:$0xff]  ;;  %v14635_v21 = vld [vmem:[#allocation57_spill] sm:$0xff] }
 0xad4   : > { %v6816_v36 = vmax.f32 %v6800_v11, 0.0 }
 0xad6   : > { %v11678_v7 = vadd.f32 %v6816_v36, %v11085_v13 }
 0xae7   : > { %v11681_v26 = vpop.xlane.xlu0 %3422 }
 0xae8   : > { %vm3424_vm1 = vcmp.eq.f32.partialorder %v11467_v54, %v11681_v26 }
 0xae9   : > { %v3425_v47 = vsel %vm3424_vm1, %v3420_v55, inf  ;;  %vm3704_vm1 = vcmp.eq.s32.totalorder %v8511_v62, 5 }
 0xaea   : > { %3426 = vmin.xlane.f32.xlu0 %v3425_v47 }
 0xaeb   : > { %v11686_v61 = vpop.xlane.xlu1 %3438 }
 0xaec   : > { %vm3440_vm12 = vcmp.eq.f32.partialorder %v11477_v38, %v11686_v61 }
 0xaed   : > { %v3441_v13 = vsel %vm3440_vm12, %v3436_v17, inf  ;;  %v3548_v17 = vcvt.s32.f32 %v3546_v35 }
 0xaee   : > { %3442 = vmin.xlane.f32.xlu1 %v3441_v13  ;;  %v3564_v13 = vcvt.s32.f32 %v3562_v18 }
 0xaef   : > { %v11691_v31 = vpop.xlane.xlu0 %3454 }
 0xaf0   : > { %vm3456_vm13 = vcmp.eq.f32.partialorder %v11487_v14, %v11691_v31  ;;  %v3461_v35 = vcvt.f32.s32 %v11691_v31 }
 0xaf1   : > { %v3457_v54 = vsel %vm3456_vm13, %v3452_v57, inf }
 0xaf2   : > { %3458 = vmin.xlane.f32.xlu0 %v3457_v54  ;;  %v3462_v18 = vshll.u32 %v3461_v35, 16 }
 0xaf3   : > { %v11696_v10 = vpop.xlane.xlu1 %3470 }
 0xaf4   : > { %vm3472_vm14 = vcmp.eq.f32.partialorder %v11497_v45, %v11696_v10 }
 0xaf5   : > { %v3473_v38 = vsel %vm3472_vm14, %v3468_v23, inf  ;;  %v3596_v23 = vcvt.s32.f32 %v3594_v33  ;;  %v14633_v33 = vld [vmem:[#allocation56_spill] sm:$0xff] }
 0xaf6   : > { %3474 = vmin.xlane.f32.xlu1 %v3473_v38  ;;  %v3612_v38 = vcvt.s32.f32 %v3610_v37 }
 0xaf7   : > { %v11701_v28 = vpop.xlane.xlu0 %3486 }
 0xaf8   : > { %vm3488_vm15 = vcmp.eq.f32.partialorder %v11507_v9, %v11701_v28 }
 0xaf9   : > { %v3489_v14 = vsel %vm3488_vm15, %v3484_v24, inf }
 0xafa   : > { %3490 = vmin.xlane.f32.xlu0 %v3489_v14 }
 0xafb   : > { %v11706_v11 = vpop.xlane.xlu1 %3502 }
 0xafc   : > { %vm3504_vm0 = vcmp.eq.f32.partialorder %v11517_v43, %v11706_v11 }
 0xafd   : > { %v3505_v45 = vsel %vm3504_vm0, %v3500_v32, inf  ;;  %v3644_v32 = vcvt.s32.f32 %v3642_v56  ;;  %v14637_v56 = vld [vmem:[#allocation58_spill] sm:$0xff] }
 0xafe   : > { %3506 = vmin.xlane.f32.xlu1 %v3505_v45  ;;  %v3660_v45 = vcvt.s32.f32 %v3658_v25 }
 0xaff   : > { %v11711_v36 = vpop.xlane.xlu0 %3518 }
 0xb00   : > { %vm3520_vm3 = vcmp.eq.f32.partialorder %v11527_v15, %v11711_v36 }
 0xb01   : > { %v3521_v9 = vsel %vm3520_vm3, %v3516_v49, inf  ;;  %v3445_v49 = vcvt.f32.s32 %v11686_v61 }
 0xb02   : > { %3522 = vmin.xlane.f32.xlu0 %v3521_v9 }
 0xb03   : > { %v11716_v55 = vpop.xlane.xlu1 %3534 }
 0xb04   : > { %vm3536_vm4 = vcmp.eq.f32.partialorder %v11537_v41, %v11716_v55 }
 0xb05   : > { %v3537_v43 = vsel %vm3536_vm4, %v3532_v20, inf  ;;  %v3446_v20 = vshll.u32 %v3445_v49, 16  ;;  %v14641_v49 = vld [vmem:[#allocation60_spill] sm:$0xff] }
 0xb06   : > { %3538 = vmin.xlane.f32.xlu1 %v3537_v43 }
 0xb07   : > { %v11721_v47 = vpop.xlane.xlu0 %3550 }
 0xb08   : > { %vm3552_vm5 = vcmp.eq.f32.partialorder %v11547_v58, %v11721_v47 }
 0xb09   : > { %v3553_v15 = vsel %vm3552_vm5, %v3548_v17, inf }
 0xb0a   : > { %3554 = vmin.xlane.f32.xlu0 %v3553_v15  ;;  %v3477_v15 = vcvt.f32.s32 %v11696_v10 }
 0xb0b   : > { %v11726_v48 = vpop.xlane.xlu1 %3566 }
 0xb0c   : > { %vm3568_vm6 = vcmp.eq.f32.partialorder %v11557_v50, %v11726_v48  ;;  %v3478_v37 = vshll.u32 %v3477_v15, 16 }
 0xb0d   : > { %v3569_v41 = vsel %vm3568_vm6, %v3564_v13, inf }
 0xb0e   : > { %3570 = vmin.xlane.f32.xlu1 %v3569_v41 }
 0xb0f   : > { %v11731_v57 = vpop.xlane.xlu0 %3582 }
 0xb10   : > { %vm3584_vm2 = vcmp.eq.f32.partialorder %v11567_v12, %v11731_v57 }
 0xb11   : > { %v3585_v58 = vsel %vm3584_vm2, %v3580_v4, inf }
 0xb12   : > { %3586 = vmin.xlane.f32.xlu0 %v3585_v58 }
 0xb13   : > { %v11736_v54 = vpop.xlane.xlu1 %3598 }
 0xb14   : > { %vm3600_vm7 = vcmp.eq.f32.partialorder %v11577_v2, %v11736_v54 }
 0xb15   : > { %v3601_v50 = vsel %vm3600_vm7, %v3596_v23, inf }
 0xb16   : > { %3602 = vmin.xlane.f32.xlu1 %v3601_v50  ;;  %v3493_v50 = vcvt.f32.s32 %v11701_v28 }
 0xb17   : > { %v11741_v40 = vpop.xlane.xlu0 %3614 }
 0xb18   : > { %vm3616_vm8 = vcmp.eq.f32.partialorder %v11587_v52, %v11741_v40 }
 0xb19   : > { %v3617_v12 = vsel %vm3616_vm8, %v3612_v38, inf }
 0xb1a   : > { %3618 = vmin.xlane.f32.xlu0 %v3617_v12 }
 0xb1b   : > { %v11746_v24 = vpop.xlane.xlu1 %3630 }
 0xb1c   : > { %vm3632_vm9 = vcmp.eq.f32.partialorder %v11597_v44, %v11746_v24  ;;  %v3429_v44 = vcvt.f32.s32 %v11681_v26 }
 0xb1d   : > { %v3633_v2 = vsel %vm3632_vm9, %v3628_v29, inf }
 0xb1e   : > { %3634 = vmin.xlane.f32.xlu1 %v3633_v2  ;;  %v3430_v9 = vshll.u32 %v3429_v44, 16 }
 0xb1f   : > { %v11751_v14 = vpop.xlane.xlu0 %3646 }
 0xb20   : > { %vm3648_vm10 = vcmp.eq.f32.partialorder %v11607_v46, %v11751_v14 }
 0xb21   : > { %v3649_v52 = vsel %vm3648_vm10, %v3644_v32, inf  ;;  %v14639_v32 = vld [vmem:[#allocation59_spill] sm:$0xff] }
 0xb22   : > { %3650 = vmin.xlane.f32.xlu0 %v3649_v52 }
 0xb23   : > { %v11756_v27 = vpop.xlane.xlu1 %3662 }
 0xb24   : > { %vm3664_vm11 = vcmp.eq.f32.partialorder %v11613_v8, %v11756_v27 }
 0xb25   : > { %v3665_v1 = vsel %vm3664_vm11, %v3660_v45, inf  ;;  %v3494_v45 = vshll.u32 %v3493_v50, 16 }
 0xb26   : > { %3666 = vmin.xlane.f32.xlu1 %v3665_v1  ;;  %v3509_v1 = vcvt.f32.s32 %v11706_v11 }
 0xb77   : > { %v3427_v3 = vpop.xlane.xlu0 %3426 }
 0xb78   : > { %v3428_v16 = vcvt.f32.s32 %v3427_v3 }
 0xb7a   : > { %v3431_v46 = vadd.s32 %v3430_v9, %v3428_v16  ;;  %v14643_v16 = vld [vmem:[#allocation61_spill] sm:$0xff] }
 0xb7b   : > { %v3443_v43 = vpop.xlane.xlu1 %3442 }
 0xb7c   : > { %v11767_v8 = vsel %vm3704_vm1, %v3431_v46, %v11174_v39  ;;  %v3444_v17 = vcvt.f32.s32 %v3443_v43  ;;  %vm3673_vm12 = vcmp.eq.s32.totalorder %v8514_v0, %v3431_v46  ;;  %vm3672_vm13 = vcmp.eq.s32.totalorder %v8511_v62, %v3431_v46 }
 0xb7d   : > { %v11772_v26 = vsel %vm3673_vm12, -inf, %v11179_v59  ;;  %7680 = vmatprep.mubr.msk.f32.mxu1 %vm3673_vm12, %v14215_v63  ;;  %v11776_v61 = vsel %vm3672_vm13, -inf, %v11183_v22  ;;  %v14631_v22 = vld [vmem:[#allocation55_spill] sm:$0xff] }
 0xb7e   : > { %v3447_v31 = vadd.s32 %v3446_v20, %v3444_v17  ;;  %7681 = vmatmul.mubr.msk.f32.gmra.mrb[18].mxu1 %vm3672_vm13, %v14215_v63  ;;  %v3854_v39 = vmax.f32 %v11776_v61, %v11772_v26  ;;  %v14645_v20 = vld [vmem:[#allocation62_spill] sm:$0xff]  ;;  %v3510_v17 = vshll.u32 %v3509_v1, 16 }
 0xb7f   : > { %v3459_v13 = vpop.xlane.xlu0 %3458 }
 0xb80   : > { %v11785_v59 = vsel %vm3704_vm1, %v3447_v31, %v14629_v34  ;;  %v3460_v41 = vcvt.f32.s32 %v3459_v13  ;;  %3855 = vmax.xlane.f32.xlu0 %v3854_v39  ;;  %vm3675_vm14 = vcmp.eq.s32.totalorder %v8514_v0, %v3447_v31  ;;  %vm3674_vm15 = vcmp.eq.s32.totalorder %v8511_v62, %v3447_v31  ;;  %v14649_v34 = vld [vmem:[#allocation64_spill] sm:$0xff] }
 0xb81   : > { %14630 = vst [vmem:[#allocation52_spill] sm:$0xff] %v11785_v59  ;;  %v11790_v4 = vsel %vm3675_vm14, -inf, %v14631_v22  ;;  %7682 = vmatprep.mubr.msk.f32.mxu1 %vm3675_vm14, %v14215_v63  ;;  %v11794_v58 = vsel %vm3674_vm15, -inf, %v14633_v33  ;;  %v3525_v31 = vcvt.f32.s32 %v11711_v36  ;;  %v14651_v22 = vld [vmem:[#allocation65_spill] sm:$0xff] }
 0xb82   : > { %14632 = vst [vmem:[#allocation53_spill] sm:$0xff] %v11790_v4  ;;  %14634 = vst [vmem:[#allocation54_spill] sm:$0xff] %v11794_v58  ;;  %v3463_v10 = vadd.s32 %v3462_v18, %v3460_v41  ;;  %7683 = vmatmul.mubr.msk.f32.gmra.mrb[20].mxu1 %vm3674_vm15, %v14215_v63  ;;  %v3857_v23 = vmax.f32 %v11794_v58, %v11790_v4  ;;  %v14647_v18 = vld [vmem:[#allocation63_spill] sm:$0xff] }
 0xb83   : > { %v3475_v38 = vpop.xlane.xlu1 %3474 }
 0xb84   : > { %v11803_v12 = vsel %vm3704_vm1, %v3463_v10, %v14635_v21  ;;  %v3476_v29 = vcvt.f32.s32 %v3475_v38  ;;  %3858 = vmax.xlane.f32.xlu1 %v3857_v23  ;;  %vm3677_vm0 = vcmp.eq.s32.totalorder %v8514_v0, %v3463_v10  ;;  %vm3676_vm3 = vcmp.eq.s32.totalorder %v8511_v62, %v3463_v10  ;;  %v14653_v38 = vld [vmem:[#allocation26_spill] sm:$0xff] }
 0xb85   : > { %14636 = vst [vmem:[#allocation55_spill] sm:$0xff] %v11803_v12  ;;  %v11808_v2 = vsel %vm3677_vm0, -inf, %v14637_v56  ;;  %7684 = vmatprep.mubr.msk.f32.mxu1 %vm3677_vm0, %v14215_v63  ;;  %v11812_v25 = vsel %vm3676_vm3, -inf, %v14639_v32  ;;  %v3526_v23 = vshll.u32 %v3525_v31, 16  ;;  %v14655_v56 = vld [vmem:[#allocation28_spill] sm:$0xff] }
 0xb86   : > { %14638 = vst [vmem:[#allocation56_spill] sm:$0xff] %v11808_v2  ;;  %14640 = vst [vmem:[#allocation57_spill] sm:$0xff] %v11812_v25  ;;  %v3479_v28 = vadd.s32 %v3478_v37, %v3476_v29  ;;  %7685 = vmatmul.mubr.msk.f32.gmra.mrb[22].mxu1 %vm3676_vm3, %v14215_v63  ;;  %v3860_v52 = vmax.f32 %v11812_v25, %v11808_v2  ;;  %v3541_v37 = vcvt.f32.s32 %v11716_v55 }
 0xb87   : > { %v3491_v44 = vpop.xlane.xlu0 %3490 }
 0xb88   : > { %v11821_v3 = vsel %vm3704_vm1, %v3479_v28, %v14641_v49  ;;  %v3492_v9 = vcvt.f32.s32 %v3491_v44  ;;  %3861 = vmax.xlane.f32.xlu0 %v3860_v52  ;;  %vm3679_vm4 = vcmp.eq.s32.totalorder %v8514_v0, %v3479_v28  ;;  %vm3678_vm5 = vcmp.eq.s32.totalorder %v8511_v62, %v3479_v28  ;;  %v14657_v28 = vld [vmem:[#allocation27_spill] sm:$0xff] }
 0xb89   : > { %14642 = vst [vmem:[#allocation58_spill] sm:$0xff] %v11821_v3  ;;  %v11826_v46 = vsel %vm3679_vm4, -inf, %v14643_v16  ;;  %7686 = vmatprep.mubr.msk.f32.mxu1 %vm3679_vm4, %v14215_v63  ;;  %v11830_v35 = vsel %vm3678_vm5, -inf, %v14645_v20  ;;  %v3542_v1 = vshll.u32 %v3541_v37, 16  ;;  %v3557_v44 = vcvt.f32.s32 %v11721_v47 }
 0xb8a   : > { %14644 = vst [vmem:[#allocation59_spill] sm:$0xff] %v11826_v46  ;;  %14646 = vst [vmem:[#allocation60_spill] sm:$0xff] %v11830_v35  ;;  %v3495_v11 = vadd.s32 %v3494_v45, %v3492_v9  ;;  %7687 = vmatmul.mubr.msk.f32.gmra.mrb[24].mxu1 %vm3678_vm5, %v14215_v63  ;;  %v3863_v43 = vmax.f32 %v11830_v35, %v11826_v46  ;;  %v14659_v9 = vld [vmem:[#allocation29_spill] sm:$0xff] }
 0xb8b   : > { %v3507_v39 = vpop.xlane.xlu1 %3506 }
 0xb8c   : > { %v11839_v15 = vsel %vm3704_vm1, %v3495_v11, %v14647_v18  ;;  %v3508_v13 = vcvt.f32.s32 %v3507_v39  ;;  %3864 = vmax.xlane.f32.xlu1 %v3863_v43  ;;  %vm3681_vm6 = vcmp.eq.s32.totalorder %v8514_v0, %v3495_v11  ;;  %vm3680_vm2 = vcmp.eq.s32.totalorder %v8511_v62, %v3495_v11  ;;  %v14661_v11 = vld [vmem:[#allocation31_spill] sm:$0xff] }
 0xb8d   : > { %14648 = vst [vmem:[#allocation61_spill] sm:$0xff] %v11839_v15  ;;  %v11844_v41 = vsel %vm3681_vm6, -inf, %v14649_v34  ;;  %7688 = vmatprep.mubr.msk.f32.mxu1 %vm3681_vm6, %v14215_v63  ;;  %v11848_v33 = vsel %vm3680_vm2, -inf, %v14651_v22  ;;  %v3558_v18 = vshll.u32 %v3557_v44, 16  ;;  %v14665_v22 = vld [vmem:[#allocation32_spill] sm:$0xff] }
 0xb8e   : > { %14650 = vst [vmem:[#allocation62_spill] sm:$0xff] %v11844_v41  ;;  %14652 = vst [vmem:[#allocation63_spill] sm:$0xff] %v11848_v33  ;;  %v3511_v36 = vadd.s32 %v3510_v17, %v3508_v13  ;;  %7689 = vmatmul.mubr.msk.f32.gmra.mrb[26].mxu1 %vm3680_vm2, %v14215_v63  ;;  %v3866_v10 = vmax.f32 %v11848_v33, %v11844_v41  ;;  %v14663_v17 = vld [vmem:[#allocation30_spill] sm:$0xff]  ;;  %v3573_v13 = vcvt.f32.s32 %v11726_v48 }
 0xb8f   : > { %v3523_v50 = vpop.xlane.xlu0 %3522 }
 0xb90   : > { %v11857_v21 = vsel %vm3704_vm1, %v3511_v36, %v14653_v38  ;;  %v3524_v29 = vcvt.f32.s32 %v3523_v50  ;;  %3867 = vmax.xlane.f32.xlu0 %v3866_v10  ;;  %vm3683_vm7 = vcmp.eq.s32.totalorder %v8514_v0, %v3511_v36  ;;  %vm3682_vm8 = vcmp.eq.s32.totalorder %v8511_v62, %v3511_v36  ;;  %v14669_v50 = vld [vmem:[#allocation33_spill] sm:$0xff] }
 0xb91   : > { %14654 = vst [vmem:[#allocation64_spill] sm:$0xff] %v11857_v21  ;;  %v11862_v32 = vsel %vm3683_vm7, -inf, %v14655_v56  ;;  %7690 = vmatprep.mubr.msk.f32.mxu1 %vm3683_vm7, %v14215_v63  ;;  %v11866_v52 = vsel %vm3682_vm8, -inf, %v14657_v28  ;;  %v3574_v56 = vshll.u32 %v3573_v13, 16  ;;  %v3589_v28 = vcvt.f32.s32 %v11731_v57  ;;  %v14677_v13 = vld [vmem:[#allocation38_spill] sm:$0xff] }
 0xb92   : > { %14656 = vst [vmem:[#allocation65_spill] sm:$0xff] %v11862_v32  ;;  %14658 = vst [vmem:[#allocation26_spill] sm:$0xff] %v11866_v52  ;;  %v3527_v55 = vadd.s32 %v3526_v23, %v3524_v29  ;;  %7691 = vmatmul.mubr.msk.f32.gmra.mrb[28].mxu1 %vm3682_vm8, %v14215_v63  ;;  %v3869_v45 = vmax.f32 %v11866_v52, %v11862_v32  ;;  %v14667_v23 = vld [vmem:[#allocation34_spill] sm:$0xff] }
 0xb93   : > { %v3539_v49 = vpop.xlane.xlu1 %3538 }
 0xb94   : > { %v11875_v16 = vsel %vm3704_vm1, %v3527_v55, %v14659_v9  ;;  %v3540_v20 = vcvt.f32.s32 %v3539_v49  ;;  %3870 = vmax.xlane.f32.xlu1 %v3869_v45  ;;  %vm3685_vm9 = vcmp.eq.s32.totalorder %v8514_v0, %v3527_v55  ;;  %vm3684_vm10 = vcmp.eq.s32.totalorder %v8511_v62, %v3527_v55  ;;  %v14671_v45 = vld [vmem:[#allocation35_spill] sm:$0xff]  ;;  %v14673_v49 = vld [vmem:[#allocation37_spill] sm:$0xff] }
 0xb95   : > { %14660 = vst [vmem:[#allocation28_spill] sm:$0xff] %v11875_v16  ;;  %v11880_v43 = vsel %vm3685_vm9, -inf, %v14661_v11  ;;  %7692 = vmatprep.mubr.msk.f32.mxu1 %vm3685_vm9, %v14215_v63  ;;  %v11884_v31 = vsel %vm3684_vm10, -inf, %v14663_v17 }
 0xb96   : > { %14662 = vst [vmem:[#allocation27_spill] sm:$0xff] %v11880_v43  ;;  %14664 = vst [vmem:[#allocation29_spill] sm:$0xff] %v11884_v31  ;;  %v3543_v47 = vadd.s32 %v3542_v1, %v3540_v20  ;;  %7693 = vmatmul.mubr.msk.f32.gmra.mrb[30].mxu1 %vm3684_vm10, %v14215_v63  ;;  %v3872_v39 = vmax.f32 %v11884_v31, %v11880_v43  ;;  %v14675_v20 = vld [vmem:[#allocation36_spill] sm:$0xff] }
 0xb97   : > { %v3555_v34 = vpop.xlane.xlu0 %3554 }
 0xb98   : > { %v11893_v36 = vsel %vm3704_vm1, %v3543_v47, %v14665_v22  ;;  %v3556_v10 = vcvt.f32.s32 %v3555_v34  ;;  %3873 = vmax.xlane.f32.xlu0 %v3872_v39  ;;  %vm3687_vm11 = vcmp.eq.s32.totalorder %v8514_v0, %v3543_v47  ;;  %vm3686_vm12 = vcmp.eq.s32.totalorder %v8511_v62, %v3543_v47 }
 0xb99   : > { %14666 = vst [vmem:[#allocation31_spill] sm:$0xff] %v11893_v36  ;;  %v11898_v37 = vsel %vm3687_vm11, -inf, %v14667_v23  ;;  %7694 = vmatprep.mubr.msk.f32.mxu1 %vm3687_vm11, %v14215_v63  ;;  %v11902_v38 = vsel %vm3686_vm12, -inf, %v14669_v50  ;;  %v3590_v47 = vshll.u32 %v3589_v28, 16  ;;  %v3605_v39 = vcvt.f32.s32 %v11736_v54  ;;  %v14681_v50 = vld [vmem:[#allocation39_spill] sm:$0xff] }
 0xb9a   : > { %14668 = vst [vmem:[#allocation30_spill] sm:$0xff] %v11898_v37  ;;  %14670 = vst [vmem:[#allocation32_spill] sm:$0xff] %v11902_v38  ;;  %v3559_v48 = vadd.s32 %v3558_v18, %v3556_v10  ;;  %7695 = vmatmul.mubr.msk.f32.gmra.mrb[32].mxu1 %vm3686_vm12, %v14215_v63  ;;  %v3875_v29 = vmax.f32 %v11902_v38, %v11898_v37  ;;  %v14679_v10 = vld [vmem:[#allocation40_spill] sm:$0xff]  ;;  %v3621_v28 = vcvt.f32.s32 %v11741_v40 }
 0xb9b   : > { %v3571_v55 = vpop.xlane.xlu1 %3570 }
 0xb9c   : > { %v11911_v1 = vsel %vm3704_vm1, %v3559_v48, %v14671_v45  ;;  %v3572_v44 = vcvt.f32.s32 %v3571_v55  ;;  %3876 = vmax.xlane.f32.xlu1 %v3875_v29  ;;  %vm3689_vm13 = vcmp.eq.s32.totalorder %v8514_v0, %v3559_v48  ;;  %vm3688_vm14 = vcmp.eq.s32.totalorder %v8511_v62, %v3559_v48  ;;  %v14683_v45 = vld [vmem:[#allocation41_spill] sm:$0xff] }
 0xb9d   : > { %14672 = vst [vmem:[#allocation34_spill] sm:$0xff] %v11911_v1  ;;  %v11916_v9 = vsel %vm3689_vm13, -inf, %v14673_v49  ;;  %7696 = vmatprep.mubr.msk.f32.mxu1 %vm3689_vm13, %v14215_v63  ;;  %v11920_v11 = vsel %vm3688_vm14, -inf, %v14675_v20  ;;  %v14685_v20 = vld [vmem:[#allocation13_spill] sm:$0xff] }
 0xb9e   : > { %14674 = vst [vmem:[#allocation33_spill] sm:$0xff] %v11916_v9  ;;  %14676 = vst [vmem:[#allocation35_spill] sm:$0xff] %v11920_v11  ;;  %v3575_v57 = vadd.s32 %v3574_v56, %v3572_v44  ;;  %7697 = vmatmul.mubr.msk.f32.gmra.mrb[34].mxu1 %vm3688_vm14, %v14215_v63  ;;  %v3878_v17 = vmax.f32 %v11920_v11, %v11916_v9  ;;  %v3606_v56 = vshll.u32 %v3605_v39, 16 }
 0xb9f   : > { %v3587_v18 = vpop.xlane.xlu0 %3586 }
 0xba0   : > { %v11929_v34 = vsel %vm3704_vm1, %v3575_v57, %v14677_v13  ;;  %v3588_v22 = vcvt.f32.s32 %v3587_v18  ;;  %3879 = vmax.xlane.f32.xlu0 %v3878_v17  ;;  %vm3691_vm15 = vcmp.eq.s32.totalorder %v8514_v0, %v3575_v57  ;;  %vm3690_vm0 = vcmp.eq.s32.totalorder %v8511_v62, %v3575_v57  ;;  %v14687_v17 = vld [vmem:[#allocation12_spill] sm:$0xff] }
 0xba1   : > { %14678 = vst [vmem:[#allocation37_spill] sm:$0xff] %v11929_v34  ;;  %v11934_v23 = vsel %vm3691_vm15, -inf, %v14679_v10  ;;  %7698 = vmatprep.mubr.msk.f32.mxu1 %vm3691_vm15, %v14215_v63  ;;  %v11938_v48 = vsel %vm3690_vm0, -inf, %v14681_v50  ;;  %v3622_v18 = vshll.u32 %v3621_v28, 16  ;;  %v3637_v13 = vcvt.f32.s32 %v11746_v24  ;;  %v14689_v10 = vld [vmem:[#allocation42_spill] sm:$0xff] }
 0xba2   : > { %14680 = vst [vmem:[#allocation36_spill] sm:$0xff] %v11934_v23  ;;  %14682 = vst [vmem:[#allocation38_spill] sm:$0xff] %v11938_v48  ;;  %v3591_v54 = vadd.s32 %v3590_v47, %v3588_v22  ;;  %7699 = vmatmul.mubr.msk.f32.gmra.mrb[36].mxu1 %vm3690_vm0, %v14215_v63  ;;  %v3881_v29 = vmax.f32 %v11938_v48, %v11934_v23  ;;  %v14693_v28 = vld [vmem:[#allocation14_spill] sm:$0xff] }
 0xba3   : > { %v3603_v55 = vpop.xlane.xlu1 %3602 }
 0xba4   : > { %v11947_v44 = vsel %vm3704_vm1, %v3591_v54, %v14683_v45  ;;  %v3604_v49 = vcvt.f32.s32 %v3603_v55  ;;  %3882 = vmax.xlane.f32.xlu1 %v3881_v29  ;;  %vm3693_vm3 = vcmp.eq.s32.totalorder %v8514_v0, %v3591_v54  ;;  %vm3692_vm4 = vcmp.eq.s32.totalorder %v8511_v62, %v3591_v54  ;;  %v14691_v29 = vld [vmem:[#allocation15_spill] sm:$0xff] }
 0xba5   : > { %14684 = vst [vmem:[#allocation40_spill] sm:$0xff] %v11947_v44  ;;  %v11952_v57 = vsel %vm3693_vm3, -inf, %v14685_v20  ;;  %7700 = vmatprep.mubr.msk.f32.mxu1 %vm3693_vm3, %v14215_v63  ;;  %v11956_v47 = vsel %vm3692_vm4, -inf, %v14687_v17  ;;  %v3653_v20 = vcvt.f32.s32 %v11751_v14 }
 0xba6   : > { %14686 = vst [vmem:[#allocation39_spill] sm:$0xff] %v11952_v57  ;;  %14688 = vst [vmem:[#allocation41_spill] sm:$0xff] %v11956_v47  ;;  %v3607_v40 = vadd.s32 %v3606_v56, %v3604_v49  ;;  %7701 = vmatmul.mubr.msk.f32.gmra.mrb[38].mxu1 %vm3692_vm4, %v14215_v63  ;;  %v3884_v39 = vmax.f32 %v11956_v47, %v11952_v57  ;;  %v3638_v49 = vshll.u32 %v3637_v13, 16  ;;  %v14699_v13 = vld [vmem:[#allocation16_spill] sm:$0xff] }
 0xba7   : > { %v3619_v22 = vpop.xlane.xlu0 %3618 }
 0xba8   : > { %v11965_v50 = vsel %vm3704_vm1, %v3607_v40, %v14689_v10  ;;  %v3620_v54 = vcvt.f32.s32 %v3619_v22  ;;  %3885 = vmax.xlane.f32.xlu0 %v3884_v39  ;;  %vm3695_vm5 = vcmp.eq.s32.totalorder %v8514_v0, %v3607_v40  ;;  %vm3694_vm6 = vcmp.eq.s32.totalorder %v8511_v62, %v3607_v40  ;;  %v14695_v39 = vld [vmem:[#allocation43_spill] sm:$0xff] }
 0xba9   : > { %14690 = vst [vmem:[#allocation13_spill] sm:$0xff] %v11965_v50  ;;  %v11970_v56 = vsel %vm3695_vm5, -inf, %v14691_v29  ;;  %7702 = vmatprep.mubr.msk.f32.mxu1 %vm3695_vm5, %v14215_v63  ;;  %v11974_v55 = vsel %vm3694_vm6, -inf, %v14693_v28  ;;  %v3654_v28 = vshll.u32 %v3653_v20, 16  ;;  %v14705_v20 = vld [vmem:[#allocation18_spill] sm:$0xff] }
 0xbaa   : > { %14692 = vst [vmem:[#allocation12_spill] sm:$0xff] %v11970_v56  ;;  %14694 = vst [vmem:[#allocation42_spill] sm:$0xff] %v11974_v55  ;;  %v3623_v24 = vadd.s32 %v3622_v18, %v3620_v54  ;;  %7703 = vmatmul.mubr.msk.f32.gmra.mrb[40].mxu1 %vm3694_vm6, %v14215_v63  ;;  %v3887_v45 = vmax.f32 %v11974_v55, %v11970_v56  ;;  %v14697_v18 = vld [vmem:[#allocation17_spill] sm:$0xff] }
 0xbab   : > { %v3635_v17 = vpop.xlane.xlu1 %3634 }
 0xbac   : > { %v11983_v40 = vsel %vm3704_vm1, %v3623_v24, %v14695_v39  ;;  %v3636_v22 = vcvt.f32.s32 %v3635_v17  ;;  %3888 = vmax.xlane.f32.xlu1 %v3887_v45  ;;  %vm3697_vm2 = vcmp.eq.s32.totalorder %v8514_v0, %v3623_v24  ;;  %vm3696_vm7 = vcmp.eq.s32.totalorder %v8511_v62, %v3623_v24  ;;  %v14701_v39 = vld [vmem:[#allocation44_spill] sm:$0xff] }
 0xbad   : > { %14696 = vst [vmem:[#allocation15_spill] sm:$0xff] %v11983_v40  ;;  %v11988_v10 = vsel %vm3697_vm2, -inf, %v14697_v18  ;;  %7704 = vmatprep.mubr.msk.f32.mxu1 %vm3697_vm2, %v14215_v63  ;;  %v11992_v54 = vsel %vm3696_vm7, -inf, %v14699_v13  ;;  %v3669_v45 = vcvt.f32.s32 %v11756_v27 }
 0xbae   : > { %14698 = vst [vmem:[#allocation14_spill] sm:$0xff] %v11988_v10  ;;  %14700 = vst [vmem:[#allocation43_spill] sm:$0xff] %v11992_v54  ;;  %v3639_v14 = vadd.s32 %v3638_v49, %v3636_v22  ;;  %7705 = vmatmul.mubr.msk.f32.gmra.mrb[42].mxu1 %vm3696_vm7, %v14215_v63  ;;  %v3890_v29 = vmax.f32 %v11992_v54, %v11988_v10  ;;  %v14703_v49 = vld [vmem:[#allocation19_spill] sm:$0xff] }
 0xbaf   : > { %v3651_v17 = vpop.xlane.xlu0 %3650 }
 0xbb0   : > { %v12001_v24 = vsel %vm3704_vm1, %v3639_v14, %v14701_v39  ;;  %v3652_v18 = vcvt.f32.s32 %v3651_v17  ;;  %3891 = vmax.xlane.f32.xlu0 %v3890_v29  ;;  %vm3699_vm8 = vcmp.eq.s32.totalorder %v8514_v0, %v3639_v14  ;;  %vm3698_vm9 = vcmp.eq.s32.totalorder %v8511_v62, %v3639_v14 }
 0xbb1   : > { %14702 = vst [vmem:[#allocation17_spill] sm:$0xff] %v12001_v24  ;;  %v12006_v22 = vsel %vm3699_vm8, -inf, %v14703_v49  ;;  %7706 = vmatprep.mubr.msk.f32.mxu1 %vm3699_vm8, %v14215_v63  ;;  %v12010_v13 = vsel %vm3698_vm9, -inf, %v14705_v20  ;;  %v3670_v17 = vshll.u32 %v3669_v45, 16  ;;  %v14707_v24 = vld [vmem:[#allocation45_spill] sm:$0xff] }
 0xbb2   : > { %14704 = vst [vmem:[#allocation16_spill] sm:$0xff] %v12006_v22  ;;  %14706 = vst [vmem:[#allocation44_spill] sm:$0xff] %v12010_v13  ;;  %v3655_v27 = vadd.s32 %v3654_v28, %v3652_v18  ;;  %7707 = vmatmul.mubr.msk.f32.gmra.mrb[44].mxu1 %vm3698_vm9, %v14215_v63  ;;  %v3893_v39 = vmax.f32 %v12010_v13, %v12006_v22  ;;  %v14709_v20 = vld [vmem:[#allocation21_spill] sm:$0xff]  ;;  %v14711_v18 = vld [vmem:[#allocation20_spill] sm:$0xff] }
 0xbb3   : > { %v3667_v29 = vpop.xlane.xlu1 %3666 }
 0xbb4   : > { %v12018_v14 = vsel %vm3704_vm1, %v3655_v27, %v14707_v24  ;;  %v3668_v49 = vcvt.f32.s32 %v3667_v29  ;;  %3894 = vmax.xlane.f32.xlu1 %v3893_v39  ;;  %vm3701_vm10 = vcmp.eq.s32.totalorder %v8514_v0, %v3655_v27  ;;  %vm3700_vm11 = vcmp.eq.s32.totalorder %v8511_v62, %v3655_v27  ;;  %v14713_v29 = vld [vmem:[#allocation46_spill] sm:$0xff]  ;;  %v14715_v27 = vld [vmem:[#allocation23_spill] sm:$0xff] }
 0xbb5   : > { %14708 = vst [vmem:[#allocation19_spill] sm:$0xff] %v12018_v14  ;;  %v12023_v28 = vsel %vm3701_vm10, -inf, %v14709_v20  ;;  %7708 = vmatprep.mubr.msk.f32.mxu1 %vm3701_vm10, %v14215_v63  ;;  %v12027_v40 = vsel %vm3700_vm11, -inf, %v14711_v18 }
 0xbb6   : > { %14710 = vst [vmem:[#allocation18_spill] sm:$0xff] %v12023_v28  ;;  %14712 = vst [vmem:[#allocation45_spill] sm:$0xff] %v12027_v40  ;;  %v3671_v45 = vadd.s32 %v3670_v17, %v3668_v49  ;;  %7709 = vmatmul.mubr.msk.f32.gmra.mrb[46].mxu1 %vm3700_vm11, %v14215_v63  ;;  %v3896_v24 = vmax.f32 %v12027_v40, %v12023_v28  ;;  %v14717_v17 = vld [vmem:[#allocation22_spill] sm:$0xff] }
 0xbb8   : > { %v12035_v39 = vsel %vm3704_vm1, %v3671_v45, %v14713_v29  ;;  %3897 = vmax.xlane.f32.xlu0 %v3896_v24  ;;  %vm3703_vm12 = vcmp.eq.s32.totalorder %v8514_v0, %v3671_v45  ;;  %vm3702_vm13 = vcmp.eq.s32.totalorder %v8511_v62, %v3671_v45 }
 0xbb9   : > { %14714 = vst [vmem:[#allocation21_spill] sm:$0xff] %v12035_v39  ;;  %v12040_v20 = vsel %vm3703_vm12, -inf, %v14715_v27  ;;  %7710 = vmatprep.mubr.msk.f32.mxu1 %vm3703_vm12, %v14215_v63  ;;  %v12044_v49 = vsel %vm3702_vm13, -inf, %v14717_v17 }
 0xbba   : > { %14716 = vst [vmem:[#allocation20_spill] sm:$0xff] %v12040_v20  ;;  %14718 = vst [vmem:[#allocation46_spill] sm:$0xff] %v12044_v49  ;;  %7711 = vmatmul.mubr.msk.f32.gmra.mrb[48].mxu1 %vm3702_vm13, %v14215_v63  ;;  %v3899_v18 = vmax.f32 %v12044_v49, %v12040_v20 }
 0xbbc   : > { %3900 = vmax.xlane.f32.xlu1 %v3899_v18 }
 0xc0d   : > { %v3856_v29 = vpop.xlane.xlu0 %3855 }
 0xc0e   : > { %vm3902_vm1 = vcmp.eq.f32.partialorder %v11776_v61, %v3856_v29  ;;  %vm3903_vm14 = vcmp.eq.f32.partialorder %v11772_v26, %v3856_v29 }
 0xc0f   : > { %v3934_v45 = vsel %vm3902_vm1, %v8511_v62, 256  ;;  %v3935_v24 = vsel %vm3903_vm14, %v8514_v0, 256 }
 0xc10   : > { %vm3966_vm15 = vcmp.lt.s32.totalorder %v3934_v45, %v3935_v24 }
 0xc11   : > { %v3859_v27 = vpop.xlane.xlu1 %3858  ;;  %v12053_v39 = vsel %vm3966_vm15, %v3934_v45, %v3935_v24 }
 0xc12   : > { %vm3904_vm0 = vcmp.eq.f32.partialorder %v11794_v58, %v3859_v27  ;;  %vm3905_vm3 = vcmp.eq.f32.partialorder %v11790_v4, %v3859_v27  ;;  %v3969_v17 = vshra.s32 %v12053_v39, 16  ;;  %v8020_v4 = vld [vmem:[%s9216_s12 + $0x10] sm:$0xff] }
 0xc13   : > { %v3936_v18 = vsel %vm3904_vm0, %v8511_v62, 256  ;;  %v3937_v14 = vsel %vm3905_vm3, %v8514_v0, 256 }
 0xc14   : > { %vm3982_vm4 = vcmp.lt.s32.totalorder %v3936_v18, %v3937_v14  ;;  %v12060_v29 = vcvt.s32.f32 %v3969_v17 }
 0xc15   : > { %v3862_v50 = vpop.xlane.xlu0 %3861  ;;  %v12062_v44 = vsel %vm3982_vm4, %v3936_v18, %v3937_v14 }
 0xc16   : > { %vm3906_vm5 = vcmp.eq.f32.partialorder %v11812_v25, %v3862_v50  ;;  %vm3907_vm6 = vcmp.eq.f32.partialorder %v11808_v2, %v3862_v50  ;;  %3972 = vmin.xlane.f32.xlu0 %v12060_v29  ;;  %v3985_v45 = vshra.s32 %v12062_v44, 16 }
 0xc17   : > { %v3938_v24 = vsel %vm3906_vm5, %v8511_v62, 256  ;;  %v3939_v27 = vsel %vm3907_vm6, %v8514_v0, 256 }
 0xc18   : > { %vm3998_vm2 = vcmp.lt.s32.totalorder %v3938_v24, %v3939_v27  ;;  %v12070_v34 = vcvt.s32.f32 %v3985_v45 }
 0xc19   : > { %v3865_v17 = vpop.xlane.xlu1 %3864  ;;  %v12072_v1 = vsel %vm3998_vm2, %v3938_v24, %v3939_v27 }
 0xc1a   : > { %vm3908_vm7 = vcmp.eq.f32.partialorder %v11830_v35, %v3865_v17  ;;  %vm3909_vm8 = vcmp.eq.f32.partialorder %v11826_v46, %v3865_v17  ;;  %3988 = vmin.xlane.f32.xlu1 %v12070_v34  ;;  %v4001_v50 = vshra.s32 %v12072_v1, 16 }
 0xc1b   : > { %v3940_v14 = vsel %vm3908_vm7, %v8511_v62, 256  ;;  %v3941_v18 = vsel %vm3909_vm8, %v8514_v0, 256 }
 0xc1c   : > { %vm4014_vm9 = vcmp.lt.s32.totalorder %v3940_v14, %v3941_v18  ;;  %v12080_v36 = vcvt.s32.f32 %v4001_v50 }
 0xc1d   : > { %v3868_v45 = vpop.xlane.xlu0 %3867  ;;  %v12082_v16 = vsel %vm4014_vm9, %v3940_v14, %v3941_v18 }
 0xc1e   : > { %vm3910_vm10 = vcmp.eq.f32.partialorder %v11848_v33, %v3868_v45  ;;  %vm3911_vm11 = vcmp.eq.f32.partialorder %v11844_v41, %v3868_v45  ;;  %4004 = vmin.xlane.f32.xlu0 %v12080_v36  ;;  %v4017_v24 = vshra.s32 %v12082_v16, 16 }
 0xc1f   : > { %v3942_v27 = vsel %vm3910_vm10, %v8511_v62, 256  ;;  %v3943_v17 = vsel %vm3911_vm11, %v8514_v0, 256 }
 0xc20   : > { %vm4030_vm12 = vcmp.lt.s32.totalorder %v3942_v27, %v3943_v17  ;;  %v12090_v21 = vcvt.s32.f32 %v4017_v24 }
 0xc21   : > { %v3871_v50 = vpop.xlane.xlu1 %3870  ;;  %v12092_v15 = vsel %vm4030_vm12, %v3942_v27, %v3943_v17 }
 0xc22   : > { %vm3912_vm13 = vcmp.eq.f32.partialorder %v11866_v52, %v3871_v50  ;;  %vm3913_vm1 = vcmp.eq.f32.partialorder %v11862_v32, %v3871_v50  ;;  %4020 = vmin.xlane.f32.xlu1 %v12090_v21  ;;  %v4033_v14 = vshra.s32 %v12092_v15, 16 }
 0xc23   : > { %v3944_v18 = vsel %vm3912_vm13, %v8511_v62, 256  ;;  %v3945_v45 = vsel %vm3913_vm1, %v8514_v0, 256 }
 0xc24   : > { %vm4046_vm14 = vcmp.lt.s32.totalorder %v3944_v18, %v3945_v45  ;;  %v12100_v33 = vcvt.s32.f32 %v4033_v14 }
 0xc25   : > { %v3874_v24 = vpop.xlane.xlu0 %3873  ;;  %v12102_v41 = vsel %vm4046_vm14, %v3944_v18, %v3945_v45 }
 0xc26   : > { %vm3914_vm15 = vcmp.eq.f32.partialorder %v11884_v31, %v3874_v24  ;;  %vm3915_vm0 = vcmp.eq.f32.partialorder %v11880_v43, %v3874_v24  ;;  %4036 = vmin.xlane.f32.xlu0 %v12100_v33  ;;  %v4049_v27 = vshra.s32 %v12102_v41, 16 }
 0xc27   : > { %v3946_v17 = vsel %vm3914_vm15, %v8511_v62, 256  ;;  %v3947_v50 = vsel %vm3915_vm0, %v8514_v0, 256 }
 0xc28   : > { %vm4062_vm3 = vcmp.lt.s32.totalorder %v3946_v17, %v3947_v50  ;;  %v12110_v52 = vcvt.s32.f32 %v4049_v27 }
 0xc29   : > { %v3877_v14 = vpop.xlane.xlu1 %3876  ;;  %v12112_v32 = vsel %vm4062_vm3, %v3946_v17, %v3947_v50 }
 0xc2a   : > { %vm3916_vm4 = vcmp.eq.f32.partialorder %v11902_v38, %v3877_v14  ;;  %vm3917_vm5 = vcmp.eq.f32.partialorder %v11898_v37, %v3877_v14  ;;  %4052 = vmin.xlane.f32.xlu1 %v12110_v52  ;;  %v4065_v18 = vshra.s32 %v12112_v32, 16 }
 0xc2b   : > { %v3948_v45 = vsel %vm3916_vm4, %v8511_v62, 256  ;;  %v3949_v24 = vsel %vm3917_vm5, %v8514_v0, 256 }
 0xc2c   : > { %vm4078_vm6 = vcmp.lt.s32.totalorder %v3948_v45, %v3949_v24  ;;  %v12120_v31 = vcvt.s32.f32 %v4065_v18 }
 0xc2d   : > { %v3880_v27 = vpop.xlane.xlu0 %3879  ;;  %v12122_v43 = vsel %vm4078_vm6, %v3948_v45, %v3949_v24 }
 0xc2e   : > { %vm3918_vm2 = vcmp.eq.f32.partialorder %v11920_v11, %v3880_v27  ;;  %vm3919_vm7 = vcmp.eq.f32.partialorder %v11916_v9, %v3880_v27  ;;  %4068 = vmin.xlane.f32.xlu0 %v12120_v31  ;;  %v4081_v17 = vshra.s32 %v12122_v43, 16 }
 0xc2f   : > { %v3950_v50 = vsel %vm3918_vm2, %v8511_v62, 256  ;;  %v3951_v14 = vsel %vm3919_vm7, %v8514_v0, 256 }
 0xc30   : > { %vm4094_vm8 = vcmp.lt.s32.totalorder %v3950_v50, %v3951_v14  ;;  %v12130_v38 = vcvt.s32.f32 %v4081_v17 }
 0xc31   : > { %v3883_v18 = vpop.xlane.xlu1 %3882  ;;  %v12132_v37 = vsel %vm4094_vm8, %v3950_v50, %v3951_v14 }
 0xc32   : > { %vm3920_vm9 = vcmp.eq.f32.partialorder %v11938_v48, %v3883_v18  ;;  %vm3921_vm10 = vcmp.eq.f32.partialorder %v11934_v23, %v3883_v18  ;;  %4084 = vmin.xlane.f32.xlu1 %v12130_v38  ;;  %v4097_v45 = vshra.s32 %v12132_v37, 16 }
 0xc33   : > { %v3952_v24 = vsel %vm3920_vm9, %v8511_v62, 256  ;;  %v3953_v27 = vsel %vm3921_vm10, %v8514_v0, 256 }
 0xc34   : > { %vm4110_vm11 = vcmp.lt.s32.totalorder %v3952_v24, %v3953_v27  ;;  %v12140_v11 = vcvt.s32.f32 %v4097_v45 }
 0xc35   : > { %v3886_v17 = vpop.xlane.xlu0 %3885  ;;  %v12142_v9 = vsel %vm4110_vm11, %v3952_v24, %v3953_v27 }
 0xc36   : > { %vm3922_vm12 = vcmp.eq.f32.partialorder %v11956_v47, %v3886_v17  ;;  %vm3923_vm13 = vcmp.eq.f32.partialorder %v11952_v57, %v3886_v17  ;;  %4100 = vmin.xlane.f32.xlu0 %v12140_v11  ;;  %v4113_v50 = vshra.s32 %v12142_v9, 16 }
 0xc37   : > { %v3954_v14 = vsel %vm3922_vm12, %v8511_v62, 256  ;;  %v3955_v18 = vsel %vm3923_vm13, %v8514_v0, 256 }
 0xc38   : > { %vm4126_vm1 = vcmp.lt.s32.totalorder %v3954_v14, %v3955_v18  ;;  %v12150_v48 = vcvt.s32.f32 %v4113_v50 }
 0xc39   : > { %v3889_v45 = vpop.xlane.xlu1 %3888  ;;  %v12152_v23 = vsel %vm4126_vm1, %v3954_v14, %v3955_v18 }
 0xc3a   : > { %vm3924_vm14 = vcmp.eq.f32.partialorder %v11974_v55, %v3889_v45  ;;  %vm3925_vm15 = vcmp.eq.f32.partialorder %v11970_v56, %v3889_v45  ;;  %4116 = vmin.xlane.f32.xlu1 %v12150_v48  ;;  %v4129_v24 = vshra.s32 %v12152_v23, 16 }
 0xc3b   : > { %v3956_v27 = vsel %vm3924_vm14, %v8511_v62, 256  ;;  %v3957_v17 = vsel %vm3925_vm15, %v8514_v0, 256 }
 0xc3c   : > { %vm4142_vm0 = vcmp.lt.s32.totalorder %v3956_v27, %v3957_v17  ;;  %v12160_v47 = vcvt.s32.f32 %v4129_v24 }
 0xc3d   : > { %v3892_v50 = vpop.xlane.xlu0 %3891  ;;  %v12162_v57 = vsel %vm4142_vm0, %v3956_v27, %v3957_v17 }
 0xc3e   : > { %vm3926_vm3 = vcmp.eq.f32.partialorder %v11992_v54, %v3892_v50  ;;  %vm3927_vm4 = vcmp.eq.f32.partialorder %v11988_v10, %v3892_v50  ;;  %4132 = vmin.xlane.f32.xlu0 %v12160_v47  ;;  %v4145_v14 = vshra.s32 %v12162_v57, 16 }
 0xc3f   : > { %v3958_v18 = vsel %vm3926_vm3, %v8511_v62, 256  ;;  %v3959_v45 = vsel %vm3927_vm4, %v8514_v0, 256 }
 0xc40   : > { %vm4158_vm5 = vcmp.lt.s32.totalorder %v3958_v18, %v3959_v45  ;;  %v12170_v55 = vcvt.s32.f32 %v4145_v14 }
 0xc41   : > { %v3895_v24 = vpop.xlane.xlu1 %3894  ;;  %v12172_v56 = vsel %vm4158_vm5, %v3958_v18, %v3959_v45 }
 0xc42   : > { %vm3928_vm6 = vcmp.eq.f32.partialorder %v12010_v13, %v3895_v24  ;;  %vm3929_vm2 = vcmp.eq.f32.partialorder %v12006_v22, %v3895_v24  ;;  %4148 = vmin.xlane.f32.xlu1 %v12170_v55  ;;  %v4161_v27 = vshra.s32 %v12172_v56, 16 }
 0xc43   : > { %v3960_v17 = vsel %vm3928_vm6, %v8511_v62, 256  ;;  %v3961_v50 = vsel %vm3929_vm2, %v8514_v0, 256 }
 0xc44   : > { %vm4174_vm7 = vcmp.lt.s32.totalorder %v3960_v17, %v3961_v50  ;;  %v12180_v54 = vcvt.s32.f32 %v4161_v27 }
 0xc45   : > { %v3898_v14 = vpop.xlane.xlu0 %3897  ;;  %v12182_v10 = vsel %vm4174_vm7, %v3960_v17, %v3961_v50 }
 0xc46   : > { %vm3930_vm8 = vcmp.eq.f32.partialorder %v12027_v40, %v3898_v14  ;;  %vm3931_vm9 = vcmp.eq.f32.partialorder %v12023_v28, %v3898_v14  ;;  %4164 = vmin.xlane.f32.xlu0 %v12180_v54  ;;  %v4177_v18 = vshra.s32 %v12182_v10, 16 }
 0xc47   : > { %v3962_v45 = vsel %vm3930_vm8, %v8511_v62, 256  ;;  %v3963_v24 = vsel %vm3931_vm9, %v8514_v0, 256 }
 0xc48   : > { %vm4190_vm10 = vcmp.lt.s32.totalorder %v3962_v45, %v3963_v24  ;;  %v12190_v13 = vcvt.s32.f32 %v4177_v18 }
 0xc49   : > { %v3901_v27 = vpop.xlane.xlu1 %3900  ;;  %v12192_v22 = vsel %vm4190_vm10, %v3962_v45, %v3963_v24 }
 0xc4a   : > { %vm3932_vm11 = vcmp.eq.f32.partialorder %v12044_v49, %v3901_v27  ;;  %vm3933_vm12 = vcmp.eq.f32.partialorder %v12040_v20, %v3901_v27  ;;  %4180 = vmin.xlane.f32.xlu1 %v12190_v13  ;;  %v4193_v17 = vshra.s32 %v12192_v22, 16  ;;  %v8018_v49 = vld [vmem:[%s9216_s12] sm:$0xff] }
 0xc4b   : > { %v3964_v50 = vsel %vm3932_vm11, %v8511_v62, 256  ;;  %v3965_v14 = vsel %vm3933_vm12, %v8514_v0, 256 }
 0xc4c   : > { %vm4206_vm13 = vcmp.lt.s32.totalorder %v3964_v50, %v3965_v14  ;;  %v12200_v18 = vcvt.s32.f32 %v4193_v17  ;;  %v14719_v17 = vld [vmem:[#allocation47_spill] sm:$0xff] }
 0xc4d   : > { %v12202_v40 = vsel %vm4206_vm13, %v3964_v50, %v3965_v14  ;;  %v8019_v50 = vld [vmem:[%s9216_s12 + $0x8] sm:$0xff] }
 0xc4e   : > { %4196 = vmin.xlane.f32.xlu0 %v12200_v18  ;;  %v4209_v45 = vshra.s32 %v12202_v40, 16 }
 0xc50   : > { %v12206_v24 = vcvt.s32.f32 %v4209_v45  ;;  %v14721_v45 = vld [vmem:[#allocation25_spill] sm:$0xff] }
 0xc51   : > { %v6274_v27 = vpop.f32.mrb[18].mxu1 }
 0xc52   : > { %v6833_v20 = vadd.f32 %v8018_v49, %v6274_v27  ;;  %v6276_v28 = vpop.f32.mrb[19].mxu1  ;;  %4212 = vmin.xlane.f32.xlu1 %v12206_v24 }
 0xc54   : > { %v6849_v35 = vmax.f32 %v6833_v20, 0.0 }
 0xc55   : > { %v6279_v46 = vpop.f32.mrb[20].mxu1 }
 0xc56   : > { %v12211_v3 = vadd.f32 %v6849_v35, %v14719_v17  ;;  %v6834_v14 = vadd.f32 %v8019_v50, %v6279_v46  ;;  %v6281_v25 = vpop.f32.mrb[21].mxu1  ;;  %v8021_v35 = vld [vmem:[%s9216_s12 + $0x18] sm:$0xff] }
 0xc58   : > { %14720 = vst [vmem:[#allocation23_spill] sm:$0xff] %v12211_v3  ;;  %v6850_v2 = vmax.f32 %v6834_v14, 0.0 }
 0xc59   : > { %v6284_v12 = vpop.f32.mrb[22].mxu1 }
 0xc5a   : > { %v12215_v58 = vadd.f32 %v6850_v2, %v14721_v45  ;;  %v6835_v49 = vadd.f32 %v8020_v4, %v6284_v12  ;;  %v6286_v28 = vpop.f32.mrb[23].mxu1  ;;  %v8022_v2 = vld [vmem:[%s9216_s12 + $0x20] sm:$0xff] }
 0xc5c   : > { %v6851_v27 = vmax.f32 %v6835_v49, 0.0  ;;  %v14723_v49 = vld [vmem:[#allocation24_spill] sm:$0xff] }
 0xc5d   : > { %v6289_v59 = vpop.f32.mrb[24].mxu1 }
 0xc5e   : > { %v12219_v20 = vadd.f32 %v6851_v27, %v11626_v19  ;;  %v6836_v17 = vadd.f32 %v8021_v35, %v6289_v59  ;;  %v6291_v3 = vpop.f32.mrb[25].mxu1  ;;  %v8023_v19 = vld [vmem:[%s9216_s12 + $0x28] sm:$0xff] }
 0xc60   : > { %14722 = vst [vmem:[#allocation22_spill] sm:$0xff] %v12219_v20  ;;  %v6852_v25 = vmax.f32 %v6836_v17, 0.0 }
 0xc61   : > { %v6294_v46 = vpop.f32.mrb[26].mxu1 }
 0xc62   : > { %v12223_v50 = vadd.f32 %v6852_v25, %v11630_v6  ;;  %v6837_v14 = vadd.f32 %v8022_v2, %v6294_v46  ;;  %v6296_v45 = vpop.f32.mrb[27].mxu1  ;;  %v8024_v6 = vld [vmem:[%s9216_s12 + $0x30] sm:$0xff] }
 0xc64   : > { %v6853_v4 = vmax.f32 %v6837_v14, 0.0  ;;  %v14726_v14 = vld [vmem:[#allocation48_spill] sm:$0xff] }
 0xc65   : > { %v6299_v12 = vpop.f32.mrb[28].mxu1 }
 0xc66   : > { %v12227_v28 = vadd.f32 %v6853_v4, %v14723_v49  ;;  %v6838_v27 = vadd.f32 %v8023_v19, %v6299_v12  ;;  %v6301_v20 = vpop.f32.mrb[29].mxu1  ;;  %v8025_v4 = vld [vmem:[%s9216_s12 + $0x38] sm:$0xff]  ;;  %v14727_v19 = vld [vmem:[#allocation49_spill] sm:$0xff] }
 0xc68   : > { %14724 = vst [vmem:[#allocation47_spill] sm:$0xff] %v12227_v28  ;;  %v6854_v59 = vmax.f32 %v6838_v27, 0.0 }
 0xc69   : > { %v6304_v3 = vpop.f32.mrb[30].mxu1 }
 0xc6a   : > { %v12231_v35 = vadd.f32 %v6854_v59, %v11638_v60  ;;  %v6839_v17 = vadd.f32 %v8024_v6, %v6304_v3  ;;  %v6306_v25 = vpop.f32.mrb[31].mxu1  ;;  %v8026_v60 = vld [vmem:[%s9216_s12 + $0x40] sm:$0xff] }
 0xc6b   : > { %v8027_v25 = vld [vmem:[%s9216_s12 + $0x48] sm:$0xff] }
 0xc6c   : > { %14725 = vst [vmem:[#allocation25_spill] sm:$0xff] %v12231_v35  ;;  %v6855_v46 = vmax.f32 %v6839_v17, 0.0 }
 0xc6d   : > { %v6309_v2 = vpop.f32.mrb[32].mxu1 }
 0xc6e   : > { %v12235_v45 = vadd.f32 %v6855_v46, %v14726_v14  ;;  %v6840_v49 = vadd.f32 %v8025_v4, %v6309_v2  ;;  %v6311_v28 = vpop.f32.mrb[33].mxu1  ;;  %v14729_v4 = vld [vmem:[#allocation50_spill] sm:$0xff] }
 0xc70   : > { %v6856_v20 = vmax.f32 %v6840_v49, 0.0 }
 0xc71   : > { %v6314_v12 = vpop.f32.mrb[34].mxu1 }
 0xc72   : > { %v12239_v27 = vadd.f32 %v6856_v20, %v14727_v19  ;;  %v6841_v59 = vadd.f32 %v8026_v60, %v6314_v12  ;;  %v6316_v35 = vpop.f32.mrb[35].mxu1  ;;  %v8028_v20 = vld [vmem:[%s9216_s12 + $0x50] sm:$0xff] }
 0xc74   : > { %14728 = vst [vmem:[#allocation24_spill] sm:$0xff] %v12239_v27  ;;  %v6857_v3 = vmax.f32 %v6841_v59, 0.0 }
 0xc75   : > { %v6319_v6 = vpop.f32.mrb[36].mxu1 }
 0xc76   : > { %v12243_v17 = vadd.f32 %v6857_v3, %v11650_v53  ;;  %v6842_v46 = vadd.f32 %v8027_v25, %v6319_v6  ;;  %v6321_v14 = vpop.f32.mrb[37].mxu1  ;;  %v8029_v53 = vld [vmem:[%s9216_s12 + $0x58] sm:$0xff] }
 0xc78   : > { %v6858_v28 = vmax.f32 %v6842_v46, 0.0  ;;  %v14731_v46 = vld [vmem:[#allocation51_spill] sm:$0xff] }
 0xc79   : > { %v6324_v2 = vpop.f32.mrb[38].mxu1 }
 0xc7a   : > { %v12247_v49 = vadd.f32 %v6858_v28, %v14729_v4  ;;  %v6843_v19 = vadd.f32 %v8028_v20, %v6324_v2  ;;  %v6326_v27 = vpop.f32.mrb[39].mxu1  ;;  %v8030_v28 = vld [vmem:[%s9216_s12 + $0x60] sm:$0xff] }
 0xc7c   : > { %14730 = vst [vmem:[#allocation48_spill] sm:$0xff] %v12247_v49  ;;  %v6859_v35 = vmax.f32 %v6843_v19, 0.0 }
 0xc7d   : > { %v6329_v12 = vpop.f32.mrb[40].mxu1 }
 0xc7e   : > { %v12251_v60 = vadd.f32 %v6859_v35, %v11658_v30  ;;  %v6844_v59 = vadd.f32 %v8029_v53, %v6329_v12  ;;  %v6331_v3 = vpop.f32.mrb[41].mxu1  ;;  %v8031_v30 = vld [vmem:[%s9216_s12 + $0x68] sm:$0xff] }
 0xc7f   : > { %v8032_v3 = vld [vmem:[%s9216_s12 + $0x70] sm:$0xff] }
 0xc80   : > { %v6860_v6 = vmax.f32 %v6844_v59, 0.0 }
 0xc81   : > { %v6334_v25 = vpop.f32.mrb[42].mxu1 }
 0xc82   : > { %v12255_v14 = vadd.f32 %v6860_v6, %v14731_v46  ;;  %v6845_v4 = vadd.f32 %v8030_v28, %v6334_v25  ;;  %v6336_v49 = vpop.f32.mrb[43].mxu1  ;;  %v8033_v28 = vld [vmem:[%s9216_s12 + $0x78] sm:$0xff] }
 0xc84   : > { %14732 = vst [vmem:[#allocation49_spill] sm:$0xff] %v12255_v14  ;;  %v6861_v27 = vmax.f32 %v6845_v4, 0.0 }
 0xc85   : > { %v6339_v2 = vpop.f32.mrb[44].mxu1 }
 0xc86   : > { %v12259_v20 = vadd.f32 %v6861_v27, %v11666_v42  ;;  %v6846_v19 = vadd.f32 %v8031_v30, %v6339_v2  ;;  %v6341_v35 = vpop.f32.mrb[45].mxu1  ;;  %v3968_v30 = vand.u32 65535, %v12053_v39 }
 0xc87   : > { %v3984_v35 = vand.u32 65535, %v12062_v44  ;;  %v4016_v44 = vand.u32 65535, %v12082_v16  ;;  %v4048_v16 = vand.u32 65535, %v12102_v41  ;;  %v4080_v41 = vand.u32 65535, %v12122_v43 }
 0xc88   : > { %v6862_v12 = vmax.f32 %v6846_v19, 0.0  ;;  %v4112_v43 = vand.u32 65535, %v12142_v9  ;;  %v4144_v9 = vand.u32 65535, %v12162_v57  ;;  %v4176_v57 = vand.u32 65535, %v12182_v10 }
 0xc89   : > { %v6344_v53 = vpop.f32.mrb[46].mxu1  ;;  %v4208_v10 = vand.u32 65535, %v12202_v40 }
 0xc8a   : > { %v12263_v59 = vadd.f32 %v6862_v12, %v11670_v5  ;;  %v6847_v6 = vadd.f32 %v8032_v3, %v6344_v53  ;;  %v6346_v46 = vpop.f32.mrb[47].mxu1  ;;  %v3970_v5 = vcvt.s32.f32 %v3968_v30  ;;  %v4000_v53 = vand.u32 65535, %v12072_v1 }
 0xc8b   : > { %v4018_v46 = vcvt.s32.f32 %v4016_v44  ;;  %v4032_v1 = vand.u32 65535, %v12092_v15  ;;  %v4064_v15 = vand.u32 65535, %v12112_v32  ;;  %v4096_v32 = vand.u32 65535, %v12132_v37 }
 0xc8c   : > { %v6863_v14 = vmax.f32 %v6847_v6, 0.0  ;;  %v4002_v3 = vcvt.s32.f32 %v4000_v53  ;;  %v4128_v37 = vand.u32 65535, %v12152_v23  ;;  %v4160_v23 = vand.u32 65535, %v12172_v56 }
 0xc8d   : > { %v6349_v25 = vpop.f32.mrb[48].mxu1  ;;  %v4066_v30 = vcvt.s32.f32 %v4064_v15  ;;  %v4192_v56 = vand.u32 65535, %v12192_v22 }
 0xc8e   : > { %v12267_v49 = vadd.f32 %v6863_v14, %v11674_v51  ;;  %v6848_v4 = vadd.f32 %v8033_v28, %v6349_v25  ;;  %v6351_v42 = vpop.f32.mrb[49].mxu1  ;;  %v3986_v14 = vcvt.s32.f32 %v3984_v35  ;;  %v4034_v28 = vcvt.s32.f32 %v4032_v1 }
 0xc8f   : > { %v4050_v42 = vcvt.s32.f32 %v4048_v16  ;;  %v4082_v35 = vcvt.s32.f32 %v4080_v41  ;;  %v4130_v44 = vcvt.s32.f32 %v4128_v37  ;;  %v4178_v16 = vcvt.s32.f32 %v4176_v57  ;;  %v14733_v37 = vld [vmem:[#allocation52_spill] sm:$0xff]  ;;  %v14739_v57 = vld [vmem:[#allocation55_spill] sm:$0xff] }
 0xc90   : > { %v6864_v27 = vmax.f32 %v6848_v4, 0.0 }
 0xc92   : > { %v12271_v2 = vadd.f32 %v6864_v27, %v11678_v7 }
 0xca3   : > { %v12274_v19 = vpop.xlane.xlu0 %3972 }
 0xca4   : > { %vm3974_vm1 = vcmp.eq.f32.partialorder %v12060_v29, %v12274_v19 }
 0xca5   : > { %v3975_v12 = vsel %vm3974_vm1, %v3970_v5, inf  ;;  %vm4254_vm1 = vcmp.eq.s32.totalorder %v8511_v62, 6 }
 0xca6   : > { %3976 = vmin.xlane.f32.xlu0 %v3975_v12 }
 0xca7   : > { %v12279_v51 = vpop.xlane.xlu1 %3988 }
 0xca8   : > { %vm3990_vm14 = vcmp.eq.f32.partialorder %v12070_v34, %v12279_v51 }
 0xca9   : > { %v3991_v7 = vsel %vm3990_vm14, %v3986_v14, inf  ;;  %v4098_v14 = vcvt.s32.f32 %v4096_v32 }
 0xcaa   : > { %3992 = vmin.xlane.f32.xlu1 %v3991_v7  ;;  %v4114_v7 = vcvt.s32.f32 %v4112_v43 }
 0xcab   : > { %v12284_v39 = vpop.xlane.xlu0 %4004 }
 0xcac   : > { %vm4006_vm15 = vcmp.eq.f32.partialorder %v12080_v36, %v12284_v39  ;;  %v4011_v32 = vcvt.f32.s32 %v12284_v39 }
 0xcad   : > { %v4007_v29 = vsel %vm4006_vm15, %v4002_v3, inf }
 0xcae   : > { %4008 = vmin.xlane.f32.xlu0 %v4007_v29  ;;  %v4012_v43 = vshll.u32 %v4011_v32, 16 }
 0xcaf   : > { %v12289_v6 = vpop.xlane.xlu1 %4020 }
 0xcb0   : > { %vm4022_vm0 = vcmp.eq.f32.partialorder %v12090_v21, %v12289_v6 }
 0xcb1   : > { %v4023_v34 = vsel %vm4022_vm0, %v4018_v46, inf  ;;  %v4146_v46 = vcvt.s32.f32 %v4144_v9  ;;  %v14737_v9 = vld [vmem:[#allocation54_spill] sm:$0xff] }
 0xcb2   : > { %4024 = vmin.xlane.f32.xlu1 %v4023_v34  ;;  %v4162_v34 = vcvt.s32.f32 %v4160_v23 }
 0xcb3   : > { %v12294_v25 = vpop.xlane.xlu0 %4036 }
 0xcb4   : > { %vm4038_vm3 = vcmp.eq.f32.partialorder %v12100_v33, %v12294_v25 }
 0xcb5   : > { %v4039_v36 = vsel %vm4038_vm3, %v4034_v28, inf }
 0xcb6   : > { %4040 = vmin.xlane.f32.xlu0 %v4039_v36 }
 0xcb7   : > { %v12299_v4 = vpop.xlane.xlu1 %4052 }
 0xcb8   : > { %vm4054_vm4 = vcmp.eq.f32.partialorder %v12110_v52, %v12299_v4 }
 0xcb9   : > { %v4055_v21 = vsel %vm4054_vm4, %v4050_v42, inf  ;;  %v4194_v42 = vcvt.s32.f32 %v4192_v56  ;;  %v14741_v56 = vld [vmem:[#allocation56_spill] sm:$0xff] }
 0xcba   : > { %4056 = vmin.xlane.f32.xlu1 %v4055_v21  ;;  %v4210_v21 = vcvt.s32.f32 %v4208_v10 }
 0xcbb   : > { %v12304_v27 = vpop.xlane.xlu0 %4068 }
 0xcbc   : > { %vm4070_vm5 = vcmp.eq.f32.partialorder %v12120_v31, %v12304_v27 }
 0xcbd   : > { %v4071_v33 = vsel %vm4070_vm5, %v4066_v30, inf  ;;  %v3995_v30 = vcvt.f32.s32 %v12279_v51 }
 0xcbe   : > { %4072 = vmin.xlane.f32.xlu0 %v4071_v33 }
 0xcbf   : > { %v12309_v5 = vpop.xlane.xlu1 %4084 }
 0xcc0   : > { %vm4086_vm6 = vcmp.eq.f32.partialorder %v12130_v38, %v12309_v5 }
 0xcc1   : > { %v4087_v52 = vsel %vm4086_vm6, %v4082_v35, inf  ;;  %v3996_v35 = vshll.u32 %v3995_v30, 16  ;;  %v14745_v30 = vld [vmem:[#allocation58_spill] sm:$0xff] }
 0xcc2   : > { %4088 = vmin.xlane.f32.xlu1 %v4087_v52 }
 0xcc3   : > { %v12314_v12 = vpop.xlane.xlu0 %4100 }
 0xcc4   : > { %vm4102_vm2 = vcmp.eq.f32.partialorder %v12140_v11, %v12314_v12 }
 0xcc5   : > { %v4103_v31 = vsel %vm4102_vm2, %v4098_v14, inf }
 0xcc6   : > { %4104 = vmin.xlane.f32.xlu0 %v4103_v31  ;;  %v4027_v31 = vcvt.f32.s32 %v12289_v6 }
 0xcc7   : > { %v12319_v53 = vpop.xlane.xlu1 %4116 }
 0xcc8   : > { %vm4118_vm7 = vcmp.eq.f32.partialorder %v12150_v48, %v12319_v53  ;;  %v4028_v23 = vshll.u32 %v4027_v31, 16 }
 0xcc9   : > { %v4119_v38 = vsel %vm4118_vm7, %v4114_v7, inf }
 0xcca   : > { %4120 = vmin.xlane.f32.xlu1 %v4119_v38 }
 0xccb   : > { %v12324_v3 = vpop.xlane.xlu0 %4132 }
 0xccc   : > { %vm4134_vm8 = vcmp.eq.f32.partialorder %v12160_v47, %v12324_v3 }
 0xccd   : > { %v4135_v11 = vsel %vm4134_vm8, %v4130_v44, inf }
 0xcce   : > { %4136 = vmin.xlane.f32.xlu0 %v4135_v11 }
 0xccf   : > { %v12329_v29 = vpop.xlane.xlu1 %4148 }
 0xcd0   : > { %vm4150_vm9 = vcmp.eq.f32.partialorder %v12170_v55, %v12329_v29 }
 0xcd1   : > { %v4151_v48 = vsel %vm4150_vm9, %v4146_v46, inf }
 0xcd2   : > { %4152 = vmin.xlane.f32.xlu1 %v4151_v48  ;;  %v4043_v48 = vcvt.f32.s32 %v12294_v25 }
 0xcd3   : > { %v12334_v1 = vpop.xlane.xlu0 %4164 }
 0xcd4   : > { %vm4166_vm10 = vcmp.eq.f32.partialorder %v12180_v54, %v12334_v1 }
 0xcd5   : > { %v4167_v47 = vsel %vm4166_vm10, %v4162_v34, inf }
 0xcd6   : > { %4168 = vmin.xlane.f32.xlu0 %v4167_v47 }
 0xcd7   : > { %v12339_v28 = vpop.xlane.xlu1 %4180 }
 0xcd8   : > { %vm4182_vm11 = vcmp.eq.f32.partialorder %v12190_v13, %v12339_v28  ;;  %v3979_v13 = vcvt.f32.s32 %v12274_v19 }
 0xcd9   : > { %v4183_v55 = vsel %vm4182_vm11, %v4178_v16, inf }
 0xcda   : > { %4184 = vmin.xlane.f32.xlu1 %v4183_v55  ;;  %v3980_v33 = vshll.u32 %v3979_v13, 16 }
 0xcdb   : > { %v12344_v36 = vpop.xlane.xlu0 %4196 }
 0xcdc   : > { %vm4198_vm12 = vcmp.eq.f32.partialorder %v12200_v18, %v12344_v36 }
 0xcdd   : > { %v4199_v54 = vsel %vm4198_vm12, %v4194_v42, inf  ;;  %v14743_v42 = vld [vmem:[#allocation57_spill] sm:$0xff] }
 0xcde   : > { %4200 = vmin.xlane.f32.xlu0 %v4199_v54 }
 0xcdf   : > { %v12349_v15 = vpop.xlane.xlu1 %4212 }
 0xce0   : > { %vm4214_vm13 = vcmp.eq.f32.partialorder %v12206_v24, %v12349_v15 }
 0xce1   : > { %v4215_v22 = vsel %vm4214_vm13, %v4210_v21, inf  ;;  %v4044_v21 = vshll.u32 %v4043_v48, 16 }
 0xce2   : > { %4216 = vmin.xlane.f32.xlu1 %v4215_v22  ;;  %v4059_v22 = vcvt.f32.s32 %v12299_v4 }
 0xd33   : > { %v3977_v41 = vpop.xlane.xlu0 %3976 }
 0xd34   : > { %v3978_v40 = vcvt.f32.s32 %v3977_v41 }
 0xd36   : > { %v3981_v18 = vadd.s32 %v3980_v33, %v3978_v40  ;;  %v14747_v40 = vld [vmem:[#allocation59_spill] sm:$0xff] }
 0xd37   : > { %v3993_v52 = vpop.xlane.xlu1 %3992 }
 0xd38   : > { %v12360_v24 = vsel %vm4254_vm1, %v3981_v18, %v11767_v8  ;;  %v3994_v14 = vcvt.f32.s32 %v3993_v52  ;;  %vm4223_vm14 = vcmp.eq.s32.totalorder %v8514_v0, %v3981_v18  ;;  %vm4222_vm15 = vcmp.eq.s32.totalorder %v8511_v62, %v3981_v18 }
 0xd39   : > { %v12365_v19 = vsel %vm4223_vm14, -inf, %v11772_v26  ;;  %7712 = vmatprep.mubr.msk.f32.mxu1 %vm4223_vm14, %v14215_v63  ;;  %v12369_v51 = vsel %vm4222_vm15, -inf, %v11776_v61  ;;  %v14735_v61 = vld [vmem:[#allocation53_spill] sm:$0xff] }
 0xd3a   : > { %v3997_v39 = vadd.s32 %v3996_v35, %v3994_v14  ;;  %7713 = vmatmul.mubr.msk.f32.gmra.mrb[50].mxu1 %vm4222_vm15, %v14215_v63  ;;  %v4404_v8 = vmax.f32 %v12369_v51, %v12365_v19  ;;  %v14749_v35 = vld [vmem:[#allocation60_spill] sm:$0xff]  ;;  %v4060_v14 = vshll.u32 %v4059_v22, 16 }
 0xd3b   : > { %v4009_v7 = vpop.xlane.xlu0 %4008 }
 0xd3c   : > { %v12378_v26 = vsel %vm4254_vm1, %v3997_v39, %v14733_v37  ;;  %v4010_v38 = vcvt.f32.s32 %v4009_v7  ;;  %4405 = vmax.xlane.f32.xlu0 %v4404_v8  ;;  %vm4225_vm0 = vcmp.eq.s32.totalorder %v8514_v0, %v3997_v39  ;;  %vm4224_vm3 = vcmp.eq.s32.totalorder %v8511_v62, %v3997_v39  ;;  %v14753_v37 = vld [vmem:[#allocation62_spill] sm:$0xff] }
 0xd3d   : > { %14734 = vst [vmem:[#allocation50_spill] sm:$0xff] %v12378_v26  ;;  %v12383_v44 = vsel %vm4225_vm0, -inf, %v14735_v61  ;;  %7714 = vmatprep.mubr.msk.f32.mxu1 %vm4225_vm0, %v14215_v63  ;;  %v12387_v11 = vsel %vm4224_vm3, -inf, %v14737_v9  ;;  %v4075_v39 = vcvt.f32.s32 %v12304_v27  ;;  %v14755_v61 = vld [vmem:[#allocation63_spill] sm:$0xff] }
 0xd3e   : > { %14736 = vst [vmem:[#allocation51_spill] sm:$0xff] %v12383_v44  ;;  %14738 = vst [vmem:[#allocation52_spill] sm:$0xff] %v12387_v11  ;;  %v4013_v6 = vadd.s32 %v4012_v43, %v4010_v38  ;;  %7715 = vmatmul.mubr.msk.f32.gmra.mrb[52].mxu1 %vm4224_vm3, %v14215_v63  ;;  %v4407_v46 = vmax.f32 %v12387_v11, %v12383_v44  ;;  %v14751_v43 = vld [vmem:[#allocation61_spill] sm:$0xff] }
 0xd3f   : > { %v4025_v34 = vpop.xlane.xlu1 %4024 }
 0xd40   : > { %v12396_v47 = vsel %vm4254_vm1, %v4013_v6, %v14739_v57  ;;  %v4026_v16 = vcvt.f32.s32 %v4025_v34  ;;  %4408 = vmax.xlane.f32.xlu1 %v4407_v46  ;;  %vm4227_vm4 = vcmp.eq.s32.totalorder %v8514_v0, %v4013_v6  ;;  %vm4226_vm5 = vcmp.eq.s32.totalorder %v8511_v62, %v4013_v6  ;;  %v14757_v34 = vld [vmem:[#allocation64_spill] sm:$0xff] }
 0xd41   : > { %14740 = vst [vmem:[#allocation53_spill] sm:$0xff] %v12396_v47  ;;  %v12401_v55 = vsel %vm4227_vm4, -inf, %v14741_v56  ;;  %7716 = vmatprep.mubr.msk.f32.mxu1 %vm4227_vm4, %v14215_v63  ;;  %v12405_v10 = vsel %vm4226_vm5, -inf, %v14743_v42  ;;  %v4076_v46 = vshll.u32 %v4075_v39, 16  ;;  %v14759_v56 = vld [vmem:[#allocation65_spill] sm:$0xff] }
 0xd42   : > { %14742 = vst [vmem:[#allocation54_spill] sm:$0xff] %v12401_v55  ;;  %14744 = vst [vmem:[#allocation55_spill] sm:$0xff] %v12405_v10  ;;  %v4029_v25 = vadd.s32 %v4028_v23, %v4026_v16  ;;  %7717 = vmatmul.mubr.msk.f32.gmra.mrb[54].mxu1 %vm4226_vm5, %v14215_v63  ;;  %v4410_v54 = vmax.f32 %v12405_v10, %v12401_v55  ;;  %v4091_v23 = vcvt.f32.s32 %v12309_v5 }
 0xd43   : > { %v4041_v13 = vpop.xlane.xlu0 %4040 }
 0xd44   : > { %v12414_v41 = vsel %vm4254_vm1, %v4029_v25, %v14745_v30  ;;  %v4042_v33 = vcvt.f32.s32 %v4041_v13  ;;  %4411 = vmax.xlane.f32.xlu0 %v4410_v54  ;;  %vm4229_vm6 = vcmp.eq.s32.totalorder %v8514_v0, %v4029_v25  ;;  %vm4228_vm2 = vcmp.eq.s32.totalorder %v8511_v62, %v4029_v25  ;;  %v14761_v25 = vld [vmem:[#allocation26_spill] sm:$0xff] }
 0xd45   : > { %14746 = vst [vmem:[#allocation56_spill] sm:$0xff] %v12414_v41  ;;  %v12419_v18 = vsel %vm4229_vm6, -inf, %v14747_v40  ;;  %7718 = vmatprep.mubr.msk.f32.mxu1 %vm4229_vm6, %v14215_v63  ;;  %v12423_v32 = vsel %vm4228_vm2, -inf, %v14749_v35  ;;  %v4092_v22 = vshll.u32 %v4091_v23, 16  ;;  %v4107_v13 = vcvt.f32.s32 %v12314_v12 }
 0xd46   : > { %14748 = vst [vmem:[#allocation57_spill] sm:$0xff] %v12419_v18  ;;  %14750 = vst [vmem:[#allocation58_spill] sm:$0xff] %v12423_v32  ;;  %v4045_v4 = vadd.s32 %v4044_v21, %v4042_v33  ;;  %7719 = vmatmul.mubr.msk.f32.gmra.mrb[56].mxu1 %vm4228_vm2, %v14215_v63  ;;  %v4413_v52 = vmax.f32 %v12423_v32, %v12419_v18  ;;  %v14763_v33 = vld [vmem:[#allocation28_spill] sm:$0xff] }
 0xd47   : > { %v4057_v8 = vpop.xlane.xlu1 %4056 }
 0xd48   : > { %v12432_v31 = vsel %vm4254_vm1, %v4045_v4, %v14751_v43  ;;  %v4058_v7 = vcvt.f32.s32 %v4057_v8  ;;  %4414 = vmax.xlane.f32.xlu1 %v4413_v52  ;;  %vm4231_vm7 = vcmp.eq.s32.totalorder %v8514_v0, %v4045_v4  ;;  %vm4230_vm8 = vcmp.eq.s32.totalorder %v8511_v62, %v4045_v4  ;;  %v14765_v4 = vld [vmem:[#allocation27_spill] sm:$0xff] }
 0xd49   : > { %14752 = vst [vmem:[#allocation59_spill] sm:$0xff] %v12432_v31  ;;  %v12437_v38 = vsel %vm4231_vm7, -inf, %v14753_v37  ;;  %7720 = vmatprep.mubr.msk.f32.mxu1 %vm4231_vm7, %v14215_v63  ;;  %v12441_v9 = vsel %vm4230_vm8, -inf, %v14755_v61  ;;  %v4108_v43 = vshll.u32 %v4107_v13, 16  ;;  %v14769_v61 = vld [vmem:[#allocation31_spill] sm:$0xff] }
 0xd4a   : > { %14754 = vst [vmem:[#allocation60_spill] sm:$0xff] %v12437_v38  ;;  %14756 = vst [vmem:[#allocation61_spill] sm:$0xff] %v12441_v9  ;;  %v4061_v27 = vadd.s32 %v4060_v14, %v4058_v7  ;;  %7721 = vmatmul.mubr.msk.f32.gmra.mrb[58].mxu1 %vm4230_vm8, %v14215_v63  ;;  %v4416_v6 = vmax.f32 %v12441_v9, %v12437_v38  ;;  %v14767_v14 = vld [vmem:[#allocation29_spill] sm:$0xff]  ;;  %v4123_v7 = vcvt.f32.s32 %v12319_v53 }
 0xd4b   : > { %v4073_v48 = vpop.xlane.xlu0 %4072 }
 0xd4c   : > { %v12450_v57 = vsel %vm4254_vm1, %v4061_v27, %v14757_v34  ;;  %v4074_v16 = vcvt.f32.s32 %v4073_v48  ;;  %4417 = vmax.xlane.f32.xlu0 %v4416_v6  ;;  %vm4233_vm9 = vcmp.eq.s32.totalorder %v8514_v0, %v4061_v27  ;;  %vm4232_vm10 = vcmp.eq.s32.totalorder %v8511_v62, %v4061_v27  ;;  %v14773_v48 = vld [vmem:[#allocation32_spill] sm:$0xff] }
 0xd4d   : > { %14758 = vst [vmem:[#allocation62_spill] sm:$0xff] %v12450_v57  ;;  %v12455_v42 = vsel %vm4233_vm9, -inf, %v14759_v56  ;;  %7722 = vmatprep.mubr.msk.f32.mxu1 %vm4233_vm9, %v14215_v63  ;;  %v12459_v54 = vsel %vm4232_vm10, -inf, %v14761_v25  ;;  %v4124_v56 = vshll.u32 %v4123_v7, 16  ;;  %v4139_v25 = vcvt.f32.s32 %v12324_v3  ;;  %v14781_v7 = vld [vmem:[#allocation37_spill] sm:$0xff] }
 0xd4e   : > { %14760 = vst [vmem:[#allocation63_spill] sm:$0xff] %v12455_v42  ;;  %14762 = vst [vmem:[#allocation64_spill] sm:$0xff] %v12459_v54  ;;  %v4077_v5 = vadd.s32 %v4076_v46, %v4074_v16  ;;  %7723 = vmatmul.mubr.msk.f32.gmra.mrb[60].mxu1 %vm4232_vm10, %v14215_v63  ;;  %v4419_v21 = vmax.f32 %v12459_v54, %v12455_v42  ;;  %v14771_v46 = vld [vmem:[#allocation30_spill] sm:$0xff] }
 0xd4f   : > { %v4089_v30 = vpop.xlane.xlu1 %4088 }
 0xd50   : > { %v12468_v40 = vsel %vm4254_vm1, %v4077_v5, %v14763_v33  ;;  %v4090_v35 = vcvt.f32.s32 %v4089_v30  ;;  %4420 = vmax.xlane.f32.xlu1 %v4419_v21  ;;  %vm4235_vm11 = vcmp.eq.s32.totalorder %v8514_v0, %v4077_v5  ;;  %vm4234_vm12 = vcmp.eq.s32.totalorder %v8511_v62, %v4077_v5  ;;  %v14775_v21 = vld [vmem:[#allocation34_spill] sm:$0xff]  ;;  %v14777_v30 = vld [vmem:[#allocation33_spill] sm:$0xff] }
 0xd51   : > { %14764 = vst [vmem:[#allocation65_spill] sm:$0xff] %v12468_v40  ;;  %v12473_v52 = vsel %vm4235_vm11, -inf, %v14765_v4  ;;  %7724 = vmatprep.mubr.msk.f32.mxu1 %vm4235_vm11, %v14215_v63  ;;  %v12477_v39 = vsel %vm4234_vm12, -inf, %v14767_v14 }
 0xd52   : > { %14766 = vst [vmem:[#allocation26_spill] sm:$0xff] %v12473_v52  ;;  %14768 = vst [vmem:[#allocation28_spill] sm:$0xff] %v12477_v39  ;;  %v4093_v12 = vadd.s32 %v4092_v22, %v4090_v35  ;;  %7725 = vmatmul.mubr.msk.f32.gmra.mrb[62].mxu1 %vm4234_vm12, %v14215_v63  ;;  %v4422_v8 = vmax.f32 %v12477_v39, %v12473_v52  ;;  %v14779_v35 = vld [vmem:[#allocation35_spill] sm:$0xff] }
 0xd53   : > { %v4105_v37 = vpop.xlane.xlu0 %4104 }
 0xd54   : > { %v12486_v27 = vsel %vm4254_vm1, %v4093_v12, %v14769_v61  ;;  %v4106_v6 = vcvt.f32.s32 %v4105_v37  ;;  %4423 = vmax.xlane.f32.xlu0 %v4422_v8  ;;  %vm4237_vm13 = vcmp.eq.s32.totalorder %v8514_v0, %v4093_v12  ;;  %vm4236_vm14 = vcmp.eq.s32.totalorder %v8511_v62, %v4093_v12 }
 0xd55   : > { %14770 = vst [vmem:[#allocation27_spill] sm:$0xff] %v12486_v27  ;;  %v12491_v23 = vsel %vm4237_vm13, -inf, %v14771_v46  ;;  %7726 = vmatprep.mubr.msk.f32.mxu1 %vm4237_vm13, %v14215_v63  ;;  %v12495_v34 = vsel %vm4236_vm14, -inf, %v14773_v48  ;;  %v4140_v12 = vshll.u32 %v4139_v25, 16  ;;  %v4155_v8 = vcvt.f32.s32 %v12329_v29  ;;  %v14785_v48 = vld [vmem:[#allocation38_spill] sm:$0xff] }
 0xd56   : > { %14772 = vst [vmem:[#allocation29_spill] sm:$0xff] %v12491_v23  ;;  %14774 = vst [vmem:[#allocation31_spill] sm:$0xff] %v12495_v34  ;;  %v4109_v53 = vadd.s32 %v4108_v43, %v4106_v6  ;;  %7727 = vmatmul.mubr.msk.f32.gmra.mrb[64].mxu1 %vm4236_vm14, %v14215_v63  ;;  %v4425_v16 = vmax.f32 %v12495_v34, %v12491_v23  ;;  %v14783_v6 = vld [vmem:[#allocation36_spill] sm:$0xff]  ;;  %v4171_v25 = vcvt.f32.s32 %v12334_v1 }
 0xd57   : > { %v4121_v5 = vpop.xlane.xlu1 %4120 }
 0xd58   : > { %v12504_v22 = vsel %vm4254_vm1, %v4109_v53, %v14775_v21  ;;  %v4122_v13 = vcvt.f32.s32 %v4121_v5  ;;  %4426 = vmax.xlane.f32.xlu1 %v4425_v16  ;;  %vm4239_vm15 = vcmp.eq.s32.totalorder %v8514_v0, %v4109_v53  ;;  %vm4238_vm0 = vcmp.eq.s32.totalorder %v8511_v62, %v4109_v53  ;;  %v14787_v21 = vld [vmem:[#allocation40_spill] sm:$0xff] }
 0xd59   : > { %14776 = vst [vmem:[#allocation30_spill] sm:$0xff] %v12504_v22  ;;  %v12509_v33 = vsel %vm4239_vm15, -inf, %v14777_v30  ;;  %7728 = vmatprep.mubr.msk.f32.mxu1 %vm4239_vm15, %v14215_v63  ;;  %v12513_v4 = vsel %vm4238_vm0, -inf, %v14779_v35  ;;  %v14789_v35 = vld [vmem:[#allocation39_spill] sm:$0xff] }
 0xd5a   : > { %14778 = vst [vmem:[#allocation32_spill] sm:$0xff] %v12509_v33  ;;  %14780 = vst [vmem:[#allocation34_spill] sm:$0xff] %v12513_v4  ;;  %v4125_v3 = vadd.s32 %v4124_v56, %v4122_v13  ;;  %7729 = vmatmul.mubr.msk.f32.gmra.mrb[66].mxu1 %vm4238_vm0, %v14215_v63  ;;  %v4428_v14 = vmax.f32 %v12513_v4, %v12509_v33  ;;  %v4156_v56 = vshll.u32 %v4155_v8, 16 }
 0xd5b   : > { %v4137_v43 = vpop.xlane.xlu0 %4136 }
 0xd5c   : > { %v12522_v37 = vsel %vm4254_vm1, %v4125_v3, %v14781_v7  ;;  %v4138_v61 = vcvt.f32.s32 %v4137_v43  ;;  %4429 = vmax.xlane.f32.xlu0 %v4428_v14  ;;  %vm4241_vm3 = vcmp.eq.s32.totalorder %v8514_v0, %v4125_v3  ;;  %vm4240_vm4 = vcmp.eq.s32.totalorder %v8511_v62, %v4125_v3  ;;  %v14791_v14 = vld [vmem:[#allocation41_spill] sm:$0xff] }
 0xd5d   : > { %14782 = vst [vmem:[#allocation33_spill] sm:$0xff] %v12522_v37  ;;  %v12527_v46 = vsel %vm4241_vm3, -inf, %v14783_v6  ;;  %7730 = vmatprep.mubr.msk.f32.mxu1 %vm4241_vm3, %v14215_v63  ;;  %v12531_v53 = vsel %vm4240_vm4, -inf, %v14785_v48  ;;  %v4172_v43 = vshll.u32 %v4171_v25, 16  ;;  %v4187_v7 = vcvt.f32.s32 %v12339_v28  ;;  %v14793_v6 = vld [vmem:[#allocation13_spill] sm:$0xff]  ;;  %v14797_v25 = vld [vmem:[#allocation42_spill] sm:$0xff] }
 0xd5e   : > { %14784 = vst [vmem:[#allocation35_spill] sm:$0xff] %v12527_v46  ;;  %14786 = vst [vmem:[#allocation37_spill] sm:$0xff] %v12531_v53  ;;  %v4141_v29 = vadd.s32 %v4140_v12, %v4138_v61  ;;  %7731 = vmatmul.mubr.msk.f32.gmra.mrb[68].mxu1 %vm4240_vm4, %v14215_v63  ;;  %v4431_v16 = vmax.f32 %v12531_v53, %v12527_v46 }
 0xd5f   : > { %v4153_v5 = vpop.xlane.xlu1 %4152 }
 0xd60   : > { %v12540_v13 = vsel %vm4254_vm1, %v4141_v29, %v14787_v21  ;;  %v4154_v30 = vcvt.f32.s32 %v4153_v5  ;;  %4432 = vmax.xlane.f32.xlu1 %v4431_v16  ;;  %vm4243_vm5 = vcmp.eq.s32.totalorder %v8514_v0, %v4141_v29  ;;  %vm4242_vm6 = vcmp.eq.s32.totalorder %v8511_v62, %v4141_v29  ;;  %v14795_v16 = vld [vmem:[#allocation12_spill] sm:$0xff] }
 0xd61   : > { %14788 = vst [vmem:[#allocation36_spill] sm:$0xff] %v12540_v13  ;;  %v12545_v3 = vsel %vm4243_vm5, -inf, %v14789_v35  ;;  %7732 = vmatprep.mubr.msk.f32.mxu1 %vm4243_vm5, %v14215_v63  ;;  %v12549_v12 = vsel %vm4242_vm6, -inf, %v14791_v14  ;;  %v4203_v35 = vcvt.f32.s32 %v12344_v36 }
 0xd62   : > { %14790 = vst [vmem:[#allocation38_spill] sm:$0xff] %v12545_v3  ;;  %14792 = vst [vmem:[#allocation40_spill] sm:$0xff] %v12549_v12  ;;  %v4157_v1 = vadd.s32 %v4156_v56, %v4154_v30  ;;  %7733 = vmatmul.mubr.msk.f32.gmra.mrb[70].mxu1 %vm4242_vm6, %v14215_v63  ;;  %v4434_v8 = vmax.f32 %v12549_v12, %v12545_v3  ;;  %v4188_v30 = vshll.u32 %v4187_v7, 16  ;;  %v14803_v7 = vld [vmem:[#allocation43_spill] sm:$0xff] }
 0xd63   : > { %v4169_v61 = vpop.xlane.xlu0 %4168 }
 0xd64   : > { %v12558_v48 = vsel %vm4254_vm1, %v4157_v1, %v14793_v6  ;;  %v4170_v29 = vcvt.f32.s32 %v4169_v61  ;;  %4435 = vmax.xlane.f32.xlu0 %v4434_v8  ;;  %vm4245_vm2 = vcmp.eq.s32.totalorder %v8514_v0, %v4157_v1  ;;  %vm4244_vm7 = vcmp.eq.s32.totalorder %v8511_v62, %v4157_v1  ;;  %v14799_v8 = vld [vmem:[#allocation15_spill] sm:$0xff] }
 0xd65   : > { %14794 = vst [vmem:[#allocation39_spill] sm:$0xff] %v12558_v48  ;;  %v12563_v56 = vsel %vm4245_vm2, -inf, %v14795_v16  ;;  %7734 = vmatprep.mubr.msk.f32.mxu1 %vm4245_vm2, %v14215_v63  ;;  %v12567_v5 = vsel %vm4244_vm7, -inf, %v14797_v25  ;;  %v4204_v25 = vshll.u32 %v4203_v35, 16  ;;  %v14809_v35 = vld [vmem:[#allocation44_spill] sm:$0xff] }
 0xd66   : > { %14796 = vst [vmem:[#allocation41_spill] sm:$0xff] %v12563_v56  ;;  %14798 = vst [vmem:[#allocation13_spill] sm:$0xff] %v12567_v5  ;;  %v4173_v28 = vadd.s32 %v4172_v43, %v4170_v29  ;;  %7735 = vmatmul.mubr.msk.f32.gmra.mrb[72].mxu1 %vm4244_vm7, %v14215_v63  ;;  %v4437_v21 = vmax.f32 %v12567_v5, %v12563_v56  ;;  %v14801_v43 = vld [vmem:[#allocation14_spill] sm:$0xff] }
 0xd67   : > { %v4185_v14 = vpop.xlane.xlu1 %4184 }
 0xd68   : > { %v12576_v1 = vsel %vm4254_vm1, %v4173_v28, %v14799_v8  ;;  %v4186_v61 = vcvt.f32.s32 %v4185_v14  ;;  %4438 = vmax.xlane.f32.xlu1 %v4437_v21  ;;  %vm4247_vm8 = vcmp.eq.s32.totalorder %v8514_v0, %v4173_v28  ;;  %vm4246_vm9 = vcmp.eq.s32.totalorder %v8511_v62, %v4173_v28  ;;  %v14805_v8 = vld [vmem:[#allocation17_spill] sm:$0xff] }
 0xd69   : > { %14800 = vst [vmem:[#allocation12_spill] sm:$0xff] %v12576_v1  ;;  %v12581_v6 = vsel %vm4247_vm8, -inf, %v14801_v43  ;;  %7736 = vmatprep.mubr.msk.f32.mxu1 %vm4247_vm8, %v14215_v63  ;;  %v12585_v29 = vsel %vm4246_vm9, -inf, %v14803_v7  ;;  %v4219_v21 = vcvt.f32.s32 %v12349_v15 }
 0xd6a   : > { %14802 = vst [vmem:[#allocation42_spill] sm:$0xff] %v12581_v6  ;;  %14804 = vst [vmem:[#allocation15_spill] sm:$0xff] %v12585_v29  ;;  %v4189_v36 = vadd.s32 %v4188_v30, %v4186_v61  ;;  %7737 = vmatmul.mubr.msk.f32.gmra.mrb[74].mxu1 %vm4246_vm9, %v14215_v63  ;;  %v4440_v16 = vmax.f32 %v12585_v29, %v12581_v6  ;;  %v14807_v30 = vld [vmem:[#allocation16_spill] sm:$0xff] }
 0xd6b   : > { %v4201_v14 = vpop.xlane.xlu0 %4200 }
 0xd6c   : > { %v12594_v28 = vsel %vm4254_vm1, %v4189_v36, %v14805_v8  ;;  %v4202_v43 = vcvt.f32.s32 %v4201_v14  ;;  %4441 = vmax.xlane.f32.xlu0 %v4440_v16  ;;  %vm4249_vm10 = vcmp.eq.s32.totalorder %v8514_v0, %v4189_v36  ;;  %vm4248_vm11 = vcmp.eq.s32.totalorder %v8511_v62, %v4189_v36 }
 0xd6d   : > { %14806 = vst [vmem:[#allocation14_spill] sm:$0xff] %v12594_v28  ;;  %v12599_v61 = vsel %vm4249_vm10, -inf, %v14807_v30  ;;  %7738 = vmatprep.mubr.msk.f32.mxu1 %vm4249_vm10, %v14215_v63  ;;  %v12603_v7 = vsel %vm4248_vm11, -inf, %v14809_v35  ;;  %v4220_v14 = vshll.u32 %v4219_v21, 16  ;;  %v14811_v28 = vld [vmem:[#allocation19_spill] sm:$0xff]  ;;  %v14813_v35 = vld [vmem:[#allocation18_spill] sm:$0xff] }
 0xd6e   : > { %14808 = vst [vmem:[#allocation43_spill] sm:$0xff] %v12599_v61  ;;  %14810 = vst [vmem:[#allocation17_spill] sm:$0xff] %v12603_v7  ;;  %v4205_v15 = vadd.s32 %v4204_v25, %v4202_v43  ;;  %7739 = vmatmul.mubr.msk.f32.gmra.mrb[76].mxu1 %vm4248_vm11, %v14215_v63  ;;  %v4443_v8 = vmax.f32 %v12603_v7, %v12599_v61  ;;  %v14815_v43 = vld [vmem:[#allocation45_spill] sm:$0xff] }
 0xd6f   : > { %v4217_v16 = vpop.xlane.xlu1 %4216 }
 0xd70   : > { %v12611_v36 = vsel %vm4254_vm1, %v4205_v15, %v14811_v28  ;;  %v4218_v30 = vcvt.f32.s32 %v4217_v16  ;;  %4444 = vmax.xlane.f32.xlu1 %v4443_v8  ;;  %vm4251_vm12 = vcmp.eq.s32.totalorder %v8514_v0, %v4205_v15  ;;  %vm4250_vm13 = vcmp.eq.s32.totalorder %v8511_v62, %v4205_v15  ;;  %v14817_v16 = vld [vmem:[#allocation21_spill] sm:$0xff]  ;;  %v14819_v15 = vld [vmem:[#allocation20_spill] sm:$0xff] }
 0xd71   : > { %14812 = vst [vmem:[#allocation16_spill] sm:$0xff] %v12611_v36  ;;  %v12616_v25 = vsel %vm4251_vm12, -inf, %v14813_v35  ;;  %7740 = vmatprep.mubr.msk.f32.mxu1 %vm4251_vm12, %v14215_v63  ;;  %v12620_v1 = vsel %vm4250_vm13, -inf, %v14815_v43 }
 0xd72   : > { %14814 = vst [vmem:[#allocation44_spill] sm:$0xff] %v12616_v25  ;;  %14816 = vst [vmem:[#allocation19_spill] sm:$0xff] %v12620_v1  ;;  %v4221_v21 = vadd.s32 %v4220_v14, %v4218_v30  ;;  %7741 = vmatmul.mubr.msk.f32.gmra.mrb[78].mxu1 %vm4250_vm13, %v14215_v63  ;;  %v4446_v28 = vmax.f32 %v12620_v1, %v12616_v25  ;;  %v14821_v14 = vld [vmem:[#allocation46_spill] sm:$0xff] }
 0xd74   : > { %v12628_v8 = vsel %vm4254_vm1, %v4221_v21, %v14817_v16  ;;  %4447 = vmax.xlane.f32.xlu0 %v4446_v28  ;;  %vm4253_vm14 = vcmp.eq.s32.totalorder %v8514_v0, %v4221_v21  ;;  %vm4252_vm15 = vcmp.eq.s32.totalorder %v8511_v62, %v4221_v21 }
 0xd75   : > { %14818 = vst [vmem:[#allocation18_spill] sm:$0xff] %v12628_v8  ;;  %v12633_v35 = vsel %vm4253_vm14, -inf, %v14819_v15  ;;  %7742 = vmatprep.mubr.msk.f32.mxu1 %vm4253_vm14, %v14215_v63  ;;  %v12637_v30 = vsel %vm4252_vm15, -inf, %v14821_v14 }
 0xd76   : > { %14820 = vst [vmem:[#allocation45_spill] sm:$0xff] %v12633_v35  ;;  %14822 = vst [vmem:[#allocation21_spill] sm:$0xff] %v12637_v30  ;;  %7743 = vmatmul.mubr.msk.f32.gmra.mrb[80].mxu1 %vm4252_vm15, %v14215_v63  ;;  %v4449_v43 = vmax.f32 %v12637_v30, %v12633_v35 }
 0xd78   : > { %4450 = vmax.xlane.f32.xlu1 %v4449_v43 }
 0xdc9   : > { %v4406_v16 = vpop.xlane.xlu0 %4405 }
 0xdca   : > { %vm4452_vm1 = vcmp.eq.f32.partialorder %v12369_v51, %v4406_v16  ;;  %vm4453_vm0 = vcmp.eq.f32.partialorder %v12365_v19, %v4406_v16 }
 0xdcb   : > { %v4484_v21 = vsel %vm4452_vm1, %v8511_v62, 256  ;;  %v4485_v28 = vsel %vm4453_vm0, %v8514_v0, 256 }
 0xdcc   : > { %vm4516_vm3 = vcmp.lt.s32.totalorder %v4484_v21, %v4485_v28 }
 0xdcd   : > { %v12646_v15 = vsel %vm4516_vm3, %v4484_v21, %v4485_v28  ;;  %v4409_v14 = vpop.xlane.xlu1 %4408 }
 0xdce   : > { %vm4454_vm4 = vcmp.eq.f32.partialorder %v12387_v11, %v4409_v14  ;;  %vm4455_vm5 = vcmp.eq.f32.partialorder %v12383_v44, %v4409_v14  ;;  %v4519_v8 = vshra.s32 %v12646_v15, 16  ;;  %v8036_v11 = vld [vmem:[%s9216_s12 + $0x10] sm:$0xff] }
 0xdcf   : > { %v4486_v43 = vsel %vm4454_vm4, %v8511_v62, 256  ;;  %v4487_v36 = vsel %vm4455_vm5, %v8514_v0, 256 }
 0xdd0   : > { %vm4532_vm6 = vcmp.lt.s32.totalorder %v4486_v43, %v4487_v36  ;;  %v12653_v16 = vcvt.s32.f32 %v4519_v8 }
 0xdd1   : > { %v12655_v48 = vsel %vm4532_vm6, %v4486_v43, %v4487_v36  ;;  %v4412_v13 = vpop.xlane.xlu0 %4411 }
 0xdd2   : > { %vm4456_vm2 = vcmp.eq.f32.partialorder %v12405_v10, %v4412_v13  ;;  %vm4457_vm7 = vcmp.eq.f32.partialorder %v12401_v55, %v4412_v13  ;;  %4522 = vmin.xlane.f32.xlu0 %v12653_v16  ;;  %v4535_v21 = vshra.s32 %v12655_v48, 16 }
 0xdd3   : > { %v4488_v28 = vsel %vm4456_vm2, %v8511_v62, 256  ;;  %v4489_v14 = vsel %vm4457_vm7, %v8514_v0, 256 }
 0xdd4   : > { %vm4548_vm8 = vcmp.lt.s32.totalorder %v4488_v28, %v4489_v14  ;;  %v12663_v37 = vcvt.s32.f32 %v4535_v21 }
 0xdd5   : > { %v12665_v8 = vsel %vm4548_vm8, %v4488_v28, %v4489_v14  ;;  %v4415_v36 = vpop.xlane.xlu1 %4414 }
 0xdd6   : > { %vm4458_vm9 = vcmp.eq.f32.partialorder %v12423_v32, %v4415_v36  ;;  %vm4459_vm10 = vcmp.eq.f32.partialorder %v12419_v18, %v4415_v36  ;;  %4538 = vmin.xlane.f32.xlu1 %v12663_v37  ;;  %v4551_v13 = vshra.s32 %v12665_v8, 16 }
 0xdd7   : > { %v4490_v43 = vsel %vm4458_vm9, %v8511_v62, 256  ;;  %v4491_v22 = vsel %vm4459_vm10, %v8514_v0, 256 }
 0xdd8   : > { %vm4564_vm11 = vcmp.lt.s32.totalorder %v4490_v43, %v4491_v22  ;;  %v12673_v27 = vcvt.s32.f32 %v4551_v13 }
 0xdd9   : > { %v12675_v21 = vsel %vm4564_vm11, %v4490_v43, %v4491_v22  ;;  %v4418_v28 = vpop.xlane.xlu0 %4417 }
 0xdda   : > { %vm4460_vm12 = vcmp.eq.f32.partialorder %v12441_v9, %v4418_v28  ;;  %vm4461_vm13 = vcmp.eq.f32.partialorder %v12437_v38, %v4418_v28  ;;  %4554 = vmin.xlane.f32.xlu0 %v12673_v27  ;;  %v4567_v14 = vshra.s32 %v12675_v21, 16 }
 0xddb   : > { %v4492_v36 = vsel %vm4460_vm12, %v8511_v62, 256  ;;  %v4493_v40 = vsel %vm4461_vm13, %v8514_v0, 256 }
 0xddc   : > { %vm4580_vm14 = vcmp.lt.s32.totalorder %v4492_v36, %v4493_v40  ;;  %v12683_v57 = vcvt.s32.f32 %v4567_v14 }
 0xddd   : > { %v12685_v13 = vsel %vm4580_vm14, %v4492_v36, %v4493_v40  ;;  %v4421_v22 = vpop.xlane.xlu1 %4420 }
 0xdde   : > { %vm4462_vm15 = vcmp.eq.f32.partialorder %v12459_v54, %v4421_v22  ;;  %vm4463_vm1 = vcmp.eq.f32.partialorder %v12455_v42, %v4421_v22  ;;  %4570 = vmin.xlane.f32.xlu1 %v12683_v57  ;;  %v4583_v43 = vshra.s32 %v12685_v13, 16 }
 0xddf   : > { %v4494_v28 = vsel %vm4462_vm15, %v8511_v62, 256  ;;  %v4495_v9 = vsel %vm4463_vm1, %v8514_v0, 256 }
 0xde0   : > { %vm4596_vm0 = vcmp.lt.s32.totalorder %v4494_v28, %v4495_v9  ;;  %v12693_v38 = vcvt.s32.f32 %v4583_v43 }
 0xde1   : > { %v12695_v14 = vsel %vm4596_vm0, %v4494_v28, %v4495_v9  ;;  %v4424_v40 = vpop.xlane.xlu0 %4423 }
 0xde2   : > { %vm4464_vm3 = vcmp.eq.f32.partialorder %v12477_v39, %v4424_v40  ;;  %vm4465_vm4 = vcmp.eq.f32.partialorder %v12473_v52, %v4424_v40  ;;  %4586 = vmin.xlane.f32.xlu0 %v12693_v38  ;;  %v4599_v36 = vshra.s32 %v12695_v14, 16 }
 0xde3   : > { %v4496_v22 = vsel %vm4464_vm3, %v8511_v62, 256  ;;  %v4497_v54 = vsel %vm4465_vm4, %v8514_v0, 256 }
 0xde4   : > { %vm4612_vm5 = vcmp.lt.s32.totalorder %v4496_v22, %v4497_v54  ;;  %v12703_v42 = vcvt.s32.f32 %v4599_v36 }
 0xde5   : > { %v12705_v43 = vsel %vm4612_vm5, %v4496_v22, %v4497_v54  ;;  %v4427_v9 = vpop.xlane.xlu1 %4426 }
 0xde6   : > { %vm4466_vm6 = vcmp.eq.f32.partialorder %v12495_v34, %v4427_v9  ;;  %vm4467_vm2 = vcmp.eq.f32.partialorder %v12491_v23, %v4427_v9  ;;  %4602 = vmin.xlane.f32.xlu1 %v12703_v42  ;;  %v4615_v28 = vshra.s32 %v12705_v43, 16 }
 0xde7   : > { %v4498_v40 = vsel %vm4466_vm6, %v8511_v62, 256  ;;  %v4499_v39 = vsel %vm4467_vm2, %v8514_v0, 256 }
 0xde8   : > { %vm4628_vm7 = vcmp.lt.s32.totalorder %v4498_v40, %v4499_v39  ;;  %v12713_v52 = vcvt.s32.f32 %v4615_v28 }
 0xde9   : > { %v12715_v36 = vsel %vm4628_vm7, %v4498_v40, %v4499_v39  ;;  %v4430_v54 = vpop.xlane.xlu0 %4429 }
 0xdea   : > { %vm4468_vm8 = vcmp.eq.f32.partialorder %v12513_v4, %v4430_v54  ;;  %vm4469_vm9 = vcmp.eq.f32.partialorder %v12509_v33, %v4430_v54  ;;  %4618 = vmin.xlane.f32.xlu0 %v12713_v52  ;;  %v4631_v22 = vshra.s32 %v12715_v36, 16 }
 0xdeb   : > { %v4500_v9 = vsel %vm4468_vm8, %v8511_v62, 256  ;;  %v4501_v34 = vsel %vm4469_vm9, %v8514_v0, 256 }
 0xdec   : > { %vm4644_vm10 = vcmp.lt.s32.totalorder %v4500_v9, %v4501_v34  ;;  %v12723_v23 = vcvt.s32.f32 %v4631_v22 }
 0xded   : > { %v12725_v28 = vsel %vm4644_vm10, %v4500_v9, %v4501_v34  ;;  %v4433_v39 = vpop.xlane.xlu1 %4432 }
 0xdee   : > { %vm4470_vm11 = vcmp.eq.f32.partialorder %v12531_v53, %v4433_v39  ;;  %vm4471_vm12 = vcmp.eq.f32.partialorder %v12527_v46, %v4433_v39  ;;  %4634 = vmin.xlane.f32.xlu1 %v12723_v23  ;;  %v4647_v40 = vshra.s32 %v12725_v28, 16 }
 0xdef   : > { %v4502_v54 = vsel %vm4470_vm11, %v8511_v62, 256  ;;  %v4503_v4 = vsel %vm4471_vm12, %v8514_v0, 256 }
 0xdf0   : > { %vm4660_vm13 = vcmp.lt.s32.totalorder %v4502_v54, %v4503_v4  ;;  %v12733_v33 = vcvt.s32.f32 %v4647_v40 }
 0xdf1   : > { %v12735_v22 = vsel %vm4660_vm13, %v4502_v54, %v4503_v4  ;;  %v4436_v34 = vpop.xlane.xlu0 %4435 }
 0xdf2   : > { %vm4472_vm14 = vcmp.eq.f32.partialorder %v12549_v12, %v4436_v34  ;;  %vm4473_vm15 = vcmp.eq.f32.partialorder %v12545_v3, %v4436_v34  ;;  %4650 = vmin.xlane.f32.xlu0 %v12733_v33  ;;  %v4663_v9 = vshra.s32 %v12735_v22, 16 }
 0xdf3   : > { %v4504_v39 = vsel %vm4472_vm14, %v8511_v62, 256  ;;  %v4505_v53 = vsel %vm4473_vm15, %v8514_v0, 256 }
 0xdf4   : > { %vm4676_vm1 = vcmp.lt.s32.totalorder %v4504_v39, %v4505_v53  ;;  %v12743_v46 = vcvt.s32.f32 %v4663_v9 }
 0xdf5   : > { %v12745_v40 = vsel %vm4676_vm1, %v4504_v39, %v4505_v53  ;;  %v4439_v4 = vpop.xlane.xlu1 %4438 }
 0xdf6   : > { %vm4474_vm0 = vcmp.eq.f32.partialorder %v12567_v5, %v4439_v4  ;;  %vm4475_vm3 = vcmp.eq.f32.partialorder %v12563_v56, %v4439_v4  ;;  %4666 = vmin.xlane.f32.xlu1 %v12743_v46  ;;  %v4679_v54 = vshra.s32 %v12745_v40, 16 }
 0xdf7   : > { %v4506_v34 = vsel %vm4474_vm0, %v8511_v62, 256  ;;  %v4507_v12 = vsel %vm4475_vm3, %v8514_v0, 256 }
 0xdf8   : > { %vm4692_vm4 = vcmp.lt.s32.totalorder %v4506_v34, %v4507_v12  ;;  %v12753_v3 = vcvt.s32.f32 %v4679_v54 }
 0xdf9   : > { %v12755_v9 = vsel %vm4692_vm4, %v4506_v34, %v4507_v12  ;;  %v4442_v53 = vpop.xlane.xlu0 %4441 }
 0xdfa   : > { %vm4476_vm5 = vcmp.eq.f32.partialorder %v12585_v29, %v4442_v53  ;;  %vm4477_vm6 = vcmp.eq.f32.partialorder %v12581_v6, %v4442_v53  ;;  %4682 = vmin.xlane.f32.xlu0 %v12753_v3  ;;  %v4695_v39 = vshra.s32 %v12755_v9, 16 }
 0xdfb   : > { %v4508_v4 = vsel %vm4476_vm5, %v8511_v62, 256  ;;  %v4509_v5 = vsel %vm4477_vm6, %v8514_v0, 256 }
 0xdfc   : > { %vm4708_vm2 = vcmp.lt.s32.totalorder %v4508_v4, %v4509_v5  ;;  %v12763_v56 = vcvt.s32.f32 %v4695_v39 }
 0xdfd   : > { %v12765_v54 = vsel %vm4708_vm2, %v4508_v4, %v4509_v5  ;;  %v4445_v12 = vpop.xlane.xlu1 %4444 }
 0xdfe   : > { %vm4478_vm7 = vcmp.eq.f32.partialorder %v12603_v7, %v4445_v12  ;;  %vm4479_vm8 = vcmp.eq.f32.partialorder %v12599_v61, %v4445_v12  ;;  %4698 = vmin.xlane.f32.xlu1 %v12763_v56  ;;  %v4711_v34 = vshra.s32 %v12765_v54, 16 }
 0xdff   : > { %v4510_v53 = vsel %vm4478_vm7, %v8511_v62, 256  ;;  %v4511_v29 = vsel %vm4479_vm8, %v8514_v0, 256 }
 0xe00   : > { %vm4724_vm9 = vcmp.lt.s32.totalorder %v4510_v53, %v4511_v29  ;;  %v12773_v6 = vcvt.s32.f32 %v4711_v34 }
 0xe01   : > { %v12775_v39 = vsel %vm4724_vm9, %v4510_v53, %v4511_v29  ;;  %v4448_v5 = vpop.xlane.xlu0 %4447 }
 0xe02   : > { %vm4480_vm10 = vcmp.eq.f32.partialorder %v12620_v1, %v4448_v5  ;;  %vm4481_vm11 = vcmp.eq.f32.partialorder %v12616_v25, %v4448_v5  ;;  %4714 = vmin.xlane.f32.xlu0 %v12773_v6  ;;  %v4727_v4 = vshra.s32 %v12775_v39, 16 }
 0xe03   : > { %v4512_v12 = vsel %vm4480_vm10, %v8511_v62, 256  ;;  %v4513_v7 = vsel %vm4481_vm11, %v8514_v0, 256 }
 0xe04   : > { %vm4740_vm12 = vcmp.lt.s32.totalorder %v4512_v12, %v4513_v7  ;;  %v12783_v61 = vcvt.s32.f32 %v4727_v4 }
 0xe05   : > { %v12785_v34 = vsel %vm4740_vm12, %v4512_v12, %v4513_v7  ;;  %v4451_v29 = vpop.xlane.xlu1 %4450 }
 0xe06   : > { %vm4482_vm13 = vcmp.eq.f32.partialorder %v12637_v30, %v4451_v29  ;;  %vm4483_vm14 = vcmp.eq.f32.partialorder %v12633_v35, %v4451_v29  ;;  %4730 = vmin.xlane.f32.xlu1 %v12783_v61  ;;  %v4743_v53 = vshra.s32 %v12785_v34, 16  ;;  %v8034_v30 = vld [vmem:[%s9216_s12] sm:$0xff] }
 0xe07   : > { %v4514_v5 = vsel %vm4482_vm13, %v8511_v62, 256  ;;  %v4515_v1 = vsel %vm4483_vm14, %v8514_v0, 256 }
 0xe08   : > { %vm4756_vm15 = vcmp.lt.s32.totalorder %v4514_v5, %v4515_v1  ;;  %v12793_v4 = vcvt.s32.f32 %v4743_v53  ;;  %v14823_v53 = vld [vmem:[#allocation23_spill] sm:$0xff] }
 0xe09   : > { %v12795_v25 = vsel %vm4756_vm15, %v4514_v5, %v4515_v1  ;;  %v8035_v1 = vld [vmem:[%s9216_s12 + $0x8] sm:$0xff] }
 0xe0a   : > { %4746 = vmin.xlane.f32.xlu0 %v12793_v4  ;;  %v4759_v7 = vshra.s32 %v12795_v25, 16 }
 0xe0c   : > { %v12799_v12 = vcvt.s32.f32 %v4759_v7 }
 0xe0d   : > { %v6354_v29 = vpop.f32.mrb[50].mxu1 }
 0xe0e   : > { %v6881_v35 = vadd.f32 %v8034_v30, %v6354_v29  ;;  %v6356_v31 = vpop.f32.mrb[51].mxu1  ;;  %4762 = vmin.xlane.f32.xlu1 %v12799_v12 }
 0xe10   : > { %v6897_v32 = vmax.f32 %v6881_v35, 0.0  ;;  %v14825_v35 = vld [vmem:[#allocation22_spill] sm:$0xff] }
 0xe11   : > { %v6359_v18 = vpop.f32.mrb[52].mxu1 }
 0xe12   : > { %v12804_v41 = vadd.f32 %v6897_v32, %v14823_v53  ;;  %v6882_v5 = vadd.f32 %v8035_v1, %v6359_v18  ;;  %v6361_v10 = vpop.f32.mrb[53].mxu1  ;;  %v8037_v32 = vld [vmem:[%s9216_s12 + $0x18] sm:$0xff] }
 0xe14   : > { %14824 = vst [vmem:[#allocation20_spill] sm:$0xff] %v12804_v41  ;;  %v6898_v55 = vmax.f32 %v6882_v5, 0.0 }
 0xe15   : > { %v6364_v47 = vpop.f32.mrb[54].mxu1 }
 0xe16   : > { %v12808_v7 = vadd.f32 %v6898_v55, %v12215_v58  ;;  %v6883_v30 = vadd.f32 %v8036_v11, %v6364_v47  ;;  %v6366_v31 = vpop.f32.mrb[55].mxu1  ;;  %v8038_v58 = vld [vmem:[%s9216_s12 + $0x20] sm:$0xff] }
 0xe18   : > { %v6899_v29 = vmax.f32 %v6883_v30, 0.0  ;;  %v14828_v30 = vld [vmem:[#allocation47_spill] sm:$0xff] }
 0xe19   : > { %v6369_v44 = vpop.f32.mrb[56].mxu1 }
 0xe1a   : > { %v12812_v26 = vadd.f32 %v6899_v29, %v14825_v35  ;;  %v6884_v53 = vadd.f32 %v8037_v32, %v6369_v44  ;;  %v6371_v41 = vpop.f32.mrb[57].mxu1  ;;  %v8039_v29 = vld [vmem:[%s9216_s12 + $0x28] sm:$0xff] }
 0xe1b   : > { %v14829_v32 = vld [vmem:[#allocation25_spill] sm:$0xff] }
 0xe1c   : > { %14826 = vst [vmem:[#allocation46_spill] sm:$0xff] %v12812_v26  ;;  %v6900_v10 = vmax.f32 %v6884_v53, 0.0 }
 0xe1d   : > { %v6374_v18 = vpop.f32.mrb[58].mxu1 }
 0xe1e   : > { %v12816_v1 = vadd.f32 %v6900_v10, %v12223_v50  ;;  %v6885_v55 = vadd.f32 %v8038_v58, %v6374_v18  ;;  %v6376_v5 = vpop.f32.mrb[59].mxu1  ;;  %v8040_v50 = vld [vmem:[%s9216_s12 + $0x30] sm:$0xff] }
 0xe1f   : > { %v8041_v5 = vld [vmem:[%s9216_s12 + $0x38] sm:$0xff] }
 0xe20   : > { %14827 = vst [vmem:[#allocation23_spill] sm:$0xff] %v12816_v1  ;;  %v6901_v11 = vmax.f32 %v6885_v55, 0.0 }
 0xe21   : > { %v6379_v47 = vpop.f32.mrb[60].mxu1 }
 0xe22   : > { %v12820_v31 = vadd.f32 %v6901_v11, %v14828_v30  ;;  %v6886_v35 = vadd.f32 %v8039_v29, %v6379_v47  ;;  %v6381_v26 = vpop.f32.mrb[61].mxu1  ;;  %v14831_v29 = vld [vmem:[#allocation24_spill] sm:$0xff] }
 0xe24   : > { %v6902_v44 = vmax.f32 %v6886_v35, 0.0 }
 0xe25   : > { %v6384_v41 = vpop.f32.mrb[62].mxu1 }
 0xe26   : > { %v12824_v53 = vadd.f32 %v6902_v44, %v14829_v32  ;;  %v6887_v10 = vadd.f32 %v8040_v50, %v6384_v41  ;;  %v6386_v1 = vpop.f32.mrb[63].mxu1  ;;  %v8042_v44 = vld [vmem:[%s9216_s12 + $0x40] sm:$0xff] }
 0xe28   : > { %14830 = vst [vmem:[#allocation22_spill] sm:$0xff] %v12824_v53  ;;  %v6903_v18 = vmax.f32 %v6887_v10, 0.0 }
 0xe29   : > { %v6389_v58 = vpop.f32.mrb[64].mxu1 }
 0xe2a   : > { %v12828_v55 = vadd.f32 %v6903_v18, %v12235_v45  ;;  %v6888_v11 = vadd.f32 %v8041_v5, %v6389_v58  ;;  %v6391_v30 = vpop.f32.mrb[65].mxu1  ;;  %v8043_v45 = vld [vmem:[%s9216_s12 + $0x48] sm:$0xff] }
 0xe2c   : > { %v6904_v26 = vmax.f32 %v6888_v11, 0.0  ;;  %v14833_v11 = vld [vmem:[#allocation48_spill] sm:$0xff] }
 0xe2d   : > { %v6394_v47 = vpop.f32.mrb[66].mxu1 }
 0xe2e   : > { %v12832_v35 = vadd.f32 %v6904_v26, %v14831_v29  ;;  %v6889_v32 = vadd.f32 %v8042_v44, %v6394_v47  ;;  %v6396_v53 = vpop.f32.mrb[67].mxu1  ;;  %v8044_v26 = vld [vmem:[%s9216_s12 + $0x50] sm:$0xff] }
 0xe30   : > { %14832 = vst [vmem:[#allocation47_spill] sm:$0xff] %v12832_v35  ;;  %v6905_v1 = vmax.f32 %v6889_v32, 0.0 }
 0xe31   : > { %v6399_v41 = vpop.f32.mrb[68].mxu1 }
 0xe32   : > { %v12836_v50 = vadd.f32 %v6905_v1, %v12243_v17  ;;  %v6890_v10 = vadd.f32 %v8043_v45, %v6399_v41  ;;  %v6401_v18 = vpop.f32.mrb[69].mxu1  ;;  %v8045_v17 = vld [vmem:[%s9216_s12 + $0x58] sm:$0xff] }
 0xe34   : > { %v6906_v58 = vmax.f32 %v6890_v10, 0.0  ;;  %v14835_v10 = vld [vmem:[#allocation49_spill] sm:$0xff] }
 0xe35   : > { %v6404_v5 = vpop.f32.mrb[70].mxu1 }
 0xe36   : > { %v12840_v30 = vadd.f32 %v6906_v58, %v14833_v11  ;;  %v6891_v29 = vadd.f32 %v8044_v26, %v6404_v5  ;;  %v6406_v35 = vpop.f32.mrb[71].mxu1  ;;  %v8046_v58 = vld [vmem:[%s9216_s12 + $0x60] sm:$0xff] }
 0xe38   : > { %14834 = vst [vmem:[#allocation25_spill] sm:$0xff] %v12840_v30  ;;  %v6907_v53 = vmax.f32 %v6891_v29, 0.0 }
 0xe39   : > { %v6409_v47 = vpop.f32.mrb[72].mxu1 }
 0xe3a   : > { %v12844_v44 = vadd.f32 %v6907_v53, %v12251_v60  ;;  %v6892_v32 = vadd.f32 %v8045_v17, %v6409_v47  ;;  %v6411_v1 = vpop.f32.mrb[73].mxu1  ;;  %v8047_v60 = vld [vmem:[%s9216_s12 + $0x68] sm:$0xff] }
 0xe3b   : > { %v8048_v1 = vld [vmem:[%s9216_s12 + $0x70] sm:$0xff] }
 0xe3c   : > { %v6908_v41 = vmax.f32 %v6892_v32, 0.0 }
 0xe3d   : > { %v6414_v45 = vpop.f32.mrb[74].mxu1 }
 0xe3e   : > { %v12848_v18 = vadd.f32 %v6908_v41, %v14835_v10  ;;  %v6893_v11 = vadd.f32 %v8046_v58, %v6414_v45  ;;  %v6416_v30 = vpop.f32.mrb[75].mxu1  ;;  %v8049_v58 = vld [vmem:[%s9216_s12 + $0x78] sm:$0xff] }
 0xe40   : > { %14836 = vst [vmem:[#allocation24_spill] sm:$0xff] %v12848_v18  ;;  %v6909_v35 = vmax.f32 %v6893_v11, 0.0 }
 0xe41   : > { %v6419_v5 = vpop.f32.mrb[76].mxu1 }
 0xe42   : > { %v12852_v26 = vadd.f32 %v6909_v35, %v12259_v20  ;;  %v6894_v29 = vadd.f32 %v8047_v60, %v6419_v5  ;;  %v6421_v53 = vpop.f32.mrb[77].mxu1  ;;  %v4518_v60 = vand.u32 65535, %v12646_v15 }
 0xe43   : > { %v4534_v53 = vand.u32 65535, %v12655_v48  ;;  %v4566_v48 = vand.u32 65535, %v12675_v21  ;;  %v4598_v21 = vand.u32 65535, %v12695_v14  ;;  %v4630_v14 = vand.u32 65535, %v12715_v36 }
 0xe44   : > { %v6910_v47 = vmax.f32 %v6894_v29, 0.0  ;;  %v4662_v36 = vand.u32 65535, %v12735_v22  ;;  %v4694_v22 = vand.u32 65535, %v12755_v9  ;;  %v4726_v9 = vand.u32 65535, %v12775_v39 }
 0xe45   : > { %v6424_v17 = vpop.f32.mrb[78].mxu1  ;;  %v4758_v39 = vand.u32 65535, %v12795_v25 }
 0xe46   : > { %v12856_v32 = vadd.f32 %v6910_v47, %v12263_v59  ;;  %v6895_v41 = vadd.f32 %v8048_v1, %v6424_v17  ;;  %v6426_v10 = vpop.f32.mrb[79].mxu1  ;;  %v4520_v59 = vcvt.s32.f32 %v4518_v60  ;;  %v4550_v17 = vand.u32 65535, %v12665_v8 }
 0xe47   : > { %v4568_v10 = vcvt.s32.f32 %v4566_v48  ;;  %v4582_v8 = vand.u32 65535, %v12685_v13  ;;  %v4614_v13 = vand.u32 65535, %v12705_v43  ;;  %v4646_v43 = vand.u32 65535, %v12725_v28 }
 0xe48   : > { %v6911_v18 = vmax.f32 %v6895_v41, 0.0  ;;  %v4552_v1 = vcvt.s32.f32 %v4550_v17  ;;  %v4678_v28 = vand.u32 65535, %v12745_v40  ;;  %v4710_v40 = vand.u32 65535, %v12765_v54 }
 0xe49   : > { %v6429_v45 = vpop.f32.mrb[80].mxu1  ;;  %v4616_v60 = vcvt.s32.f32 %v4614_v13  ;;  %v4742_v54 = vand.u32 65535, %v12785_v34 }
 0xe4a   : > { %v12860_v30 = vadd.f32 %v6911_v18, %v12267_v49  ;;  %v6896_v11 = vadd.f32 %v8049_v58, %v6429_v45  ;;  %v6431_v20 = vpop.f32.mrb[81].mxu1  ;;  %v4536_v18 = vcvt.s32.f32 %v4534_v53  ;;  %v4584_v58 = vcvt.s32.f32 %v4582_v8 }
 0xe4b   : > { %v4600_v20 = vcvt.s32.f32 %v4598_v21  ;;  %v4632_v53 = vcvt.s32.f32 %v4630_v14  ;;  %v4680_v48 = vcvt.s32.f32 %v4678_v28  ;;  %v4728_v21 = vcvt.s32.f32 %v4726_v9  ;;  %v14837_v28 = vld [vmem:[#allocation50_spill] sm:$0xff]  ;;  %v14840_v9 = vld [vmem:[#allocation53_spill] sm:$0xff] }
 0xe4c   : > { %v6912_v35 = vmax.f32 %v6896_v11, 0.0 }
 0xe4e   : > { %v12864_v5 = vadd.f32 %v6912_v35, %v12271_v2 }
 0xe5f   : > { %v12867_v29 = vpop.xlane.xlu0 %4522 }
 0xe60   : > { %vm4524_vm1 = vcmp.eq.f32.partialorder %v12653_v16, %v12867_v29 }
 0xe61   : > { %v4525_v47 = vsel %vm4524_vm1, %v4520_v59, inf  ;;  %vm4804_vm1 = vcmp.eq.s32.totalorder %v8511_v62, 7 }
 0xe62   : > { %4526 = vmin.xlane.f32.xlu0 %v4525_v47 }
 0xe63   : > { %v12872_v49 = vpop.xlane.xlu1 %4538 }
 0xe64   : > { %vm4540_vm0 = vcmp.eq.f32.partialorder %v12663_v37, %v12872_v49 }
 0xe65   : > { %v4541_v2 = vsel %vm4540_vm0, %v4536_v18, inf  ;;  %v4648_v18 = vcvt.s32.f32 %v4646_v43 }
 0xe66   : > { %4542 = vmin.xlane.f32.xlu1 %v4541_v2  ;;  %v4664_v2 = vcvt.s32.f32 %v4662_v36 }
 0xe67   : > { %v12877_v15 = vpop.xlane.xlu0 %4554 }
 0xe68   : > { %vm4556_vm3 = vcmp.eq.f32.partialorder %v12673_v27, %v12877_v15  ;;  %v4561_v43 = vcvt.f32.s32 %v12877_v15 }
 0xe69   : > { %v4557_v16 = vsel %vm4556_vm3, %v4552_v1, inf }
 0xe6a   : > { %4558 = vmin.xlane.f32.xlu0 %v4557_v16  ;;  %v4562_v36 = vshll.u32 %v4561_v43, 16 }
 0xe6b   : > { %v12882_v41 = vpop.xlane.xlu1 %4570 }
 0xe6c   : > { %vm4572_vm4 = vcmp.eq.f32.partialorder %v12683_v57, %v12882_v41 }
 0xe6d   : > { %v4573_v37 = vsel %vm4572_vm4, %v4568_v10, inf  ;;  %v4696_v10 = vcvt.s32.f32 %v4694_v22  ;;  %v14839_v22 = vld [vmem:[#allocation52_spill] sm:$0xff] }
 0xe6e   : > { %4574 = vmin.xlane.f32.xlu1 %v4573_v37  ;;  %v4712_v37 = vcvt.s32.f32 %v4710_v40 }
 0xe6f   : > { %v12887_v45 = vpop.xlane.xlu0 %4586 }
 0xe70   : > { %vm4588_vm5 = vcmp.eq.f32.partialorder %v12693_v38, %v12887_v45 }
 0xe71   : > { %v4589_v27 = vsel %vm4588_vm5, %v4584_v58, inf }
 0xe72   : > { %4590 = vmin.xlane.f32.xlu0 %v4589_v27 }
 0xe73   : > { %v12892_v11 = vpop.xlane.xlu1 %4602 }
 0xe74   : > { %vm4604_vm6 = vcmp.eq.f32.partialorder %v12703_v42, %v12892_v11 }
 0xe75   : > { %v4605_v57 = vsel %vm4604_vm6, %v4600_v20, inf  ;;  %v4744_v20 = vcvt.s32.f32 %v4742_v54  ;;  %v14841_v54 = vld [vmem:[#allocation54_spill] sm:$0xff] }
 0xe76   : > { %4606 = vmin.xlane.f32.xlu1 %v4605_v57  ;;  %v4760_v57 = vcvt.s32.f32 %v4758_v39 }
 0xe77   : > { %v12897_v35 = vpop.xlane.xlu0 %4618 }
 0xe78   : > { %vm4620_vm2 = vcmp.eq.f32.partialorder %v12713_v52, %v12897_v35 }
 0xe79   : > { %v4621_v38 = vsel %vm4620_vm2, %v4616_v60, inf  ;;  %v4545_v60 = vcvt.f32.s32 %v12872_v49 }
 0xe7a   : > { %4622 = vmin.xlane.f32.xlu0 %v4621_v38 }
 0xe7b   : > { %v12902_v59 = vpop.xlane.xlu1 %4634 }
 0xe7c   : > { %vm4636_vm7 = vcmp.eq.f32.partialorder %v12723_v23, %v12902_v59 }
 0xe7d   : > { %v4637_v42 = vsel %vm4636_vm7, %v4632_v53, inf  ;;  %v4546_v53 = vshll.u32 %v4545_v60, 16  ;;  %v14843_v60 = vld [vmem:[#allocation56_spill] sm:$0xff] }
 0xe7e   : > { %4638 = vmin.xlane.f32.xlu1 %v4637_v42 }
 0xe7f   : > { %v12907_v47 = vpop.xlane.xlu0 %4650 }
 0xe80   : > { %vm4652_vm8 = vcmp.eq.f32.partialorder %v12733_v33, %v12907_v47 }
 0xe81   : > { %v4653_v52 = vsel %vm4652_vm8, %v4648_v18, inf }
 0xe82   : > { %4654 = vmin.xlane.f32.xlu0 %v4653_v52  ;;  %v4577_v52 = vcvt.f32.s32 %v12882_v41 }
 0xe83   : > { %v12912_v17 = vpop.xlane.xlu1 %4666 }
 0xe84   : > { %vm4668_vm9 = vcmp.eq.f32.partialorder %v12743_v46, %v12912_v17  ;;  %v4578_v40 = vshll.u32 %v4577_v52, 16 }
 0xe85   : > { %v4669_v23 = vsel %vm4668_vm9, %v4664_v2, inf }
 0xe86   : > { %4670 = vmin.xlane.f32.xlu1 %v4669_v23 }
 0xe87   : > { %v12917_v1 = vpop.xlane.xlu0 %4682 }
 0xe88   : > { %vm4684_vm10 = vcmp.eq.f32.partialorder %v12753_v3, %v12917_v1 }
 0xe89   : > { %v4685_v33 = vsel %vm4684_vm10, %v4680_v48, inf }
 0xe8a   : > { %4686 = vmin.xlane.f32.xlu0 %v4685_v33 }
 0xe8b   : > { %v12922_v16 = vpop.xlane.xlu1 %4698 }
 0xe8c   : > { %vm4700_vm11 = vcmp.eq.f32.partialorder %v12763_v56, %v12922_v16 }
 0xe8d   : > { %v4701_v46 = vsel %vm4700_vm11, %v4696_v10, inf }
 0xe8e   : > { %4702 = vmin.xlane.f32.xlu1 %v4701_v46  ;;  %v4593_v46 = vcvt.f32.s32 %v12887_v45 }
 0xe8f   : > { %v12927_v8 = vpop.xlane.xlu0 %4714 }
 0xe90   : > { %vm4716_vm12 = vcmp.eq.f32.partialorder %v12773_v6, %v12927_v8 }
 0xe91   : > { %v4717_v3 = vsel %vm4716_vm12, %v4712_v37, inf }
 0xe92   : > { %4718 = vmin.xlane.f32.xlu0 %v4717_v3 }
 0xe93   : > { %v12932_v58 = vpop.xlane.xlu1 %4730 }
 0xe94   : > { %vm4732_vm13 = vcmp.eq.f32.partialorder %v12783_v61, %v12932_v58  ;;  %v4529_v61 = vcvt.f32.s32 %v12867_v29 }
 0xe95   : > { %v4733_v56 = vsel %vm4732_vm13, %v4728_v21, inf }
 0xe96   : > { %4734 = vmin.xlane.f32.xlu1 %v4733_v56  ;;  %v4530_v38 = vshll.u32 %v4529_v61, 16 }
 0xe97   : > { %v12937_v27 = vpop.xlane.xlu0 %4746 }
 0xe98   : > { %vm4748_vm14 = vcmp.eq.f32.partialorder %v12793_v4, %v12937_v27 }
 0xe99   : > { %v4749_v6 = vsel %vm4748_vm14, %v4744_v20, inf  ;;  %v14842_v20 = vld [vmem:[#allocation55_spill] sm:$0xff] }
 0xe9a   : > { %4750 = vmin.xlane.f32.xlu0 %v4749_v6 }
 0xe9b   : > { %v12942_v13 = vpop.xlane.xlu1 %4762 }
 0xe9c   : > { %vm4764_vm15 = vcmp.eq.f32.partialorder %v12799_v12, %v12942_v13 }
 0xe9d   : > { %v4765_v34 = vsel %vm4764_vm15, %v4760_v57, inf  ;;  %v4594_v57 = vshll.u32 %v4593_v46, 16 }
 0xe9e   : > { %4766 = vmin.xlane.f32.xlu1 %v4765_v34  ;;  %v4609_v34 = vcvt.f32.s32 %v12892_v11 }
 0xeef   : > { %v4527_v14 = vpop.xlane.xlu0 %4526 }
 0xef0   : > { %v4528_v25 = vcvt.f32.s32 %v4527_v14 }
 0xef2   : > { %v4531_v4 = vadd.s32 %v4530_v38, %v4528_v25  ;;  %v14844_v25 = vld [vmem:[#allocation57_spill] sm:$0xff] }
 0xef3   : > { %v4543_v42 = vpop.xlane.xlu1 %4542 }
 0xef4   : > { %v12953_v12 = vsel %vm4804_vm1, %v4531_v4, %v12360_v24  ;;  %v4544_v18 = vcvt.f32.s32 %v4543_v42  ;;  %vm4773_vm0 = vcmp.eq.s32.totalorder %v8514_v0, %v4531_v4  ;;  %vm4772_vm3 = vcmp.eq.s32.totalorder %v8511_v62, %v4531_v4 }
 0xef5   : > { %v12958_v29 = vsel %vm4773_vm0, -inf, %v12365_v19  ;;  %7744 = vmatprep.mubr.msk.f32.mxu1 %vm4773_vm0, %v14215_v63  ;;  %v12962_v49 = vsel %vm4772_vm3, -inf, %v12369_v51  ;;  %v14838_v51 = vld [vmem:[#allocation51_spill] sm:$0xff] }
 0xef6   : > { %v4547_v15 = vadd.s32 %v4546_v53, %v4544_v18  ;;  %7745 = vmatmul.mubr.msk.f32.gmra.mrb[82].mxu1 %vm4772_vm3, %v14215_v63  ;;  %v4954_v24 = vmax.f32 %v12962_v49, %v12958_v29  ;;  %v14845_v53 = vld [vmem:[#allocation58_spill] sm:$0xff]  ;;  %v4610_v18 = vshll.u32 %v4609_v34, 16 }
 0xef7   : > { %v4559_v2 = vpop.xlane.xlu0 %4558 }
 0xef8   : > { %v12971_v19 = vsel %vm4804_vm1, %v4547_v15, %v14837_v28  ;;  %v4560_v23 = vcvt.f32.s32 %v4559_v2  ;;  %4955 = vmax.xlane.f32.xlu0 %v4954_v24  ;;  %vm4775_vm4 = vcmp.eq.s32.totalorder %v8514_v0, %v4547_v15  ;;  %vm4774_vm5 = vcmp.eq.s32.totalorder %v8511_v62, %v4547_v15  ;;  %v14847_v28 = vld [vmem:[#allocation60_spill] sm:$0xff] }
 0xef9   : > { %v12976_v48 = vsel %vm4775_vm4, -inf, %v14838_v51  ;;  %7746 = vmatprep.mubr.msk.f32.mxu1 %vm4775_vm4, %v14215_v63  ;;  %v12980_v33 = vsel %vm4774_vm5, -inf, %v14839_v22  ;;  %v4625_v15 = vcvt.f32.s32 %v12897_v35  ;;  %v14848_v51 = vld [vmem:[#allocation61_spill] sm:$0xff] }
 0xefa   : > { %v4563_v41 = vadd.s32 %v4562_v36, %v4560_v23  ;;  %7747 = vmatmul.mubr.msk.f32.gmra.mrb[84].mxu1 %vm4774_vm5, %v14215_v63  ;;  %v4957_v10 = vmax.f32 %v12980_v33, %v12976_v48  ;;  %v14846_v36 = vld [vmem:[#allocation59_spill] sm:$0xff] }
 0xefb   : > { %v4575_v37 = vpop.xlane.xlu1 %4574 }
 0xefc   : > { %v12989_v3 = vsel %vm4804_vm1, %v4563_v41, %v14840_v9  ;;  %v4576_v21 = vcvt.f32.s32 %v4575_v37  ;;  %4958 = vmax.xlane.f32.xlu1 %v4957_v10  ;;  %vm4777_vm6 = vcmp.eq.s32.totalorder %v8514_v0, %v4563_v41  ;;  %vm4776_vm2 = vcmp.eq.s32.totalorder %v8511_v62, %v4563_v41  ;;  %v14849_v37 = vld [vmem:[#allocation62_spill] sm:$0xff] }
 0xefd   : > { %v12994_v56 = vsel %vm4777_vm6, -inf, %v14841_v54  ;;  %7748 = vmatprep.mubr.msk.f32.mxu1 %vm4777_vm6, %v14215_v63  ;;  %v12998_v39 = vsel %vm4776_vm2, -inf, %v14842_v20  ;;  %v4626_v10 = vshll.u32 %v4625_v15, 16  ;;  %v14851_v54 = vld [vmem:[#allocation63_spill] sm:$0xff] }
 0xefe   : > { %v4579_v45 = vadd.s32 %v4578_v40, %v4576_v21  ;;  %7749 = vmatmul.mubr.msk.f32.gmra.mrb[86].mxu1 %vm4776_vm2, %v14215_v63  ;;  %v4960_v6 = vmax.f32 %v12998_v39, %v12994_v56  ;;  %v4641_v40 = vcvt.f32.s32 %v12902_v59 }
 0xeff   : > { %v4591_v61 = vpop.xlane.xlu0 %4590 }
 0xf00   : > { %v13007_v14 = vsel %vm4804_vm1, %v4579_v45, %v14843_v60  ;;  %v4592_v38 = vcvt.f32.s32 %v4591_v61  ;;  %4961 = vmax.xlane.f32.xlu0 %v4960_v6  ;;  %vm4779_vm7 = vcmp.eq.s32.totalorder %v8514_v0, %v4579_v45  ;;  %vm4778_vm8 = vcmp.eq.s32.totalorder %v8511_v62, %v4579_v45  ;;  %v14852_v45 = vld [vmem:[#allocation64_spill] sm:$0xff] }
 0xf01   : > { %v13012_v4 = vsel %vm4779_vm7, -inf, %v14844_v25  ;;  %7750 = vmatprep.mubr.msk.f32.mxu1 %vm4779_vm7, %v14215_v63  ;;  %v13016_v43 = vsel %vm4778_vm8, -inf, %v14845_v53  ;;  %v4642_v34 = vshll.u32 %v4641_v40, 16  ;;  %v4657_v61 = vcvt.f32.s32 %v12907_v47 }
 0xf02   : > { %v4595_v11 = vadd.s32 %v4594_v57, %v4592_v38  ;;  %7751 = vmatmul.mubr.msk.f32.gmra.mrb[88].mxu1 %vm4778_vm8, %v14215_v63  ;;  %v4963_v42 = vmax.f32 %v13016_v43, %v13012_v4  ;;  %v14853_v38 = vld [vmem:[#allocation65_spill] sm:$0xff] }
 0xf03   : > { %v4607_v24 = vpop.xlane.xlu1 %4606 }
 0xf04   : > { %v13025_v52 = vsel %vm4804_vm1, %v4595_v11, %v14846_v36  ;;  %v4608_v2 = vcvt.f32.s32 %v4607_v24  ;;  %4964 = vmax.xlane.f32.xlu1 %v4963_v42  ;;  %vm4781_vm9 = vcmp.eq.s32.totalorder %v8514_v0, %v4595_v11  ;;  %vm4780_vm10 = vcmp.eq.s32.totalorder %v8511_v62, %v4595_v11  ;;  %v14855_v11 = vld [vmem:[#allocation26_spill] sm:$0xff] }
 0xf05   : > { %v13030_v23 = vsel %vm4781_vm9, -inf, %v14847_v28  ;;  %7752 = vmatprep.mubr.msk.f32.mxu1 %vm4781_vm9, %v14215_v63  ;;  %v13034_v22 = vsel %vm4780_vm10, -inf, %v14848_v51  ;;  %v4658_v36 = vshll.u32 %v4657_v61, 16  ;;  %v14857_v51 = vld [vmem:[#allocation27_spill] sm:$0xff] }
 0xf06   : > { %v4611_v35 = vadd.s32 %v4610_v18, %v4608_v2  ;;  %7753 = vmatmul.mubr.msk.f32.gmra.mrb[90].mxu1 %vm4780_vm10, %v14215_v63  ;;  %v4966_v41 = vmax.f32 %v13034_v22, %v13030_v23  ;;  %v14856_v18 = vld [vmem:[#allocation28_spill] sm:$0xff]  ;;  %v4673_v2 = vcvt.f32.s32 %v12912_v17 }
 0xf07   : > { %v4623_v46 = vpop.xlane.xlu0 %4622 }
 0xf08   : > { %v13043_v9 = vsel %vm4804_vm1, %v4611_v35, %v14849_v37  ;;  %v4624_v21 = vcvt.f32.s32 %v4623_v46  ;;  %4967 = vmax.xlane.f32.xlu0 %v4966_v41  ;;  %vm4783_vm11 = vcmp.eq.s32.totalorder %v8514_v0, %v4611_v35  ;;  %vm4782_vm12 = vcmp.eq.s32.totalorder %v8511_v62, %v4611_v35  ;;  %v14860_v46 = vld [vmem:[#allocation31_spill] sm:$0xff] }
 0xf09   : > { %14850 = vst [vmem:[#allocation48_spill] sm:$0xff] %v13043_v9  ;;  %v13048_v20 = vsel %vm4783_vm11, -inf, %v14851_v54  ;;  %7754 = vmatprep.mubr.msk.f32.mxu1 %vm4783_vm11, %v14215_v63  ;;  %v13052_v6 = vsel %vm4782_vm12, -inf, %v14852_v45  ;;  %v4674_v54 = vshll.u32 %v4673_v2, 16  ;;  %v4689_v45 = vcvt.f32.s32 %v12917_v1  ;;  %v14865_v2 = vld [vmem:[#allocation33_spill] sm:$0xff]  ;;  %v13417_v9 = vld [vmem:[%s9216_s12 + $0x18] sm:$0xff] }
 0xf0a   : > { %v4627_v59 = vadd.s32 %v4626_v10, %v4624_v21  ;;  %7755 = vmatmul.mubr.msk.f32.gmra.mrb[92].mxu1 %vm4782_vm12, %v14215_v63  ;;  %v4969_v57 = vmax.f32 %v13052_v6, %v13048_v20  ;;  %v14859_v10 = vld [vmem:[#allocation29_spill] sm:$0xff]  ;;  %14900 = vst [vmem:[#allocation64_spill] sm:$0xff] %v13417_v9 }
 0xf0b   : > { %v4639_v60 = vpop.xlane.xlu1 %4638 }
 0xf0c   : > { %v13061_v25 = vsel %vm4804_vm1, %v4627_v59, %v14853_v38  ;;  %v4640_v53 = vcvt.f32.s32 %v4639_v60  ;;  %4970 = vmax.xlane.f32.xlu1 %v4969_v57  ;;  %vm4785_vm13 = vcmp.eq.s32.totalorder %v8514_v0, %v4627_v59  ;;  %vm4784_vm14 = vcmp.eq.s32.totalorder %v8511_v62, %v4627_v59  ;;  %v14861_v57 = vld [vmem:[#allocation30_spill] sm:$0xff]  ;;  %v14863_v60 = vld [vmem:[#allocation32_spill] sm:$0xff] }
 0xf0d   : > { %14854 = vst [vmem:[#allocation49_spill] sm:$0xff] %v13061_v25  ;;  %v13066_v42 = vsel %vm4785_vm13, -inf, %v14855_v11  ;;  %7756 = vmatprep.mubr.msk.f32.mxu1 %vm4785_vm13, %v14215_v63  ;;  %v13070_v15 = vsel %vm4784_vm14, -inf, %v14856_v18 }
 0xf0e   : > { %v4643_v47 = vadd.s32 %v4642_v34, %v4640_v53  ;;  %7757 = vmatmul.mubr.msk.f32.gmra.mrb[94].mxu1 %vm4784_vm14, %v14215_v63  ;;  %v4972_v24 = vmax.f32 %v13070_v15, %v13066_v42  ;;  %v14864_v53 = vld [vmem:[#allocation34_spill] sm:$0xff] }
 0xf0f   : > { %v4655_v28 = vpop.xlane.xlu0 %4654 }
 0xf10   : > { %v13079_v35 = vsel %vm4804_vm1, %v4643_v47, %v14857_v51  ;;  %v4656_v41 = vcvt.f32.s32 %v4655_v28  ;;  %4973 = vmax.xlane.f32.xlu0 %v4972_v24  ;;  %vm4787_vm15 = vcmp.eq.s32.totalorder %v8514_v0, %v4643_v47  ;;  %vm4786_vm0 = vcmp.eq.s32.totalorder %v8511_v62, %v4643_v47 }
 0xf11   : > { %14858 = vst [vmem:[#allocation50_spill] sm:$0xff] %v13079_v35  ;;  %v13084_v40 = vsel %vm4787_vm15, -inf, %v14859_v10  ;;  %7758 = vmatprep.mubr.msk.f32.mxu1 %vm4787_vm15, %v14215_v63  ;;  %v13088_v37 = vsel %vm4786_vm0, -inf, %v14860_v46  ;;  %v4690_v47 = vshll.u32 %v4689_v45, 16  ;;  %v4705_v24 = vcvt.f32.s32 %v12922_v16  ;;  %v14868_v46 = vld [vmem:[#allocation37_spill] sm:$0xff] }
 0xf12   : > { %v4659_v17 = vadd.s32 %v4658_v36, %v4656_v41  ;;  %7759 = vmatmul.mubr.msk.f32.gmra.mrb[96].mxu1 %vm4786_vm0, %v14215_v63  ;;  %v4975_v21 = vmax.f32 %v13088_v37, %v13084_v40  ;;  %v14867_v41 = vld [vmem:[#allocation35_spill] sm:$0xff]  ;;  %v4721_v45 = vcvt.f32.s32 %v12927_v8 }
 0xf13   : > { %v4671_v59 = vpop.xlane.xlu1 %4670 }
 0xf14   : > { %v13097_v34 = vsel %vm4804_vm1, %v4659_v17, %v14861_v57  ;;  %v4672_v61 = vcvt.f32.s32 %v4671_v59  ;;  %4976 = vmax.xlane.f32.xlu1 %v4975_v21  ;;  %vm4789_vm3 = vcmp.eq.s32.totalorder %v8514_v0, %v4659_v17  ;;  %vm4788_vm4 = vcmp.eq.s32.totalorder %v8511_v62, %v4659_v17  ;;  %v14869_v57 = vld [vmem:[#allocation36_spill] sm:$0xff] }
 0xf15   : > { %14862 = vst [vmem:[#allocation51_spill] sm:$0xff] %v13097_v34  ;;  %v13102_v38 = vsel %vm4789_vm3, -inf, %v14863_v60  ;;  %7760 = vmatprep.mubr.msk.f32.mxu1 %vm4789_vm3, %v14215_v63  ;;  %v13106_v11 = vsel %vm4788_vm4, -inf, %v14864_v53  ;;  %v14871_v53 = vld [vmem:[#allocation38_spill] sm:$0xff] }
 0xf16   : > { %v4675_v1 = vadd.s32 %v4674_v54, %v4672_v61  ;;  %7761 = vmatmul.mubr.msk.f32.gmra.mrb[98].mxu1 %vm4788_vm4, %v14215_v63  ;;  %v4978_v18 = vmax.f32 %v13106_v11, %v13102_v38  ;;  %v4706_v54 = vshll.u32 %v4705_v24, 16 }
 0xf17   : > { %v4687_v36 = vpop.xlane.xlu0 %4686 }
 0xf18   : > { %v13115_v28 = vsel %vm4804_vm1, %v4675_v1, %v14865_v2  ;;  %v4688_v51 = vcvt.f32.s32 %v4687_v36  ;;  %4979 = vmax.xlane.f32.xlu0 %v4978_v18  ;;  %vm4791_vm5 = vcmp.eq.s32.totalorder %v8514_v0, %v4675_v1  ;;  %vm4790_vm6 = vcmp.eq.s32.totalorder %v8511_v62, %v4675_v1  ;;  %v14872_v18 = vld [vmem:[#allocation40_spill] sm:$0xff] }
 0xf19   : > { %14866 = vst [vmem:[#allocation52_spill] sm:$0xff] %v13115_v28  ;;  %v13120_v10 = vsel %vm4791_vm5, -inf, %v14867_v41  ;;  %7762 = vmatprep.mubr.msk.f32.mxu1 %vm4791_vm5, %v14215_v63  ;;  %v13124_v17 = vsel %vm4790_vm6, -inf, %v14868_v46  ;;  %v4722_v36 = vshll.u32 %v4721_v45, 16  ;;  %v4737_v2 = vcvt.f32.s32 %v12932_v58  ;;  %v14873_v41 = vld [vmem:[#allocation39_spill] sm:$0xff]  ;;  %v14876_v45 = vld [vmem:[#allocation13_spill] sm:$0xff] }
 0xf1a   : > { %v4691_v16 = vadd.s32 %v4690_v47, %v4688_v51  ;;  %7763 = vmatmul.mubr.msk.f32.gmra.mrb[100].mxu1 %vm4790_vm6, %v14215_v63  ;;  %v4981_v21 = vmax.f32 %v13124_v17, %v13120_v10 }
 0xf1b   : > { %v4703_v59 = vpop.xlane.xlu1 %4702 }
 0xf1c   : > { %v13133_v61 = vsel %vm4804_vm1, %v4691_v16, %v14869_v57  ;;  %v4704_v60 = vcvt.f32.s32 %v4703_v59  ;;  %4982 = vmax.xlane.f32.xlu1 %v4981_v21  ;;  %vm4793_vm2 = vcmp.eq.s32.totalorder %v8514_v0, %v4691_v16  ;;  %vm4792_vm7 = vcmp.eq.s32.totalorder %v8511_v62, %v4691_v16  ;;  %v14875_v21 = vld [vmem:[#allocation41_spill] sm:$0xff] }
 0xf1d   : > { %14870 = vst [vmem:[#allocation53_spill] sm:$0xff] %v13133_v61  ;;  %v13138_v1 = vsel %vm4793_vm2, -inf, %v14871_v53  ;;  %7764 = vmatprep.mubr.msk.f32.mxu1 %vm4793_vm2, %v14215_v63  ;;  %v13142_v47 = vsel %vm4792_vm7, -inf, %v14872_v18  ;;  %v4753_v53 = vcvt.f32.s32 %v12937_v27  ;;  %v13403_v61 = vld [vmem:[%s9216_s12 + $0x8] sm:$0xff] }
 0xf1e   : > { %v4707_v8 = vadd.s32 %v4706_v54, %v4704_v60  ;;  %7765 = vmatmul.mubr.msk.f32.gmra.mrb[102].mxu1 %vm4792_vm7, %v14215_v63  ;;  %v4984_v24 = vmax.f32 %v13142_v47, %v13138_v1  ;;  %v4738_v60 = vshll.u32 %v4737_v2, 16  ;;  %v14880_v2 = vld [vmem:[#allocation15_spill] sm:$0xff]  ;;  %14896 = vst [vmem:[#allocation61_spill] sm:$0xff] %v13403_v61 }
 0xf1f   : > { %v4719_v51 = vpop.xlane.xlu0 %4718 }
 0xf20   : > { %v13151_v46 = vsel %vm4804_vm1, %v4707_v8, %v14873_v41  ;;  %v4720_v16 = vcvt.f32.s32 %v4719_v51  ;;  %4985 = vmax.xlane.f32.xlu0 %v4984_v24  ;;  %vm4795_vm8 = vcmp.eq.s32.totalorder %v8514_v0, %v4707_v8  ;;  %vm4794_vm9 = vcmp.eq.s32.totalorder %v8511_v62, %v4707_v8  ;;  %v14877_v24 = vld [vmem:[#allocation12_spill] sm:$0xff] }
 0xf21   : > { %14874 = vst [vmem:[#allocation54_spill] sm:$0xff] %v13151_v46  ;;  %v13156_v54 = vsel %vm4795_vm8, -inf, %v14875_v21  ;;  %7766 = vmatprep.mubr.msk.f32.mxu1 %vm4795_vm8, %v14215_v63  ;;  %v13160_v59 = vsel %vm4794_vm9, -inf, %v14876_v45  ;;  %v4754_v45 = vshll.u32 %v4753_v53, 16  ;;  %v14884_v53 = vld [vmem:[#allocation17_spill] sm:$0xff] }
 0xf22   : > { %v4723_v58 = vadd.s32 %v4722_v36, %v4720_v16  ;;  %7767 = vmatmul.mubr.msk.f32.gmra.mrb[104].mxu1 %vm4794_vm9, %v14215_v63  ;;  %v4987_v57 = vmax.f32 %v13160_v59, %v13156_v54  ;;  %v14879_v36 = vld [vmem:[#allocation42_spill] sm:$0xff] }
 0xf23   : > { %v4735_v18 = vpop.xlane.xlu1 %4734 }
 0xf24   : > { %v13169_v8 = vsel %vm4804_vm1, %v4723_v58, %v14877_v24  ;;  %v4736_v51 = vcvt.f32.s32 %v4735_v18  ;;  %4988 = vmax.xlane.f32.xlu1 %v4987_v57  ;;  %vm4797_vm10 = vcmp.eq.s32.totalorder %v8514_v0, %v4723_v58  ;;  %vm4796_vm11 = vcmp.eq.s32.totalorder %v8511_v62, %v4723_v58  ;;  %v14881_v24 = vld [vmem:[#allocation14_spill] sm:$0xff] }
 0xf25   : > { %14878 = vst [vmem:[#allocation55_spill] sm:$0xff] %v13169_v8  ;;  %v13174_v41 = vsel %vm4797_vm10, -inf, %v14879_v36  ;;  %7768 = vmatprep.mubr.msk.f32.mxu1 %vm4797_vm10, %v14215_v63  ;;  %v13178_v16 = vsel %vm4796_vm11, -inf, %v14880_v2  ;;  %v4769_v57 = vcvt.f32.s32 %v12942_v13 }
 0xf26   : > { %v4739_v27 = vadd.s32 %v4738_v60, %v4736_v51  ;;  %7769 = vmatmul.mubr.msk.f32.gmra.mrb[106].mxu1 %vm4796_vm11, %v14215_v63  ;;  %v4990_v21 = vmax.f32 %v13178_v16, %v13174_v41  ;;  %v14883_v60 = vld [vmem:[#allocation43_spill] sm:$0xff] }
 0xf27   : > { %v4751_v18 = vpop.xlane.xlu0 %4750 }
 0xf28   : > { %v13187_v58 = vsel %vm4804_vm1, %v4739_v27, %v14881_v24  ;;  %v4752_v36 = vcvt.f32.s32 %v4751_v18  ;;  %4991 = vmax.xlane.f32.xlu0 %v4990_v21  ;;  %vm4799_vm12 = vcmp.eq.s32.totalorder %v8514_v0, %v4739_v27  ;;  %vm4798_vm13 = vcmp.eq.s32.totalorder %v8511_v62, %v4739_v27 }
 0xf29   : > { %14882 = vst [vmem:[#allocation56_spill] sm:$0xff] %v13187_v58  ;;  %v13192_v51 = vsel %vm4799_vm12, -inf, %v14883_v60  ;;  %7770 = vmatprep.mubr.msk.f32.mxu1 %vm4799_vm12, %v14215_v63  ;;  %v13196_v2 = vsel %vm4798_vm13, -inf, %v14884_v53  ;;  %v4770_v18 = vshll.u32 %v4769_v57, 16  ;;  %v14885_v58 = vld [vmem:[#allocation16_spill] sm:$0xff] }
 0xf2a   : > { %v4755_v13 = vadd.s32 %v4754_v45, %v4752_v36  ;;  %7771 = vmatmul.mubr.msk.f32.gmra.mrb[108].mxu1 %vm4798_vm13, %v14215_v63  ;;  %v4993_v24 = vmax.f32 %v13196_v2, %v13192_v51  ;;  %v14887_v53 = vld [vmem:[#allocation44_spill] sm:$0xff]  ;;  %v14888_v36 = vld [vmem:[#allocation19_spill] sm:$0xff] }
 0xf2b   : > { %v4767_v21 = vpop.xlane.xlu1 %4766 }
 0xf2c   : > { %v13204_v27 = vsel %vm4804_vm1, %v4755_v13, %v14885_v58  ;;  %v4768_v60 = vcvt.f32.s32 %v4767_v21  ;;  %4994 = vmax.xlane.f32.xlu1 %v4993_v24  ;;  %vm4801_vm14 = vcmp.eq.s32.totalorder %v8514_v0, %v4755_v13  ;;  %vm4800_vm15 = vcmp.eq.s32.totalorder %v8511_v62, %v4755_v13  ;;  %v14889_v21 = vld [vmem:[#allocation18_spill] sm:$0xff]  ;;  %v14891_v13 = vld [vmem:[#allocation45_spill] sm:$0xff] }
 0xf2d   : > { %14886 = vst [vmem:[#allocation57_spill] sm:$0xff] %v13204_v27  ;;  %v13209_v45 = vsel %vm4801_vm14, -inf, %v14887_v53  ;;  %7772 = vmatprep.mubr.msk.f32.mxu1 %vm4801_vm14, %v14215_v63  ;;  %v13213_v8 = vsel %vm4800_vm15, -inf, %v14888_v36 }
 0xf2e   : > { %v4771_v57 = vadd.s32 %v4770_v18, %v4768_v60  ;;  %7773 = vmatmul.mubr.msk.f32.gmra.mrb[110].mxu1 %vm4800_vm15, %v14215_v63  ;;  %v4996_v58 = vmax.f32 %v13213_v8, %v13209_v45  ;;  %v14892_v18 = vld [vmem:[#allocation21_spill] sm:$0xff] }
 0xf30   : > { %v13221_v24 = vsel %vm4804_vm1, %v4771_v57, %v14889_v21  ;;  %4997 = vmax.xlane.f32.xlu0 %v4996_v58  ;;  %vm4803_vm0 = vcmp.eq.s32.totalorder %v8514_v0, %v4771_v57  ;;  %vm4802_vm3 = vcmp.eq.s32.totalorder %v8511_v62, %v4771_v57 }
 0xf31   : > { %14890 = vst [vmem:[#allocation58_spill] sm:$0xff] %v13221_v24  ;;  %v13226_v53 = vsel %vm4803_vm0, -inf, %v14891_v13  ;;  %7774 = vmatprep.mubr.msk.f32.mxu1 %vm4803_vm0, %v14215_v63  ;;  %v13230_v60 = vsel %vm4802_vm3, -inf, %v14892_v18 }
 0xf32   : > { %7775 = vmatmul.mubr.msk.f32.gmra.mrb[112].mxu1 %vm4802_vm3, %v14215_v63  ;;  %v4999_v36 = vmax.f32 %v13230_v60, %v13226_v53 }
 0xf34   : > { %5000 = vmax.xlane.f32.xlu1 %v4999_v36 }
 0xf85   : > { %v4956_v21 = vpop.xlane.xlu0 %4955 }
 0xf86   : > { %vm5002_vm1 = vcmp.eq.f32.partialorder %v12962_v49, %v4956_v21  ;;  %vm5003_vm4 = vcmp.eq.f32.partialorder %v12958_v29, %v4956_v21 }
 0xf87   : > { %v5034_v57 = vsel %vm5002_vm1, %v8511_v62, 256  ;;  %v5035_v58 = vsel %vm5003_vm4, %v8514_v0, 256 }
 0xf88   : > { %vm5066_vm5 = vcmp.lt.s32.totalorder %v5034_v57, %v5035_v58 }
 0xf89   : > { %v13239_v13 = vsel %vm5066_vm5, %v5034_v57, %v5035_v58  ;;  %v4959_v18 = vpop.xlane.xlu1 %4958 }
 0xf8a   : > { %vm5004_vm6 = vcmp.eq.f32.partialorder %v12980_v33, %v4959_v18  ;;  %vm5005_vm2 = vcmp.eq.f32.partialorder %v12976_v48, %v4959_v18  ;;  %v5069_v24 = vshra.s32 %v13239_v13, 16 }
 0xf8b   : > { %v5036_v36 = vsel %vm5004_vm6, %v8511_v62, 256  ;;  %v5037_v49 = vsel %vm5005_vm2, %v8514_v0, 256 }
 0xf8c   : > { %vm5082_vm7 = vcmp.lt.s32.totalorder %v5036_v36, %v5037_v49  ;;  %v13246_v29 = vcvt.s32.f32 %v5069_v24 }
 0xf8d   : > { %v13248_v21 = vsel %vm5082_vm7, %v5036_v36, %v5037_v49  ;;  %v4962_v27 = vpop.xlane.xlu0 %4961 }
 0xf8e   : > { %vm5006_vm8 = vcmp.eq.f32.partialorder %v12998_v39, %v4962_v27  ;;  %vm5007_vm9 = vcmp.eq.f32.partialorder %v12994_v56, %v4962_v27  ;;  %5072 = vmin.xlane.f32.xlu0 %v13246_v29  ;;  %v5085_v48 = vshra.s32 %v13248_v21, 16 }
 0xf8f   : > { %v5038_v33 = vsel %vm5006_vm8, %v8511_v62, 256  ;;  %v5039_v57 = vsel %vm5007_vm9, %v8514_v0, 256 }
 0xf90   : > { %vm5098_vm10 = vcmp.lt.s32.totalorder %v5038_v33, %v5039_v57  ;;  %v13256_v58 = vcvt.s32.f32 %v5085_v48 }
 0xf91   : > { %v13258_v24 = vsel %vm5098_vm10, %v5038_v33, %v5039_v57  ;;  %v4965_v18 = vpop.xlane.xlu1 %4964 }
 0xf92   : > { %vm5008_vm11 = vcmp.eq.f32.partialorder %v13016_v43, %v4965_v18  ;;  %vm5009_vm12 = vcmp.eq.f32.partialorder %v13012_v4, %v4965_v18  ;;  %5088 = vmin.xlane.f32.xlu1 %v13256_v58  ;;  %v5101_v56 = vshra.s32 %v13258_v24, 16 }
 0xf93   : > { %v5040_v39 = vsel %vm5008_vm11, %v8511_v62, 256  ;;  %v5041_v27 = vsel %vm5009_vm12, %v8514_v0, 256 }
 0xf94   : > { %vm5114_vm13 = vcmp.lt.s32.totalorder %v5040_v39, %v5041_v27  ;;  %v13266_v36 = vcvt.s32.f32 %v5101_v56 }
 0xf95   : > { %v13268_v49 = vsel %vm5114_vm13, %v5040_v39, %v5041_v27  ;;  %v4968_v48 = vpop.xlane.xlu0 %4967 }
 0xf96   : > { %vm5010_vm14 = vcmp.eq.f32.partialorder %v13034_v22, %v4968_v48  ;;  %vm5011_vm15 = vcmp.eq.f32.partialorder %v13030_v23, %v4968_v48  ;;  %5104 = vmin.xlane.f32.xlu0 %v13266_v36  ;;  %v5117_v4 = vshra.s32 %v13268_v49, 16 }
 0xf97   : > { %v5042_v43 = vsel %vm5010_vm14, %v8511_v62, 256  ;;  %v5043_v33 = vsel %vm5011_vm15, %v8514_v0, 256 }
 0xf98   : > { %vm5130_vm0 = vcmp.lt.s32.totalorder %v5042_v43, %v5043_v33  ;;  %v13276_v57 = vcvt.s32.f32 %v5117_v4 }
 0xf99   : > { %v13278_v18 = vsel %vm5130_vm0, %v5042_v43, %v5043_v33  ;;  %v4971_v56 = vpop.xlane.xlu1 %4970 }
 0xf9a   : > { %vm5012_vm3 = vcmp.eq.f32.partialorder %v13052_v6, %v4971_v56  ;;  %vm5013_vm1 = vcmp.eq.f32.partialorder %v13048_v20, %v4971_v56  ;;  %5120 = vmin.xlane.f32.xlu1 %v13276_v57  ;;  %v5133_v23 = vshra.s32 %v13278_v18, 16 }
 0xf9b   : > { %v5044_v22 = vsel %vm5012_vm3, %v8511_v62, 256  ;;  %v5045_v39 = vsel %vm5013_vm1, %v8514_v0, 256 }
 0xf9c   : > { %vm5146_vm4 = vcmp.lt.s32.totalorder %v5044_v22, %v5045_v39  ;;  %v13286_v27 = vcvt.s32.f32 %v5133_v23 }
 0xf9d   : > { %v13288_v48 = vsel %vm5146_vm4, %v5044_v22, %v5045_v39  ;;  %v4974_v4 = vpop.xlane.xlu0 %4973 }
 0xf9e   : > { %vm5014_vm5 = vcmp.eq.f32.partialorder %v13070_v15, %v4974_v4  ;;  %vm5015_vm6 = vcmp.eq.f32.partialorder %v13066_v42, %v4974_v4  ;;  %5136 = vmin.xlane.f32.xlu0 %v13286_v27  ;;  %v5149_v20 = vshra.s32 %v13288_v48, 16 }
 0xf9f   : > { %v5046_v6 = vsel %vm5014_vm5, %v8511_v62, 256  ;;  %v5047_v43 = vsel %vm5015_vm6, %v8514_v0, 256 }
 0xfa0   : > { %vm5162_vm2 = vcmp.lt.s32.totalorder %v5046_v6, %v5047_v43  ;;  %v13296_v33 = vcvt.s32.f32 %v5149_v20 }
 0xfa1   : > { %v13298_v56 = vsel %vm5162_vm2, %v5046_v6, %v5047_v43  ;;  %v4977_v23 = vpop.xlane.xlu1 %4976 }
 0xfa2   : > { %vm5016_vm7 = vcmp.eq.f32.partialorder %v13088_v37, %v4977_v23  ;;  %vm5017_vm8 = vcmp.eq.f32.partialorder %v13084_v40, %v4977_v23  ;;  %5152 = vmin.xlane.f32.xlu1 %v13296_v33  ;;  %v5165_v42 = vshra.s32 %v13298_v56, 16 }
 0xfa3   : > { %v5048_v15 = vsel %vm5016_vm7, %v8511_v62, 256  ;;  %v5049_v22 = vsel %vm5017_vm8, %v8514_v0, 256 }
 0xfa4   : > { %vm5178_vm9 = vcmp.lt.s32.totalorder %v5048_v15, %v5049_v22  ;;  %v13306_v39 = vcvt.s32.f32 %v5165_v42 }
 0xfa5   : > { %v13308_v4 = vsel %vm5178_vm9, %v5048_v15, %v5049_v22  ;;  %v4980_v20 = vpop.xlane.xlu0 %4979 }
 0xfa6   : > { %vm5018_vm10 = vcmp.eq.f32.partialorder %v13106_v11, %v4980_v20  ;;  %vm5019_vm11 = vcmp.eq.f32.partialorder %v13102_v38, %v4980_v20  ;;  %5168 = vmin.xlane.f32.xlu0 %v13306_v39  ;;  %v5181_v40 = vshra.s32 %v13308_v4, 16 }
 0xfa7   : > { %v5050_v37 = vsel %vm5018_vm10, %v8511_v62, 256  ;;  %v5051_v6 = vsel %vm5019_vm11, %v8514_v0, 256 }
 0xfa8   : > { %vm5194_vm12 = vcmp.lt.s32.totalorder %v5050_v37, %v5051_v6  ;;  %v13316_v43 = vcvt.s32.f32 %v5181_v40 }
 0xfa9   : > { %v13318_v23 = vsel %vm5194_vm12, %v5050_v37, %v5051_v6  ;;  %v4983_v42 = vpop.xlane.xlu1 %4982 }
 0xfaa   : > { %vm5020_vm13 = vcmp.eq.f32.partialorder %v13124_v17, %v4983_v42  ;;  %vm5021_vm14 = vcmp.eq.f32.partialorder %v13120_v10, %v4983_v42  ;;  %5184 = vmin.xlane.f32.xlu1 %v13316_v43  ;;  %v5197_v38 = vshra.s32 %v13318_v23, 16 }
 0xfab   : > { %v5052_v11 = vsel %vm5020_vm13, %v8511_v62, 256  ;;  %v5053_v15 = vsel %vm5021_vm14, %v8514_v0, 256 }
 0xfac   : > { %vm5210_vm15 = vcmp.lt.s32.totalorder %v5052_v11, %v5053_v15  ;;  %v13326_v22 = vcvt.s32.f32 %v5197_v38 }
 0xfad   : > { %v13328_v20 = vsel %vm5210_vm15, %v5052_v11, %v5053_v15  ;;  %v4986_v40 = vpop.xlane.xlu0 %4985 }
 0xfae   : > { %vm5022_vm0 = vcmp.eq.f32.partialorder %v13142_v47, %v4986_v40  ;;  %vm5023_vm3 = vcmp.eq.f32.partialorder %v13138_v1, %v4986_v40  ;;  %5200 = vmin.xlane.f32.xlu0 %v13326_v22  ;;  %v5213_v10 = vshra.s32 %v13328_v20, 16 }
 0xfaf   : > { %v5054_v17 = vsel %vm5022_vm0, %v8511_v62, 256  ;;  %v5055_v37 = vsel %vm5023_vm3, %v8514_v0, 256 }
 0xfb0   : > { %vm5226_vm1 = vcmp.lt.s32.totalorder %v5054_v17, %v5055_v37  ;;  %v13336_v6 = vcvt.s32.f32 %v5213_v10 }
 0xfb1   : > { %v13338_v42 = vsel %vm5226_vm1, %v5054_v17, %v5055_v37  ;;  %v4989_v38 = vpop.xlane.xlu1 %4988 }
 0xfb2   : > { %vm5024_vm4 = vcmp.eq.f32.partialorder %v13160_v59, %v4989_v38  ;;  %vm5025_vm5 = vcmp.eq.f32.partialorder %v13156_v54, %v4989_v38  ;;  %5216 = vmin.xlane.f32.xlu1 %v13336_v6  ;;  %v5229_v1 = vshra.s32 %v13338_v42, 16 }
 0xfb3   : > { %v5056_v47 = vsel %vm5024_vm4, %v8511_v62, 256  ;;  %v5057_v11 = vsel %vm5025_vm5, %v8514_v0, 256 }
 0xfb4   : > { %vm5242_vm6 = vcmp.lt.s32.totalorder %v5056_v47, %v5057_v11  ;;  %v13346_v15 = vcvt.s32.f32 %v5229_v1 }
 0xfb5   : > { %v13348_v40 = vsel %vm5242_vm6, %v5056_v47, %v5057_v11  ;;  %v4992_v10 = vpop.xlane.xlu0 %4991 }
 0xfb6   : > { %vm5026_vm2 = vcmp.eq.f32.partialorder %v13178_v16, %v4992_v10  ;;  %vm5027_vm7 = vcmp.eq.f32.partialorder %v13174_v41, %v4992_v10  ;;  %5232 = vmin.xlane.f32.xlu0 %v13346_v15  ;;  %v5245_v54 = vshra.s32 %v13348_v40, 16 }
 0xfb7   : > { %v5058_v59 = vsel %vm5026_vm2, %v8511_v62, 256  ;;  %v5059_v17 = vsel %vm5027_vm7, %v8514_v0, 256 }
 0xfb8   : > { %vm5258_vm8 = vcmp.lt.s32.totalorder %v5058_v59, %v5059_v17  ;;  %v13356_v37 = vcvt.s32.f32 %v5245_v54 }
 0xfb9   : > { %v13358_v38 = vsel %vm5258_vm8, %v5058_v59, %v5059_v17  ;;  %v4995_v1 = vpop.xlane.xlu1 %4994 }
 0xfba   : > { %vm5028_vm9 = vcmp.eq.f32.partialorder %v13196_v2, %v4995_v1  ;;  %vm5029_vm10 = vcmp.eq.f32.partialorder %v13192_v51, %v4995_v1  ;;  %5248 = vmin.xlane.f32.xlu1 %v13356_v37  ;;  %v5261_v41 = vshra.s32 %v13358_v38, 16 }
 0xfbb   : > { %v5060_v16 = vsel %vm5028_vm9, %v8511_v62, 256  ;;  %v5061_v47 = vsel %vm5029_vm10, %v8514_v0, 256 }
 0xfbc   : > { %vm5274_vm11 = vcmp.lt.s32.totalorder %v5060_v16, %v5061_v47  ;;  %v13366_v11 = vcvt.s32.f32 %v5261_v41 }
 0xfbd   : > { %v13368_v10 = vsel %vm5274_vm11, %v5060_v16, %v5061_v47  ;;  %v4998_v54 = vpop.xlane.xlu0 %4997 }
 0xfbe   : > { %vm5030_vm12 = vcmp.eq.f32.partialorder %v13213_v8, %v4998_v54  ;;  %vm5031_vm13 = vcmp.eq.f32.partialorder %v13209_v45, %v4998_v54  ;;  %5264 = vmin.xlane.f32.xlu0 %v13366_v11  ;;  %v5277_v51 = vshra.s32 %v13368_v10, 16 }
 0xfbf   : > { %v5062_v2 = vsel %vm5030_vm12, %v8511_v62, 256  ;;  %v5063_v59 = vsel %vm5031_vm13, %v8514_v0, 256 }
 0xfc0   : > { %vm5290_vm14 = vcmp.lt.s32.totalorder %v5062_v2, %v5063_v59  ;;  %v13376_v17 = vcvt.s32.f32 %v5277_v51 }
 0xfc1   : > { %v13378_v1 = vsel %vm5290_vm14, %v5062_v2, %v5063_v59  ;;  %v5001_v41 = vpop.xlane.xlu1 %5000  ;;  %v13395_v2 = vld [vmem:[%s9216_s12] sm:$0xff] }
 0xfc2   : > { %vm5032_vm15 = vcmp.eq.f32.partialorder %v13230_v60, %v5001_v41  ;;  %vm5033_vm0 = vcmp.eq.f32.partialorder %v13226_v53, %v5001_v41  ;;  %5280 = vmin.xlane.f32.xlu1 %v13376_v17  ;;  %v5293_v8 = vshra.s32 %v13378_v1, 16  ;;  %14893 = vst [vmem:[#allocation59_spill] sm:$0xff] %v13395_v2 }
 0xfc3   : > { %v5064_v45 = vsel %vm5032_vm15, %v8511_v62, 256  ;;  %v5065_v16 = vsel %vm5033_vm0, %v8514_v0, 256 }
 0xfc4   : > { %vm5306_vm3 = vcmp.lt.s32.totalorder %v5064_v45, %v5065_v16  ;;  %v13386_v47 = vcvt.s32.f32 %v5293_v8 }
 0xfc5   : > { %v13388_v54 = vsel %vm5306_vm3, %v5064_v45, %v5065_v16  ;;  %v14894_v45 = vld [vmem:[#allocation20_spill] sm:$0xff] }
 0xfc6   : > { %5296 = vmin.xlane.f32.xlu0 %v13386_v47  ;;  %v5309_v60 = vshra.s32 %v13388_v54, 16 }
 0xfc8   : > { %v13392_v53 = vcvt.s32.f32 %v5309_v60 }
 0xfc9   : > { %v6434_v51 = vpop.f32.mrb[82].mxu1 }
 0xfca   : > { %v6929_v59 = vadd.f32 %v13395_v2, %v6434_v51  ;;  %v6436_v41 = vpop.f32.mrb[83].mxu1  ;;  %5312 = vmin.xlane.f32.xlu1 %v13392_v53  ;;  %v13410_v51 = vld [vmem:[%s9216_s12 + $0x10] sm:$0xff] }
 0xfcc   : > { %v6945_v8 = vmax.f32 %v6929_v59, 0.0 }
 0xfcd   : > { %v6439_v46 = vpop.f32.mrb[84].mxu1 }
 0xfce   : > { %v13400_v16 = vadd.f32 %v6945_v8, %v14894_v45  ;;  %v6930_v28 = vadd.f32 %v13403_v61, %v6439_v46  ;;  %v6441_v60 = vpop.f32.mrb[85].mxu1  ;;  %v14898_v45 = vld [vmem:[#allocation46_spill] sm:$0xff]  ;;  %v13424_v61 = vld [vmem:[%s9216_s12 + $0x20] sm:$0xff] }
 0xfd0   : > { %14895 = vst [vmem:[#allocation60_spill] sm:$0xff] %v13400_v16  ;;  %v6946_v34 = vmax.f32 %v6930_v28, 0.0 }
 0xfd1   : > { %v6444_v35 = vpop.f32.mrb[86].mxu1 }
 0xfd2   : > { %v13407_v25 = vadd.f32 %v6946_v34, %v12808_v7  ;;  %v6931_v41 = vadd.f32 %v13410_v51, %v6444_v35  ;;  %v6446_v59 = vpop.f32.mrb[87].mxu1  ;;  %v14901_v34 = vld [vmem:[#allocation23_spill] sm:$0xff] }
 0xfd4   : > { %14897 = vst [vmem:[#allocation62_spill] sm:$0xff] %v13407_v25  ;;  %v6947_v2 = vmax.f32 %v6931_v41, 0.0 }
 0xfd5   : > { %v6449_v8 = vpop.f32.mrb[88].mxu1 }
 0xfd6   : > { %v13414_v16 = vadd.f32 %v6947_v2, %v14898_v45  ;;  %v6932_v46 = vadd.f32 %v13417_v9, %v6449_v8  ;;  %v6451_v28 = vpop.f32.mrb[89].mxu1  ;;  %v13438_v9 = vld [vmem:[%s9216_s12 + $0x30] sm:$0xff] }
 0xfd8   : > { %14899 = vst [vmem:[#allocation63_spill] sm:$0xff] %v13414_v16  ;;  %v6948_v60 = vmax.f32 %v6932_v46, 0.0  ;;  %v13431_v16 = vld [vmem:[%s9216_s12 + $0x28] sm:$0xff] }
 0xfd9   : > { %v6454_v7 = vpop.f32.mrb[90].mxu1  ;;  %14904 = vst [vmem:[#allocation28_spill] sm:$0xff] %v13431_v16 }
 0xfda   : > { %v13421_v25 = vadd.f32 %v6948_v60, %v14901_v34  ;;  %v6933_v35 = vadd.f32 %v13424_v61, %v6454_v7  ;;  %v6456_v41 = vpop.f32.mrb[91].mxu1  ;;  %v14905_v34 = vld [vmem:[#allocation22_spill] sm:$0xff] }
 0xfdc   : > { %14902 = vst [vmem:[#allocation65_spill] sm:$0xff] %v13421_v25  ;;  %v6949_v59 = vmax.f32 %v6933_v35, 0.0 }
 0xfdd   : > { %v6459_v2 = vpop.f32.mrb[92].mxu1 }
 0xfde   : > { %v13428_v45 = vadd.f32 %v6949_v59, %v12820_v31  ;;  %v6934_v8 = vadd.f32 %v13431_v16, %v6459_v2  ;;  %v6461_v46 = vpop.f32.mrb[93].mxu1  ;;  %v13452_v16 = vld [vmem:[%s9216_s12 + $0x40] sm:$0xff] }
 0xfe0   : > { %14903 = vst [vmem:[#allocation26_spill] sm:$0xff] %v13428_v45  ;;  %v6950_v28 = vmax.f32 %v6934_v8, 0.0  ;;  %v13445_v45 = vld [vmem:[%s9216_s12 + $0x38] sm:$0xff] }
 0xfe1   : > { %v6464_v60 = vpop.f32.mrb[94].mxu1  ;;  %14908 = vst [vmem:[#allocation31_spill] sm:$0xff] %v13445_v45 }
 0xfe2   : > { %v13435_v25 = vadd.f32 %v6950_v28, %v14905_v34  ;;  %v6935_v7 = vadd.f32 %v13438_v9, %v6464_v60  ;;  %v6466_v35 = vpop.f32.mrb[95].mxu1  ;;  %v14909_v34 = vld [vmem:[#allocation47_spill] sm:$0xff] }
 0xfe4   : > { %14906 = vst [vmem:[#allocation27_spill] sm:$0xff] %v13435_v25  ;;  %v6951_v41 = vmax.f32 %v6935_v7, 0.0 }
 0xfe5   : > { %v6469_v31 = vpop.f32.mrb[96].mxu1 }
 0xfe6   : > { %v13442_v59 = vadd.f32 %v6951_v41, %v12828_v55  ;;  %v6936_v2 = vadd.f32 %v13445_v45, %v6469_v31  ;;  %v6471_v8 = vpop.f32.mrb[97].mxu1  ;;  %v13466_v45 = vld [vmem:[%s9216_s12 + $0x50] sm:$0xff] }
 0xfe8   : > { %14907 = vst [vmem:[#allocation29_spill] sm:$0xff] %v13442_v59  ;;  %v6952_v46 = vmax.f32 %v6936_v2, 0.0  ;;  %v13459_v59 = vld [vmem:[%s9216_s12 + $0x48] sm:$0xff] }
 0xfe9   : > { %v6474_v28 = vpop.f32.mrb[98].mxu1  ;;  %14912 = vst [vmem:[#allocation34_spill] sm:$0xff] %v13459_v59 }
 0xfea   : > { %v13449_v25 = vadd.f32 %v6952_v46, %v14909_v34  ;;  %v6937_v60 = vadd.f32 %v13452_v16, %v6474_v28  ;;  %v6476_v7 = vpop.f32.mrb[99].mxu1  ;;  %v14913_v34 = vld [vmem:[#allocation25_spill] sm:$0xff] }
 0xfec   : > { %14910 = vst [vmem:[#allocation30_spill] sm:$0xff] %v13449_v25  ;;  %v6953_v35 = vmax.f32 %v6937_v60, 0.0 }
 0xfed   : > { %v6479_v55 = vpop.f32.mrb[100].mxu1 }
 0xfee   : > { %v13456_v41 = vadd.f32 %v6953_v35, %v12836_v50  ;;  %v6938_v31 = vadd.f32 %v13459_v59, %v6479_v55  ;;  %v6481_v2 = vpop.f32.mrb[101].mxu1  ;;  %v13480_v59 = vld [vmem:[%s9216_s12 + $0x60] sm:$0xff] }
 0xfef   : > { %14918 = vst [vmem:[#allocation36_spill] sm:$0xff] %v13480_v59 }
 0xff0   : > { %14911 = vst [vmem:[#allocation32_spill] sm:$0xff] %v13456_v41  ;;  %v6954_v8 = vmax.f32 %v6938_v31, 0.0  ;;  %v13473_v41 = vld [vmem:[%s9216_s12 + $0x58] sm:$0xff] }
 0xff1   : > { %v6484_v46 = vpop.f32.mrb[102].mxu1  ;;  %14916 = vst [vmem:[#allocation37_spill] sm:$0xff] %v13473_v41 }
 0xff2   : > { %v13463_v25 = vadd.f32 %v6954_v8, %v14913_v34  ;;  %v6939_v28 = vadd.f32 %v13466_v45, %v6484_v46  ;;  %v6486_v60 = vpop.f32.mrb[103].mxu1  ;;  %v14917_v34 = vld [vmem:[#allocation24_spill] sm:$0xff] }
 0xff4   : > { %14914 = vst [vmem:[#allocation33_spill] sm:$0xff] %v13463_v25  ;;  %v6955_v7 = vmax.f32 %v6939_v28, 0.0 }
 0xff5   : > { %v6489_v50 = vpop.f32.mrb[104].mxu1 }
 0xff6   : > { %v13470_v35 = vadd.f32 %v6955_v7, %v12844_v44  ;;  %v6940_v55 = vadd.f32 %v13473_v41, %v6489_v50  ;;  %v6491_v31 = vpop.f32.mrb[105].mxu1 }
 0xff8   : > { %14915 = vst [vmem:[#allocation35_spill] sm:$0xff] %v13470_v35  ;;  %v6956_v2 = vmax.f32 %v6940_v55, 0.0  ;;  %v13487_v35 = vld [vmem:[%s9216_s12 + $0x68] sm:$0xff] }
 0xff9   : > { %v6494_v8 = vpop.f32.mrb[106].mxu1  ;;  %14919 = vst [vmem:[#allocation38_spill] sm:$0xff] %v13487_v35 }
 0xffa   : > { %v13477_v25 = vadd.f32 %v6956_v2, %v14917_v34  ;;  %v6941_v46 = vadd.f32 %v13480_v59, %v6494_v8  ;;  %v6496_v28 = vpop.f32.mrb[107].mxu1  ;;  %v13494_v34 = vld [vmem:[%s9216_s12 + $0x70] sm:$0xff] }
 0xffc   : > { %v6957_v60 = vmax.f32 %v6941_v46, 0.0 }
 0xffd   : > { %v6499_v44 = vpop.f32.mrb[108].mxu1 }
 0xffe   : > { %v13484_v7 = vadd.f32 %v6957_v60, %v12852_v26  ;;  %v6942_v50 = vadd.f32 %v13487_v35, %v6499_v44  ;;  %v6501_v55 = vpop.f32.mrb[109].mxu1  ;;  %v13501_v60 = vld [vmem:[%s9216_s12 + $0x78] sm:$0xff] }
0x1000   : > { %v6958_v31 = vmax.f32 %v6942_v50, 0.0 }
0x1001   : > { %v6504_v41 = vpop.f32.mrb[110].mxu1 }
0x1002   : > { %v13491_v2 = vadd.f32 %v6958_v31, %v12856_v32  ;;  %v6943_v8 = vadd.f32 %v13494_v34, %v6504_v41  ;;  %v6506_v28 = vpop.f32.mrb[111].mxu1  ;;  %v5068_v32 = vand.u32 65535, %v13239_v13 }
0x1004   : > { %v6959_v46 = vmax.f32 %v6943_v8, 0.0  ;;  %v5070_v41 = vcvt.s32.f32 %v5068_v32  ;;  %v5084_v8 = vand.u32 65535, %v13248_v21  ;;  %v5116_v21 = vand.u32 65535, %v13268_v49 }
0x1005   : > { %v6509_v59 = vpop.f32.mrb[112].mxu1  ;;  %v5148_v49 = vand.u32 65535, %v13288_v48  ;;  %v5180_v48 = vand.u32 65535, %v13308_v4  ;;  %v5212_v4 = vand.u32 65535, %v13328_v20  ;;  %v5244_v20 = vand.u32 65535, %v13348_v40 }
0x1006   : > { %v13498_v26 = vadd.f32 %v6959_v46, %v12860_v30  ;;  %v6944_v44 = vadd.f32 %v13501_v60, %v6509_v59  ;;  %v6511_v55 = vpop.f32.mrb[113].mxu1  ;;  %v5086_v59 = vcvt.s32.f32 %v5084_v8  ;;  %v5100_v46 = vand.u32 65535, %v13258_v24 }
0x1007   : > { %v5132_v24 = vand.u32 65535, %v13278_v18  ;;  %v5164_v18 = vand.u32 65535, %v13298_v56  ;;  %v5196_v56 = vand.u32 65535, %v13318_v23  ;;  %v5228_v23 = vand.u32 65535, %v13338_v42 }
0x1008   : > { %v6960_v50 = vmax.f32 %v6944_v44, 0.0  ;;  %v5102_v44 = vcvt.s32.f32 %v5100_v46  ;;  %v5260_v42 = vand.u32 65535, %v13358_v38  ;;  %v5276_v40 = vand.u32 65535, %v13368_v10 }
0x1009   : > { %v5166_v46 = vcvt.s32.f32 %v5164_v18  ;;  %v5292_v38 = vand.u32 65535, %v13378_v1  ;;  %v5308_v10 = vand.u32 65535, %v13388_v54 }
0x100a   : > { %v13505_v35 = vadd.f32 %v6960_v50, %v12864_v5  ;;  %v5118_v50 = vcvt.s32.f32 %v5116_v21  ;;  %v5262_v18 = vcvt.s32.f32 %v5260_v42 }
0x101b   : > { %v13508_v31 = vpop.xlane.xlu0 %5072 }
0x101c   : > { %vm5074_vm1 = vcmp.eq.f32.partialorder %v13246_v29, %v13508_v31 }
0x101d   : > { %v5075_v30 = vsel %vm5074_vm1, %v5070_v41, inf  ;;  %v5134_v41 = vcvt.s32.f32 %v5132_v24  ;;  %v5214_v24 = vcvt.s32.f32 %v5212_v4  ;;  %vm5354_vm1 = vcmp.eq.s32.totalorder %v8511_v62, 8 }
0x101e   : > { %5076 = vmin.xlane.f32.xlu0 %v5075_v30  ;;  %v5150_v30 = vcvt.s32.f32 %v5148_v49 }
0x101f   : > { %v13513_v28 = vpop.xlane.xlu1 %5088 }
0x1020   : > { %vm5090_vm4 = vcmp.eq.f32.partialorder %v13256_v58, %v13513_v28  ;;  %v5095_v54 = vcvt.f32.s32 %v13513_v28 }
0x1021   : > { %v5091_v5 = vsel %vm5090_vm4, %v5086_v59, inf }
0x1022   : > { %5092 = vmin.xlane.f32.xlu1 %v5091_v5 }
0x1023   : > { %v13518_v13 = vpop.xlane.xlu0 %5104 }
0x1024   : > { %vm5106_vm5 = vcmp.eq.f32.partialorder %v13266_v36, %v13518_v13 }
0x1025   : > { %v5107_v29 = vsel %vm5106_vm5, %v5102_v44, inf  ;;  %v5182_v44 = vcvt.s32.f32 %v5180_v48 }
0x1026   : > { %5108 = vmin.xlane.f32.xlu0 %v5107_v29  ;;  %v5198_v29 = vcvt.s32.f32 %v5196_v56  ;;  %v5310_v56 = vcvt.s32.f32 %v5308_v10 }
0x1027   : > { %v13523_v55 = vpop.xlane.xlu1 %5120 }
0x1028   : > { %vm5122_vm6 = vcmp.eq.f32.partialorder %v13276_v57, %v13523_v55 }
0x1029   : > { %v5123_v58 = vsel %vm5122_vm6, %v5118_v50, inf }
0x102a   : > { %5124 = vmin.xlane.f32.xlu1 %v5123_v58 }
0x102b   : > { %v13528_v32 = vpop.xlane.xlu0 %5136 }
0x102c   : > { %vm5138_vm2 = vcmp.eq.f32.partialorder %v13286_v27, %v13528_v32 }
0x102d   : > { %v5139_v36 = vsel %vm5138_vm2, %v5134_v41, inf  ;;  %v5230_v41 = vcvt.s32.f32 %v5228_v23 }
0x102e   : > { %5140 = vmin.xlane.f32.xlu0 %v5139_v36  ;;  %v5246_v36 = vcvt.s32.f32 %v5244_v20 }
0x102f   : > { %v13533_v8 = vpop.xlane.xlu1 %5152 }
0x1030   : > { %vm5154_vm7 = vcmp.eq.f32.partialorder %v13296_v33, %v13533_v8 }
0x1031   : > { %v5155_v57 = vsel %vm5154_vm7, %v5150_v30, inf }
0x1032   : > { %5156 = vmin.xlane.f32.xlu1 %v5155_v57 }
0x1033   : > { %v13538_v59 = vpop.xlane.xlu0 %5168 }
0x1034   : > { %vm5170_vm8 = vcmp.eq.f32.partialorder %v13306_v39, %v13538_v59 }
0x1035   : > { %v5171_v27 = vsel %vm5170_vm8, %v5166_v46, inf  ;;  %v5278_v46 = vcvt.s32.f32 %v5276_v40 }
0x1036   : > { %5172 = vmin.xlane.f32.xlu0 %v5171_v27  ;;  %v5294_v27 = vcvt.s32.f32 %v5292_v38 }
0x1037   : > { %v13543_v5 = vpop.xlane.xlu1 %5184 }
0x1038   : > { %vm5186_vm9 = vcmp.eq.f32.partialorder %v13316_v43, %v13543_v5 }
0x1039   : > { %v5187_v33 = vsel %vm5186_vm9, %v5182_v44, inf }
0x103a   : > { %5188 = vmin.xlane.f32.xlu1 %v5187_v33 }
0x103b   : > { %v13548_v21 = vpop.xlane.xlu0 %5200 }
0x103c   : > { %vm5202_vm10 = vcmp.eq.f32.partialorder %v13326_v22, %v13548_v21 }
0x103d   : > { %v5203_v39 = vsel %vm5202_vm10, %v5198_v29, inf }
0x103e   : > { %5204 = vmin.xlane.f32.xlu0 %v5203_v39  ;;  %v5096_v39 = vshll.u32 %v5095_v54, 16 }
0x103f   : > { %v13553_v50 = vpop.xlane.xlu1 %5216 }
0x1040   : > { %vm5218_vm11 = vcmp.eq.f32.partialorder %v13336_v6, %v13553_v50 }
0x1041   : > { %v5219_v43 = vsel %vm5218_vm11, %v5214_v24, inf }
0x1042   : > { %5220 = vmin.xlane.f32.xlu1 %v5219_v43  ;;  %v5127_v43 = vcvt.f32.s32 %v13523_v55  ;;  %v5143_v55 = vcvt.f32.s32 %v13528_v32  ;;  %v5159_v32 = vcvt.f32.s32 %v13533_v8  ;;  %v5175_v8 = vcvt.f32.s32 %v13538_v59 }
0x1043   : > { %v13558_v58 = vpop.xlane.xlu0 %5232  ;;  %v5191_v59 = vcvt.f32.s32 %v13543_v5  ;;  %v5207_v5 = vcvt.f32.s32 %v13548_v21  ;;  %v5223_v21 = vcvt.f32.s32 %v13553_v50 }
0x1044   : > { %vm5234_vm12 = vcmp.eq.f32.partialorder %v13346_v15, %v13558_v58  ;;  %v5144_v40 = vshll.u32 %v5143_v55, 16  ;;  %v5239_v50 = vcvt.f32.s32 %v13558_v58 }
0x1045   : > { %v5235_v22 = vsel %vm5234_vm12, %v5230_v41, inf }
0x1046   : > { %5236 = vmin.xlane.f32.xlu0 %v5235_v22 }
0x1047   : > { %v13563_v49 = vpop.xlane.xlu1 %5248 }
0x1048   : > { %vm5250_vm13 = vcmp.eq.f32.partialorder %v13356_v37, %v13563_v49  ;;  %v5255_v58 = vcvt.f32.s32 %v13563_v49 }
0x1049   : > { %v5251_v6 = vsel %vm5250_vm13, %v5246_v36, inf  ;;  %v5128_v36 = vshll.u32 %v5127_v43, 16 }
0x104a   : > { %5252 = vmin.xlane.f32.xlu1 %v5251_v6 }
0x104b   : > { %v13568_v30 = vpop.xlane.xlu0 %5264 }
0x104c   : > { %vm5266_vm14 = vcmp.eq.f32.partialorder %v13366_v11, %v13568_v30  ;;  %v5271_v49 = vcvt.f32.s32 %v13568_v30 }
0x104d   : > { %v5267_v15 = vsel %vm5266_vm14, %v5262_v18, inf }
0x104e   : > { %5268 = vmin.xlane.f32.xlu0 %v5267_v15 }
0x104f   : > { %v13573_v57 = vpop.xlane.xlu1 %5280 }
0x1050   : > { %vm5282_vm15 = vcmp.eq.f32.partialorder %v13376_v17, %v13573_v57  ;;  %v5079_v17 = vcvt.f32.s32 %v13508_v31  ;;  %v5287_v30 = vcvt.f32.s32 %v13573_v57 }
0x1051   : > { %v5283_v37 = vsel %vm5282_vm15, %v5278_v46, inf }
0x1052   : > { %5284 = vmin.xlane.f32.xlu1 %v5283_v37  ;;  %v5080_v33 = vshll.u32 %v5079_v17, 16  ;;  %v5160_v37 = vshll.u32 %v5159_v32, 16  ;;  %v14920_v17 = vld [vmem:[#allocation48_spill] sm:$0xff] }
0x1053   : > { %v13578_v48 = vpop.xlane.xlu0 %5296 }
0x1054   : > { %vm5298_vm0 = vcmp.eq.f32.partialorder %v13386_v47, %v13578_v48  ;;  %v5303_v57 = vcvt.f32.s32 %v13578_v48 }
0x1055   : > { %v5299_v11 = vsel %vm5298_vm0, %v5294_v27, inf }
0x1056   : > { %5300 = vmin.xlane.f32.xlu0 %v5299_v11 }
0x1057   : > { %v13583_v44 = vpop.xlane.xlu1 %5312 }
0x1058   : > { %vm5314_vm3 = vcmp.eq.f32.partialorder %v13392_v53, %v13583_v44  ;;  %v5111_v53 = vcvt.f32.s32 %v13518_v13  ;;  %v5319_v48 = vcvt.f32.s32 %v13583_v44 }
0x1059   : > { %v5315_v1 = vsel %vm5314_vm3, %v5310_v56, inf  ;;  %v5176_v56 = vshll.u32 %v5175_v8, 16 }
0x105a   : > { %5316 = vmin.xlane.f32.xlu1 %v5315_v1  ;;  %v5112_v13 = vshll.u32 %v5111_v53, 16 }
0x10ab   : > { %v5077_v47 = vpop.xlane.xlu0 %5076 }
0x10ac   : > { %v5078_v29 = vcvt.f32.s32 %v5077_v47 }
0x10ae   : > { %v5081_v4 = vadd.s32 %v5080_v33, %v5078_v29  ;;  %v5192_v33 = vshll.u32 %v5191_v59, 16 }
0x10af   : > { %v5093_v24 = vpop.xlane.xlu1 %5092 }
0x10b0   : > { %v5357_v31 = vsel %vm5354_vm1, %v5081_v4, %v12953_v12  ;;  %v5094_v23 = vcvt.f32.s32 %v5093_v24  ;;  %vm5323_vm4 = vcmp.eq.s32.totalorder %v8514_v0, %v5081_v4  ;;  %vm5322_vm5 = vcmp.eq.s32.totalorder %v8511_v62, %v5081_v4  ;;  %v14921_v4 = vld [vmem:[#allocation49_spill] sm:$0xff] }
0x10b1   : > { %5472 = vst [vmem:[%s13602_s11] sm:$0xff] %v5357_v31  ;;  %7776 = vmatprep.mubr.msk.f32.mxu1 %vm5323_vm4, %v14215_v63  ;;  %v5208_v31 = vshll.u32 %v5207_v5, 16 }
0x10b2   : > { %v5097_v28 = vadd.s32 %v5096_v39, %v5094_v23  ;;  %7777 = vmatmul.mubr.msk.f32.gmra.mrb[114].mxu1 %vm5322_vm5, %v14215_v63 }
0x10b3   : > { %v5109_v12 = vpop.xlane.xlu0 %5108 }
0x10b4   : > { %v5358_v41 = vsel %vm5354_vm1, %v5097_v28, %v12971_v19  ;;  %v5110_v20 = vcvt.f32.s32 %v5109_v12  ;;  %vm5325_vm6 = vcmp.eq.s32.totalorder %v8514_v0, %v5097_v28  ;;  %vm5324_vm2 = vcmp.eq.s32.totalorder %v8511_v62, %v5097_v28  ;;  %v14922_v28 = vld [vmem:[#allocation50_spill] sm:$0xff] }
0x10b5   : > { %5473 = vst [vmem:[%s13602_s11 + $0x8] sm:$0xff] %v5358_v41  ;;  %7778 = vmatprep.mubr.msk.f32.mxu1 %vm5325_vm6, %v14215_v63  ;;  %v5224_v41 = vshll.u32 %v5223_v21, 16  ;;  %v5320_v21 = vshll.u32 %v5319_v48, 16 }
0x10b6   : > { %v5113_v22 = vadd.s32 %v5112_v13, %v5110_v20  ;;  %7779 = vmatmul.mubr.msk.f32.gmra.mrb[116].mxu1 %vm5324_vm2, %v14215_v63 }
0x10b7   : > { %v5125_v42 = vpop.xlane.xlu1 %5124 }
0x10b8   : > { %v5359_v19 = vsel %vm5354_vm1, %v5113_v22, %v12989_v3  ;;  %v5126_v6 = vcvt.f32.s32 %v5125_v42  ;;  %vm5327_vm7 = vcmp.eq.s32.totalorder %v8514_v0, %v5113_v22  ;;  %vm5326_vm8 = vcmp.eq.s32.totalorder %v8511_v62, %v5113_v22  ;;  %v14923_v22 = vld [vmem:[#allocation51_spill] sm:$0xff] }
0x10b9   : > { %5474 = vst [vmem:[%s13602_s11 + $0x10] sm:$0xff] %v5359_v19  ;;  %7780 = vmatprep.mubr.msk.f32.mxu1 %vm5327_vm7, %v14215_v63  ;;  %v5240_v19 = vshll.u32 %v5239_v50, 16 }
0x10ba   : > { %v5129_v18 = vadd.s32 %v5128_v36, %v5126_v6  ;;  %7781 = vmatmul.mubr.msk.f32.gmra.mrb[118].mxu1 %vm5326_vm8, %v14215_v63 }
0x10bb   : > { %v5141_v15 = vpop.xlane.xlu0 %5140 }
0x10bc   : > { %v5360_v3 = vsel %vm5354_vm1, %v5129_v18, %v13007_v14  ;;  %v5142_v46 = vcvt.f32.s32 %v5141_v15  ;;  %vm5329_vm9 = vcmp.eq.s32.totalorder %v8514_v0, %v5129_v18  ;;  %vm5328_vm10 = vcmp.eq.s32.totalorder %v8511_v62, %v5129_v18  ;;  %v14924_v18 = vld [vmem:[#allocation52_spill] sm:$0xff] }
0x10bd   : > { %5475 = vst [vmem:[%s13602_s11 + $0x18] sm:$0xff] %v5360_v3  ;;  %7782 = vmatprep.mubr.msk.f32.mxu1 %vm5329_vm9, %v14215_v63  ;;  %v5256_v3 = vshll.u32 %v5255_v58, 16 }
0x10be   : > { %v5145_v38 = vadd.s32 %v5144_v40, %v5142_v46  ;;  %7783 = vmatmul.mubr.msk.f32.gmra.mrb[120].mxu1 %vm5328_vm10, %v14215_v63 }
0x10bf   : > { %v5157_v27 = vpop.xlane.xlu1 %5156 }
0x10c0   : > { %v5361_v14 = vsel %vm5354_vm1, %v5145_v38, %v13025_v52  ;;  %v5158_v10 = vcvt.f32.s32 %v5157_v27  ;;  %vm5331_vm11 = vcmp.eq.s32.totalorder %v8514_v0, %v5145_v38  ;;  %vm5330_vm12 = vcmp.eq.s32.totalorder %v8511_v62, %v5145_v38  ;;  %v14925_v38 = vld [vmem:[#allocation53_spill] sm:$0xff] }
0x10c1   : > { %5476 = vst [vmem:[%s13602_s11 + $0x20] sm:$0xff] %v5361_v14  ;;  %7784 = vmatprep.mubr.msk.f32.mxu1 %vm5331_vm11, %v14215_v63  ;;  %v5272_v14 = vshll.u32 %v5271_v49, 16 }
0x10c2   : > { %v5161_v11 = vadd.s32 %v5160_v37, %v5158_v10  ;;  %7785 = vmatmul.mubr.msk.f32.gmra.mrb[122].mxu1 %vm5330_vm12, %v14215_v63 }
0x10c3   : > { %v5173_v1 = vpop.xlane.xlu0 %5172 }
0x10c4   : > { %v5362_v52 = vsel %vm5354_vm1, %v5161_v11, %v14920_v17  ;;  %v5174_v54 = vcvt.f32.s32 %v5173_v1  ;;  %vm5333_vm13 = vcmp.eq.s32.totalorder %v8514_v0, %v5161_v11  ;;  %vm5332_vm14 = vcmp.eq.s32.totalorder %v8511_v62, %v5161_v11  ;;  %v14926_v11 = vld [vmem:[#allocation54_spill] sm:$0xff] }
0x10c5   : > { %5477 = vst [vmem:[%s13602_s11 + $0x28] sm:$0xff] %v5362_v52  ;;  %7786 = vmatprep.mubr.msk.f32.mxu1 %vm5333_vm13, %v14215_v63  ;;  %v5288_v17 = vshll.u32 %v5287_v30, 16 }
0x10c6   : > { %v5177_v47 = vadd.s32 %v5176_v56, %v5174_v54  ;;  %7787 = vmatmul.mubr.msk.f32.gmra.mrb[124].mxu1 %vm5332_vm14, %v14215_v63  ;;  %v14927_v54 = vld [vmem:[#allocation55_spill] sm:$0xff] }
0x10c7   : > { %v5189_v29 = vpop.xlane.xlu1 %5188 }
0x10c8   : > { %v5363_v39 = vsel %vm5354_vm1, %v5177_v47, %v14921_v4  ;;  %v5190_v53 = vcvt.f32.s32 %v5189_v29  ;;  %vm5335_vm15 = vcmp.eq.s32.totalorder %v8514_v0, %v5177_v47  ;;  %vm5334_vm0 = vcmp.eq.s32.totalorder %v8511_v62, %v5177_v47 }
0x10c9   : > { %5478 = vst [vmem:[%s13602_s11 + $0x30] sm:$0xff] %v5363_v39  ;;  %7788 = vmatprep.mubr.msk.f32.mxu1 %vm5335_vm15, %v14215_v63  ;;  %v5304_v29 = vshll.u32 %v5303_v57, 16  ;;  %v14928_v39 = vld [vmem:[#allocation56_spill] sm:$0xff] }
0x10ca   : > { %v5193_v24 = vadd.s32 %v5192_v33, %v5190_v53  ;;  %7789 = vmatmul.mubr.msk.f32.gmra.mrb[126].mxu1 %vm5334_vm0, %v14215_v63 }
0x10cb   : > { %v5205_v23 = vpop.xlane.xlu0 %5204 }
0x10cc   : > { %v5364_v13 = vsel %vm5354_vm1, %v5193_v24, %v14922_v28  ;;  %v5206_v43 = vcvt.f32.s32 %v5205_v23  ;;  %vm5337_vm3 = vcmp.eq.s32.totalorder %v8514_v0, %v5193_v24  ;;  %vm5336_vm4 = vcmp.eq.s32.totalorder %v8511_v62, %v5193_v24  ;;  %v14929_v23 = vld [vmem:[#allocation57_spill] sm:$0xff] }
0x10cd   : > { %5479 = vst [vmem:[%s13602_s11 + $0x38] sm:$0xff] %v5364_v13  ;;  %7790 = vmatprep.mubr.msk.f32.mxu1 %vm5337_vm3, %v14215_v63 }
0x10ce   : > { %v5209_v12 = vadd.s32 %v5208_v31, %v5206_v43  ;;  %7791 = vmatmul.mubr.msk.f32.gmra.mrb[128].mxu1 %vm5336_vm4, %v14215_v63 }
0x10cf   : > { %v5221_v20 = vpop.xlane.xlu1 %5220 }
0x10d0   : > { %v5365_v36 = vsel %vm5354_vm1, %v5209_v12, %v14923_v22  ;;  %v5222_v55 = vcvt.f32.s32 %v5221_v20  ;;  %vm5339_vm5 = vcmp.eq.s32.totalorder %v8514_v0, %v5209_v12  ;;  %vm5338_vm6 = vcmp.eq.s32.totalorder %v8511_v62, %v5209_v12  ;;  %v14930_v12 = vld [vmem:[#allocation58_spill] sm:$0xff] }
0x10d1   : > { %5480 = vst [vmem:[%s13602_s11 + $0x40] sm:$0xff] %v5365_v36  ;;  %7792 = vmatprep.mubr.msk.f32.mxu1 %vm5339_vm5, %v14215_v63 }
0x10d2   : > { %v5225_v42 = vadd.s32 %v5224_v41, %v5222_v55  ;;  %7793 = vmatmul.mubr.msk.f32.gmra.mrb[130].mxu1 %vm5338_vm6, %v14215_v63 }
0x10d3   : > { %v5237_v6 = vpop.xlane.xlu0 %5236 }
0x10d4   : > { %v5366_v40 = vsel %vm5354_vm1, %v5225_v42, %v14924_v18  ;;  %v5238_v32 = vcvt.f32.s32 %v5237_v6  ;;  %vm5341_vm2 = vcmp.eq.s32.totalorder %v8514_v0, %v5225_v42  ;;  %vm5340_vm7 = vcmp.eq.s32.totalorder %v8511_v62, %v5225_v42 }
0x10d5   : > { %5481 = vst [vmem:[%s13602_s11 + $0x48] sm:$0xff] %v5366_v40  ;;  %7794 = vmatprep.mubr.msk.f32.mxu1 %vm5341_vm2, %v14215_v63 }
0x10d6   : > { %v5241_v15 = vadd.s32 %v5240_v19, %v5238_v32  ;;  %7795 = vmatmul.mubr.msk.f32.gmra.mrb[132].mxu1 %vm5340_vm7, %v14215_v63 }
0x10d7   : > { %v5253_v46 = vpop.xlane.xlu1 %5252 }
0x10d8   : > { %v5367_v37 = vsel %vm5354_vm1, %v5241_v15, %v14925_v38  ;;  %v5254_v8 = vcvt.f32.s32 %v5253_v46  ;;  %vm5343_vm8 = vcmp.eq.s32.totalorder %v8514_v0, %v5241_v15  ;;  %vm5342_vm9 = vcmp.eq.s32.totalorder %v8511_v62, %v5241_v15 }
0x10d9   : > { %5482 = vst [vmem:[%s13602_s11 + $0x50] sm:$0xff] %v5367_v37  ;;  %7796 = vmatprep.mubr.msk.f32.mxu1 %vm5343_vm8, %v14215_v63 }
0x10da   : > { %v5257_v27 = vadd.s32 %v5256_v3, %v5254_v8  ;;  %7797 = vmatmul.mubr.msk.f32.gmra.mrb[134].mxu1 %vm5342_vm9, %v14215_v63 }
0x10db   : > { %v5269_v10 = vpop.xlane.xlu0 %5268 }
0x10dc   : > { %v5368_v56 = vsel %vm5354_vm1, %v5257_v27, %v14926_v11  ;;  %v5270_v59 = vcvt.f32.s32 %v5269_v10  ;;  %vm5345_vm10 = vcmp.eq.s32.totalorder %v8514_v0, %v5257_v27  ;;  %vm5344_vm11 = vcmp.eq.s32.totalorder %v8511_v62, %v5257_v27 }
0x10dd   : > { %5483 = vst [vmem:[%s13602_s11 + $0x58] sm:$0xff] %v5368_v56  ;;  %7798 = vmatprep.mubr.msk.f32.mxu1 %vm5345_vm10, %v14215_v63 }
0x10de   : > { %v5273_v1 = vadd.s32 %v5272_v14, %v5270_v59  ;;  %7799 = vmatmul.mubr.msk.f32.gmra.mrb[136].mxu1 %vm5344_vm11, %v14215_v63 }
0x10df   : > { %v5285_v52 = vpop.xlane.xlu1 %5284 }
0x10e0   : > { %v5369_v47 = vsel %vm5354_vm1, %v5273_v1, %v14927_v54  ;;  %v5286_v33 = vcvt.f32.s32 %v5285_v52  ;;  %vm5347_vm12 = vcmp.eq.s32.totalorder %v8514_v0, %v5273_v1  ;;  %vm5346_vm13 = vcmp.eq.s32.totalorder %v8511_v62, %v5273_v1 }
0x10e1   : > { %5484 = vst [vmem:[%s13602_s11 + $0x60] sm:$0xff] %v5369_v47  ;;  %7800 = vmatprep.mubr.msk.f32.mxu1 %vm5347_vm12, %v14215_v63 }
0x10e2   : > { %v5289_v5 = vadd.s32 %v5288_v17, %v5286_v33  ;;  %7801 = vmatmul.mubr.msk.f32.gmra.mrb[138].mxu1 %vm5346_vm13, %v14215_v63 }
0x10e3   : > { %v5301_v4 = vpop.xlane.xlu0 %5300 }
0x10e4   : > { %v5370_v53 = vsel %vm5354_vm1, %v5289_v5, %v14928_v39  ;;  %v5302_v24 = vcvt.f32.s32 %v5301_v4  ;;  %vm5349_vm14 = vcmp.eq.s32.totalorder %v8514_v0, %v5289_v5  ;;  %vm5348_vm15 = vcmp.eq.s32.totalorder %v8511_v62, %v5289_v5 }
0x10e5   : > { %5485 = vst [vmem:[%s13602_s11 + $0x68] sm:$0xff] %v5370_v53  ;;  %7802 = vmatprep.mubr.msk.f32.mxu1 %vm5349_vm14, %v14215_v63 }
0x10e6   : > { %v5305_v31 = vadd.s32 %v5304_v29, %v5302_v24  ;;  %7803 = vmatmul.mubr.msk.f32.gmra.mrb[140].mxu1 %vm5348_vm15, %v14215_v63 }
0x10e7   : > { %v5317_v44 = vpop.xlane.xlu1 %5316 }
0x10e8   : > { %v5371_v28 = vsel %vm5354_vm1, %v5305_v31, %v14929_v23  ;;  %v5318_v13 = vcvt.f32.s32 %v5317_v44  ;;  %vm5351_vm0 = vcmp.eq.s32.totalorder %v8514_v0, %v5305_v31  ;;  %vm5350_vm3 = vcmp.eq.s32.totalorder %v8511_v62, %v5305_v31 }
0x10e9   : > { %5486 = vst [vmem:[%s13602_s11 + $0x70] sm:$0xff] %v5371_v28  ;;  %7804 = vmatprep.mubr.msk.f32.mxu1 %vm5351_vm0, %v14215_v63 }
0x10ea   : > { %v5321_v43 = vadd.s32 %v5320_v21, %v5318_v13  ;;  %7805 = vmatmul.mubr.msk.f32.gmra.mrb[142].mxu1 %vm5350_vm3, %v14215_v63 }
0x10ec   : > { %v5372_v41 = vsel %vm5354_vm1, %v5321_v43, %v14930_v12  ;;  %vm5353_vm4 = vcmp.eq.s32.totalorder %v8514_v0, %v5321_v43  ;;  %vm5352_vm5 = vcmp.eq.s32.totalorder %v8511_v62, %v5321_v43 }
0x10ed   : > { %5487 = vst [vmem:[%s13602_s11 + $0x78] sm:$0xff] %v5372_v41  ;;  %7806 = vmatprep.mubr.msk.f32.mxu1 %vm5353_vm4, %v14215_v63 }
0x10ee   : > { %7807 = vmatmul.mubr.msk.f32.gmra.mrb[144].mxu1 %vm5352_vm5, %v14215_v63 }
0x10ef   : > { %8107 = shalt.err (!%p8104_p4)
}
0x10f0   : > { %s8108_s14 = scalar_lea.hbm %s13747_s19, 2048  ;;  %s8112_s17 = scalar_lea.hbm %s13889_s5, 4096 }
0x10f1   : > { %p8109_p7 = scmp.ne.s32.totalorder %s13747_s19, %s8108_s14  ;;  %p8113_p13 = scmp.lt.u32.totalorder %s13747_s19, %s13889_s5 }
0x10f2   : > { %p8114_p1 = scmp.lt.u32.totalorder %s8112_s17, %s8108_s14  ;;  %p8116_p5 = scmp.lt.u32.totalorder %s8108_s14, %s13747_s19 }
0x10f3   : > { %p8110_p8 = pnand %p8109_p7, %p14931_p6 }
0x10f4   : > { %p8115_p0 = por %p8114_p1, %p8113_p13 }
0x10f5   : > { %p8111_p11 = pneg %p8110_p8 }
0x10f6   : > { %p8117_p9 = por %p8116_p5, %p8115_p0 }
0x10f8   : > { %p8118_p10 = pnand %p8117_p9, %p8111_p11 }
0x10fa   : > { %8121 = shalt.err (!%p8118_p10)
}
0x10fb   : > { %s8201_s26 = smov 128   ;;  %s8202_s29 = smov 8   ;;  %v14932_v0 = vld [vmem:[#allocation59_spill] sm:$0xff]  ;;  %v14933_v36 = vld [vmem:[#allocation60_spill] sm:$0xff]  ;;  %v14934_v42 = vld [vmem:[#allocation61_spill] sm:$0xff] }
0x10fc   : > { %7896 = dma.vmem_to_hbm [thread:$0]  (%p14931_p6), %s13749_s16, 2048, %s13747_s19, %s7058_s20, %s8201_s26, %s8201_s26, %s8202_s29   ;;  %v14935_v32 = vld [vmem:[#allocation62_spill] sm:$0xff]  ;;  %v14936_v8 = vld [vmem:[#allocation63_spill] sm:$0xff]  ;;  %v14937_v14 = vld [vmem:[#allocation64_spill] sm:$0xff] }
0x10fd   : > { %s13783_s10 = scalar_lea.vmem [#allocation7], %s7203_s15  ;;  %v14938_v1 = vld [vmem:[#allocation65_spill] sm:$0xff]  ;;  %v14939_v33 = vld [vmem:[#allocation26_spill] sm:$0xff]  ;;  %v14940_v29 = vld [vmem:[#allocation28_spill] sm:$0xff]  ;;  %s13835_s20 = scalar_lea.hbm %s13890_s6, %s7518_s9 }
0x10fe   : > { %v14941_v31 = vld [vmem:[#allocation27_spill] sm:$0xff]  ;;  %v14942_v43 = vld [vmem:[#allocation29_spill] sm:$0xff]  ;;  %s7092_s15 = sshll.u32 %s13783_s10, 4  ;;  %s7063_s14 = scalar_lea.sflag [#allocation8], %s13589_s13  ;;  %s13837_s15 = int_to_ptr.vmem [resolvable:$true] %s7092_s15 }
0x10ff   : > { %v14943_v41 = vld [vmem:[#allocation31_spill] sm:$0xff]  ;;  %s8122_s12 = scalar_lea.vmem %s13837_s15, 2048  ;;  %s8203_s11 = smov [#allocation7]  }
0x1100   : > { %p8123_p12 = scmp.ne.s32.totalorder %s13837_s15, %s8122_s12  ;;  %s8126_s17 = sshll.u32 %s8203_s11, 4  ;;  %s8127_s17 = int_to_ptr.vmem [resolvable:$false] %s8126_s17 }
0x1101   : > { %s8128_s25 = scalar_lea.vmem %s8127_s17, 4096  ;;  %p8129_p4 = scmp.lt.s32.totalorder %s13837_s15, %s8127_s17 }
0x1102   : > { %p8124_p2 = pnand %p8123_p12, %p14931_p6  ;;  %p8130_p7 = scmp.lt.s32.totalorder %s8128_s25, %s8122_s12 }
0x1104   : > { %p8125_p3 = pneg %p8124_p2  ;;  %p8131_p8 = por %p8130_p7, %p8129_p4 }
0x1106   : > { %p8132_p11 = pnand %p8131_p8, %p8125_p3 }
0x1185   : > { %v6514_v62 = vpop.f32.mrb[114].mxu1 }
0x1186   : > { %v6977_v63 = vadd.f32 %v14932_v0, %v6514_v62  ;;  %v6516_v50 = vpop.f32.mrb[115].mxu1 }
0x1188   : > { %v6993_v20 = vmax.f32 %v6977_v63, 0.0 }
0x1189   : > { %v6519_v22 = vpop.f32.mrb[116].mxu1 }
0x118a   : > { %v7009_v55 = vadd.f32 %v6993_v20, %v14933_v36  ;;  %v6978_v19 = vadd.f32 %v14934_v42, %v6519_v22  ;;  %v6521_v58 = vpop.f32.mrb[117].mxu1  ;;  %v14944_v22 = vld [vmem:[#allocation30_spill] sm:$0xff] }
0x118c   : > { %v7025_v6 = vmul.f32 0.11111111, %v7009_v55  ;;  %v6994_v18 = vmax.f32 %v6978_v19, 0.0 }
0x118d   : > { %v6524_v40 = vpop.f32.mrb[118].mxu1 }
0x118e   : > { %7041 = vst [vmem:[%s13783_s10] sm:$0xff] %v7025_v6  ;;  %v7010_v15 = vadd.f32 %v6994_v18, %v14935_v32  ;;  %v6979_v3 = vadd.f32 %v13410_v51, %v6524_v40  ;;  %v6526_v49 = vpop.f32.mrb[119].mxu1  ;;  %v14945_v6 = vld [vmem:[#allocation32_spill] sm:$0xff]  ;;  %v14946_v40 = vld [vmem:[#allocation34_spill] sm:$0xff] }
0x1190   : > { %v7026_v46 = vmul.f32 0.11111111, %v7010_v15  ;;  %v6995_v38 = vmax.f32 %v6979_v3, 0.0 }
0x1191   : > { %v6529_v37 = vpop.f32.mrb[120].mxu1 }
0x1192   : > { %7042 = vst [vmem:[%s13783_s10 + $0x8] sm:$0xff] %v7026_v46  ;;  %v7011_v27 = vadd.f32 %v6995_v38, %v14936_v8  ;;  %v6980_v30 = vadd.f32 %v14937_v14, %v6529_v37  ;;  %v6531_v10 = vpop.f32.mrb[121].mxu1  ;;  %v14947_v38 = vld [vmem:[#allocation33_spill] sm:$0xff] }
0x1193   : > { %v14948_v10 = vld [vmem:[#allocation35_spill] sm:$0xff] }
0x1194   : > { %v7027_v11 = vmul.f32 0.11111111, %v7011_v27  ;;  %v6996_v56 = vmax.f32 %v6980_v30, 0.0 }
0x1195   : > { %v6534_v59 = vpop.f32.mrb[122].mxu1 }
0x1196   : > { %7043 = vst [vmem:[%s13783_s10 + $0x10] sm:$0xff] %v7027_v11  ;;  %v7012_v17 = vadd.f32 %v6996_v56, %v14938_v1  ;;  %v6981_v51 = vadd.f32 %v13424_v61, %v6534_v59  ;;  %v6536_v57 = vpop.f32.mrb[123].mxu1  ;;  %v14949_v56 = vld [vmem:[#allocation37_spill] sm:$0xff] }
0x1198   : > { %v7028_v52 = vmul.f32 0.11111111, %v7012_v17  ;;  %v6997_v54 = vmax.f32 %v6981_v51, 0.0 }
0x1199   : > { %v6539_v47 = vpop.f32.mrb[124].mxu1 }
0x119a   : > { %7044 = vst [vmem:[%s13783_s10 + $0x18] sm:$0xff] %v7028_v52  ;;  %v7013_v5 = vadd.f32 %v6997_v54, %v14939_v33  ;;  %v6982_v48 = vadd.f32 %v14940_v29, %v6539_v47  ;;  %v6541_v4 = vpop.f32.mrb[125].mxu1  ;;  %v14950_v54 = vld [vmem:[#allocation36_spill] sm:$0xff] }
0x119b   : > { %v14951_v4 = vld [vmem:[#allocation38_spill] sm:$0xff] }
0x119c   : > { %v7029_v39 = vmul.f32 0.11111111, %v7013_v5  ;;  %v6998_v53 = vmax.f32 %v6982_v48, 0.0 }
0x119d   : > { %v6544_v24 = vpop.f32.mrb[126].mxu1 }
0x119e   : > { %7045 = vst [vmem:[%s13783_s10 + $0x20] sm:$0xff] %v7029_v39  ;;  %v7014_v21 = vadd.f32 %v6998_v53, %v14941_v31  ;;  %v6983_v61 = vadd.f32 %v13438_v9, %v6544_v24  ;;  %v6546_v44 = vpop.f32.mrb[127].mxu1 }
0x11a0   : > { %v7030_v23 = vmul.f32 0.11111111, %v7014_v21  ;;  %v6999_v28 = vmax.f32 %v6983_v61, 0.0 }
0x11a1   : > { %v6549_v13 = vpop.f32.mrb[128].mxu1 }
0x11a2   : > { %7046 = vst [vmem:[%s13783_s10 + $0x28] sm:$0xff] %v7030_v23  ;;  %v7015_v12 = vadd.f32 %v6999_v28, %v14942_v43  ;;  %v6984_v62 = vadd.f32 %v14943_v41, %v6549_v13  ;;  %v6551_v0 = vpop.f32.mrb[129].mxu1 }
0x11a4   : > { %v7031_v63 = vmul.f32 0.11111111, %v7015_v12  ;;  %v7000_v50 = vmax.f32 %v6984_v62, 0.0 }
0x11a5   : > { %v6554_v20 = vpop.f32.mrb[130].mxu1 }
0x11a6   : > { %7047 = vst [vmem:[%s13783_s10 + $0x30] sm:$0xff] %v7031_v63  ;;  %v7016_v36 = vadd.f32 %v7000_v50, %v14944_v22  ;;  %v6985_v9 = vadd.f32 %v13452_v16, %v6554_v20  ;;  %v6556_v55 = vpop.f32.mrb[131].mxu1 }
0x11a8   : > { %v7032_v42 = vmul.f32 0.11111111, %v7016_v36  ;;  %v7001_v19 = vmax.f32 %v6985_v9, 0.0 }
0x11a9   : > { %v6559_v58 = vpop.f32.mrb[132].mxu1 }
0x11aa   : > { %7048 = vst [vmem:[%s13783_s10 + $0x38] sm:$0xff] %v7032_v42  ;;  %v7017_v18 = vadd.f32 %v7001_v19, %v14945_v6  ;;  %v6986_v32 = vadd.f32 %v14946_v40, %v6559_v58  ;;  %v6561_v15 = vpop.f32.mrb[133].mxu1 }
0x11ac   : > { %v7033_v3 = vmul.f32 0.11111111, %v7017_v18  ;;  %v7002_v49 = vmax.f32 %v6986_v32, 0.0 }
0x11ad   : > { %v6564_v46 = vpop.f32.mrb[134].mxu1 }
0x11ae   : > { %7049 = vst [vmem:[%s13783_s10 + $0x40] sm:$0xff] %v7033_v3  ;;  %v7018_v37 = vadd.f32 %v7002_v49, %v14947_v38  ;;  %v6987_v16 = vadd.f32 %v13466_v45, %v6564_v46  ;;  %v6566_v8 = vpop.f32.mrb[135].mxu1 }
0x11b0   : > { %v7034_v27 = vmul.f32 0.11111111, %v7018_v37  ;;  %v7003_v14 = vmax.f32 %v6987_v16, 0.0 }
0x11b1   : > { %v6569_v30 = vpop.f32.mrb[136].mxu1 }
0x11b2   : > { %7050 = vst [vmem:[%s13783_s10 + $0x48] sm:$0xff] %v7034_v27  ;;  %v7019_v11 = vadd.f32 %v7003_v14, %v14948_v10  ;;  %v6988_v59 = vadd.f32 %v14949_v56, %v6569_v30  ;;  %v6571_v1 = vpop.f32.mrb[137].mxu1 }
0x11b4   : > { %v7035_v17 = vmul.f32 0.11111111, %v7019_v11  ;;  %v7004_v51 = vmax.f32 %v6988_v59, 0.0 }
0x11b5   : > { %v6574_v57 = vpop.f32.mrb[138].mxu1 }
0x11b6   : > { %7051 = vst [vmem:[%s13783_s10 + $0x50] sm:$0xff] %v7035_v17  ;;  %v7020_v52 = vadd.f32 %v7004_v51, %v13477_v25  ;;  %v6989_v45 = vadd.f32 %v14950_v54, %v6574_v57  ;;  %v6576_v47 = vpop.f32.mrb[139].mxu1 }
0x11b8   : > { %v7036_v33 = vmul.f32 0.11111111, %v7020_v52  ;;  %v7005_v5 = vmax.f32 %v6989_v45, 0.0 }
0x11b9   : > { %v6579_v29 = vpop.f32.mrb[140].mxu1 }
0x11ba   : > { %7052 = vst [vmem:[%s13783_s10 + $0x58] sm:$0xff] %v7036_v33  ;;  %v7021_v48 = vadd.f32 %v7005_v5, %v13484_v7  ;;  %v6990_v39 = vadd.f32 %v14951_v4, %v6579_v29  ;;  %v6581_v53 = vpop.f32.mrb[141].mxu1 }
0x11bc   : > { %v7037_v24 = vmul.f32 0.11111111, %v7021_v48  ;;  %v7006_v31 = vmax.f32 %v6990_v39, 0.0 }
0x11bd   : > { %v6584_v21 = vpop.f32.mrb[142].mxu1 }
0x11be   : > { %7053 = vst [vmem:[%s13783_s10 + $0x60] sm:$0xff] %v7037_v24  ;;  %v7022_v25 = vadd.f32 %v7006_v31, %v13491_v2  ;;  %v6991_v61 = vadd.f32 %v13494_v34, %v6584_v21  ;;  %v6586_v44 = vpop.f32.mrb[143].mxu1 }
0x11c0   : > { %v7038_v23 = vmul.f32 0.11111111, %v7022_v25  ;;  %v7007_v28 = vmax.f32 %v6991_v61, 0.0 }
0x11c1   : > { %v6589_v7 = vpop.f32.mrb[144].mxu1 }
0x11c2   : > { %7054 = vst [vmem:[%s13783_s10 + $0x68] sm:$0xff] %v7038_v23  ;;  %v7023_v13 = vadd.f32 %v7007_v28, %v13498_v26  ;;  %v6992_v43 = vadd.f32 %v13501_v60, %v6589_v7  ;;  %v6591_v12 = vpop.f32.mrb[145].mxu1 }
0x11c4   : > { %v7039_v41 = vmul.f32 0.11111111, %v7023_v13  ;;  %v7008_v62 = vmax.f32 %v6992_v43, 0.0 }
0x11c6   : > { %7055 = vst [vmem:[%s13783_s10 + $0x70] sm:$0xff] %v7039_v41  ;;  %v7024_v2 = vadd.f32 %v7008_v62, %v13505_v35 }
0x11c8   : > { %v7040_v34 = vmul.f32 0.11111111, %v7024_v2 }
0x11ca   : > { %7056 = vst [vmem:[%s13783_s10 + $0x78] sm:$0xff] %v7040_v34 }
0x11cb   : > { %8135 = shalt.err (!%p8132_p11)
}
0x11cc   : > { %s8136_s9 = scalar_lea.hbm %s13835_s20, 2048  ;;  %s8140_s10 = scalar_lea.hbm %s13890_s6, 4096 }
0x11cd   : > { %p8137_p13 = scmp.ne.s32.totalorder %s13835_s20, %s8136_s9  ;;  %p8141_p5 = scmp.lt.u32.totalorder %s13835_s20, %s13890_s6 }
0x11ce   : > { %p8142_p9 = scmp.lt.u32.totalorder %s8140_s10, %s8136_s9  ;;  %p8144_p12 = scmp.lt.u32.totalorder %s8136_s9, %s13835_s20 }
0x11cf   : > { %p8138_p1 = pnand %p8137_p13, %p14931_p6 }
0x11d0   : > { %p8143_p10 = por %p8142_p9, %p8141_p5 }
0x11d1   : > { %p8139_p0 = pneg %p8138_p1 }
0x11d2   : > { %p8145_p2 = por %p8144_p12, %p8143_p10 }
0x11d4   : > { %p8146_p3 = pnand %p8145_p2, %p8139_p0 }
0x11d6   : > { %8149 = shalt.err (!%p8146_p3)
}
0x11d7   : > { %7897 = dma.vmem_to_hbm [thread:$0]  (%p14931_p6), %s13837_s15, 2048, %s13835_s20, %s7063_s14, %s8201_s26, %s8201_s26, %s8202_s29  }
0x11d8 PF: > { %p7913_p4 = scmp.ge.s32.totalorder %s8192_s24, 2  ;;  %s7107_s12 = sand.u32 1, %s8180_s21  }
0x11d9   : > { %p14952_p7 = scmp.ne.s32.totalorder %s14134_s8, 0  ;;  %s7108_s11 = scalar_lea.sflag [#allocation5], %s7107_s12 }
0x11db   : > { %p7905_p8 = pnand %p7913_p4, %p14952_p7 }
0x11dd   : > { %8171 = dma.done.wait (!%p7905_p8), %s7108_s11, 2048  }
0x11de   : > { %8173 = vsyncadd (!%p7905_p8), %s7108_s11, 4294965248  ;;  %s7117_s7 = scalar_lea.sflag [#allocation8], %s7107_s12 }
0x11df   : > { %8175 = dma.done.wait (!%p7905_p8), %s7117_s7, 2048  }
0x11e0   : > { %8177 = vsyncadd (!%p7905_p8), %s7117_s7, 4294965248  ;;  %p21_p6 = scmp.ge.s32.totalorder %s8264_s27, 4   ;;  %s14953_s21 = smov %s8184_s22 }
0x11e1   : > { %s14954_s22 = smov %s8188_s23  ;;  %s14955_s23 = smov %s8275_s30 }
0x11e2   : > { %s14956_s24 = smov %s8264_s27  ;;  %23 = sbr.rel (!%p21_p6) target bundleno = 6 (0x6), region = 105 }
0x11e9   :  { %7122 = vsyncpa [#allocation4], 1 }
0x11ea   :  { %7124 = vsyncpa [#allocation4 + $0x1], 1 }
0x11eb   :  { %7125 = vsyncpa [#allocation5], 1 }
0x11ec   :  { %7127 = vsyncpa [#allocation5 + $0x1], 1 }
0x11ed   :  { %7128 = vsyncpa [#allocation8], 1 }
0x11ee   :  { %7130 = vsyncpa [#allocation8 + $0x1], 1 }

</bundles_post_ra>
